<compile_context>
chip_gen: v7x
topology: tpu7x:2x2x1
jax: 0.10.0
libtpu: 0.0.40
codegen_flags: <defaults>
</compile_context>

<pallas_src>
import functools

import jax
import jax.numpy as jnp
from jax.experimental import pallas as pl
from jax.experimental.pallas import tpu as pltpu


# ----------------------------------------------------------------------------
# Fused whole-network kernel (one image per grid step)
# ----------------------------------------------------------------------------
def _student_kernel(x_ref, w1_ref, b1_ref, w2_ref, b2_ref, lw_ref, lb_ref,
                    stage_out_ref, lin_out_ref, p_in, p_hid,
                    *, H, W, Cin, hidden, n_layers):
    Wp = W + 2                      # padded width
    SR = H * Wp                     # "strip" rows: one conv-output position each
    PRB = (H + 3) * Wp              # padded-buffer rows (1 top + 2 bottom pad rows)
    IO = Wp + 1                     # flat index of pixel (0, 0) inside the padded buffer

    # Mask (SR, 1): 1.0 for real pixels, 0.0 for the 2 inter-row pad columns of
    # the strip view (H, W+2).  Keeps the pad entries of the next padded buffer
    # at exactly zero.
    col = jax.lax.broadcasted_iota(jnp.int32, (SR, 1), 0) % Wp
    valid = (col < W).astype(jnp.float32)

    # Padded activation buffers.  Pads must be zero: the hidden buffer is
    # zeroed once per image; the Cin buffer is the already zero-padded input.
    p_hid[...] = jnp.zeros((PRB, hidden), jnp.float32)
    p_in[...] = x_ref[...].astype(jnp.float32)

    def conv3x3_bn_relu(p_ref, w_tap, bias):
        # SAME 3x3 conv as 9 row-shifted matmuls on the flattened padded buffer.
        acc = None
        for kh in range(3):
            for kw in range(3):
                xt = p_ref[pl.ds(kh * Wp + kw, SR), :]            # (SR, cin), static offset
                r = jnp.dot(xt, w_tap(kh * 3 + kw),               # (cin, cout)
                            preferred_element_type=jnp.float32)
                acc = r if acc is None else acc + r
        y = jnp.maximum(acc + bias, 0.0)                          # folded-BN bias + ReLU
        return y * valid                                          # zero the pad columns

    y = None
    for l in range(n_layers):
        # Conv2d(Cin -> hidden) + BN + ReLU
        y = conv3x3_bn_relu(p_in, lambda t, l=l: w1_ref[l, t], b1_ref[l])
        p_hid[pl.ds(IO, SR), :] = y
        # ConvTranspose2d(hidden -> Cin) (== flipped 3x3 conv) + BN + ReLU
        y = conv3x3_bn_relu(p_hid, lambda t, l=l: w2_ref[l, t], b2_ref[l])
        stage_out_ref[l] = y.astype(stage_out_ref.dtype)
        if l + 1 < n_layers:
            p_in[pl.ds(IO, SR), :] = y                            # feed next stage

    # Final Linear(Cin, Cin) on the flattened pixels: y @ W.T + b
    lin = jnp.dot(y, lw_ref[...], preferred_element_type=jnp.float32) + lb_ref[...]
    lin_out_ref[...] = lin.astype(lin_out_ref.dtype)


# ----------------------------------------------------------------------------
# Weight preparation (pure JAX, one-time)
# ----------------------------------------------------------------------------
def _fold_conv_weight(w_oihw, scale):
    # (O, I, 3, 3) -> (9, I, O), tap order (kh, kw), BN scale folded into O cols.
    O, I = w_oihw.shape[0], w_oihw.shape[1]
    w = jnp.transpose(w_oihw, (2, 3, 1, 0)).reshape(9, I, O)
    return w * scale[None, None, :]


def _convT_as_conv_weight(w_t):
    # ConvTranspose2d(stride=1, pad=1) weight (I, O, 3, 3) is a plain 3x3 conv
    # with  W_eq[o, i, kh, kw] = W_t[i, o, 2 - kh, 2 - kw].
    return jnp.transpose(w_t[:, :, ::-1, ::-1], (1, 0, 2, 3))


# ----------------------------------------------------------------------------
# Student forward (returns list of NCHW arrays, same as the PyTorch module)
# ----------------------------------------------------------------------------
def student_forward(x_nchw, params, eps=1e-5):
    B, Cin, H, W = x_nchw.shape
    layers = params["layers"]
    L = len(layers)
    hidden = layers[0]["conv_w"].shape[0]

    Wp = W + 2
    SR = H * Wp
    PRB = (H + 3) * Wp

    # NCHW -> NHWC -> zero pad (1 top, 2 bottom, 1 left, 1 right) -> flatten rows.
    x = jnp.transpose(x_nchw, (0, 2, 3, 1))
    xp = jnp.pad(x, ((0, 0), (1, 2), (1, 1), (0, 0))).reshape(B, PRB, Cin)

    # Fold BN (inference stats) + conv bias into per-tap weights / bias rows.
    W1, B1, W2, B2 = [], [], [], []
    for lp in layers:
        s1 = lp["bn1_gamma"] / jnp.sqrt(lp["bn1_var"] + eps)
        W1.append(_fold_conv_weight(lp["conv_w"], s1))
        B1.append(((lp["conv_b"] - lp["bn1_mean"]) * s1 + lp["bn1_beta"]).reshape(1, hidden))
        s2 = lp["bn2_gamma"] / jnp.sqrt(lp["bn2_var"] + eps)
        W2.append(_fold_conv_weight(_convT_as_conv_weight(lp["convT_w"]), s2))
        B2.append(((lp["convT_b"] - lp["bn2_mean"]) * s2 + lp["bn2_beta"]).reshape(1, Cin))
    W1 = jnp.stack(W1)        # (L, 9, Cin, hidden)
    B1 = jnp.stack(B1)        # (L, 1, hidden)
    W2 = jnp.stack(W2)        # (L, 9, hidden, Cin)
    B2 = jnp.stack(B2)        # (L, 1, Cin)
    lin_wT = params["lin_w"].T                # (Cin, Cin)
    lin_b = params["lin_b"].reshape(1, Cin)

    kernel = functools.partial(_student_kernel, H=H, W=W, Cin=Cin,
                               hidden=hidden, n_layers=L)

    stage_out, lin_out = pl.pallas_call(
        kernel,
        out_shape=(jax.ShapeDtypeStruct((B, L, SR, Cin), x.dtype),
                   jax.ShapeDtypeStruct((B, SR, Cin), x.dtype)),
        grid=(B,),
        in_specs=[
            pl.BlockSpec((None, PRB, Cin), lambda b: (b, 0, 0)),        # per-image input
            pl.BlockSpec((L, 9, Cin, hidden), lambda b: (0, 0, 0, 0)),  # resident weights
            pl.BlockSpec((L, 1, hidden), lambda b: (0, 0, 0)),
            pl.BlockSpec((L, 9, hidden, Cin), lambda b: (0, 0, 0, 0)),
            pl.BlockSpec((L, 1, Cin), lambda b: (0, 0, 0)),
            pl.BlockSpec((Cin, Cin), lambda b: (0, 0)),
            pl.BlockSpec((1, Cin), lambda b: (0, 0)),
        ],
        out_specs=(
            pl.BlockSpec((None, L, SR, Cin), lambda b: (b, 0, 0, 0)),
            pl.BlockSpec((None, SR, Cin), lambda b: (b, 0, 0)),
        ),
        scratch_shapes=[
            pltpu.VMEM((PRB, Cin), jnp.float32),     # padded Cin-channel activation
            pltpu.VMEM((PRB, hidden), jnp.float32),  # padded hidden activation
        ],
        compiler_params=pltpu.CompilerParams(
            dimension_semantics=("parallel",),       # one image per TensorCore on v7x
        ),
    )(xp, W1, B1, W2, B2, lin_wT, lin_b)

    # Crop the strip (H, W+2) -> (H, W) and return NCHW, matching PyTorch.
    so = stage_out.reshape(B, L, H, Wp, Cin)[:, :, :, :W, :]
    outs = [jnp.transpose(so[:, l], (0, 3, 1, 2)) for l in range(L)]
    lo = lin_out.reshape(B, H, Wp, Cin)[:, :, :W, :]
    outs.append(jnp.transpose(lo, (0, 3, 1, 2)))
    return outs


# ----------------------------------------------------------------------------
# Deterministic parameter construction
# ----------------------------------------------------------------------------
def _make_layer_params(key, cin, hidden):
    ks = jax.random.split(key, 12)
    return {
        "conv_w":   0.2 * jax.random.normal(ks[0], (hidden, cin, 3, 3), jnp.float32),
        "conv_b":   0.1 * jax.random.normal(ks[1], (hidden,), jnp.float32),
        "bn1_gamma": 1.0 + 0.1 * jax.random.normal(ks[2], (hidden,), jnp.float32),
        "bn1_beta":  0.1 * jax.random.normal(ks[3], (hidden,), jnp.float32),
        "bn1_mean":  0.1 * jax.random.normal(ks[4], (hidden,), jnp.float32),
        "bn1_var":   0.5 + jax.random.uniform(ks[5], (hidden,), jnp.float32),
        "convT_w":  0.2 * jax.random.normal(ks[6], (hidden, cin, 3, 3), jnp.float32),
        "convT_b":  0.1 * jax.random.normal(ks[7], (cin,), jnp.float32),
        "bn2_gamma": 1.0 + 0.1 * jax.random.normal(ks[8], (cin,), jnp.float32),
        "bn2_beta":  0.1 * jax.random.normal(ks[9], (cin,), jnp.float32),
        "bn2_mean":  0.1 * jax.random.normal(ks[10], (cin,), jnp.float32),
        "bn2_var":   0.5 + jax.random.uniform(ks[11], (cin,), jnp.float32),
    }


def init_params(key, cin, hidden, stages):
    keys = jax.random.split(key, stages + 1)
    layers = [_make_layer_params(keys[i], cin, hidden) for i in range(stages - 1)]
    lin_w = 0.2 * jax.random.normal(keys[-2], (cin, cin), jnp.float32)  # (out, in)
    lin_b = 0.1 * jax.random.normal(keys[-1], (cin,), jnp.float32)
    return {"layers": layers, "lin_w": lin_w, "lin_b": lin_b}


# ----------------------------------------------------------------------------
# Pure-JAX reference (correctness check against the Pallas path)
# ----------------------------------------------------------------------------
def _reference_forward(x_nchw, params, eps=1e-5):
    def conv_bn_relu_ref(x, w, b, g, be, m, v):
        y = jax.lax.conv_general_dilated(
            x, jnp.transpose(w, (2, 3, 1, 0)), (1, 1), "SAME",
            dimension_numbers=("NHWC", "HWIO", "NHWC")) + b
        y = (y - m) / jnp.sqrt(v + eps) * g + be
        return jnp.maximum(y, 0.0)

    x = jnp.transpose(x_nchw, (0, 2, 3, 1))
    outs = []
    for lp in params["layers"]:
        x = conv_bn_relu_ref(x, lp["conv_w"], lp["conv_b"],
                             lp["bn1_gamma"], lp["bn1_beta"], lp["bn1_mean"], lp["bn1_var"])
        w_eq = _convT_as_conv_weight(lp["convT_w"])
        x = conv_bn_relu_ref(x, w_eq, lp["convT_b"],
                             lp["bn2_gamma"], lp["bn2_beta"], lp["bn2_mean"], lp["bn2_var"])
        outs.append(jnp.transpose(x, (0, 3, 1, 2)))
    B, M, N, C = x.shape
    y = x.reshape(B, M * N, C) @ params["lin_w"].T + params["lin_b"]
    outs.append(jnp.transpose(y.reshape(B, M, N, C), (0, 3, 1, 2)))
    return outs


if __name__ == "__main__":
    key = jax.random.PRNGKey(0)
    k_x, k_p = jax.random.split(key)

    B, Cin, H, W = 2, 4, 16, 16        # input x: NCHW, matching PyTorch convention
    hidden, stages = 32, 3

    x = jax.random.normal(k_x, (B, Cin, H, W), jnp.float32)
    params = init_params(k_p, Cin, hidden, stages)

    outs = student_forward(x, params)
    outs = [jax.block_until_ready(o) for o in outs]

    refs = _reference_forward(x, params)
    assert len(outs) == stages  # stages-1 intermediate maps + final linear map
    for o, r in zip(outs, refs):
        assert o.shape == r.shape and o.dtype == r.dtype
        assert jnp.allclose(o, r, atol=1e-4, rtol=1e-4), float(jnp.max(jnp.abs(o - r)))

    print("KERNEL_OK")
</pallas_src>

<mosaic_0001>
module attributes {stable_mosaic.version = 11 : i64} {
  func.func @_student_kernel(%arg0: i32, %arg1: memref<1x342x4xf32, #tpu.memory_space<vmem>>, %arg2: memref<2x9x4x32xf32, #tpu.memory_space<vmem>>, %arg3: memref<2x1x32xf32, #tpu.memory_space<vmem>>, %arg4: memref<2x9x32x4xf32, #tpu.memory_space<vmem>>, %arg5: memref<2x1x4xf32, #tpu.memory_space<vmem>>, %arg6: memref<4x4xf32, #tpu.memory_space<vmem>>, %arg7: memref<1x4xf32, #tpu.memory_space<vmem>>, %arg8: memref<1x2x288x4xf32, #tpu.memory_space<vmem>>, %arg9: memref<1x288x4xf32, #tpu.memory_space<vmem>>, %arg10: memref<342x4xf32, #tpu.memory_space<vmem>>, %arg11: memref<342x32xf32, #tpu.memory_space<vmem>>) attributes {dimension_semantics = [#tpu.dimension_semantics<parallel>], iteration_bounds = array<i64: 2>, scalar_prefetch = 0 : i64, scratch_operands = 2 : i64, tpu.core_type = #tpu.core_type<tc>, window_params = [{transform_indices = @transform_0, window_bounds = array<i64: 1, 342, 4>}, {pipeline_mode = #tpu.pipeline_mode<synchronous>, transform_indices = @transform_1, window_bounds = array<i64: 2, 9, 4, 32>}, {pipeline_mode = #tpu.pipeline_mode<synchronous>, transform_indices = @transform_2, window_bounds = array<i64: 2, 1, 32>}, {pipeline_mode = #tpu.pipeline_mode<synchronous>, transform_indices = @transform_3, window_bounds = array<i64: 2, 9, 32, 4>}, {pipeline_mode = #tpu.pipeline_mode<synchronous>, transform_indices = @transform_4, window_bounds = array<i64: 2, 1, 4>}, {pipeline_mode = #tpu.pipeline_mode<synchronous>, transform_indices = @transform_5, window_bounds = array<i64: 4, 4>}, {pipeline_mode = #tpu.pipeline_mode<synchronous>, transform_indices = @transform_6, window_bounds = array<i64: 1, 4>}, {transform_indices = @transform_7, window_bounds = array<i64: 1, 2, 288, 4>}, {transform_indices = @transform_8, window_bounds = array<i64: 1, 288, 4>}]} {
    %0 = tpu.iota {dimensions = array<i32: 0>} : vector<288x1xi32>
    %c18_i32 = arith.constant 18 : i32
    %c0_i32 = arith.constant 0 : i32
    %1 = arith.cmpi eq, %c18_i32, %c0_i32 : i32
    %c1_i32 = arith.constant 1 : i32
    %2 = arith.select %1, %c1_i32, %c18_i32 : i32
    %3 = vector.broadcast %2 : i32 to vector<288x1xi32>
    %4 = arith.remsi %0, %3 : vector<288x1xi32>
    %c0_i32_0 = arith.constant 0 : i32
    %5 = vector.broadcast %c0_i32_0 : i32 to vector<288x1xi32>
    %6 = arith.cmpi ne, %4, %5 : vector<288x1xi32>
    %c0_i32_1 = arith.constant 0 : i32
    %7 = vector.broadcast %c0_i32_1 : i32 to vector<288x1xi32>
    %8 = arith.cmpi slt, %4, %7 : vector<288x1xi32>
    %c0_i32_2 = arith.constant 0 : i32
    %9 = arith.cmpi slt, %2, %c0_i32_2 : i32
    %10 = vector.broadcast %9 : i1 to vector<288x1xi1>
    %11 = vector.broadcast %10 : vector<288x1xi1> to vector<288x1xi1>
    %12 = arith.xori %8, %11 : vector<288x1xi1>
    %13 = arith.andi %12, %6 : vector<288x1xi1>
    %14 = vector.broadcast %2 : i32 to vector<288x1xi32>
    %15 = arith.addi %4, %14 : vector<288x1xi32>
    %16 = arith.select %13, %15, %4 : vector<288x1xi1>, vector<288x1xi32>
    %c16_i32 = arith.constant 16 : i32
    %17 = vector.broadcast %c16_i32 : i32 to vector<288x1xi32>
    %18 = arith.cmpi slt, %16, %17 : vector<288x1xi32>
    %19 = arith.extui %18 : vector<288x1xi1> to vector<288x1xi32>
    %20 = arith.sitofp %19 : vector<288x1xi32> to vector<288x1xf32>
    %cst = arith.constant 0.000000e+00 : f32
    %21 = vector.broadcast %cst : f32 to vector<342x32xf32>
    %c0 = arith.constant 0 : index
    %c0_3 = arith.constant 0 : index
    %22 = vector.load %arg11[%c0, %c0_3] : memref<342x32xf32, #tpu.memory_space<vmem>>, vector<342x32xf32>
    tpu.vector_store %arg11[%c0, %c0_3], %21 {strides = array<i32>} : memref<342x32xf32, #tpu.memory_space<vmem>>, vector<342x32xf32>,
    %c0_4 = arith.constant 0 : index
    %c0_5 = arith.constant 0 : index
    %c0_6 = arith.constant 0 : index
    %23 = vector.load %arg1[%c0_4, %c0_5, %c0_6] : memref<1x342x4xf32, #tpu.memory_space<vmem>>, vector<1x342x4xf32>
    %24 = vector.shape_cast %23 : vector<1x342x4xf32> to vector<342x4xf32>
    %c0_7 = arith.constant 0 : index
    %c0_8 = arith.constant 0 : index
    %25 = vector.load %arg10[%c0_7, %c0_8] : memref<342x4xf32, #tpu.memory_space<vmem>>, vector<342x4xf32>
    tpu.vector_store %arg10[%c0_7, %c0_8], %24 {strides = array<i32>} : memref<342x4xf32, #tpu.memory_space<vmem>>, vector<342x4xf32>,
    %c0_9 = arith.constant 0 : index
    %c0_10 = arith.constant 0 : index
    %c0_11 = arith.constant 0 : index
    %26 = vector.load %arg3[%c0_9, %c0_10, %c0_11] : memref<2x1x32xf32, #tpu.memory_space<vmem>>, vector<1x1x32xf32>
    %27 = vector.shape_cast %26 : vector<1x1x32xf32> to vector<1x32xf32>
    %c0_12 = arith.constant 0 : index
    %c0_13 = arith.constant 0 : index
    %28 = vector.load %arg10[%c0_12, %c0_13] : memref<342x4xf32, #tpu.memory_space<vmem>>, vector<288x4xf32>
    %c0_14 = arith.constant 0 : index
    %c0_15 = arith.constant 0 : index
    %c0_16 = arith.constant 0 : index
    %c0_17 = arith.constant 0 : index
    %29 = vector.load %arg2[%c0_14, %c0_15, %c0_16, %c0_17] : memref<2x9x4x32xf32, #tpu.memory_space<vmem>>, vector<1x1x4x32xf32>
    %30 = vector.shape_cast %29 : vector<1x1x4x32xf32> to vector<4x32xf32>
    %cst_18 = arith.constant dense<0.000000e+00> : vector<288x32xf32>
    %31 = tpu.matmul %28, %30, %cst_18 {dimension_numbers = #tpu.dot_dimension_numbers<[1], [0], [0], [1], [0, 0, 1, 1], [], []>} : vector<288x4xf32>, vector<4x32xf32>, vector<288x32xf32> -> vector<288x32xf32>
    %c1 = arith.constant 1 : index
    %c0_19 = arith.constant 0 : index
    %32 = vector.load %arg10[%c1, %c0_19] : memref<342x4xf32, #tpu.memory_space<vmem>>, vector<288x4xf32>
    %c0_20 = arith.constant 0 : index
    %c1_21 = arith.constant 1 : index
    %c0_22 = arith.constant 0 : index
    %c0_23 = arith.constant 0 : index
    %33 = vector.load %arg2[%c0_20, %c1_21, %c0_22, %c0_23] : memref<2x9x4x32xf32, #tpu.memory_space<vmem>>, vector<1x1x4x32xf32>
    %34 = vector.shape_cast %33 : vector<1x1x4x32xf32> to vector<4x32xf32>
    %cst_24 = arith.constant dense<0.000000e+00> : vector<288x32xf32>
    %35 = tpu.matmul %32, %34, %cst_24 {dimension_numbers = #tpu.dot_dimension_numbers<[1], [0], [0], [1], [0, 0, 1, 1], [], []>} : vector<288x4xf32>, vector<4x32xf32>, vector<288x32xf32> -> vector<288x32xf32>
    %36 = arith.addf %31, %35 : vector<288x32xf32>
    %c2 = arith.constant 2 : index
    %c0_25 = arith.constant 0 : index
    %37 = vector.load %arg10[%c2, %c0_25] : memref<342x4xf32, #tpu.memory_space<vmem>>, vector<288x4xf32>
    %c0_26 = arith.constant 0 : index
    %c2_27 = arith.constant 2 : index
    %c0_28 = arith.constant 0 : index
    %c0_29 = arith.constant 0 : index
    %38 = vector.load %arg2[%c0_26, %c2_27, %c0_28, %c0_29] : memref<2x9x4x32xf32, #tpu.memory_space<vmem>>, vector<1x1x4x32xf32>
    %39 = vector.shape_cast %38 : vector<1x1x4x32xf32> to vector<4x32xf32>
    %cst_30 = arith.constant dense<0.000000e+00> : vector<288x32xf32>
    %40 = tpu.matmul %37, %39, %cst_30 {dimension_numbers = #tpu.dot_dimension_numbers<[1], [0], [0], [1], [0, 0, 1, 1], [], []>} : vector<288x4xf32>, vector<4x32xf32>, vector<288x32xf32> -> vector<288x32xf32>
    %41 = arith.addf %36, %40 : vector<288x32xf32>
    %c18 = arith.constant 18 : index
    %c0_31 = arith.constant 0 : index
    %42 = vector.load %arg10[%c18, %c0_31] : memref<342x4xf32, #tpu.memory_space<vmem>>, vector<288x4xf32>
    %c0_32 = arith.constant 0 : index
    %c3 = arith.constant 3 : index
    %c0_33 = arith.constant 0 : index
    %c0_34 = arith.constant 0 : index
    %43 = vector.load %arg2[%c0_32, %c3, %c0_33, %c0_34] : memref<2x9x4x32xf32, #tpu.memory_space<vmem>>, vector<1x1x4x32xf32>
    %44 = vector.shape_cast %43 : vector<1x1x4x32xf32> to vector<4x32xf32>
    %cst_35 = arith.constant dense<0.000000e+00> : vector<288x32xf32>
    %45 = tpu.matmul %42, %44, %cst_35 {dimension_numbers = #tpu.dot_dimension_numbers<[1], [0], [0], [1], [0, 0, 1, 1], [], []>} : vector<288x4xf32>, vector<4x32xf32>, vector<288x32xf32> -> vector<288x32xf32>
    %46 = arith.addf %41, %45 : vector<288x32xf32>
    %c19 = arith.constant 19 : index
    %c0_36 = arith.constant 0 : index
    %47 = vector.load %arg10[%c19, %c0_36] : memref<342x4xf32, #tpu.memory_space<vmem>>, vector<288x4xf32>
    %c0_37 = arith.constant 0 : index
    %c4 = arith.constant 4 : index
    %c0_38 = arith.constant 0 : index
    %c0_39 = arith.constant 0 : index
    %48 = vector.load %arg2[%c0_37, %c4, %c0_38, %c0_39] : memref<2x9x4x32xf32, #tpu.memory_space<vmem>>, vector<1x1x4x32xf32>
    %49 = vector.shape_cast %48 : vector<1x1x4x32xf32> to vector<4x32xf32>
    %cst_40 = arith.constant dense<0.000000e+00> : vector<288x32xf32>
    %50 = tpu.matmul %47, %49, %cst_40 {dimension_numbers = #tpu.dot_dimension_numbers<[1], [0], [0], [1], [0, 0, 1, 1], [], []>} : vector<288x4xf32>, vector<4x32xf32>, vector<288x32xf32> -> vector<288x32xf32>
    %51 = arith.addf %46, %50 : vector<288x32xf32>
    %c20 = arith.constant 20 : index
    %c0_41 = arith.constant 0 : index
    %52 = vector.load %arg10[%c20, %c0_41] : memref<342x4xf32, #tpu.memory_space<vmem>>, vector<288x4xf32>
    %c0_42 = arith.constant 0 : index
    %c5 = arith.constant 5 : index
    %c0_43 = arith.constant 0 : index
    %c0_44 = arith.constant 0 : index
    %53 = vector.load %arg2[%c0_42, %c5, %c0_43, %c0_44] : memref<2x9x4x32xf32, #tpu.memory_space<vmem>>, vector<1x1x4x32xf32>
    %54 = vector.shape_cast %53 : vector<1x1x4x32xf32> to vector<4x32xf32>
    %cst_45 = arith.constant dense<0.000000e+00> : vector<288x32xf32>
    %55 = tpu.matmul %52, %54, %cst_45 {dimension_numbers = #tpu.dot_dimension_numbers<[1], [0], [0], [1], [0, 0, 1, 1], [], []>} : vector<288x4xf32>, vector<4x32xf32>, vector<288x32xf32> -> vector<288x32xf32>
    %56 = arith.addf %51, %55 : vector<288x32xf32>
    %c36 = arith.constant 36 : index
    %c0_46 = arith.constant 0 : index
    %57 = vector.load %arg10[%c36, %c0_46] : memref<342x4xf32, #tpu.memory_space<vmem>>, vector<288x4xf32>
    %c0_47 = arith.constant 0 : index
    %c6 = arith.constant 6 : index
    %c0_48 = arith.constant 0 : index
    %c0_49 = arith.constant 0 : index
    %58 = vector.load %arg2[%c0_47, %c6, %c0_48, %c0_49] : memref<2x9x4x32xf32, #tpu.memory_space<vmem>>, vector<1x1x4x32xf32>
    %59 = vector.shape_cast %58 : vector<1x1x4x32xf32> to vector<4x32xf32>
    %cst_50 = arith.constant dense<0.000000e+00> : vector<288x32xf32>
    %60 = tpu.matmul %57, %59, %cst_50 {dimension_numbers = #tpu.dot_dimension_numbers<[1], [0], [0], [1], [0, 0, 1, 1], [], []>} : vector<288x4xf32>, vector<4x32xf32>, vector<288x32xf32> -> vector<288x32xf32>
    %61 = arith.addf %56, %60 : vector<288x32xf32>
    %c37 = arith.constant 37 : index
    %c0_51 = arith.constant 0 : index
    %62 = vector.load %arg10[%c37, %c0_51] : memref<342x4xf32, #tpu.memory_space<vmem>>, vector<288x4xf32>
    %c0_52 = arith.constant 0 : index
    %c7 = arith.constant 7 : index
    %c0_53 = arith.constant 0 : index
    %c0_54 = arith.constant 0 : index
    %63 = vector.load %arg2[%c0_52, %c7, %c0_53, %c0_54] : memref<2x9x4x32xf32, #tpu.memory_space<vmem>>, vector<1x1x4x32xf32>
    %64 = vector.shape_cast %63 : vector<1x1x4x32xf32> to vector<4x32xf32>
    %cst_55 = arith.constant dense<0.000000e+00> : vector<288x32xf32>
    %65 = tpu.matmul %62, %64, %cst_55 {dimension_numbers = #tpu.dot_dimension_numbers<[1], [0], [0], [1], [0, 0, 1, 1], [], []>} : vector<288x4xf32>, vector<4x32xf32>, vector<288x32xf32> -> vector<288x32xf32>
    %66 = arith.addf %61, %65 : vector<288x32xf32>
    %c38 = arith.constant 38 : index
    %c0_56 = arith.constant 0 : index
    %67 = vector.load %arg10[%c38, %c0_56] : memref<342x4xf32, #tpu.memory_space<vmem>>, vector<288x4xf32>
    %c0_57 = arith.constant 0 : index
    %c8 = arith.constant 8 : index
    %c0_58 = arith.constant 0 : index
    %c0_59 = arith.constant 0 : index
    %68 = vector.load %arg2[%c0_57, %c8, %c0_58, %c0_59] : memref<2x9x4x32xf32, #tpu.memory_space<vmem>>, vector<1x1x4x32xf32>
    %69 = vector.shape_cast %68 : vector<1x1x4x32xf32> to vector<4x32xf32>
    %cst_60 = arith.constant dense<0.000000e+00> : vector<288x32xf32>
    %70 = tpu.matmul %67, %69, %cst_60 {dimension_numbers = #tpu.dot_dimension_numbers<[1], [0], [0], [1], [0, 0, 1, 1], [], []>} : vector<288x4xf32>, vector<4x32xf32>, vector<288x32xf32> -> vector<288x32xf32>
    %71 = arith.addf %66, %70 : vector<288x32xf32>
    %72 = vector.broadcast %27 : vector<1x32xf32> to vector<288x32xf32>
    %73 = arith.addf %71, %72 : vector<288x32xf32>
    %cst_61 = arith.constant 0.000000e+00 : f32
    %74 = vector.broadcast %cst_61 : f32 to vector<288x32xf32>
    %75 = arith.maximumf %73, %74 : vector<288x32xf32>
    %76 = vector.broadcast %20 : vector<288x1xf32> to vector<288x32xf32>
    %77 = arith.mulf %75, %76 : vector<288x32xf32>
    %c19_62 = arith.constant 19 : index
    %c0_63 = arith.constant 0 : index
    %78 = vector.load %arg11[%c19_62, %c0_63] : memref<342x32xf32, #tpu.memory_space<vmem>>, vector<288x32xf32>
    tpu.vector_store %arg11[%c19_62, %c0_63], %77 {strides = array<i32>} : memref<342x32xf32, #tpu.memory_space<vmem>>, vector<288x32xf32>,
    %c0_64 = arith.constant 0 : index
    %c0_65 = arith.constant 0 : index
    %c0_66 = arith.constant 0 : index
    %79 = vector.load %arg5[%c0_64, %c0_65, %c0_66] : memref<2x1x4xf32, #tpu.memory_space<vmem>>, vector<1x1x4xf32>
    %80 = vector.shape_cast %79 : vector<1x1x4xf32> to vector<1x4xf32>
    %c0_67 = arith.constant 0 : index
    %c0_68 = arith.constant 0 : index
    %81 = vector.load %arg11[%c0_67, %c0_68] : memref<342x32xf32, #tpu.memory_space<vmem>>, vector<288x32xf32>
    %c0_69 = arith.constant 0 : index
    %c0_70 = arith.constant 0 : index
    %c0_71 = arith.constant 0 : index
    %c0_72 = arith.constant 0 : index
    %82 = vector.load %arg4[%c0_69, %c0_70, %c0_71, %c0_72] : memref<2x9x32x4xf32, #tpu.memory_space<vmem>>, vector<1x1x32x4xf32>
    %83 = vector.shape_cast %82 : vector<1x1x32x4xf32> to vector<32x4xf32>
    %cst_73 = arith.constant dense<0.000000e+00> : vector<288x4xf32>
    %84 = tpu.matmul %81, %83, %cst_73 {dimension_numbers = #tpu.dot_dimension_numbers<[1], [0], [0], [1], [0, 0, 1, 1], [], []>} : vector<288x32xf32>, vector<32x4xf32>, vector<288x4xf32> -> vector<288x4xf32>
    %c1_74 = arith.constant 1 : index
    %c0_75 = arith.constant 0 : index
    %85 = vector.load %arg11[%c1_74, %c0_75] : memref<342x32xf32, #tpu.memory_space<vmem>>, vector<288x32xf32>
    %c0_76 = arith.constant 0 : index
    %c1_77 = arith.constant 1 : index
    %c0_78 = arith.constant 0 : index
    %c0_79 = arith.constant 0 : index
    %86 = vector.load %arg4[%c0_76, %c1_77, %c0_78, %c0_79] : memref<2x9x32x4xf32, #tpu.memory_space<vmem>>, vector<1x1x32x4xf32>
    %87 = vector.shape_cast %86 : vector<1x1x32x4xf32> to vector<32x4xf32>
    %cst_80 = arith.constant dense<0.000000e+00> : vector<288x4xf32>
    %88 = tpu.matmul %85, %87, %cst_80 {dimension_numbers = #tpu.dot_dimension_numbers<[1], [0], [0], [1], [0, 0, 1, 1], [], []>} : vector<288x32xf32>, vector<32x4xf32>, vector<288x4xf32> -> vector<288x4xf32>
    %89 = arith.addf %84, %88 : vector<288x4xf32>
    %c2_81 = arith.constant 2 : index
    %c0_82 = arith.constant 0 : index
    %90 = vector.load %arg11[%c2_81, %c0_82] : memref<342x32xf32, #tpu.memory_space<vmem>>, vector<288x32xf32>
    %c0_83 = arith.constant 0 : index
    %c2_84 = arith.constant 2 : index
    %c0_85 = arith.constant 0 : index
    %c0_86 = arith.constant 0 : index
    %91 = vector.load %arg4[%c0_83, %c2_84, %c0_85, %c0_86] : memref<2x9x32x4xf32, #tpu.memory_space<vmem>>, vector<1x1x32x4xf32>
    %92 = vector.shape_cast %91 : vector<1x1x32x4xf32> to vector<32x4xf32>
    %cst_87 = arith.constant dense<0.000000e+00> : vector<288x4xf32>
    %93 = tpu.matmul %90, %92, %cst_87 {dimension_numbers = #tpu.dot_dimension_numbers<[1], [0], [0], [1], [0, 0, 1, 1], [], []>} : vector<288x32xf32>, vector<32x4xf32>, vector<288x4xf32> -> vector<288x4xf32>
    %94 = arith.addf %89, %93 : vector<288x4xf32>
    %c18_88 = arith.constant 18 : index
    %c0_89 = arith.constant 0 : index
    %95 = vector.load %arg11[%c18_88, %c0_89] : memref<342x32xf32, #tpu.memory_space<vmem>>, vector<288x32xf32>
    %c0_90 = arith.constant 0 : index
    %c3_91 = arith.constant 3 : index
    %c0_92 = arith.constant 0 : index
    %c0_93 = arith.constant 0 : index
    %96 = vector.load %arg4[%c0_90, %c3_91, %c0_92, %c0_93] : memref<2x9x32x4xf32, #tpu.memory_space<vmem>>, vector<1x1x32x4xf32>
    %97 = vector.shape_cast %96 : vector<1x1x32x4xf32> to vector<32x4xf32>
    %cst_94 = arith.constant dense<0.000000e+00> : vector<288x4xf32>
    %98 = tpu.matmul %95, %97, %cst_94 {dimension_numbers = #tpu.dot_dimension_numbers<[1], [0], [0], [1], [0, 0, 1, 1], [], []>} : vector<288x32xf32>, vector<32x4xf32>, vector<288x4xf32> -> vector<288x4xf32>
    %99 = arith.addf %94, %98 : vector<288x4xf32>
    %c19_95 = arith.constant 19 : index
    %c0_96 = arith.constant 0 : index
    %100 = vector.load %arg11[%c19_95, %c0_96] : memref<342x32xf32, #tpu.memory_space<vmem>>, vector<288x32xf32>
    %c0_97 = arith.constant 0 : index
    %c4_98 = arith.constant 4 : index
    %c0_99 = arith.constant 0 : index
    %c0_100 = arith.constant 0 : index
    %101 = vector.load %arg4[%c0_97, %c4_98, %c0_99, %c0_100] : memref<2x9x32x4xf32, #tpu.memory_space<vmem>>, vector<1x1x32x4xf32>
    %102 = vector.shape_cast %101 : vector<1x1x32x4xf32> to vector<32x4xf32>
    %cst_101 = arith.constant dense<0.000000e+00> : vector<288x4xf32>
    %103 = tpu.matmul %100, %102, %cst_101 {dimension_numbers = #tpu.dot_dimension_numbers<[1], [0], [0], [1], [0, 0, 1, 1], [], []>} : vector<288x32xf32>, vector<32x4xf32>, vector<288x4xf32> -> vector<288x4xf32>
    %104 = arith.addf %99, %103 : vector<288x4xf32>
    %c20_102 = arith.constant 20 : index
    %c0_103 = arith.constant 0 : index
    %105 = vector.load %arg11[%c20_102, %c0_103] : memref<342x32xf32, #tpu.memory_space<vmem>>, vector<288x32xf32>
    %c0_104 = arith.constant 0 : index
    %c5_105 = arith.constant 5 : index
    %c0_106 = arith.constant 0 : index
    %c0_107 = arith.constant 0 : index
    %106 = vector.load %arg4[%c0_104, %c5_105, %c0_106, %c0_107] : memref<2x9x32x4xf32, #tpu.memory_space<vmem>>, vector<1x1x32x4xf32>
    %107 = vector.shape_cast %106 : vector<1x1x32x4xf32> to vector<32x4xf32>
    %cst_108 = arith.constant dense<0.000000e+00> : vector<288x4xf32>
    %108 = tpu.matmul %105, %107, %cst_108 {dimension_numbers = #tpu.dot_dimension_numbers<[1], [0], [0], [1], [0, 0, 1, 1], [], []>} : vector<288x32xf32>, vector<32x4xf32>, vector<288x4xf32> -> vector<288x4xf32>
    %109 = arith.addf %104, %108 : vector<288x4xf32>
    %c36_109 = arith.constant 36 : index
    %c0_110 = arith.constant 0 : index
    %110 = vector.load %arg11[%c36_109, %c0_110] : memref<342x32xf32, #tpu.memory_space<vmem>>, vector<288x32xf32>
    %c0_111 = arith.constant 0 : index
    %c6_112 = arith.constant 6 : index
    %c0_113 = arith.constant 0 : index
    %c0_114 = arith.constant 0 : index
    %111 = vector.load %arg4[%c0_111, %c6_112, %c0_113, %c0_114] : memref<2x9x32x4xf32, #tpu.memory_space<vmem>>, vector<1x1x32x4xf32>
    %112 = vector.shape_cast %111 : vector<1x1x32x4xf32> to vector<32x4xf32>
    %cst_115 = arith.constant dense<0.000000e+00> : vector<288x4xf32>
    %113 = tpu.matmul %110, %112, %cst_115 {dimension_numbers = #tpu.dot_dimension_numbers<[1], [0], [0], [1], [0, 0, 1, 1], [], []>} : vector<288x32xf32>, vector<32x4xf32>, vector<288x4xf32> -> vector<288x4xf32>
    %114 = arith.addf %109, %113 : vector<288x4xf32>
    %c37_116 = arith.constant 37 : index
    %c0_117 = arith.constant 0 : index
    %115 = vector.load %arg11[%c37_116, %c0_117] : memref<342x32xf32, #tpu.memory_space<vmem>>, vector<288x32xf32>
    %c0_118 = arith.constant 0 : index
    %c7_119 = arith.constant 7 : index
    %c0_120 = arith.constant 0 : index
    %c0_121 = arith.constant 0 : index
    %116 = vector.load %arg4[%c0_118, %c7_119, %c0_120, %c0_121] : memref<2x9x32x4xf32, #tpu.memory_space<vmem>>, vector<1x1x32x4xf32>
    %117 = vector.shape_cast %116 : vector<1x1x32x4xf32> to vector<32x4xf32>
    %cst_122 = arith.constant dense<0.000000e+00> : vector<288x4xf32>
    %118 = tpu.matmul %115, %117, %cst_122 {dimension_numbers = #tpu.dot_dimension_numbers<[1], [0], [0], [1], [0, 0, 1, 1], [], []>} : vector<288x32xf32>, vector<32x4xf32>, vector<288x4xf32> -> vector<288x4xf32>
    %119 = arith.addf %114, %118 : vector<288x4xf32>
    %c38_123 = arith.constant 38 : index
    %c0_124 = arith.constant 0 : index
    %120 = vector.load %arg11[%c38_123, %c0_124] : memref<342x32xf32, #tpu.memory_space<vmem>>, vector<288x32xf32>
    %c0_125 = arith.constant 0 : index
    %c8_126 = arith.constant 8 : index
    %c0_127 = arith.constant 0 : index
    %c0_128 = arith.constant 0 : index
    %121 = vector.load %arg4[%c0_125, %c8_126, %c0_127, %c0_128] : memref<2x9x32x4xf32, #tpu.memory_space<vmem>>, vector<1x1x32x4xf32>
    %122 = vector.shape_cast %121 : vector<1x1x32x4xf32> to vector<32x4xf32>
    %cst_129 = arith.constant dense<0.000000e+00> : vector<288x4xf32>
    %123 = tpu.matmul %120, %122, %cst_129 {dimension_numbers = #tpu.dot_dimension_numbers<[1], [0], [0], [1], [0, 0, 1, 1], [], []>} : vector<288x32xf32>, vector<32x4xf32>, vector<288x4xf32> -> vector<288x4xf32>
    %124 = arith.addf %119, %123 : vector<288x4xf32>
    %125 = vector.broadcast %80 : vector<1x4xf32> to vector<288x4xf32>
    %126 = arith.addf %124, %125 : vector<288x4xf32>
    %cst_130 = arith.constant 0.000000e+00 : f32
    %127 = vector.broadcast %cst_130 : f32 to vector<288x4xf32>
    %128 = arith.maximumf %126, %127 : vector<288x4xf32>
    %129 = vector.broadcast %20 : vector<288x1xf32> to vector<288x4xf32>
    %130 = arith.mulf %128, %129 : vector<288x4xf32>
    %c0_131 = arith.constant 0 : index
    %c0_132 = arith.constant 0 : index
    %c0_133 = arith.constant 0 : index
    %c0_134 = arith.constant 0 : index
    %131 = vector.load %arg8[%c0_131, %c0_132, %c0_133, %c0_134] : memref<1x2x288x4xf32, #tpu.memory_space<vmem>>, vector<1x1x288x4xf32>
    %132 = vector.shape_cast %131 : vector<1x1x288x4xf32> to vector<288x4xf32>
    %133 = vector.shape_cast %130 : vector<288x4xf32> to vector<1x1x288x4xf32>
    tpu.vector_store %arg8[%c0_131, %c0_132, %c0_133, %c0_134], %133 {strides = array<i32>} : memref<1x2x288x4xf32, #tpu.memory_space<vmem>>, vector<1x1x288x4xf32>,
    %c19_135 = arith.constant 19 : index
    %c0_136 = arith.constant 0 : index
    %134 = vector.load %arg10[%c19_135, %c0_136] : memref<342x4xf32, #tpu.memory_space<vmem>>, vector<288x4xf32>
    tpu.vector_store %arg10[%c19_135, %c0_136], %130 {strides = array<i32>} : memref<342x4xf32, #tpu.memory_space<vmem>>, vector<288x4xf32>,
    %c1_137 = arith.constant 1 : index
    %c0_138 = arith.constant 0 : index
    %c0_139 = arith.constant 0 : index
    %135 = vector.load %arg3[%c1_137, %c0_138, %c0_139] : memref<2x1x32xf32, #tpu.memory_space<vmem>>, vector<1x1x32xf32>
    %136 = vector.shape_cast %135 : vector<1x1x32xf32> to vector<1x32xf32>
    %c0_140 = arith.constant 0 : index
    %c0_141 = arith.constant 0 : index
    %137 = vector.load %arg10[%c0_140, %c0_141] : memref<342x4xf32, #tpu.memory_space<vmem>>, vector<288x4xf32>
    %c1_142 = arith.constant 1 : index
    %c0_143 = arith.constant 0 : index
    %c0_144 = arith.constant 0 : index
    %c0_145 = arith.constant 0 : index
    %138 = vector.load %arg2[%c1_142, %c0_143, %c0_144, %c0_145] : memref<2x9x4x32xf32, #tpu.memory_space<vmem>>, vector<1x1x4x32xf32>
    %139 = vector.shape_cast %138 : vector<1x1x4x32xf32> to vector<4x32xf32>
    %cst_146 = arith.constant dense<0.000000e+00> : vector<288x32xf32>
    %140 = tpu.matmul %137, %139, %cst_146 {dimension_numbers = #tpu.dot_dimension_numbers<[1], [0], [0], [1], [0, 0, 1, 1], [], []>} : vector<288x4xf32>, vector<4x32xf32>, vector<288x32xf32> -> vector<288x32xf32>
    %c1_147 = arith.constant 1 : index
    %c0_148 = arith.constant 0 : index
    %141 = vector.load %arg10[%c1_147, %c0_148] : memref<342x4xf32, #tpu.memory_space<vmem>>, vector<288x4xf32>
    %c1_149 = arith.constant 1 : index
    %c1_150 = arith.constant 1 : index
    %c0_151 = arith.constant 0 : index
    %c0_152 = arith.constant 0 : index
    %142 = vector.load %arg2[%c1_149, %c1_150, %c0_151, %c0_152] : memref<2x9x4x32xf32, #tpu.memory_space<vmem>>, vector<1x1x4x32xf32>
    %143 = vector.shape_cast %142 : vector<1x1x4x32xf32> to vector<4x32xf32>
    %cst_153 = arith.constant dense<0.000000e+00> : vector<288x32xf32>
    %144 = tpu.matmul %141, %143, %cst_153 {dimension_numbers = #tpu.dot_dimension_numbers<[1], [0], [0], [1], [0, 0, 1, 1], [], []>} : vector<288x4xf32>, vector<4x32xf32>, vector<288x32xf32> -> vector<288x32xf32>
    %145 = arith.addf %140, %144 : vector<288x32xf32>
    %c2_154 = arith.constant 2 : index
    %c0_155 = arith.constant 0 : index
    %146 = vector.load %arg10[%c2_154, %c0_155] : memref<342x4xf32, #tpu.memory_space<vmem>>, vector<288x4xf32>
    %c1_156 = arith.constant 1 : index
    %c2_157 = arith.constant 2 : index
    %c0_158 = arith.constant 0 : index
    %c0_159 = arith.constant 0 : index
    %147 = vector.load %arg2[%c1_156, %c2_157, %c0_158, %c0_159] : memref<2x9x4x32xf32, #tpu.memory_space<vmem>>, vector<1x1x4x32xf32>
    %148 = vector.shape_cast %147 : vector<1x1x4x32xf32> to vector<4x32xf32>
    %cst_160 = arith.constant dense<0.000000e+00> : vector<288x32xf32>
    %149 = tpu.matmul %146, %148, %cst_160 {dimension_numbers = #tpu.dot_dimension_numbers<[1], [0], [0], [1], [0, 0, 1, 1], [], []>} : vector<288x4xf32>, vector<4x32xf32>, vector<288x32xf32> -> vector<288x32xf32>
    %150 = arith.addf %145, %149 : vector<288x32xf32>
    %c18_161 = arith.constant 18 : index
    %c0_162 = arith.constant 0 : index
    %151 = vector.load %arg10[%c18_161, %c0_162] : memref<342x4xf32, #tpu.memory_space<vmem>>, vector<288x4xf32>
    %c1_163 = arith.constant 1 : index
    %c3_164 = arith.constant 3 : index
    %c0_165 = arith.constant 0 : index
    %c0_166 = arith.constant 0 : index
    %152 = vector.load %arg2[%c1_163, %c3_164, %c0_165, %c0_166] : memref<2x9x4x32xf32, #tpu.memory_space<vmem>>, vector<1x1x4x32xf32>
    %153 = vector.shape_cast %152 : vector<1x1x4x32xf32> to vector<4x32xf32>
    %cst_167 = arith.constant dense<0.000000e+00> : vector<288x32xf32>
    %154 = tpu.matmul %151, %153, %cst_167 {dimension_numbers = #tpu.dot_dimension_numbers<[1], [0], [0], [1], [0, 0, 1, 1], [], []>} : vector<288x4xf32>, vector<4x32xf32>, vector<288x32xf32> -> vector<288x32xf32>
    %155 = arith.addf %150, %154 : vector<288x32xf32>
    %c19_168 = arith.constant 19 : index
    %c0_169 = arith.constant 0 : index
    %156 = vector.load %arg10[%c19_168, %c0_169] : memref<342x4xf32, #tpu.memory_space<vmem>>, vector<288x4xf32>
    %c1_170 = arith.constant 1 : index
    %c4_171 = arith.constant 4 : index
    %c0_172 = arith.constant 0 : index
    %c0_173 = arith.constant 0 : index
    %157 = vector.load %arg2[%c1_170, %c4_171, %c0_172, %c0_173] : memref<2x9x4x32xf32, #tpu.memory_space<vmem>>, vector<1x1x4x32xf32>
    %158 = vector.shape_cast %157 : vector<1x1x4x32xf32> to vector<4x32xf32>
    %cst_174 = arith.constant dense<0.000000e+00> : vector<288x32xf32>
    %159 = tpu.matmul %156, %158, %cst_174 {dimension_numbers = #tpu.dot_dimension_numbers<[1], [0], [0], [1], [0, 0, 1, 1], [], []>} : vector<288x4xf32>, vector<4x32xf32>, vector<288x32xf32> -> vector<288x32xf32>
    %160 = arith.addf %155, %159 : vector<288x32xf32>
    %c20_175 = arith.constant 20 : index
    %c0_176 = arith.constant 0 : index
    %161 = vector.load %arg10[%c20_175, %c0_176] : memref<342x4xf32, #tpu.memory_space<vmem>>, vector<288x4xf32>
    %c1_177 = arith.constant 1 : index
    %c5_178 = arith.constant 5 : index
    %c0_179 = arith.constant 0 : index
    %c0_180 = arith.constant 0 : index
    %162 = vector.load %arg2[%c1_177, %c5_178, %c0_179, %c0_180] : memref<2x9x4x32xf32, #tpu.memory_space<vmem>>, vector<1x1x4x32xf32>
    %163 = vector.shape_cast %162 : vector<1x1x4x32xf32> to vector<4x32xf32>
    %cst_181 = arith.constant dense<0.000000e+00> : vector<288x32xf32>
    %164 = tpu.matmul %161, %163, %cst_181 {dimension_numbers = #tpu.dot_dimension_numbers<[1], [0], [0], [1], [0, 0, 1, 1], [], []>} : vector<288x4xf32>, vector<4x32xf32>, vector<288x32xf32> -> vector<288x32xf32>
    %165 = arith.addf %160, %164 : vector<288x32xf32>
    %c36_182 = arith.constant 36 : index
    %c0_183 = arith.constant 0 : index
    %166 = vector.load %arg10[%c36_182, %c0_183] : memref<342x4xf32, #tpu.memory_space<vmem>>, vector<288x4xf32>
    %c1_184 = arith.constant 1 : index
    %c6_185 = arith.constant 6 : index
    %c0_186 = arith.constant 0 : index
    %c0_187 = arith.constant 0 : index
    %167 = vector.load %arg2[%c1_184, %c6_185, %c0_186, %c0_187] : memref<2x9x4x32xf32, #tpu.memory_space<vmem>>, vector<1x1x4x32xf32>
    %168 = vector.shape_cast %167 : vector<1x1x4x32xf32> to vector<4x32xf32>
    %cst_188 = arith.constant dense<0.000000e+00> : vector<288x32xf32>
    %169 = tpu.matmul %166, %168, %cst_188 {dimension_numbers = #tpu.dot_dimension_numbers<[1], [0], [0], [1], [0, 0, 1, 1], [], []>} : vector<288x4xf32>, vector<4x32xf32>, vector<288x32xf32> -> vector<288x32xf32>
    %170 = arith.addf %165, %169 : vector<288x32xf32>
    %c37_189 = arith.constant 37 : index
    %c0_190 = arith.constant 0 : index
    %171 = vector.load %arg10[%c37_189, %c0_190] : memref<342x4xf32, #tpu.memory_space<vmem>>, vector<288x4xf32>
    %c1_191 = arith.constant 1 : index
    %c7_192 = arith.constant 7 : index
    %c0_193 = arith.constant 0 : index
    %c0_194 = arith.constant 0 : index
    %172 = vector.load %arg2[%c1_191, %c7_192, %c0_193, %c0_194] : memref<2x9x4x32xf32, #tpu.memory_space<vmem>>, vector<1x1x4x32xf32>
    %173 = vector.shape_cast %172 : vector<1x1x4x32xf32> to vector<4x32xf32>
    %cst_195 = arith.constant dense<0.000000e+00> : vector<288x32xf32>
    %174 = tpu.matmul %171, %173, %cst_195 {dimension_numbers = #tpu.dot_dimension_numbers<[1], [0], [0], [1], [0, 0, 1, 1], [], []>} : vector<288x4xf32>, vector<4x32xf32>, vector<288x32xf32> -> vector<288x32xf32>
    %175 = arith.addf %170, %174 : vector<288x32xf32>
    %c38_196 = arith.constant 38 : index
    %c0_197 = arith.constant 0 : index
    %176 = vector.load %arg10[%c38_196, %c0_197] : memref<342x4xf32, #tpu.memory_space<vmem>>, vector<288x4xf32>
    %c1_198 = arith.constant 1 : index
    %c8_199 = arith.constant 8 : index
    %c0_200 = arith.constant 0 : index
    %c0_201 = arith.constant 0 : index
    %177 = vector.load %arg2[%c1_198, %c8_199, %c0_200, %c0_201] : memref<2x9x4x32xf32, #tpu.memory_space<vmem>>, vector<1x1x4x32xf32>
    %178 = vector.shape_cast %177 : vector<1x1x4x32xf32> to vector<4x32xf32>
    %cst_202 = arith.constant dense<0.000000e+00> : vector<288x32xf32>
    %179 = tpu.matmul %176, %178, %cst_202 {dimension_numbers = #tpu.dot_dimension_numbers<[1], [0], [0], [1], [0, 0, 1, 1], [], []>} : vector<288x4xf32>, vector<4x32xf32>, vector<288x32xf32> -> vector<288x32xf32>
    %180 = arith.addf %175, %179 : vector<288x32xf32>
    %181 = vector.broadcast %136 : vector<1x32xf32> to vector<288x32xf32>
    %182 = arith.addf %180, %181 : vector<288x32xf32>
    %cst_203 = arith.constant 0.000000e+00 : f32
    %183 = vector.broadcast %cst_203 : f32 to vector<288x32xf32>
    %184 = arith.maximumf %182, %183 : vector<288x32xf32>
    %185 = vector.broadcast %20 : vector<288x1xf32> to vector<288x32xf32>
    %186 = arith.mulf %184, %185 : vector<288x32xf32>
    %c19_204 = arith.constant 19 : index
    %c0_205 = arith.constant 0 : index
    %187 = vector.load %arg11[%c19_204, %c0_205] : memref<342x32xf32, #tpu.memory_space<vmem>>, vector<288x32xf32>
    tpu.vector_store %arg11[%c19_204, %c0_205], %186 {strides = array<i32>} : memref<342x32xf32, #tpu.memory_space<vmem>>, vector<288x32xf32>,
    %c1_206 = arith.constant 1 : index
    %c0_207 = arith.constant 0 : index
    %c0_208 = arith.constant 0 : index
    %188 = vector.load %arg5[%c1_206, %c0_207, %c0_208] : memref<2x1x4xf32, #tpu.memory_space<vmem>>, vector<1x1x4xf32>
    %189 = vector.shape_cast %188 : vector<1x1x4xf32> to vector<1x4xf32>
    %c0_209 = arith.constant 0 : index
    %c0_210 = arith.constant 0 : index
    %190 = vector.load %arg11[%c0_209, %c0_210] : memref<342x32xf32, #tpu.memory_space<vmem>>, vector<288x32xf32>
    %c1_211 = arith.constant 1 : index
    %c0_212 = arith.constant 0 : index
    %c0_213 = arith.constant 0 : index
    %c0_214 = arith.constant 0 : index
    %191 = vector.load %arg4[%c1_211, %c0_212, %c0_213, %c0_214] : memref<2x9x32x4xf32, #tpu.memory_space<vmem>>, vector<1x1x32x4xf32>
    %192 = vector.shape_cast %191 : vector<1x1x32x4xf32> to vector<32x4xf32>
    %cst_215 = arith.constant dense<0.000000e+00> : vector<288x4xf32>
    %193 = tpu.matmul %190, %192, %cst_215 {dimension_numbers = #tpu.dot_dimension_numbers<[1], [0], [0], [1], [0, 0, 1, 1], [], []>} : vector<288x32xf32>, vector<32x4xf32>, vector<288x4xf32> -> vector<288x4xf32>
    %c1_216 = arith.constant 1 : index
    %c0_217 = arith.constant 0 : index
    %194 = vector.load %arg11[%c1_216, %c0_217] : memref<342x32xf32, #tpu.memory_space<vmem>>, vector<288x32xf32>
    %c1_218 = arith.constant 1 : index
    %c1_219 = arith.constant 1 : index
    %c0_220 = arith.constant 0 : index
    %c0_221 = arith.constant 0 : index
    %195 = vector.load %arg4[%c1_218, %c1_219, %c0_220, %c0_221] : memref<2x9x32x4xf32, #tpu.memory_space<vmem>>, vector<1x1x32x4xf32>
    %196 = vector.shape_cast %195 : vector<1x1x32x4xf32> to vector<32x4xf32>
    %cst_222 = arith.constant dense<0.000000e+00> : vector<288x4xf32>
    %197 = tpu.matmul %194, %196, %cst_222 {dimension_numbers = #tpu.dot_dimension_numbers<[1], [0], [0], [1], [0, 0, 1, 1], [], []>} : vector<288x32xf32>, vector<32x4xf32>, vector<288x4xf32> -> vector<288x4xf32>
    %198 = arith.addf %193, %197 : vector<288x4xf32>
    %c2_223 = arith.constant 2 : index
    %c0_224 = arith.constant 0 : index
    %199 = vector.load %arg11[%c2_223, %c0_224] : memref<342x32xf32, #tpu.memory_space<vmem>>, vector<288x32xf32>
    %c1_225 = arith.constant 1 : index
    %c2_226 = arith.constant 2 : index
    %c0_227 = arith.constant 0 : index
    %c0_228 = arith.constant 0 : index
    %200 = vector.load %arg4[%c1_225, %c2_226, %c0_227, %c0_228] : memref<2x9x32x4xf32, #tpu.memory_space<vmem>>, vector<1x1x32x4xf32>
    %201 = vector.shape_cast %200 : vector<1x1x32x4xf32> to vector<32x4xf32>
    %cst_229 = arith.constant dense<0.000000e+00> : vector<288x4xf32>
    %202 = tpu.matmul %199, %201, %cst_229 {dimension_numbers = #tpu.dot_dimension_numbers<[1], [0], [0], [1], [0, 0, 1, 1], [], []>} : vector<288x32xf32>, vector<32x4xf32>, vector<288x4xf32> -> vector<288x4xf32>
    %203 = arith.addf %198, %202 : vector<288x4xf32>
    %c18_230 = arith.constant 18 : index
    %c0_231 = arith.constant 0 : index
    %204 = vector.load %arg11[%c18_230, %c0_231] : memref<342x32xf32, #tpu.memory_space<vmem>>, vector<288x32xf32>
    %c1_232 = arith.constant 1 : index
    %c3_233 = arith.constant 3 : index
    %c0_234 = arith.constant 0 : index
    %c0_235 = arith.constant 0 : index
    %205 = vector.load %arg4[%c1_232, %c3_233, %c0_234, %c0_235] : memref<2x9x32x4xf32, #tpu.memory_space<vmem>>, vector<1x1x32x4xf32>
    %206 = vector.shape_cast %205 : vector<1x1x32x4xf32> to vector<32x4xf32>
    %cst_236 = arith.constant dense<0.000000e+00> : vector<288x4xf32>
    %207 = tpu.matmul %204, %206, %cst_236 {dimension_numbers = #tpu.dot_dimension_numbers<[1], [0], [0], [1], [0, 0, 1, 1], [], []>} : vector<288x32xf32>, vector<32x4xf32>, vector<288x4xf32> -> vector<288x4xf32>
    %208 = arith.addf %203, %207 : vector<288x4xf32>
    %c19_237 = arith.constant 19 : index
    %c0_238 = arith.constant 0 : index
    %209 = vector.load %arg11[%c19_237, %c0_238] : memref<342x32xf32, #tpu.memory_space<vmem>>, vector<288x32xf32>
    %c1_239 = arith.constant 1 : index
    %c4_240 = arith.constant 4 : index
    %c0_241 = arith.constant 0 : index
    %c0_242 = arith.constant 0 : index
    %210 = vector.load %arg4[%c1_239, %c4_240, %c0_241, %c0_242] : memref<2x9x32x4xf32, #tpu.memory_space<vmem>>, vector<1x1x32x4xf32>
    %211 = vector.shape_cast %210 : vector<1x1x32x4xf32> to vector<32x4xf32>
    %cst_243 = arith.constant dense<0.000000e+00> : vector<288x4xf32>
    %212 = tpu.matmul %209, %211, %cst_243 {dimension_numbers = #tpu.dot_dimension_numbers<[1], [0], [0], [1], [0, 0, 1, 1], [], []>} : vector<288x32xf32>, vector<32x4xf32>, vector<288x4xf32> -> vector<288x4xf32>
    %213 = arith.addf %208, %212 : vector<288x4xf32>
    %c20_244 = arith.constant 20 : index
    %c0_245 = arith.constant 0 : index
    %214 = vector.load %arg11[%c20_244, %c0_245] : memref<342x32xf32, #tpu.memory_space<vmem>>, vector<288x32xf32>
    %c1_246 = arith.constant 1 : index
    %c5_247 = arith.constant 5 : index
    %c0_248 = arith.constant 0 : index
    %c0_249 = arith.constant 0 : index
    %215 = vector.load %arg4[%c1_246, %c5_247, %c0_248, %c0_249] : memref<2x9x32x4xf32, #tpu.memory_space<vmem>>, vector<1x1x32x4xf32>
    %216 = vector.shape_cast %215 : vector<1x1x32x4xf32> to vector<32x4xf32>
    %cst_250 = arith.constant dense<0.000000e+00> : vector<288x4xf32>
    %217 = tpu.matmul %214, %216, %cst_250 {dimension_numbers = #tpu.dot_dimension_numbers<[1], [0], [0], [1], [0, 0, 1, 1], [], []>} : vector<288x32xf32>, vector<32x4xf32>, vector<288x4xf32> -> vector<288x4xf32>
    %218 = arith.addf %213, %217 : vector<288x4xf32>
    %c36_251 = arith.constant 36 : index
    %c0_252 = arith.constant 0 : index
    %219 = vector.load %arg11[%c36_251, %c0_252] : memref<342x32xf32, #tpu.memory_space<vmem>>, vector<288x32xf32>
    %c1_253 = arith.constant 1 : index
    %c6_254 = arith.constant 6 : index
    %c0_255 = arith.constant 0 : index
    %c0_256 = arith.constant 0 : index
    %220 = vector.load %arg4[%c1_253, %c6_254, %c0_255, %c0_256] : memref<2x9x32x4xf32, #tpu.memory_space<vmem>>, vector<1x1x32x4xf32>
    %221 = vector.shape_cast %220 : vector<1x1x32x4xf32> to vector<32x4xf32>
    %cst_257 = arith.constant dense<0.000000e+00> : vector<288x4xf32>
    %222 = tpu.matmul %219, %221, %cst_257 {dimension_numbers = #tpu.dot_dimension_numbers<[1], [0], [0], [1], [0, 0, 1, 1], [], []>} : vector<288x32xf32>, vector<32x4xf32>, vector<288x4xf32> -> vector<288x4xf32>
    %223 = arith.addf %218, %222 : vector<288x4xf32>
    %c37_258 = arith.constant 37 : index
    %c0_259 = arith.constant 0 : index
    %224 = vector.load %arg11[%c37_258, %c0_259] : memref<342x32xf32, #tpu.memory_space<vmem>>, vector<288x32xf32>
    %c1_260 = arith.constant 1 : index
    %c7_261 = arith.constant 7 : index
    %c0_262 = arith.constant 0 : index
    %c0_263 = arith.constant 0 : index
    %225 = vector.load %arg4[%c1_260, %c7_261, %c0_262, %c0_263] : memref<2x9x32x4xf32, #tpu.memory_space<vmem>>, vector<1x1x32x4xf32>
    %226 = vector.shape_cast %225 : vector<1x1x32x4xf32> to vector<32x4xf32>
    %cst_264 = arith.constant dense<0.000000e+00> : vector<288x4xf32>
    %227 = tpu.matmul %224, %226, %cst_264 {dimension_numbers = #tpu.dot_dimension_numbers<[1], [0], [0], [1], [0, 0, 1, 1], [], []>} : vector<288x32xf32>, vector<32x4xf32>, vector<288x4xf32> -> vector<288x4xf32>
    %228 = arith.addf %223, %227 : vector<288x4xf32>
    %c38_265 = arith.constant 38 : index
    %c0_266 = arith.constant 0 : index
    %229 = vector.load %arg11[%c38_265, %c0_266] : memref<342x32xf32, #tpu.memory_space<vmem>>, vector<288x32xf32>
    %c1_267 = arith.constant 1 : index
    %c8_268 = arith.constant 8 : index
    %c0_269 = arith.constant 0 : index
    %c0_270 = arith.constant 0 : index
    %230 = vector.load %arg4[%c1_267, %c8_268, %c0_269, %c0_270] : memref<2x9x32x4xf32, #tpu.memory_space<vmem>>, vector<1x1x32x4xf32>
    %231 = vector.shape_cast %230 : vector<1x1x32x4xf32> to vector<32x4xf32>
    %cst_271 = arith.constant dense<0.000000e+00> : vector<288x4xf32>
    %232 = tpu.matmul %229, %231, %cst_271 {dimension_numbers = #tpu.dot_dimension_numbers<[1], [0], [0], [1], [0, 0, 1, 1], [], []>} : vector<288x32xf32>, vector<32x4xf32>, vector<288x4xf32> -> vector<288x4xf32>
    %233 = arith.addf %228, %232 : vector<288x4xf32>
    %234 = vector.broadcast %189 : vector<1x4xf32> to vector<288x4xf32>
    %235 = arith.addf %233, %234 : vector<288x4xf32>
    %cst_272 = arith.constant 0.000000e+00 : f32
    %236 = vector.broadcast %cst_272 : f32 to vector<288x4xf32>
    %237 = arith.maximumf %235, %236 : vector<288x4xf32>
    %238 = vector.broadcast %20 : vector<288x1xf32> to vector<288x4xf32>
    %239 = arith.mulf %237, %238 : vector<288x4xf32>
    %c0_273 = arith.constant 0 : index
    %c1_274 = arith.constant 1 : index
    %c0_275 = arith.constant 0 : index
    %c0_276 = arith.constant 0 : index
    %240 = vector.load %arg8[%c0_273, %c1_274, %c0_275, %c0_276] : memref<1x2x288x4xf32, #tpu.memory_space<vmem>>, vector<1x1x288x4xf32>
    %241 = vector.shape_cast %240 : vector<1x1x288x4xf32> to vector<288x4xf32>
    %242 = vector.shape_cast %239 : vector<288x4xf32> to vector<1x1x288x4xf32>
    tpu.vector_store %arg8[%c0_273, %c1_274, %c0_275, %c0_276], %242 {strides = array<i32>} : memref<1x2x288x4xf32, #tpu.memory_space<vmem>>, vector<1x1x288x4xf32>,
    %c0_277 = arith.constant 0 : index
    %c0_278 = arith.constant 0 : index
    %243 = vector.load %arg6[%c0_277, %c0_278] : memref<4x4xf32, #tpu.memory_space<vmem>>, vector<4x4xf32>
    %cst_279 = arith.constant dense<0.000000e+00> : vector<288x4xf32>
    %244 = tpu.matmul %239, %243, %cst_279 {dimension_numbers = #tpu.dot_dimension_numbers<[1], [0], [0], [1], [0, 0, 1, 1], [], []>} : vector<288x4xf32>, vector<4x4xf32>, vector<288x4xf32> -> vector<288x4xf32>
    %c0_280 = arith.constant 0 : index
    %c0_281 = arith.constant 0 : index
    %245 = vector.load %arg7[%c0_280, %c0_281] : memref<1x4xf32, #tpu.memory_space<vmem>>, vector<1x4xf32>
    %246 = vector.broadcast %245 : vector<1x4xf32> to vector<288x4xf32>
    %247 = arith.addf %244, %246 : vector<288x4xf32>
    %c0_282 = arith.constant 0 : index
    %c0_283 = arith.constant 0 : index
    %c0_284 = arith.constant 0 : index
    %248 = vector.load %arg9[%c0_282, %c0_283, %c0_284] : memref<1x288x4xf32, #tpu.memory_space<vmem>>, vector<1x288x4xf32>
    %249 = vector.shape_cast %248 : vector<1x288x4xf32> to vector<288x4xf32>
    %250 = vector.shape_cast %247 : vector<288x4xf32> to vector<1x288x4xf32>
    tpu.vector_store %arg9[%c0_282, %c0_283, %c0_284], %250 {strides = array<i32>} : memref<1x288x4xf32, #tpu.memory_space<vmem>>, vector<1x288x4xf32>,
    return
  }
  func.func @transform_0(%arg0: i32) -> (i32, i32, i32) {
    %c0_i32 = arith.constant 0 : i32
    %c0_i32_0 = arith.constant 0 : i32
    %c0_i32_1 = arith.constant 0 : i32
    return %arg0, %c0_i32, %c0_i32_0 : i32, i32, i32
  }
  func.func @transform_1(%arg0: i32) -> (i32, i32, i32, i32) {
    %c0_i32 = arith.constant 0 : i32
    %c0_i32_0 = arith.constant 0 : i32
    %c0_i32_1 = arith.constant 0 : i32
    %c0_i32_2 = arith.constant 0 : i32
    %c0_i32_3 = arith.constant 0 : i32
    return %c0_i32, %c0_i32_0, %c0_i32_1, %c0_i32_2 : i32, i32, i32, i32
  }
  func.func @transform_2(%arg0: i32) -> (i32, i32, i32) {
    %c0_i32 = arith.constant 0 : i32
    %c0_i32_0 = arith.constant 0 : i32
    %c0_i32_1 = arith.constant 0 : i32
    %c0_i32_2 = arith.constant 0 : i32
    return %c0_i32, %c0_i32_0, %c0_i32_1 : i32, i32, i32
  }
  func.func @transform_3(%arg0: i32) -> (i32, i32, i32, i32) {
    %c0_i32 = arith.constant 0 : i32
    %c0_i32_0 = arith.constant 0 : i32
    %c0_i32_1 = arith.constant 0 : i32
    %c0_i32_2 = arith.constant 0 : i32
    %c0_i32_3 = arith.constant 0 : i32
    return %c0_i32, %c0_i32_0, %c0_i32_1, %c0_i32_2 : i32, i32, i32, i32
  }
  func.func @transform_4(%arg0: i32) -> (i32, i32, i32) {
    %c0_i32 = arith.constant 0 : i32
    %c0_i32_0 = arith.constant 0 : i32
    %c0_i32_1 = arith.constant 0 : i32
    %c0_i32_2 = arith.constant 0 : i32
    return %c0_i32, %c0_i32_0, %c0_i32_1 : i32, i32, i32
  }
  func.func @transform_5(%arg0: i32) -> (i32, i32) {
    %c0_i32 = arith.constant 0 : i32
    %c0_i32_0 = arith.constant 0 : i32
    %c0_i32_1 = arith.constant 0 : i32
    return %c0_i32, %c0_i32_0 : i32, i32
  }
  func.func @transform_6(%arg0: i32) -> (i32, i32) {
    %c0_i32 = arith.constant 0 : i32
    %c0_i32_0 = arith.constant 0 : i32
    %c0_i32_1 = arith.constant 0 : i32
    return %c0_i32, %c0_i32_0 : i32, i32
  }
  func.func @transform_7(%arg0: i32) -> (i32, i32, i32, i32) {
    %c0_i32 = arith.constant 0 : i32
    %c0_i32_0 = arith.constant 0 : i32
    %c0_i32_1 = arith.constant 0 : i32
    %c0_i32_2 = arith.constant 0 : i32
    return %arg0, %c0_i32, %c0_i32_0, %c0_i32_1 : i32, i32, i32, i32
  }
  func.func @transform_8(%arg0: i32) -> (i32, i32, i32) {
    %c0_i32 = arith.constant 0 : i32
    %c0_i32_0 = arith.constant 0 : i32
    %c0_i32_1 = arith.constant 0 : i32
    return %arg0, %c0_i32, %c0_i32_0 : i32, i32, i32
  }
}

</mosaic_0001>

<bundles_post_ra>
// kernel: tpu_custom_call.1
= control target key start
LH: loop header
LB: loop body
LE: loop exit
PB: predicated region body
PF: predicated region fallthrough
CT: control target
= control target key end

     0   :  { %s24059_s27 = smov 0   ;;  %s28194_s0 = inlined_call_operand.vmem [shape: f32[2,342,4], index: 0, kind: input, shape index: {}]   ;;  %s28195_s1 = inlined_call_operand.vmem [shape: f32[2,9,4,32], index: 1, kind: input, shape index: {}]   ;;  %s28196_s2 = inlined_call_operand.vmem [shape: f32[2,1,32], index: 2, kind: input, shape index: {}]   ;;  %s28197_s3 = inlined_call_operand.vmem [shape: f32[2,9,32,4], index: 3, kind: input, shape index: {}]   ;;  %s28198_s4 = inlined_call_operand.vmem [shape: f32[2,1,4], index: 4, kind: input, shape index: {}]   ;;  %s28199_s5 = inlined_call_operand.vmem [shape: f32[4,4], index: 5, kind: input, shape index: {}]   ;;  %s28200_s6 = inlined_call_operand.vmem [shape: f32[1,4], index: 6, kind: input, shape index: {}]   ;;  %s28201_s7 = inlined_call_operand.vmem [shape: f32[2,2,288,4], index: 7, kind: output, shape index: {0}]   ;;  %s28202_s8 = inlined_call_operand.vmem [shape: f32[2,288,4], index: 8, kind: output, shape index: {1}]  }
   0x1 LB: > { %s17495_s28 = sadd.s32 4294967295, %s24011_s27   ;;  %p17499_p0 = scmp.ge.s32.totalorder %s24011_s27, 1  ;;  %s24011_s27 = sphi %s24059_s27, %s19_s27  }
   0x2   : > { %p265_p1 = scmp.lt.s32.totalorder %s24011_s27, 3 }
   0x4   : > { %p266_p2 = pnand %p17499_p0, %p265_p1 }
   0x6   : > { %269 = sbr.rel (%p266_p2) target bundleno = 3491 (0xda3), region = 48 }
   0xd   : > { %v17539_v0 = vld [vmem:[%s28195_s1 + $0x4] sm:$0xf]  ;;  %vm28204_vm0 = vcmask 1043456   ;;  %p304_p3 = scmp.lt.s32.totalorder %s17495_s28, 1  ;;  %v1210_v1 = vld [vmem:[%s28195_s1] sm:$0xf] }
   0xe   : > { %20443 = vmatprep.subr.msk.mxu0 %vm28204_vm0, %v17539_v0  ;;  %22767 = vmatprep.subr.msk.mxu1 %vm28204_vm0, %v17539_v0  ;;  %vm28203_vm1 = vcmask 31744   ;;  %v24134_v27 = vld [vmem:[%s28195_s1 + $0x8] sm:$0xf]  ;;  %v24188_v60 = vld [vmem:[%s28195_s1 + $0xc] sm:$0xf]  ;;  %vm1040_vm2 = vcmask 261120  }
   0xf   : > { %20444 = vmatpush3.msk.msra.mxu0 %vm28204_vm0, %v17539_v0  ;;  %s28928_s28 = smov (!%p304_p3, %s17495_s28), 1  ;;  %22768 = vmatpush3.msk.msra.mxu1 %vm28204_vm0, %v17539_v0 }
  0x10   : > { %20499 = vmatprep.subr.msk.mxu0 %vm28204_vm0, %v1210_v1  ;;  %s23921_s11 = smul.u32 344, %s28928_s28 }
  0x11   : > { %s23923_s9 = smul.u32 288, %s28928_s28 }
  0x12   : > { %s24084_s14 = scalar_lea.vmem %s28194_s0, %s23921_s11  ;;  %s23922_s11 = smul.u32 576, %s28928_s28 }
  0x13   : > { %v1085_v2 = vld [vmem:[%s24084_s14] sm:$0xff]  ;;  %v1086_v3 = vld [vmem:[%s24084_s14 + $0x8] sm:$0xff]  ;;  %v1087_v4 = vld [vmem:[%s24084_s14 + $0x10] sm:$0xff]  ;;  %s28081_s15 = scalar_lea.vmem %s28202_s8, %s23923_s9 }
  0x14   : > { %1129 = vst.msk [vmem:[#allocation2] sm:$0xff] %vm28203_vm1, %v1085_v2  ;;  %1130 = vst.msk [vmem:[#allocation2 + $0x8] sm:$0xff] %vm28203_vm1, %v1086_v3  ;;  %v1088_v5 = vld [vmem:[%s24084_s14 + $0x18] sm:$0xff]  ;;  %v1089_v6 = vld [vmem:[%s24084_s14 + $0x20] sm:$0xff] }
  0x15   : > { %1131 = vst.msk [vmem:[#allocation2 + $0x10] sm:$0xff] %vm28203_vm1, %v1087_v4  ;;  %1132 = vst.msk [vmem:[#allocation2 + $0x18] sm:$0xff] %vm28203_vm1, %v1088_v5  ;;  %v1090_v7 = vld [vmem:[%s24084_s14 + $0x28] sm:$0xff]  ;;  %v1091_v8 = vld [vmem:[%s24084_s14 + $0x30] sm:$0xff] }
  0x16   : > { %1133 = vst.msk [vmem:[#allocation2 + $0x20] sm:$0xff] %vm28203_vm1, %v1089_v6  ;;  %1134 = vst.msk [vmem:[#allocation2 + $0x28] sm:$0xff] %vm28203_vm1, %v1090_v7  ;;  %v1092_v9 = vld [vmem:[%s24084_s14 + $0x38] sm:$0xff]  ;;  %v1093_v10 = vld [vmem:[%s24084_s14 + $0x40] sm:$0xff] }
  0x17   : > { %1135 = vst.msk [vmem:[#allocation2 + $0x30] sm:$0xff] %vm28203_vm1, %v1091_v8  ;;  %v1094_v11 = vld [vmem:[%s24084_s14 + $0x48] sm:$0xff]  ;;  %1136 = vst.msk [vmem:[#allocation2 + $0x38] sm:$0xff] %vm28203_vm1, %v1092_v9  ;;  %v1095_v12 = vld [vmem:[%s24084_s14 + $0x50] sm:$0xff] }
  0x18   : > { %1137 = vst.msk [vmem:[#allocation2 + $0x40] sm:$0xff] %vm28203_vm1, %v1093_v10  ;;  %1138 = vst.msk [vmem:[#allocation2 + $0x48] sm:$0xff] %vm28203_vm1, %v1094_v11  ;;  %v1096_v13 = vld [vmem:[%s24084_s14 + $0x58] sm:$0xff]  ;;  %v1097_v14 = vld [vmem:[%s24084_s14 + $0x60] sm:$0xff] }
  0x19   : > { %1139 = vst.msk [vmem:[#allocation2 + $0x50] sm:$0xff] %vm28203_vm1, %v1095_v12  ;;  %1140 = vst.msk [vmem:[#allocation2 + $0x58] sm:$0xff] %vm28203_vm1, %v1096_v13  ;;  %v1098_v15 = vld [vmem:[%s24084_s14 + $0x68] sm:$0xff]  ;;  %v1099_v16 = vld [vmem:[%s24084_s14 + $0x70] sm:$0xff] }
  0x1a   : > { %1141 = vst.msk [vmem:[#allocation2 + $0x60] sm:$0xff] %vm28203_vm1, %v1097_v14  ;;  %v1100_v17 = vld [vmem:[%s24084_s14 + $0x78] sm:$0xff]  ;;  %1142 = vst.msk [vmem:[#allocation2 + $0x68] sm:$0xff] %vm28203_vm1, %v1098_v15  ;;  %v1101_v18 = vld [vmem:[%s24084_s14 + $0x80] sm:$0xff] }
  0x1b   : > { %1143 = vst.msk [vmem:[#allocation2 + $0x70] sm:$0xff] %vm28203_vm1, %v1099_v16  ;;  %1144 = vst.msk [vmem:[#allocation2 + $0x78] sm:$0xff] %vm28203_vm1, %v1100_v17  ;;  %v1102_v19 = vld [vmem:[%s24084_s14 + $0x88] sm:$0xff]  ;;  %v1103_v20 = vld [vmem:[%s24084_s14 + $0x90] sm:$0xff] }
  0x1c   : > { %1145 = vst.msk [vmem:[#allocation2 + $0x80] sm:$0xff] %vm28203_vm1, %v1101_v18  ;;  %1146 = vst.msk [vmem:[#allocation2 + $0x88] sm:$0xff] %vm28203_vm1, %v1102_v19  ;;  %v1104_v21 = vld [vmem:[%s24084_s14 + $0x98] sm:$0xff]  ;;  %v1105_v22 = vld [vmem:[%s24084_s14 + $0xa0] sm:$0xff] }
  0x1d   : > { %1147 = vst.msk [vmem:[#allocation2 + $0x90] sm:$0xff] %vm28203_vm1, %v1103_v20  ;;  %v1106_v23 = vld [vmem:[%s24084_s14 + $0xa8] sm:$0xff]  ;;  %1148 = vst.msk [vmem:[#allocation2 + $0x98] sm:$0xff] %vm28203_vm1, %v1104_v21  ;;  %v1213_v26 = vld [vmem:[#allocation2 + $0x11] sm:$0xff] }
  0x1e   : > { %v1211_v24 = vld [vmem:[#allocation2 + $0x1] sm:$0xff]  ;;  %1149 = vst.msk [vmem:[#allocation2 + $0xa0] sm:$0xff] %vm28203_vm1, %v1105_v22  ;;  %1150 = vst.msk [vmem:[#allocation2 + $0xa8] sm:$0xff] %vm28203_vm1, %v1106_v23  ;;  %v1212_v25 = vld [vmem:[#allocation2 + $0x9] sm:$0xff] }
  0x1f   : > { %20445 = vmatprep.mubr.msk.f32.mxu0 %vm28203_vm1, %v1211_v24  ;;  %v1214_v28 = vld [vmem:[#allocation2 + $0x19] sm:$0xff]  ;;  %v1215_v29 = vld [vmem:[#allocation2 + $0x21] sm:$0xff]  ;;  %v1216_v30 = vld [vmem:[#allocation2 + $0x29] sm:$0xff] }
  0x20   : > { %20446 = vmatmul.mubr.msk.f32.vlgmr.msra.gmra.mrb[0].mxu0 %vm28203_vm1, %v1212_v25  ;;  %v1217_v31 = vld [vmem:[#allocation2 + $0x31] sm:$0xff]  ;;  %v1218_v32 = vld [vmem:[#allocation2 + $0x39] sm:$0xff]  ;;  %v1219_v33 = vld [vmem:[#allocation2 + $0x41] sm:$0xff] }
  0x21   : > { %20500 = vmatpush3.msk.msra.mxu0 %vm28204_vm0, %v1210_v1  ;;  %20448 = vmatprep.mubr.msk.f32.mxu0 %vm28203_vm1, %v1213_v26  ;;  %v1220_v34 = vld [vmem:[#allocation2 + $0x49] sm:$0xff]  ;;  %v1108_v36 = vld [vmem:[%s24084_s14 + $0xb8] sm:$0xff]  ;;  %v1109_v38 = vld [vmem:[%s24084_s14 + $0xc0] sm:$0xff] }
  0x22   : > { %20555 = vmatprep.subr.msk.mxu0 %vm28204_vm0, %v24134_v27  ;;  %v1107_v35 = vld [vmem:[%s24084_s14 + $0xb0] sm:$0xff]  ;;  %1152 = vst.msk [vmem:[#allocation2 + $0xb8] sm:$0xff] %vm28203_vm1, %v1108_v36  ;;  %v1110_v39 = vld [vmem:[%s24084_s14 + $0xc8] sm:$0xff]  ;;  %1153 = vst.msk [vmem:[#allocation2 + $0xc0] sm:$0xff] %vm28203_vm1, %v1109_v38 }
  0x23   : > { %v1221_v37 = vld [vmem:[#allocation2 + $0x51] sm:$0xff]  ;;  %1151 = vst.msk [vmem:[#allocation2 + $0xb0] sm:$0xff] %vm28203_vm1, %v1107_v35  ;;  %1154 = vst.msk [vmem:[#allocation2 + $0xc8] sm:$0xff] %vm28203_vm1, %v1110_v39  ;;  %v1113_v42 = vld [vmem:[%s24084_s14 + $0xe0] sm:$0xff] }
  0x24   : > { %20449 = vmatmul.mubr.msk.f32.gmra.mrb[2].mxu0 %vm28203_vm1, %v1214_v28  ;;  %v1111_v40 = vld [vmem:[%s24084_s14 + $0xd0] sm:$0xff]  ;;  %v1112_v41 = vld [vmem:[%s24084_s14 + $0xd8] sm:$0xff]  ;;  %v1114_v43 = vld [vmem:[%s24084_s14 + $0xe8] sm:$0xff]  ;;  %1157 = vst.msk [vmem:[#allocation2 + $0xe0] sm:$0xff] %vm28203_vm1, %v1113_v42 }
  0x25   : > { %20451 = vmatprep.mubr.msk.f32.mxu0 %vm28203_vm1, %v1215_v29  ;;  %1155 = vst.msk [vmem:[#allocation2 + $0xd0] sm:$0xff] %vm28203_vm1, %v1111_v40  ;;  %1156 = vst.msk [vmem:[#allocation2 + $0xd8] sm:$0xff] %vm28203_vm1, %v1112_v41  ;;  %v1115_v44 = vld [vmem:[%s24084_s14 + $0xf0] sm:$0xff]  ;;  %v1116_v45 = vld [vmem:[%s24084_s14 + $0xf8] sm:$0xff] }
  0x26   : > { %1158 = vst.msk [vmem:[#allocation2 + $0xe8] sm:$0xff] %vm28203_vm1, %v1114_v43  ;;  %v1117_v46 = vld [vmem:[%s24084_s14 + $0x100] sm:$0xff]  ;;  %1159 = vst.msk [vmem:[#allocation2 + $0xf0] sm:$0xff] %vm28203_vm1, %v1115_v44  ;;  %v1118_v47 = vld [vmem:[%s24084_s14 + $0x108] sm:$0xff] }
  0x27   : > { %1160 = vst.msk [vmem:[#allocation2 + $0xf8] sm:$0xff] %vm28203_vm1, %v1116_v45  ;;  %1161 = vst.msk [vmem:[#allocation2 + $0x100] sm:$0xff] %vm28203_vm1, %v1117_v46  ;;  %v1119_v48 = vld [vmem:[%s24084_s14 + $0x110] sm:$0xff]  ;;  %v1120_v49 = vld [vmem:[%s24084_s14 + $0x118] sm:$0xff] }
  0x28   : > { %20452 = vmatmul.mubr.msk.f32.gmra.mrb[4].mxu0 %vm28203_vm1, %v1216_v30  ;;  %1162 = vst.msk [vmem:[#allocation2 + $0x108] sm:$0xff] %vm28203_vm1, %v1118_v47  ;;  %1163 = vst.msk [vmem:[#allocation2 + $0x110] sm:$0xff] %vm28203_vm1, %v1119_v48  ;;  %v1222_v50 = vld [vmem:[#allocation2 + $0x59] sm:$0xff]  ;;  %v1223_v51 = vld [vmem:[#allocation2 + $0x61] sm:$0xff] }
  0x29   : > { %20454 = vmatprep.mubr.msk.f32.mxu0 %vm28203_vm1, %v1217_v31  ;;  %1164 = vst.msk [vmem:[#allocation2 + $0x118] sm:$0xff] %vm28203_vm1, %v1120_v49  ;;  %v1224_v52 = vld [vmem:[#allocation2 + $0x69] sm:$0xff]  ;;  %v1225_v53 = vld [vmem:[#allocation2 + $0x71] sm:$0xff]  ;;  %v1226_v54 = vld [vmem:[#allocation2 + $0x79] sm:$0xff] }
  0x2a   : > { %v1227_v55 = vld [vmem:[#allocation2 + $0x81] sm:$0xff]  ;;  %v1228_v56 = vld [vmem:[#allocation2 + $0x89] sm:$0xff]  ;;  %v1177_v61 = vld [vmem:[#allocation2 + $0x18] sm:$0xff] }
  0x2b   : > { %v1174_v57 = vld [vmem:[#allocation2] sm:$0xff]  ;;  %v1175_v58 = vld [vmem:[#allocation2 + $0x8] sm:$0xff]  ;;  %v1176_v59 = vld [vmem:[#allocation2 + $0x10] sm:$0xff] }
  0x2c   : > { %20455 = vmatmul.mubr.msk.f32.gmra.mrb[6].mxu0 %vm28203_vm1, %v1218_v32  ;;  %v1178_v62 = vld [vmem:[#allocation2 + $0x20] sm:$0xff]  ;;  %v1179_v0 = vld [vmem:[#allocation2 + $0x28] sm:$0xff]  ;;  %v1180_v1 = vld [vmem:[#allocation2 + $0x30] sm:$0xff] }
  0x2d   : > { %20457 = vmatprep.mubr.msk.f32.mxu0 %vm28203_vm1, %v1219_v33  ;;  %v1121_v63 = vld [vmem:[%s24084_s14 + $0x120] sm:$0xff]  ;;  %v1181_v2 = vld [vmem:[#allocation2 + $0x38] sm:$0xff]  ;;  %v1183_v4 = vld [vmem:[#allocation2 + $0x48] sm:$0xff] }
  0x2e   : > { %1165 = vst.msk [vmem:[#allocation2 + $0x120] sm:$0xff] %vm28203_vm1, %v1121_v63  ;;  %v1182_v3 = vld [vmem:[#allocation2 + $0x40] sm:$0xff]  ;;  %v1184_v5 = vld [vmem:[#allocation2 + $0x50] sm:$0xff]  ;;  %v1185_v6 = vld [vmem:[#allocation2 + $0x58] sm:$0xff] }
  0x2f   : > { %v1186_v7 = vld [vmem:[#allocation2 + $0x60] sm:$0xff]  ;;  %v1187_v8 = vld [vmem:[#allocation2 + $0x68] sm:$0xff]  ;;  %v1188_v9 = vld [vmem:[#allocation2 + $0x70] sm:$0xff] }
  0x30   : > { %20458 = vmatmul.mubr.msk.f32.gmra.mrb[8].mxu0 %vm28203_vm1, %v1220_v34  ;;  %v1189_v10 = vld [vmem:[#allocation2 + $0x78] sm:$0xff]  ;;  %v1190_v11 = vld [vmem:[#allocation2 + $0x80] sm:$0xff]  ;;  %v1191_v12 = vld [vmem:[#allocation2 + $0x88] sm:$0xff] }
  0x31   : > { %20460 = vmatprep.mubr.msk.f32.mxu0 %vm28203_vm1, %v1221_v37  ;;  %v1192_v13 = vld [vmem:[#allocation2 + $0x90] sm:$0xff]  ;;  %v1193_v14 = vld [vmem:[#allocation2 + $0x98] sm:$0xff]  ;;  %v1194_v15 = vld [vmem:[#allocation2 + $0xa0] sm:$0xff] }
  0x32   : > { %v1195_v16 = vld [vmem:[#allocation2 + $0xa8] sm:$0xff]  ;;  %v1196_v17 = vld [vmem:[#allocation2 + $0xb0] sm:$0xff]  ;;  %v1197_v18 = vld [vmem:[#allocation2 + $0xb8] sm:$0xff] }
  0x33   : > { %v1198_v19 = vld [vmem:[#allocation2 + $0xc0] sm:$0xff]  ;;  %v1199_v20 = vld [vmem:[#allocation2 + $0xc8] sm:$0xff]  ;;  %v1200_v21 = vld [vmem:[#allocation2 + $0xd0] sm:$0xff] }
  0x34   : > { %20461 = vmatmul.mubr.msk.f32.gmra.mrb[10].mxu0 %vm28203_vm1, %v1222_v50  ;;  %v1201_v22 = vld [vmem:[#allocation2 + $0xd8] sm:$0xff]  ;;  %v1202_v23 = vld [vmem:[#allocation2 + $0xe0] sm:$0xff]  ;;  %v1203_v24 = vld [vmem:[#allocation2 + $0xe8] sm:$0xff] }
  0x35   : > { %20463 = vmatprep.mubr.msk.f32.mxu0 %vm28203_vm1, %v1223_v51  ;;  %v1204_v25 = vld [vmem:[#allocation2 + $0xf0] sm:$0xff]  ;;  %v1205_v26 = vld [vmem:[#allocation2 + $0xf8] sm:$0xff]  ;;  %v1207_v28 = vld [vmem:[#allocation2 + $0x108] sm:$0xff] }
  0x36   : > { %v1208_v29 = vld [vmem:[#allocation2 + $0x110] sm:$0xff]  ;;  %v1209_v30 = vld [vmem:[#allocation2 + $0x118] sm:$0xff]  ;;  %v1962_v31 = vld [vmem:[#allocation2 + $0x2] sm:$0xff] }
  0x37   : > { %v1963_v32 = vld [vmem:[#allocation2 + $0xa] sm:$0xff]  ;;  %v24232_v33 = vld [vmem:[#allocation2 + $0x12] sm:$0xff]  ;;  %v24244_v35 = vld [vmem:[#allocation2 + $0x1a] sm:$0xff] }
  0x38   : > { %20464 = vmatmul.mubr.msk.f32.gmra.mrb[12].mxu0 %vm28203_vm1, %v1224_v52  ;;  %v24237_v34 = vld [vmem:[%s28195_s1 + $0x10] sm:$0xf]  ;;  %v24246_v36 = vld [vmem:[#allocation2 + $0x22] sm:$0xff]  ;;  %v24266_v41 = vld [vmem:[#allocation2 + $0x3a] sm:$0xff] }
  0x39   : > { %20466 = vmatprep.mubr.msk.f32.mxu0 %vm28203_vm1, %v1225_v53  ;;  %v1122_v37 = vld [vmem:[%s24084_s14 + $0x128] sm:$0xff]  ;;  %v1123_v38 = vld [vmem:[%s24084_s14 + $0x130] sm:$0xff]  ;;  %v1973_v45 = vld [vmem:[#allocation2 + $0x5a] sm:$0xff] }
  0x3a   : > { %1166 = vst.msk [vmem:[#allocation2 + $0x128] sm:$0xff] %vm28203_vm1, %v1122_v37  ;;  %1167 = vst.msk [vmem:[#allocation2 + $0x130] sm:$0xff] %vm28203_vm1, %v1123_v38  ;;  %v24258_v39 = vld [vmem:[#allocation2 + $0x2a] sm:$0xff]  ;;  %v24260_v40 = vld [vmem:[#allocation2 + $0x32] sm:$0xff] }
  0x3b   : > { %v24268_v42 = vld [vmem:[#allocation2 + $0x42] sm:$0xff]  ;;  %v24274_v43 = vld [vmem:[#allocation2 + $0x4a] sm:$0xff]  ;;  %v24276_v44 = vld [vmem:[#allocation2 + $0x52] sm:$0xff] }
  0x3c   : > { %20467 = vmatmul.mubr.msk.f32.gmra.mrb[14].mxu0 %vm28203_vm1, %v1226_v54  ;;  %v1974_v46 = vld [vmem:[#allocation2 + $0x62] sm:$0xff]  ;;  %v1975_v47 = vld [vmem:[#allocation2 + $0x6a] sm:$0xff]  ;;  %v1976_v48 = vld [vmem:[#allocation2 + $0x72] sm:$0xff] }
  0x3d   : > { %20469 = vmatprep.mubr.msk.f32.mxu0 %vm28203_vm1, %v1227_v55  ;;  %v1977_v49 = vld [vmem:[#allocation2 + $0x7a] sm:$0xff]  ;;  %v1978_v50 = vld [vmem:[#allocation2 + $0x82] sm:$0xff]  ;;  %v1979_v51 = vld [vmem:[#allocation2 + $0x8a] sm:$0xff] }
  0x3e   : > { %v1980_v52 = vld [vmem:[#allocation2 + $0x92] sm:$0xff]  ;;  %v1981_v53 = vld [vmem:[#allocation2 + $0x9a] sm:$0xff]  ;;  %v1982_v54 = vld [vmem:[#allocation2 + $0xa2] sm:$0xff] }
  0x3f   : > { %v1983_v55 = vld [vmem:[#allocation2 + $0xaa] sm:$0xff]  ;;  %v2850_v38 = vld [vmem:[#allocation2 + $0xf3] sm:$0xff] }
  0x40   : > { %20470 = vmatmul.mubr.msk.f32.gmra.mrb[16].mxu0 %vm28203_vm1, %v1228_v56  ;;  %v1984_v56 = vld [vmem:[#allocation2 + $0xb2] sm:$0xff]  ;;  %v1991_v63 = vld [vmem:[#allocation2 + $0xea] sm:$0xff] }
  0x41   : > { %20501 = vmatprep.mubr.msk.f32.mxu0 %vm28203_vm1, %v1174_v57  ;;  %v1985_v57 = vld [vmem:[#allocation2 + $0xba] sm:$0xff]  ;;  %v2849_v37 = vld [vmem:[#allocation2 + $0xeb] sm:$0xff] }
  0x44   : > { %20502 = vmatmul.mubr.msk.f32.vlgmr.msra.gmra.mrb[0].mxu0 %vm28203_vm1, %v1175_v58  ;;  %v1986_v58 = vld [vmem:[#allocation2 + $0xc2] sm:$0xff] }
  0x45   : > { %20556 = vmatpush3.msk.msra.mxu0 %vm28204_vm0, %v24134_v27  ;;  %20504 = vmatprep.mubr.msk.f32.mxu0 %vm28203_vm1, %v1176_v59  ;;  %v1206_v27 = vld [vmem:[#allocation2 + $0x100] sm:$0xff]  ;;  %v1987_v59 = vld [vmem:[#allocation2 + $0xca] sm:$0xff] }
  0x46   : > { %20611 = vmatprep.subr.msk.mxu0 %vm28204_vm0, %v24188_v60 }
  0x48   : > { %20505 = vmatmul.mubr.msk.f32.gmra.mrb[2].mxu0 %vm28203_vm1, %v1177_v61  ;;  %v1989_v61 = vld [vmem:[#allocation2 + $0xda] sm:$0xff] }
  0x49   : > { %20507 = vmatprep.mubr.msk.f32.mxu0 %vm28203_vm1, %v1178_v62  ;;  %v1990_v62 = vld [vmem:[#allocation2 + $0xe2] sm:$0xff] }
  0x4c   : > { %20508 = vmatmul.mubr.msk.f32.gmra.mrb[4].mxu0 %vm28203_vm1, %v1179_v0  ;;  %v1992_v0 = vld [vmem:[#allocation2 + $0xf2] sm:$0xff] }
  0x4d   : > { %20510 = vmatprep.mubr.msk.f32.mxu0 %vm28203_vm1, %v1180_v1  ;;  %v1993_v1 = vld [vmem:[#allocation2 + $0xfa] sm:$0xff] }
  0x50   : > { %20511 = vmatmul.mubr.msk.f32.gmra.mrb[6].mxu0 %vm28203_vm1, %v1181_v2  ;;  %v1994_v2 = vld [vmem:[#allocation2 + $0x102] sm:$0xff] }
  0x51   : > { %20513 = vmatprep.mubr.msk.f32.mxu0 %vm28203_vm1, %v1182_v3  ;;  %v1995_v3 = vld [vmem:[#allocation2 + $0x10a] sm:$0xff] }
  0x54   : > { %20514 = vmatmul.mubr.msk.f32.gmra.mrb[8].mxu0 %vm28203_vm1, %v1183_v4  ;;  %v1996_v4 = vld [vmem:[#allocation2 + $0x112] sm:$0xff] }
  0x55   : > { %20516 = vmatprep.mubr.msk.f32.mxu0 %vm28203_vm1, %v1184_v5  ;;  %v1997_v5 = vld [vmem:[#allocation2 + $0x11a] sm:$0xff] }
  0x58   : > { %20517 = vmatmul.mubr.msk.f32.gmra.mrb[10].mxu0 %vm28203_vm1, %v1185_v6  ;;  %v17728_v6 = vld [vmem:[%s28195_s1 + $0x14] sm:$0xf] }
  0x59   : > { %20519 = vmatprep.mubr.msk.f32.mxu0 %vm28203_vm1, %v1186_v7  ;;  %v2426_v7 = vld [vmem:[#allocation2 + $0x122] sm:$0xff] }
  0x5c   : > { %20520 = vmatmul.mubr.msk.f32.gmra.mrb[12].mxu0 %vm28203_vm1, %v1187_v8  ;;  %v2427_v8 = vld [vmem:[#allocation2 + $0x12a] sm:$0xff] }
  0x5d   : > { %20522 = vmatprep.mubr.msk.f32.mxu0 %vm28203_vm1, %v1188_v9  ;;  %v2822_v9 = vld [vmem:[#allocation2 + $0x13] sm:$0xff] }
  0x60   : > { %20523 = vmatmul.mubr.msk.f32.gmra.mrb[14].mxu0 %vm28203_vm1, %v1189_v10  ;;  %v2823_v10 = vld [vmem:[#allocation2 + $0x1b] sm:$0xff] }
  0x61   : > { %20525 = vmatprep.mubr.msk.f32.mxu0 %vm28203_vm1, %v1190_v11  ;;  %v2824_v11 = vld [vmem:[#allocation2 + $0x23] sm:$0xff] }
  0x64   : > { %20526 = vmatmul.mubr.msk.f32.gmra.mrb[16].mxu0 %vm28203_vm1, %v1191_v12  ;;  %v24362_v12 = vld [vmem:[%s28195_s1 + $0x18] sm:$0xf] }
  0x65   : > { %20528 = vmatprep.mubr.msk.f32.mxu0 %vm28203_vm1, %v1192_v13  ;;  %v2825_v13 = vld [vmem:[#allocation2 + $0x2b] sm:$0xff] }
  0x68   : > { %20529 = vmatmul.mubr.msk.f32.gmra.mrb[18].mxu0 %vm28203_vm1, %v1193_v14  ;;  %v2826_v14 = vld [vmem:[#allocation2 + $0x33] sm:$0xff] }
  0x69   : > { %20531 = vmatprep.mubr.msk.f32.mxu0 %vm28203_vm1, %v1194_v15  ;;  %v2827_v15 = vld [vmem:[#allocation2 + $0x3b] sm:$0xff] }
  0x6c   : > { %20532 = vmatmul.mubr.msk.f32.gmra.mrb[20].mxu0 %vm28203_vm1, %v1195_v16  ;;  %v2828_v16 = vld [vmem:[#allocation2 + $0x43] sm:$0xff] }
  0x6d   : > { %20534 = vmatprep.mubr.msk.f32.mxu0 %vm28203_vm1, %v1196_v17  ;;  %v2829_v17 = vld [vmem:[#allocation2 + $0x4b] sm:$0xff] }
  0x70   : > { %20535 = vmatmul.mubr.msk.f32.gmra.mrb[22].mxu0 %vm28203_vm1, %v1197_v18  ;;  %v2830_v18 = vld [vmem:[#allocation2 + $0x53] sm:$0xff] }
  0x71   : > { %20537 = vmatprep.mubr.msk.f32.mxu0 %vm28203_vm1, %v1198_v19  ;;  %v2831_v19 = vld [vmem:[#allocation2 + $0x5b] sm:$0xff] }
  0x74   : > { %20538 = vmatmul.mubr.msk.f32.gmra.mrb[24].mxu0 %vm28203_vm1, %v1199_v20  ;;  %v2832_v20 = vld [vmem:[#allocation2 + $0x63] sm:$0xff] }
  0x75   : > { %20540 = vmatprep.mubr.msk.f32.mxu0 %vm28203_vm1, %v1200_v21  ;;  %v2833_v21 = vld [vmem:[#allocation2 + $0x6b] sm:$0xff] }
  0x78   : > { %20541 = vmatmul.mubr.msk.f32.gmra.mrb[26].mxu0 %vm28203_vm1, %v1201_v22  ;;  %v2834_v22 = vld [vmem:[#allocation2 + $0x73] sm:$0xff] }
  0x79   : > { %20543 = vmatprep.mubr.msk.f32.mxu0 %vm28203_vm1, %v1202_v23  ;;  %v2835_v23 = vld [vmem:[#allocation2 + $0x7b] sm:$0xff] }
  0x7c   : > { %20544 = vmatmul.mubr.msk.f32.gmra.mrb[28].mxu0 %vm28203_vm1, %v1203_v24  ;;  %v2836_v24 = vld [vmem:[#allocation2 + $0x83] sm:$0xff] }
  0x7d   : > { %20546 = vmatprep.mubr.msk.f32.mxu0 %vm28203_vm1, %v1204_v25  ;;  %v2837_v25 = vld [vmem:[#allocation2 + $0x8b] sm:$0xff] }
  0x80   : > { %20547 = vmatmul.mubr.msk.f32.gmra.mrb[30].mxu0 %vm28203_vm1, %v1205_v26  ;;  %v2838_v26 = vld [vmem:[#allocation2 + $0x93] sm:$0xff] }
  0x81   : > { %20549 = vmatprep.mubr.msk.f32.mxu0 %vm28203_vm1, %v1206_v27  ;;  %v2839_v27 = vld [vmem:[#allocation2 + $0x9b] sm:$0xff] }
  0x84   : > { %20550 = vmatmul.mubr.msk.f32.gmra.mrb[32].mxu0 %vm28203_vm1, %v1207_v28  ;;  %v2840_v28 = vld [vmem:[#allocation2 + $0xa3] sm:$0xff] }
  0x85   : > { %20552 = vmatprep.mubr.msk.f32.mxu0 %vm28203_vm1, %v1208_v29  ;;  %v2841_v29 = vld [vmem:[#allocation2 + $0xab] sm:$0xff] }
  0x88   : > { %20553 = vmatmul.mubr.msk.f32.gmra.mrb[34].mxu0 %vm28203_vm1, %v1209_v30  ;;  %v2842_v30 = vld [vmem:[#allocation2 + $0xb3] sm:$0xff] }
  0x89   : > { %20557 = vmatprep.mubr.msk.f32.mxu0 %vm28203_vm1, %v1962_v31  ;;  %v2843_v31 = vld [vmem:[#allocation2 + $0xbb] sm:$0xff] }
  0x8c   : > { %20558 = vmatmul.mubr.msk.f32.vlgmr.msra.gmra.mrb[0].mxu0 %vm28203_vm1, %v1963_v32  ;;  %v2844_v32 = vld [vmem:[#allocation2 + $0xc3] sm:$0xff] }
  0x8d   : > { %20612 = vmatpush3.msk.msra.mxu0 %vm28204_vm0, %v24188_v60  ;;  %20560 = vmatprep.mubr.msk.f32.mxu0 %vm28203_vm1, %v24232_v33  ;;  %v1988_v60 = vld [vmem:[#allocation2 + $0xd2] sm:$0xff] }
  0x8e   : > { %20667 = vmatprep.subr.msk.mxu0 %vm28204_vm0, %v24237_v34 }
  0x90   : > { %20561 = vmatmul.mubr.msk.f32.gmra.mrb[2].mxu0 %vm28203_vm1, %v24244_v35 }
  0x91   : > { %20563 = vmatprep.mubr.msk.f32.mxu0 %vm28203_vm1, %v24246_v36 }
  0x94   : > { %20564 = vmatmul.mubr.msk.f32.gmra.mrb[4].mxu0 %vm28203_vm1, %v24258_v39 }
  0x95   : > { %20566 = vmatprep.mubr.msk.f32.mxu0 %vm28203_vm1, %v24260_v40 }
  0x98   : > { %20567 = vmatmul.mubr.msk.f32.gmra.mrb[6].mxu0 %vm28203_vm1, %v24266_v41 }
  0x99   : > { %20569 = vmatprep.mubr.msk.f32.mxu0 %vm28203_vm1, %v24268_v42 }
  0x9c   : > { %20570 = vmatmul.mubr.msk.f32.gmra.mrb[8].mxu0 %vm28203_vm1, %v24274_v43 }
  0x9d   : > { %20572 = vmatprep.mubr.msk.f32.mxu0 %vm28203_vm1, %v24276_v44 }
  0xa0   : > { %20573 = vmatmul.mubr.msk.f32.gmra.mrb[10].mxu0 %vm28203_vm1, %v1973_v45 }
  0xa1   : > { %20575 = vmatprep.mubr.msk.f32.mxu0 %vm28203_vm1, %v1974_v46 }
  0xa4   : > { %20576 = vmatmul.mubr.msk.f32.gmra.mrb[12].mxu0 %vm28203_vm1, %v1975_v47 }
  0xa5   : > { %20578 = vmatprep.mubr.msk.f32.mxu0 %vm28203_vm1, %v1976_v48 }
  0xa8   : > { %20579 = vmatmul.mubr.msk.f32.gmra.mrb[14].mxu0 %vm28203_vm1, %v1977_v49 }
  0xa9   : > { %20581 = vmatprep.mubr.msk.f32.mxu0 %vm28203_vm1, %v1978_v50 }
  0xac   : > { %20582 = vmatmul.mubr.msk.f32.gmra.mrb[16].mxu0 %vm28203_vm1, %v1979_v51 }
  0xad   : > { %20584 = vmatprep.mubr.msk.f32.mxu0 %vm28203_vm1, %v1980_v52 }
  0xb0   : > { %20585 = vmatmul.mubr.msk.f32.gmra.mrb[18].mxu0 %vm28203_vm1, %v1981_v53 }
  0xb1   : > { %20587 = vmatprep.mubr.msk.f32.mxu0 %vm28203_vm1, %v1982_v54 }
  0xb4   : > { %20588 = vmatmul.mubr.msk.f32.gmra.mrb[20].mxu0 %vm28203_vm1, %v1983_v55 }
  0xb5   : > { %20590 = vmatprep.mubr.msk.f32.mxu0 %vm28203_vm1, %v1984_v56 }
  0xb8   : > { %20591 = vmatmul.mubr.msk.f32.gmra.mrb[22].mxu0 %vm28203_vm1, %v1985_v57 }
  0xb9   : > { %20593 = vmatprep.mubr.msk.f32.mxu0 %vm28203_vm1, %v1986_v58 }
  0xbc   : > { %20594 = vmatmul.mubr.msk.f32.gmra.mrb[24].mxu0 %vm28203_vm1, %v1987_v59 }
  0xbd   : > { %20596 = vmatprep.mubr.msk.f32.mxu0 %vm28203_vm1, %v1988_v60 }
  0xc0   : > { %20597 = vmatmul.mubr.msk.f32.gmra.mrb[26].mxu0 %vm28203_vm1, %v1989_v61 }
  0xc1   : > { %20599 = vmatprep.mubr.msk.f32.mxu0 %vm28203_vm1, %v1990_v62 }
  0xc4   : > { %20600 = vmatmul.mubr.msk.f32.gmra.mrb[28].mxu0 %vm28203_vm1, %v1991_v63 }
  0xc5   : > { %20602 = vmatprep.mubr.msk.f32.mxu0 %vm28203_vm1, %v1992_v0 }
  0xc8   : > { %20603 = vmatmul.mubr.msk.f32.gmra.mrb[30].mxu0 %vm28203_vm1, %v1993_v1 }
  0xc9   : > { %20605 = vmatprep.mubr.msk.f32.mxu0 %vm28203_vm1, %v1994_v2 }
  0xcc   : > { %20606 = vmatmul.mubr.msk.f32.gmra.mrb[32].mxu0 %vm28203_vm1, %v1995_v3 }
  0xcd   : > { %20608 = vmatprep.mubr.msk.f32.mxu0 %vm28203_vm1, %v1996_v4 }
  0xd0   : > { %20609 = vmatmul.mubr.msk.f32.gmra.mrb[34].mxu0 %vm28203_vm1, %v1997_v5 }
  0xd1   : > { %20613 = vmatprep.mubr.msk.f32.mxu0 %vm28203_vm1, %v24232_v33  ;;  %v2845_v33 = vld [vmem:[#allocation2 + $0xcb] sm:$0xff] }
  0xd4   : > { %20614 = vmatmul.mubr.msk.f32.vlgmr.msra.gmra.mrb[0].mxu0 %vm28203_vm1, %v24244_v35  ;;  %v2847_v35 = vld [vmem:[#allocation2 + $0xdb] sm:$0xff] }
  0xd5   : > { %20668 = vmatpush3.msk.msra.mxu0 %vm28204_vm0, %v24237_v34  ;;  %20616 = vmatprep.mubr.msk.f32.mxu0 %vm28203_vm1, %v24246_v36  ;;  %v2846_v34 = vld [vmem:[#allocation2 + $0xd3] sm:$0xff]  ;;  %v2848_v36 = vld [vmem:[#allocation2 + $0xe3] sm:$0xff] }
  0xd6   : > { %20723 = vmatprep.subr.msk.mxu0 %vm28204_vm0, %v17728_v6 }
  0xd8   : > { %20617 = vmatmul.mubr.msk.f32.gmra.mrb[2].mxu0 %vm28203_vm1, %v24258_v39  ;;  %v2851_v39 = vld [vmem:[#allocation2 + $0xfb] sm:$0xff] }
  0xd9   : > { %20619 = vmatprep.mubr.msk.f32.mxu0 %vm28203_vm1, %v24260_v40  ;;  %v2852_v40 = vld [vmem:[#allocation2 + $0x103] sm:$0xff] }
  0xdc   : > { %20620 = vmatmul.mubr.msk.f32.gmra.mrb[4].mxu0 %vm28203_vm1, %v24266_v41  ;;  %v2853_v41 = vld [vmem:[#allocation2 + $0x10b] sm:$0xff] }
  0xdd   : > { %20622 = vmatprep.mubr.msk.f32.mxu0 %vm28203_vm1, %v24268_v42  ;;  %v2854_v42 = vld [vmem:[#allocation2 + $0x113] sm:$0xff] }
  0xe0   : > { %20623 = vmatmul.mubr.msk.f32.gmra.mrb[6].mxu0 %vm28203_vm1, %v24274_v43  ;;  %v2855_v43 = vld [vmem:[#allocation2 + $0x11b] sm:$0xff] }
  0xe1   : > { %20625 = vmatprep.mubr.msk.f32.mxu0 %vm28203_vm1, %v24276_v44  ;;  %v2856_v44 = vld [vmem:[#allocation2 + $0x123] sm:$0xff] }
  0xe4   : > { %20626 = vmatmul.mubr.msk.f32.gmra.mrb[8].mxu0 %vm28203_vm1, %v1973_v45  ;;  %v2857_v45 = vld [vmem:[#allocation2 + $0x12b] sm:$0xff] }
  0xe5   : > { %20628 = vmatprep.mubr.msk.f32.mxu0 %vm28203_vm1, %v1974_v46  ;;  %v3252_v46 = vld [vmem:[#allocation2 + $0x14] sm:$0xff] }
  0xe8   : > { %20629 = vmatmul.mubr.msk.f32.gmra.mrb[10].mxu0 %vm28203_vm1, %v1975_v47  ;;  %v3253_v47 = vld [vmem:[#allocation2 + $0x1c] sm:$0xff] }
  0xe9   : > { %20631 = vmatprep.mubr.msk.f32.mxu0 %vm28203_vm1, %v1976_v48  ;;  %v24403_v48 = vld [vmem:[#allocation2 + $0x24] sm:$0xff] }
  0xec   : > { %20632 = vmatmul.mubr.msk.f32.gmra.mrb[12].mxu0 %vm28203_vm1, %v1977_v49  ;;  %v24408_v49 = vld [vmem:[%s28195_s1 + $0x1c] sm:$0xf] }
  0xed   : > { %20634 = vmatprep.mubr.msk.f32.mxu0 %vm28203_vm1, %v1978_v50  ;;  %v24415_v50 = vld [vmem:[#allocation2 + $0x2c] sm:$0xff] }
  0xf0   : > { %20635 = vmatmul.mubr.msk.f32.gmra.mrb[14].mxu0 %vm28203_vm1, %v1979_v51  ;;  %v24417_v51 = vld [vmem:[#allocation2 + $0x34] sm:$0xff] }
  0xf1   : > { %20637 = vmatprep.mubr.msk.f32.mxu0 %vm28203_vm1, %v1980_v52  ;;  %v1124_v52 = vld [vmem:[%s24084_s14 + $0x138] sm:$0xff] }
  0xf2   : > { %1168 = vst.msk [vmem:[#allocation2 + $0x138] sm:$0xff] %vm28203_vm1, %v1124_v52  ;;  %v17882_v52 = vld [vmem:[%s28197_s3 + $0x28] sm:$0xff] }
  0xf4   : > { %20638 = vmatmul.mubr.msk.f32.gmra.mrb[16].mxu0 %vm28203_vm1, %v1981_v53  ;;  %v1125_v53 = vld [vmem:[%s24084_s14 + $0x140] sm:$0xff]  ;;  %s26567_s14 = scalar_lea.vmem %s28201_s7, %s23922_s11 }
  0xf5   : > { %20640 = vmatprep.mubr.msk.f32.mxu0 %vm28203_vm1, %v1982_v54  ;;  %1169 = vst.msk [vmem:[#allocation2 + $0x140] sm:$0xff] %vm28203_vm1, %v1125_v53  ;;  %v24429_v54 = vld [vmem:[#allocation2 + $0x3c] sm:$0xff]  ;;  %v17883_v53 = vld [vmem:[%s28197_s3 + $0x30] sm:$0xff] }
  0xf8   : > { %20641 = vmatmul.mubr.msk.f32.gmra.mrb[18].mxu0 %vm28203_vm1, %v1983_v55  ;;  %v24431_v55 = vld [vmem:[#allocation2 + $0x44] sm:$0xff] }
  0xf9   : > { %20643 = vmatprep.mubr.msk.f32.mxu0 %vm28203_vm1, %v1984_v56  ;;  %v24437_v56 = vld [vmem:[#allocation2 + $0x4c] sm:$0xff] }
  0xfc   : > { %20644 = vmatmul.mubr.msk.f32.gmra.mrb[20].mxu0 %vm28203_vm1, %v1985_v57  ;;  %v24439_v57 = vld [vmem:[#allocation2 + $0x54] sm:$0xff] }
  0xfd   : > { %20646 = vmatprep.mubr.msk.f32.mxu0 %vm28203_vm1, %v1986_v58  ;;  %v24445_v58 = vld [vmem:[#allocation2 + $0x5c] sm:$0xff] }
 0x100   : > { %20647 = vmatmul.mubr.msk.f32.gmra.mrb[22].mxu0 %vm28203_vm1, %v1987_v59  ;;  %v24447_v59 = vld [vmem:[#allocation2 + $0x64] sm:$0xff] }
 0x101   : > { %20649 = vmatprep.mubr.msk.f32.mxu0 %vm28203_vm1, %v1988_v60  ;;  %v3263_v60 = vld [vmem:[#allocation2 + $0x6c] sm:$0xff] }
 0x104   : > { %20650 = vmatmul.mubr.msk.f32.gmra.mrb[24].mxu0 %vm28203_vm1, %v1989_v61  ;;  %v3264_v61 = vld [vmem:[#allocation2 + $0x74] sm:$0xff] }
 0x105   : > { %20652 = vmatprep.mubr.msk.f32.mxu0 %vm28203_vm1, %v1990_v62  ;;  %v3265_v62 = vld [vmem:[#allocation2 + $0x7c] sm:$0xff] }
 0x108   : > { %20653 = vmatmul.mubr.msk.f32.gmra.mrb[26].mxu0 %vm28203_vm1, %v1991_v63  ;;  %v3266_v63 = vld [vmem:[#allocation2 + $0x84] sm:$0xff] }
 0x109   : > { %20655 = vmatprep.mubr.msk.f32.mxu0 %vm28203_vm1, %v1992_v0  ;;  %v3267_v0 = vld [vmem:[#allocation2 + $0x8c] sm:$0xff] }
 0x10c   : > { %20656 = vmatmul.mubr.msk.f32.gmra.mrb[28].mxu0 %vm28203_vm1, %v1993_v1  ;;  %v3268_v1 = vld [vmem:[#allocation2 + $0x94] sm:$0xff] }
 0x10d   : > { %20658 = vmatprep.mubr.msk.f32.mxu0 %vm28203_vm1, %v1994_v2  ;;  %v3269_v2 = vld [vmem:[#allocation2 + $0x9c] sm:$0xff] }
 0x110   : > { %20659 = vmatmul.mubr.msk.f32.gmra.mrb[30].mxu0 %vm28203_vm1, %v1995_v3  ;;  %v3270_v3 = vld [vmem:[#allocation2 + $0xa4] sm:$0xff] }
 0x111   : > { %20661 = vmatprep.mubr.msk.f32.mxu0 %vm28203_vm1, %v1996_v4  ;;  %v3271_v4 = vld [vmem:[#allocation2 + $0xac] sm:$0xff] }
 0x114   : > { %20662 = vmatmul.mubr.msk.f32.gmra.mrb[32].mxu0 %vm28203_vm1, %v1997_v5  ;;  %v3272_v5 = vld [vmem:[#allocation2 + $0xb4] sm:$0xff] }
 0x115   : > { %20664 = vmatprep.mubr.msk.f32.mxu0 %vm28203_vm1, %v2426_v7  ;;  %v3274_v7 = vld [vmem:[#allocation2 + $0xc4] sm:$0xff] }
 0x118   : > { %20665 = vmatmul.mubr.msk.f32.gmra.mrb[34].mxu0 %vm28203_vm1, %v2427_v8  ;;  %v3275_v8 = vld [vmem:[#allocation2 + $0xcc] sm:$0xff] }
 0x119   : > { %20669 = vmatprep.mubr.msk.f32.mxu0 %vm28203_vm1, %v2822_v9  ;;  %v3276_v9 = vld [vmem:[#allocation2 + $0xd4] sm:$0xff] }
 0x11c   : > { %20670 = vmatmul.mubr.msk.f32.vlgmr.msra.gmra.mrb[0].mxu0 %vm28203_vm1, %v2823_v10  ;;  %v3277_v10 = vld [vmem:[#allocation2 + $0xdc] sm:$0xff] }
 0x11d   : > { %20724 = vmatpush3.msk.msra.mxu0 %vm28204_vm0, %v17728_v6  ;;  %20672 = vmatprep.mubr.msk.f32.mxu0 %vm28203_vm1, %v2824_v11  ;;  %v3273_v6 = vld [vmem:[#allocation2 + $0xbc] sm:$0xff]  ;;  %v3278_v11 = vld [vmem:[#allocation2 + $0xe4] sm:$0xff] }
 0x11e   : > { %20779 = vmatprep.subr.msk.mxu0 %vm28204_vm0, %v24362_v12 }
 0x120   : > { %20673 = vmatmul.mubr.msk.f32.gmra.mrb[2].mxu0 %vm28203_vm1, %v2825_v13  ;;  %v3280_v13 = vld [vmem:[#allocation2 + $0xf4] sm:$0xff] }
 0x121   : > { %20675 = vmatprep.mubr.msk.f32.mxu0 %vm28203_vm1, %v2826_v14  ;;  %v3281_v14 = vld [vmem:[#allocation2 + $0xfc] sm:$0xff] }
 0x124   : > { %20676 = vmatmul.mubr.msk.f32.gmra.mrb[4].mxu0 %vm28203_vm1, %v2827_v15  ;;  %v3282_v15 = vld [vmem:[#allocation2 + $0x104] sm:$0xff] }
 0x125   : > { %20678 = vmatprep.mubr.msk.f32.mxu0 %vm28203_vm1, %v2828_v16  ;;  %v3283_v16 = vld [vmem:[#allocation2 + $0x10c] sm:$0xff] }
 0x128   : > { %20679 = vmatmul.mubr.msk.f32.gmra.mrb[6].mxu0 %vm28203_vm1, %v2829_v17  ;;  %v3284_v17 = vld [vmem:[#allocation2 + $0x114] sm:$0xff] }
 0x129   : > { %20681 = vmatprep.mubr.msk.f32.mxu0 %vm28203_vm1, %v2830_v18  ;;  %v3285_v18 = vld [vmem:[#allocation2 + $0x11c] sm:$0xff] }
 0x12c   : > { %20682 = vmatmul.mubr.msk.f32.gmra.mrb[8].mxu0 %vm28203_vm1, %v2831_v19  ;;  %v3286_v19 = vld [vmem:[#allocation2 + $0x124] sm:$0xff] }
 0x12d   : > { %20684 = vmatprep.mubr.msk.f32.mxu0 %vm28203_vm1, %v2832_v20  ;;  %v3287_v20 = vld [vmem:[#allocation2 + $0x12c] sm:$0xff] }
 0x130   : > { %20685 = vmatmul.mubr.msk.f32.gmra.mrb[10].mxu0 %vm28203_vm1, %v2833_v21  ;;  %v24483_v21 = vld [vmem:[%s28195_s1 + $0x20] sm:$0xf] }
 0x131   : > { %20687 = vmatprep.mubr.msk.f32.mxu0 %vm28203_vm1, %v2834_v22  ;;  %v1229_v22 = vld [vmem:[#allocation2 + $0x91] sm:$0xff] }
 0x132   : > { %20472 = vmatprep.mubr.msk.f32.mxu1 %vm28203_vm1, %v1229_v22  ;;  %v4543_v22 = vld [vmem:[#allocation2 + $0x2e] sm:$0xff] }
 0x134   : > { %20688 = vmatmul.mubr.msk.f32.gmra.mrb[12].mxu0 %vm28203_vm1, %v2835_v23  ;;  %v1230_v23 = vld [vmem:[#allocation2 + $0x99] sm:$0xff] }
 0x135   : > { %20690 = vmatprep.mubr.msk.f32.mxu0 %vm28203_vm1, %v2836_v24  ;;  %20473 = vmatmul.mubr.msk.f32.vlgmr.msra.gmra.mrb[0].mxu1 %vm28203_vm1, %v1230_v23  ;;  %v1231_v24 = vld [vmem:[#allocation2 + $0xa1] sm:$0xff]  ;;  %v4544_v23 = vld [vmem:[#allocation2 + $0x36] sm:$0xff] }
 0x136   : > { %20475 = vmatprep.mubr.msk.f32.mxu1 %vm28203_vm1, %v1231_v24  ;;  %v4545_v24 = vld [vmem:[#allocation2 + $0x3e] sm:$0xff] }
 0x138   : > { %20691 = vmatmul.mubr.msk.f32.gmra.mrb[14].mxu0 %vm28203_vm1, %v2837_v25  ;;  %v1232_v25 = vld [vmem:[#allocation2 + $0xa9] sm:$0xff] }
 0x139   : > { %20693 = vmatprep.mubr.msk.f32.mxu0 %vm28203_vm1, %v2838_v26  ;;  %20476 = vmatmul.mubr.msk.f32.gmra.mrb[2].mxu1 %vm28203_vm1, %v1232_v25  ;;  %v1233_v26 = vld [vmem:[#allocation2 + $0xb1] sm:$0xff]  ;;  %v4546_v25 = vld [vmem:[#allocation2 + $0x46] sm:$0xff] }
 0x13a   : > { %20478 = vmatprep.mubr.msk.f32.mxu1 %vm28203_vm1, %v1233_v26  ;;  %v4547_v26 = vld [vmem:[#allocation2 + $0x4e] sm:$0xff] }
 0x13c   : > { %20694 = vmatmul.mubr.msk.f32.gmra.mrb[16].mxu0 %vm28203_vm1, %v2839_v27  ;;  %v1234_v27 = vld [vmem:[#allocation2 + $0xb9] sm:$0xff] }
 0x13d   : > { %20696 = vmatprep.mubr.msk.f32.mxu0 %vm28203_vm1, %v2840_v28  ;;  %20479 = vmatmul.mubr.msk.f32.gmra.mrb[4].mxu1 %vm28203_vm1, %v1234_v27  ;;  %v1235_v28 = vld [vmem:[#allocation2 + $0xc1] sm:$0xff]  ;;  %v4548_v27 = vld [vmem:[#allocation2 + $0x56] sm:$0xff] }
 0x13e   : > { %20481 = vmatprep.mubr.msk.f32.mxu1 %vm28203_vm1, %v1235_v28  ;;  %v4549_v28 = vld [vmem:[#allocation2 + $0x5e] sm:$0xff] }
 0x140   : > { %20697 = vmatmul.mubr.msk.f32.gmra.mrb[18].mxu0 %vm28203_vm1, %v2841_v29  ;;  %v1236_v29 = vld [vmem:[#allocation2 + $0xc9] sm:$0xff] }
 0x141   : > { %20699 = vmatprep.mubr.msk.f32.mxu0 %vm28203_vm1, %v2842_v30  ;;  %v3716_v30 = vld [vmem:[#allocation2 + $0x134] sm:$0xff]  ;;  %20482 = vmatmul.mubr.msk.f32.gmra.mrb[6].mxu1 %vm28203_vm1, %v1236_v29  ;;  %v4550_v29 = vld [vmem:[#allocation2 + $0x66] sm:$0xff] }
 0x144   : > { %20700 = vmatmul.mubr.msk.f32.gmra.mrb[20].mxu0 %vm28203_vm1, %v2843_v31  ;;  %v1237_v31 = vld [vmem:[#allocation2 + $0xd1] sm:$0xff] }
 0x145   : > { %20702 = vmatprep.mubr.msk.f32.mxu0 %vm28203_vm1, %v2844_v32  ;;  %v1238_v32 = vld [vmem:[#allocation2 + $0xd9] sm:$0xff]  ;;  %20484 = vmatprep.mubr.msk.f32.mxu1 %vm28203_vm1, %v1237_v31 }
 0x146   : > { %20485 = vmatmul.mubr.msk.f32.gmra.mrb[8].mxu1 %vm28203_vm1, %v1238_v32  ;;  %v4552_v31 = vld [vmem:[#allocation2 + $0x76] sm:$0xff]  ;;  %v4553_v32 = vld [vmem:[#allocation2 + $0x7e] sm:$0xff] }
 0x148   : > { %20703 = vmatmul.mubr.msk.f32.gmra.mrb[22].mxu0 %vm28203_vm1, %v2845_v33  ;;  %v3717_v33 = vld [vmem:[#allocation2 + $0x13c] sm:$0xff] }
 0x149   : > { %20705 = vmatprep.mubr.msk.f32.mxu0 %vm28203_vm1, %v2846_v34  ;;  %v4112_v34 = vld [vmem:[#allocation2 + $0x25] sm:$0xff] }
 0x14c   : > { %20706 = vmatmul.mubr.msk.f32.gmra.mrb[24].mxu0 %vm28203_vm1, %v2847_v35  ;;  %v1239_v35 = vld [vmem:[#allocation2 + $0xe1] sm:$0xff] }
 0x14d   : > { %20708 = vmatprep.mubr.msk.f32.mxu0 %vm28203_vm1, %v2848_v36  ;;  %v1240_v36 = vld [vmem:[#allocation2 + $0xe9] sm:$0xff]  ;;  %20487 = vmatprep.mubr.msk.f32.mxu1 %vm28203_vm1, %v1239_v35  ;;  %v4556_v35 = vld [vmem:[#allocation2 + $0x96] sm:$0xff] }
 0x14e   : > { %20488 = vmatmul.mubr.msk.f32.gmra.mrb[10].mxu1 %vm28203_vm1, %v1240_v36  ;;  %v4557_v36 = vld [vmem:[#allocation2 + $0x9e] sm:$0xff] }
 0x150   : > { %20709 = vmatmul.mubr.msk.f32.gmra.mrb[26].mxu0 %vm28203_vm1, %v2849_v37  ;;  %v4113_v37 = vld [vmem:[#allocation2 + $0x2d] sm:$0xff] }
 0x151   : > { %20711 = vmatprep.mubr.msk.f32.mxu0 %vm28203_vm1, %v2850_v38  ;;  %v4114_v38 = vld [vmem:[#allocation2 + $0x35] sm:$0xff] }
 0x154   : > { %20712 = vmatmul.mubr.msk.f32.gmra.mrb[28].mxu0 %vm28203_vm1, %v2851_v39  ;;  %v1241_v39 = vld [vmem:[#allocation2 + $0xf1] sm:$0xff] }
 0x155   : > { %20714 = vmatprep.mubr.msk.f32.mxu0 %vm28203_vm1, %v2852_v40  ;;  %v1242_v40 = vld [vmem:[#allocation2 + $0xf9] sm:$0xff]  ;;  %20490 = vmatprep.mubr.msk.f32.mxu1 %vm28203_vm1, %v1241_v39 }
 0x156   : > { %20491 = vmatmul.mubr.msk.f32.gmra.mrb[12].mxu1 %vm28203_vm1, %v1242_v40  ;;  %v4560_v39 = vld [vmem:[#allocation2 + $0xb6] sm:$0xff]  ;;  %v4561_v40 = vld [vmem:[#allocation2 + $0xbe] sm:$0xff] }
 0x158   : > { %20715 = vmatmul.mubr.msk.f32.gmra.mrb[30].mxu0 %vm28203_vm1, %v2853_v41  ;;  %v4115_v41 = vld [vmem:[#allocation2 + $0x3d] sm:$0xff] }
 0x159   : > { %20717 = vmatprep.mubr.msk.f32.mxu0 %vm28203_vm1, %v2854_v42  ;;  %v4116_v42 = vld [vmem:[#allocation2 + $0x45] sm:$0xff] }
 0x15c   : > { %20718 = vmatmul.mubr.msk.f32.gmra.mrb[32].mxu0 %vm28203_vm1, %v2855_v43  ;;  %v1243_v43 = vld [vmem:[#allocation2 + $0x101] sm:$0xff] }
 0x15d   : > { %20720 = vmatprep.mubr.msk.f32.mxu0 %vm28203_vm1, %v2856_v44  ;;  %v1244_v44 = vld [vmem:[#allocation2 + $0x109] sm:$0xff]  ;;  %20493 = vmatprep.mubr.msk.f32.mxu1 %vm28203_vm1, %v1243_v43  ;;  %v4564_v43 = vld [vmem:[#allocation2 + $0xd6] sm:$0xff] }
 0x15e   : > { %20494 = vmatmul.mubr.msk.f32.gmra.mrb[14].mxu1 %vm28203_vm1, %v1244_v44  ;;  %v4565_v44 = vld [vmem:[#allocation2 + $0xde] sm:$0xff] }
 0x160   : > { %20721 = vmatmul.mubr.msk.f32.gmra.mrb[34].mxu0 %vm28203_vm1, %v2857_v45  ;;  %v4117_v45 = vld [vmem:[#allocation2 + $0x4d] sm:$0xff] }
 0x161   : > { %20725 = vmatprep.mubr.msk.f32.mxu0 %vm28203_vm1, %v3252_v46  ;;  %v4118_v46 = vld [vmem:[#allocation2 + $0x55] sm:$0xff] }
 0x164   : > { %20726 = vmatmul.mubr.msk.f32.vlgmr.msra.gmra.mrb[0].mxu0 %vm28203_vm1, %v3253_v47  ;;  %v1245_v47 = vld [vmem:[#allocation2 + $0x111] sm:$0xff] }
 0x165   : > { %20780 = vmatpush3.msk.msra.mxu0 %vm28204_vm0, %v24362_v12  ;;  %20728 = vmatprep.mubr.msk.f32.mxu0 %vm28203_vm1, %v24403_v48  ;;  %v3279_v12 = vld [vmem:[#allocation2 + $0xec] sm:$0xff] }
 0x166   : > { %20835 = vmatprep.subr.msk.mxu0 %vm28204_vm0, %v24408_v49  ;;  %20496 = vmatprep.mubr.msk.f32.mxu1 %vm28203_vm1, %v1245_v47  ;;  %v4568_v47 = vld [vmem:[#allocation2 + $0xf6] sm:$0xff] }
 0x168   : > { %20729 = vmatmul.mubr.msk.f32.gmra.mrb[2].mxu0 %vm28203_vm1, %v24415_v50 }
 0x169   : > { %20731 = vmatprep.mubr.msk.f32.mxu0 %vm28203_vm1, %v24417_v51 }
 0x16c   : > { %20732 = vmatmul.mubr.msk.f32.gmra.mrb[4].mxu0 %vm28203_vm1, %v24429_v54 }
 0x16d   : > { %20734 = vmatprep.mubr.msk.f32.mxu0 %vm28203_vm1, %v24431_v55 }
 0x170   : > { %20735 = vmatmul.mubr.msk.f32.gmra.mrb[6].mxu0 %vm28203_vm1, %v24437_v56 }
 0x171   : > { %20737 = vmatprep.mubr.msk.f32.mxu0 %vm28203_vm1, %v24439_v57 }
 0x174   : > { %20738 = vmatmul.mubr.msk.f32.gmra.mrb[8].mxu0 %vm28203_vm1, %v24445_v58 }
 0x175   : > { %20740 = vmatprep.mubr.msk.f32.mxu0 %vm28203_vm1, %v24447_v59 }
 0x178   : > { %20741 = vmatmul.mubr.msk.f32.gmra.mrb[10].mxu0 %vm28203_vm1, %v3263_v60 }
 0x179   : > { %20743 = vmatprep.mubr.msk.f32.mxu0 %vm28203_vm1, %v3264_v61 }
 0x17c   : > { %20744 = vmatmul.mubr.msk.f32.gmra.mrb[12].mxu0 %vm28203_vm1, %v3265_v62 }
 0x17d   : > { %20746 = vmatprep.mubr.msk.f32.mxu0 %vm28203_vm1, %v3266_v63 }
 0x180   : > { %20747 = vmatmul.mubr.msk.f32.gmra.mrb[14].mxu0 %vm28203_vm1, %v3267_v0 }
 0x181   : > { %20749 = vmatprep.mubr.msk.f32.mxu0 %vm28203_vm1, %v3268_v1 }
 0x184   : > { %20750 = vmatmul.mubr.msk.f32.gmra.mrb[16].mxu0 %vm28203_vm1, %v3269_v2 }
 0x185   : > { %20752 = vmatprep.mubr.msk.f32.mxu0 %vm28203_vm1, %v3270_v3 }
 0x188   : > { %20753 = vmatmul.mubr.msk.f32.gmra.mrb[18].mxu0 %vm28203_vm1, %v3271_v4 }
 0x189   : > { %20755 = vmatprep.mubr.msk.f32.mxu0 %vm28203_vm1, %v3272_v5 }
 0x18c   : > { %20756 = vmatmul.mubr.msk.f32.gmra.mrb[20].mxu0 %vm28203_vm1, %v3273_v6 }
 0x18d   : > { %20758 = vmatprep.mubr.msk.f32.mxu0 %vm28203_vm1, %v3274_v7 }
 0x190   : > { %20759 = vmatmul.mubr.msk.f32.gmra.mrb[22].mxu0 %vm28203_vm1, %v3275_v8 }
 0x191   : > { %20761 = vmatprep.mubr.msk.f32.mxu0 %vm28203_vm1, %v3276_v9 }
 0x194   : > { %20762 = vmatmul.mubr.msk.f32.gmra.mrb[24].mxu0 %vm28203_vm1, %v3277_v10 }
 0x195   : > { %20764 = vmatprep.mubr.msk.f32.mxu0 %vm28203_vm1, %v3278_v11 }
 0x198   : > { %20765 = vmatmul.mubr.msk.f32.gmra.mrb[26].mxu0 %vm28203_vm1, %v3279_v12 }
 0x199   : > { %20767 = vmatprep.mubr.msk.f32.mxu0 %vm28203_vm1, %v3280_v13 }
 0x19c   : > { %20768 = vmatmul.mubr.msk.f32.gmra.mrb[28].mxu0 %vm28203_vm1, %v3281_v14 }
 0x19d   : > { %20770 = vmatprep.mubr.msk.f32.mxu0 %vm28203_vm1, %v3282_v15 }
 0x1a0   : > { %20771 = vmatmul.mubr.msk.f32.gmra.mrb[30].mxu0 %vm28203_vm1, %v3283_v16 }
 0x1a1   : > { %20773 = vmatprep.mubr.msk.f32.mxu0 %vm28203_vm1, %v3284_v17 }
 0x1a4   : > { %20774 = vmatmul.mubr.msk.f32.gmra.mrb[32].mxu0 %vm28203_vm1, %v3285_v18 }
 0x1a5   : > { %20776 = vmatprep.mubr.msk.f32.mxu0 %vm28203_vm1, %v3286_v19 }
 0x1a8   : > { %20777 = vmatmul.mubr.msk.f32.gmra.mrb[34].mxu0 %vm28203_vm1, %v3287_v20 }
 0x1a9   : > { %20781 = vmatprep.mubr.msk.f32.mxu0 %vm28203_vm1, %v24403_v48  ;;  %v4119_v48 = vld [vmem:[#allocation2 + $0x5d] sm:$0xff] }
 0x1ac   : > { %20782 = vmatmul.mubr.msk.f32.vlgmr.msra.gmra.mrb[0].mxu0 %vm28203_vm1, %v24415_v50  ;;  %v4120_v50 = vld [vmem:[#allocation2 + $0x65] sm:$0xff] }
 0x1ad   : > { %20836 = vmatpush3.msk.msra.mxu0 %vm28204_vm0, %v24408_v49  ;;  %20784 = vmatprep.mubr.msk.f32.mxu0 %vm28203_vm1, %v24417_v51  ;;  %v1246_v49 = vld [vmem:[#allocation2 + $0x119] sm:$0xff] }
 0x1ae   : > { %20891 = vmatprep.subr.msk.mxu0 %vm28204_vm0, %v24483_v21  ;;  %20497 = vmatmul.mubr.msk.f32.gmra.mrb[16].mxu1 %vm28203_vm1, %v1246_v49  ;;  %v17881_v51 = vld [vmem:[%s28197_s3 + $0x20] sm:$0xff] }
 0x1af   : > { %v4570_v49 = vld [vmem:[#allocation2 + $0x106] sm:$0xff] }
 0x1b0   : > { %20785 = vmatmul.mubr.msk.f32.gmra.mrb[2].mxu0 %vm28203_vm1, %v24429_v54  ;;  %v4121_v54 = vld [vmem:[#allocation2 + $0x6d] sm:$0xff] }
 0x1b1   : > { %20787 = vmatprep.mubr.msk.f32.mxu0 %vm28203_vm1, %v24431_v55  ;;  %v22623_v55 = vpack.c.bf16 %v17882_v52, %v17881_v51  ;;  %v4572_v51 = vld [vmem:[#allocation2 + $0x116] sm:$0xff]  ;;  %v4573_v52 = vld [vmem:[#allocation2 + $0x11e] sm:$0xff] }
 0x1b3   : > { %22624 = vmatprep.subr.bf16.mxu1 %v22623_v55 }
 0x1b4   : > { %20788 = vmatmul.mubr.msk.f32.gmra.mrb[4].mxu0 %vm28203_vm1, %v24437_v56  ;;  %v17884_v56 = vld [vmem:[%s28197_s3 + $0x38] sm:$0xff]  ;;  %22626 = vmatpush3.bf16.msra.mxu1 %v22623_v55 }
 0x1b5   : > { %20790 = vmatprep.mubr.msk.f32.mxu0 %vm28203_vm1, %v24439_v57  ;;  %v28205_v57 = vmov 0.0   ;;  %v4576_v55 = vld [vmem:[#allocation2 + $0x136] sm:$0xff] }
 0x1b6   : > { %1044 = vst.msk [vmem:[#allocation3 + $0x18] sm:$0xff] %vm1040_vm2, %v28205_v57  ;;  %1045 = vst.msk [vmem:[#allocation3 + $0x20] sm:$0xff] %vm1040_vm2, %v28205_v57 }
 0x1b7   : > { %1041 = vst.msk [vmem:[#allocation3] sm:$0xff] %vm1040_vm2, %v28205_v57  ;;  %1042 = vst.msk [vmem:[#allocation3 + $0x8] sm:$0xff] %vm1040_vm2, %v28205_v57 }
 0x1b8   : > { %20791 = vmatmul.mubr.msk.f32.gmra.mrb[6].mxu0 %vm28203_vm1, %v24445_v58  ;;  %1043 = vst.msk [vmem:[#allocation3 + $0x10] sm:$0xff] %vm1040_vm2, %v28205_v57  ;;  %1046 = vst.msk [vmem:[#allocation3 + $0x28] sm:$0xff] %vm1040_vm2, %v28205_v57  ;;  %v4122_v58 = vld [vmem:[#allocation2 + $0x75] sm:$0xff] }
 0x1b9   : > { %20793 = vmatprep.mubr.msk.f32.mxu0 %vm28203_vm1, %v24447_v59  ;;  %1047 = vst.msk [vmem:[#allocation3 + $0x30] sm:$0xff] %vm1040_vm2, %v28205_v57  ;;  %1048 = vst.msk [vmem:[#allocation3 + $0x38] sm:$0xff] %vm1040_vm2, %v28205_v57  ;;  %v22627_v59 = vpack.c.bf16 %v17884_v56, %v17883_v53  ;;  %v4574_v53 = vld [vmem:[#allocation2 + $0x126] sm:$0xff]  ;;  %v4577_v56 = vld [vmem:[#allocation2 + $0x13e] sm:$0xff] }
 0x1ba   : > { %1049 = vst.msk [vmem:[#allocation3 + $0x40] sm:$0xff] %vm1040_vm2, %v28205_v57  ;;  %1050 = vst.msk [vmem:[#allocation3 + $0x48] sm:$0xff] %vm1040_vm2, %v28205_v57 }
 0x1bb   : > { %1051 = vst.msk [vmem:[#allocation3 + $0x50] sm:$0xff] %vm1040_vm2, %v28205_v57  ;;  %1052 = vst.msk [vmem:[#allocation3 + $0x58] sm:$0xff] %vm1040_vm2, %v28205_v57  ;;  %22628 = vmatprep.subr.bf16.mxu1 %v22627_v59 }
 0x1bc   : > { %20794 = vmatmul.mubr.msk.f32.gmra.mrb[8].mxu0 %vm28203_vm1, %v3263_v60  ;;  %1053 = vst.msk [vmem:[#allocation3 + $0x60] sm:$0xff] %vm1040_vm2, %v28205_v57  ;;  %1054 = vst.msk [vmem:[#allocation3 + $0x68] sm:$0xff] %vm1040_vm2, %v28205_v57  ;;  %v4123_v60 = vld [vmem:[#allocation2 + $0x7d] sm:$0xff]  ;;  %22630 = vmatpush3.bf16.msra.mxu1 %v22627_v59 }
 0x1bd   : > { %20796 = vmatprep.mubr.msk.f32.mxu0 %vm28203_vm1, %v3264_v61  ;;  %1055 = vst.msk [vmem:[#allocation3 + $0x70] sm:$0xff] %vm1040_vm2, %v28205_v57  ;;  %1056 = vst.msk [vmem:[#allocation3 + $0x78] sm:$0xff] %vm1040_vm2, %v28205_v57  ;;  %v4124_v61 = vld [vmem:[#allocation2 + $0x85] sm:$0xff] }
 0x1be   : > { %1057 = vst.msk [vmem:[#allocation3 + $0x80] sm:$0xff] %vm1040_vm2, %v28205_v57  ;;  %1058 = vst.msk [vmem:[#allocation3 + $0x88] sm:$0xff] %vm1040_vm2, %v28205_v57 }
 0x1bf   : > { %1059 = vst.msk [vmem:[#allocation3 + $0x90] sm:$0xff] %vm1040_vm2, %v28205_v57  ;;  %1060 = vst.msk [vmem:[#allocation3 + $0x98] sm:$0xff] %vm1040_vm2, %v28205_v57  ;;  %v5164_v59 = vld [vmem:[#allocation3 + $0x9] sm:$0xff] }
 0x1c0   : > { %20797 = vmatmul.mubr.msk.f32.gmra.mrb[10].mxu0 %vm28203_vm1, %v3265_v62  ;;  %1061 = vst.msk [vmem:[#allocation3 + $0xa0] sm:$0xff] %vm1040_vm2, %v28205_v57  ;;  %1062 = vst.msk [vmem:[#allocation3 + $0xa8] sm:$0xff] %vm1040_vm2, %v28205_v57  ;;  %v4125_v62 = vld [vmem:[#allocation2 + $0x8d] sm:$0xff] }
 0x1c1   : > { %20799 = vmatprep.mubr.msk.f32.mxu0 %vm28203_vm1, %v3266_v63  ;;  %1063 = vst.msk [vmem:[#allocation3 + $0xb0] sm:$0xff] %vm1040_vm2, %v28205_v57  ;;  %1064 = vst.msk [vmem:[#allocation3 + $0xb8] sm:$0xff] %vm1040_vm2, %v28205_v57  ;;  %v4126_v63 = vld [vmem:[#allocation2 + $0x95] sm:$0xff] }
 0x1c2   : > { %1065 = vst.msk [vmem:[#allocation3 + $0xc0] sm:$0xff] %vm1040_vm2, %v28205_v57  ;;  %1066 = vst.msk [vmem:[#allocation3 + $0xc8] sm:$0xff] %vm1040_vm2, %v28205_v57 }
 0x1c3   : > { %1067 = vst.msk [vmem:[#allocation3 + $0xd0] sm:$0xff] %vm1040_vm2, %v28205_v57  ;;  %1068 = vst.msk [vmem:[#allocation3 + $0xd8] sm:$0xff] %vm1040_vm2, %v28205_v57 }
 0x1c4   : > { %20800 = vmatmul.mubr.msk.f32.gmra.mrb[12].mxu0 %vm28203_vm1, %v3267_v0  ;;  %1069 = vst.msk [vmem:[#allocation3 + $0xe0] sm:$0xff] %vm1040_vm2, %v28205_v57  ;;  %1070 = vst.msk [vmem:[#allocation3 + $0xe8] sm:$0xff] %vm1040_vm2, %v28205_v57  ;;  %v4127_v0 = vld [vmem:[#allocation2 + $0x9d] sm:$0xff] }
 0x1c5   : > { %20802 = vmatprep.mubr.msk.f32.mxu0 %vm28203_vm1, %v3268_v1  ;;  %1071 = vst.msk [vmem:[#allocation3 + $0xf0] sm:$0xff] %vm1040_vm2, %v28205_v57  ;;  %1072 = vst.msk [vmem:[#allocation3 + $0xf8] sm:$0xff] %vm1040_vm2, %v28205_v57  ;;  %v4128_v1 = vld [vmem:[#allocation2 + $0xa5] sm:$0xff] }
 0x1c6   : > { %1073 = vst.msk [vmem:[#allocation3 + $0x100] sm:$0xff] %vm1040_vm2, %v28205_v57  ;;  %1074 = vst.msk [vmem:[#allocation3 + $0x108] sm:$0xff] %vm1040_vm2, %v28205_v57 }
 0x1c7   : > { %1075 = vst.msk [vmem:[#allocation3 + $0x110] sm:$0xff] %vm1040_vm2, %v28205_v57  ;;  %1076 = vst.msk [vmem:[#allocation3 + $0x118] sm:$0xff] %vm1040_vm2, %v28205_v57 }
 0x1c8   : > { %20803 = vmatmul.mubr.msk.f32.gmra.mrb[14].mxu0 %vm28203_vm1, %v3269_v2  ;;  %1077 = vst.msk [vmem:[#allocation3 + $0x120] sm:$0xff] %vm1040_vm2, %v28205_v57  ;;  %1078 = vst.msk [vmem:[#allocation3 + $0x128] sm:$0xff] %vm1040_vm2, %v28205_v57  ;;  %v4129_v2 = vld [vmem:[#allocation2 + $0xad] sm:$0xff] }
 0x1c9   : > { %20805 = vmatprep.mubr.msk.f32.mxu0 %vm28203_vm1, %v3270_v3  ;;  %1079 = vst.msk [vmem:[#allocation3 + $0x130] sm:$0xff] %vm1040_vm2, %v28205_v57  ;;  %1080 = vst.msk [vmem:[#allocation3 + $0x138] sm:$0xff] %vm1040_vm2, %v28205_v57  ;;  %v4130_v3 = vld [vmem:[#allocation2 + $0xb5] sm:$0xff] }
 0x1ca   : > { %1081 = vst.msk [vmem:[#allocation3 + $0x140] sm:$0xff] %vm1040_vm2, %v28205_v57 }
 0x1cc   : > { %20806 = vmatmul.mubr.msk.f32.gmra.mrb[16].mxu0 %vm28203_vm1, %v3271_v4  ;;  %v4131_v4 = vld [vmem:[#allocation2 + $0xbd] sm:$0xff] }
 0x1cd   : > { %20808 = vmatprep.mubr.msk.f32.mxu0 %vm28203_vm1, %v3272_v5  ;;  %v4132_v5 = vld [vmem:[#allocation2 + $0xc5] sm:$0xff] }
 0x1d0   : > { %20809 = vmatmul.mubr.msk.f32.gmra.mrb[18].mxu0 %vm28203_vm1, %v3273_v6  ;;  %v4133_v6 = vld [vmem:[#allocation2 + $0xcd] sm:$0xff] }
 0x1d1   : > { %20811 = vmatprep.mubr.msk.f32.mxu0 %vm28203_vm1, %v3274_v7  ;;  %v4134_v7 = vld [vmem:[#allocation2 + $0xd5] sm:$0xff] }
 0x1d4   : > { %20812 = vmatmul.mubr.msk.f32.gmra.mrb[20].mxu0 %vm28203_vm1, %v3275_v8  ;;  %v4135_v8 = vld [vmem:[#allocation2 + $0xdd] sm:$0xff] }
 0x1d5   : > { %20814 = vmatprep.mubr.msk.f32.mxu0 %vm28203_vm1, %v3276_v9  ;;  %v4136_v9 = vld [vmem:[#allocation2 + $0xe5] sm:$0xff] }
 0x1d8   : > { %20815 = vmatmul.mubr.msk.f32.gmra.mrb[22].mxu0 %vm28203_vm1, %v3277_v10  ;;  %v4137_v10 = vld [vmem:[#allocation2 + $0xed] sm:$0xff] }
 0x1d9   : > { %20817 = vmatprep.mubr.msk.f32.mxu0 %vm28203_vm1, %v3278_v11  ;;  %v4138_v11 = vld [vmem:[#allocation2 + $0xf5] sm:$0xff] }
 0x1dc   : > { %20818 = vmatmul.mubr.msk.f32.gmra.mrb[24].mxu0 %vm28203_vm1, %v3279_v12  ;;  %v4139_v12 = vld [vmem:[#allocation2 + $0xfd] sm:$0xff] }
 0x1dd   : > { %20820 = vmatprep.mubr.msk.f32.mxu0 %vm28203_vm1, %v3280_v13  ;;  %v4140_v13 = vld [vmem:[#allocation2 + $0x105] sm:$0xff] }
 0x1e0   : > { %20821 = vmatmul.mubr.msk.f32.gmra.mrb[26].mxu0 %vm28203_vm1, %v3281_v14  ;;  %v4141_v14 = vld [vmem:[#allocation2 + $0x10d] sm:$0xff] }
 0x1e1   : > { %20823 = vmatprep.mubr.msk.f32.mxu0 %vm28203_vm1, %v3282_v15  ;;  %v4142_v15 = vld [vmem:[#allocation2 + $0x115] sm:$0xff] }
 0x1e4   : > { %20824 = vmatmul.mubr.msk.f32.gmra.mrb[28].mxu0 %vm28203_vm1, %v3283_v16  ;;  %v4143_v16 = vld [vmem:[#allocation2 + $0x11d] sm:$0xff] }
 0x1e5   : > { %20826 = vmatprep.mubr.msk.f32.mxu0 %vm28203_vm1, %v3284_v17  ;;  %v4144_v17 = vld [vmem:[#allocation2 + $0x125] sm:$0xff] }
 0x1e8   : > { %20827 = vmatmul.mubr.msk.f32.gmra.mrb[30].mxu0 %vm28203_vm1, %v3285_v18  ;;  %v4145_v18 = vld [vmem:[#allocation2 + $0x12d] sm:$0xff] }
 0x1e9   : > { %20829 = vmatprep.mubr.msk.f32.mxu0 %vm28203_vm1, %v3286_v19  ;;  %v4146_v19 = vld [vmem:[#allocation2 + $0x135] sm:$0xff] }
 0x1ec   : > { %20830 = vmatmul.mubr.msk.f32.gmra.mrb[32].mxu0 %vm28203_vm1, %v3287_v20  ;;  %v4147_v20 = vld [vmem:[#allocation2 + $0x13d] sm:$0xff] }
 0x1ed   : > { %20832 = vmatprep.mubr.msk.f32.mxu0 %vm28203_vm1, %v3716_v30  ;;  %v4551_v30 = vld [vmem:[#allocation2 + $0x6e] sm:$0xff] }
 0x1f0   : > { %20833 = vmatmul.mubr.msk.f32.gmra.mrb[34].mxu0 %vm28203_vm1, %v3717_v33  ;;  %v4554_v33 = vld [vmem:[#allocation2 + $0x86] sm:$0xff] }
 0x1f1   : > { %20837 = vmatprep.mubr.msk.f32.mxu0 %vm28203_vm1, %v4112_v34  ;;  %v4555_v34 = vld [vmem:[#allocation2 + $0x8e] sm:$0xff] }
 0x1f4   : > { %20838 = vmatmul.mubr.msk.f32.vlgmr.msra.gmra.mrb[0].mxu0 %vm28203_vm1, %v4113_v37  ;;  %v4558_v37 = vld [vmem:[#allocation2 + $0xa6] sm:$0xff] }
 0x1f5   : > { %20892 = vmatpush3.msk.msra.mxu0 %vm28204_vm0, %v24483_v21  ;;  %20840 = vmatprep.mubr.msk.f32.mxu0 %vm28203_vm1, %v4114_v38  ;;  %v4542_v21 = vld [vmem:[#allocation2 + $0x26] sm:$0xff]  ;;  %v4559_v38 = vld [vmem:[#allocation2 + $0xae] sm:$0xff] }
 0x1f8   : > { %20841 = vmatmul.mubr.msk.f32.gmra.mrb[2].mxu0 %vm28203_vm1, %v4115_v41  ;;  %v4562_v41 = vld [vmem:[#allocation2 + $0xc6] sm:$0xff] }
 0x1f9   : > { %20843 = vmatprep.mubr.msk.f32.mxu0 %vm28203_vm1, %v4116_v42  ;;  %v4563_v42 = vld [vmem:[#allocation2 + $0xce] sm:$0xff] }
 0x1fc   : > { %20844 = vmatmul.mubr.msk.f32.gmra.mrb[4].mxu0 %vm28203_vm1, %v4117_v45  ;;  %v4566_v45 = vld [vmem:[#allocation2 + $0xe6] sm:$0xff] }
 0x1fd   : > { %20846 = vmatprep.mubr.msk.f32.mxu0 %vm28203_vm1, %v4118_v46  ;;  %v4567_v46 = vld [vmem:[#allocation2 + $0xee] sm:$0xff] }
 0x200   : > { %20847 = vmatmul.mubr.msk.f32.gmra.mrb[6].mxu0 %vm28203_vm1, %v4119_v48  ;;  %v4569_v48 = vld [vmem:[#allocation2 + $0xfe] sm:$0xff] }
 0x201   : > { %20849 = vmatprep.mubr.msk.f32.mxu0 %vm28203_vm1, %v4120_v50  ;;  %v4571_v50 = vld [vmem:[#allocation2 + $0x10e] sm:$0xff] }
 0x204   : > { %20850 = vmatmul.mubr.msk.f32.gmra.mrb[8].mxu0 %vm28203_vm1, %v4121_v54  ;;  %v4575_v54 = vld [vmem:[#allocation2 + $0x12e] sm:$0xff] }
 0x205   : > { %20852 = vmatprep.mubr.msk.f32.mxu0 %vm28203_vm1, %v4122_v58  ;;  %v5163_v58 = vld [vmem:[#allocation3 + $0x1] sm:$0xff] }
 0x206   : > { %20955 = vmatprep.mubr.msk.f32.mxu1 %vm1040_vm2, %v5163_v58 }
 0x207   : > { %20956 = vmatmul.mubr.msk.f32.vlgmr.msra.gmra.mrb[18].mxu1 %vm1040_vm2, %v5164_v59 }
 0x208   : > { %20853 = vmatmul.mubr.msk.f32.gmra.mrb[10].mxu0 %vm28203_vm1, %v4123_v60  ;;  %v5159_v60 = vld [vmem:[%s28197_s3] sm:$0xff] }
 0x209   : > { %20855 = vmatprep.mubr.msk.f32.mxu0 %vm28203_vm1, %v4124_v61  ;;  %v5160_v61 = vld [vmem:[%s28197_s3 + $0x8] sm:$0xff] }
 0x20c   : > { %20856 = vmatmul.mubr.msk.f32.gmra.mrb[12].mxu0 %vm28203_vm1, %v4125_v62  ;;  %v22631_v62 = vpack.c.bf16 %v5160_v61, %v5159_v60 }
 0x20d   : > { %20858 = vmatprep.mubr.msk.f32.mxu0 %vm28203_vm1, %v4126_v63  ;;  %v319_v63 = vlaneseq }
 0x20e   : > { %22632 = vmatprep.subr.bf16.mxu1 %v22631_v62 }
 0x20f   : > { %22634 = vmatpush3.bf16.msra.mxu1 %v22631_v62 }
 0x210   : > { %20859 = vmatmul.mubr.msk.f32.gmra.mrb[14].mxu0 %vm28203_vm1, %v4127_v0  ;;  %v24726_v0 = vpop.f32.mrb[0].mxu1 }
 0x211   : > { %20861 = vmatprep.mubr.msk.f32.mxu0 %vm28203_vm1, %v4128_v1  ;;  %v24728_v1 = vpop.f32.mrb[1].mxu1 }
 0x214   : > { %20862 = vmatmul.mubr.msk.f32.gmra.mrb[16].mxu0 %vm28203_vm1, %v4129_v2  ;;  %v24730_v2 = vshrl.u32 %v319_v63, 7 }
 0x215   : > { %20864 = vmatprep.mubr.msk.f32.mxu0 %vm28203_vm1, %v4130_v3  ;;  %v24732_v3 = vpop.f32.mrb[2].mxu1 }
 0x218   : > { %20865 = vmatmul.mubr.msk.f32.gmra.mrb[18].mxu0 %vm28203_vm1, %v4131_v4  ;;  %v24734_v4 = vpop.f32.mrb[3].mxu1 }
 0x219   : > { %20867 = vmatprep.mubr.msk.f32.mxu0 %vm28203_vm1, %v4132_v5  ;;  %v321_v5 = vadd.s32 8, %v24730_v2 }
 0x21c   : > { %20868 = vmatmul.mubr.msk.f32.gmra.mrb[20].mxu0 %vm28203_vm1, %v4133_v6  ;;  %v24737_v6 = vpop.f32.mrb[4].mxu1 }
 0x21d   : > { %20870 = vmatprep.mubr.msk.f32.mxu0 %vm28203_vm1, %v4134_v7  ;;  %v24739_v7 = vpop.f32.mrb[5].mxu1 }
 0x220   : > { %20871 = vmatmul.mubr.msk.f32.gmra.mrb[22].mxu0 %vm28203_vm1, %v4135_v8 }
 0x221   : > { %20873 = vmatprep.mubr.msk.f32.mxu0 %vm28203_vm1, %v4136_v9  ;;  %v24741_v8 = vmul.u32.u64.low 3817748708, %v321_v5  ;;  %v24742_v9 = vmul.u32.u64.high 3817748708, %v321_v5, %v24741_v8 }
 0x224   : > { %20874 = vmatmul.mubr.msk.f32.gmra.mrb[24].mxu0 %vm28203_vm1, %v4137_v10  ;;  %v323_v10 = vadd.s32 24, %v24730_v2 }
 0x225   : > { %20876 = vmatprep.mubr.msk.f32.mxu0 %vm28203_vm1, %v4138_v11  ;;  %v24745_v11 = vpop.f32.mrb[6].mxu1 }
 0x228   : > { %20877 = vmatmul.mubr.msk.f32.gmra.mrb[26].mxu0 %vm28203_vm1, %v4139_v12  ;;  %v24747_v12 = vpop.f32.mrb[7].mxu1 }
 0x229   : > { %20879 = vmatprep.mubr.msk.f32.mxu0 %vm28203_vm1, %v4140_v13 }
 0x22c   : > { %20880 = vmatmul.mubr.msk.f32.gmra.mrb[28].mxu0 %vm28203_vm1, %v4141_v14  ;;  %v24750_v13 = vmul.u32.u64.low 3817748708, %v24730_v2  ;;  %v24751_v14 = vmul.u32.u64.high 3817748708, %v24730_v2, %v24750_v13 }
 0x22d   : > { %20882 = vmatprep.mubr.msk.f32.mxu0 %vm28203_vm1, %v4142_v15  ;;  %v322_v15 = vadd.s32 16, %v24730_v2 }
 0x230   : > { %20883 = vmatmul.mubr.msk.f32.gmra.mrb[30].mxu0 %vm28203_vm1, %v4143_v16 }
 0x231   : > { %20885 = vmatprep.mubr.msk.f32.mxu0 %vm28203_vm1, %v4144_v17  ;;  %v24754_v16 = vmul.u32.u64.low 3817748708, %v323_v10  ;;  %v24755_v17 = vmul.u32.u64.high 3817748708, %v323_v10, %v24754_v16 }
 0x234   : > { %20886 = vmatmul.mubr.msk.f32.gmra.mrb[32].mxu0 %vm28203_vm1, %v4145_v18  ;;  %v24757_v18 = vpop.f32.mrb[8].mxu1 }
 0x235   : > { %20888 = vmatprep.mubr.msk.f32.mxu0 %vm28203_vm1, %v4146_v19  ;;  %v24759_v19 = vpop.f32.mrb[9].mxu1 }
 0x238   : > { %20889 = vmatmul.mubr.msk.f32.gmra.mrb[34].mxu0 %vm28203_vm1, %v4147_v20  ;;  %v373_v20 = vshrl.u32 %v24742_v9, 4 }
 0x239   : > { %20893 = vmatprep.mubr.msk.f32.mxu0 %vm28203_vm1, %v4542_v21 }
 0x23c   : > { %20894 = vmatmul.mubr.msk.f32.vlgmr.msra.gmra.mrb[0].mxu0 %vm28203_vm1, %v4543_v22  ;;  %v24762_v21 = vmul.u32.u64.low 3817748708, %v322_v15  ;;  %v24763_v22 = vmul.u32.u64.high 3817748708, %v322_v15, %v24762_v21 }
 0x23d   : > { %20896 = vmatprep.mubr.msk.f32.mxu0 %vm28203_vm1, %v4544_v23  ;;  %v24766_v23 = vadd.s32 40, %v24730_v2 }
 0x240   : > { %20897 = vmatmul.mubr.msk.f32.gmra.mrb[2].mxu0 %vm28203_vm1, %v4545_v24  ;;  %v24768_v24 = vpop.f32.mrb[10].mxu1 }
 0x241   : > { %20899 = vmatprep.mubr.msk.f32.mxu0 %vm28203_vm1, %v4546_v25  ;;  %v24770_v25 = vpop.f32.mrb[11].mxu1 }
 0x244   : > { %20900 = vmatmul.mubr.msk.f32.gmra.mrb[4].mxu0 %vm28203_vm1, %v4547_v26  ;;  %v374_v26 = vmul.u32 18, %v373_v20 }
 0x245   : > { %20902 = vmatprep.mubr.msk.f32.mxu0 %vm28203_vm1, %v4548_v27  ;;  %v362_v27 = vshrl.u32 %v24751_v14, 4 }
 0x248   : > { %20903 = vmatmul.mubr.msk.f32.gmra.mrb[6].mxu0 %vm28203_vm1, %v4549_v28  ;;  %v24774_v28 = vadd.s32 32, %v24730_v2 }
 0x249   : > { %20905 = vmatprep.mubr.msk.f32.mxu0 %vm28203_vm1, %v4550_v29  ;;  %v5161_v29 = vld [vmem:[%s28197_s3 + $0x10] sm:$0xff] }
 0x24c   : > { %20906 = vmatmul.mubr.msk.f32.gmra.mrb[8].mxu0 %vm28203_vm1, %v4551_v30  ;;  %v5162_v30 = vld [vmem:[%s28197_s3 + $0x18] sm:$0xff] }
 0x24d   : > { %20908 = vmatprep.mubr.msk.f32.mxu0 %vm28203_vm1, %v4552_v31  ;;  %v395_v31 = vshrl.u32 %v24755_v17, 4 }
 0x250   : > { %20909 = vmatmul.mubr.msk.f32.gmra.mrb[10].mxu0 %vm28203_vm1, %v4553_v32 }
 0x251   : > { %20911 = vmatprep.mubr.msk.f32.mxu0 %vm28203_vm1, %v4554_v33  ;;  %v24784_v32 = vmul.u32.u64.low 3817748708, %v24766_v23  ;;  %v24785_v33 = vmul.u32.u64.high 3817748708, %v24766_v23, %v24784_v32 }
 0x254   : > { %20912 = vmatmul.mubr.msk.f32.gmra.mrb[12].mxu0 %vm28203_vm1, %v4555_v34  ;;  %v22635_v34 = vpack.c.bf16 %v5162_v30, %v5161_v29 }
 0x255   : > { %20914 = vmatprep.mubr.msk.f32.mxu0 %vm28203_vm1, %v4556_v35  ;;  %v24787_v35 = vpop.f32.mrb[12].mxu1 }
 0x256   : > { %22636 = vmatprep.subr.bf16.mxu1 %v22635_v34 }
 0x257   : > { %22638 = vmatpush3.bf16.msra.mxu1 %v22635_v34 }
 0x258   : > { %20915 = vmatmul.mubr.msk.f32.gmra.mrb[14].mxu0 %vm28203_vm1, %v4557_v36  ;;  %v24789_v36 = vpop.f32.mrb[13].mxu1 }
 0x259   : > { %20917 = vmatprep.mubr.msk.f32.mxu0 %vm28203_vm1, %v4558_v37  ;;  %28239 = vst [vmem:[#allocation4_spill] sm:$0xff] %v24789_v36  ;;  %v375_v37 = vsub.s32 %v321_v5, %v374_v26  ;;  %v24833_v5 = vadd.s32 64, %v24730_v2 }
 0x25b   : > { %vm753_vm3 = vcmp.ne.s32.totalorder %v375_v37, 0  ;;  %vm789_vm4 = vcmp.lt.s32.totalorder %v375_v37, 0  ;;  %v861_v58 = vadd.s32 18, %v375_v37 }
 0x25c   : > { %20918 = vmatmul.mubr.msk.f32.gmra.mrb[16].mxu0 %vm28203_vm1, %v4559_v38  ;;  %v363_v38 = vmul.u32 18, %v362_v27  ;;  %vm24827_vm5 = vmand %vm789_vm4, %vm753_vm3 }
 0x25d   : > { %20920 = vmatprep.mubr.msk.f32.mxu0 %vm28203_vm1, %v4560_v39  ;;  %v384_v39 = vshrl.u32 %v24763_v22, 4  ;;  %v897_v13 = vsel %vm24827_vm5, %v861_v58, %v375_v37  ;;  %v24852_v22 = vmul.u32.u64.low 3817748708, %v24833_v5  ;;  %v24853_v26 = vmul.u32.u64.high 3817748708, %v24833_v5, %v24852_v22 }
 0x25e   : > { %vm933_vm14 = vcmp.lt.s32.totalorder %v897_v13, 16 }
 0x260   : > { %20921 = vmatmul.mubr.msk.f32.gmra.mrb[18].mxu0 %vm28203_vm1, %v4561_v40 }
 0x261   : > { %20923 = vmatprep.mubr.msk.f32.mxu0 %vm28203_vm1, %v4562_v41  ;;  %v24793_v40 = vmul.u32.u64.low 3817748708, %v24774_v28  ;;  %v24794_v41 = vmul.u32.u64.high 3817748708, %v24774_v28, %v24793_v40 }
 0x262   : > { %v24877_v40 = vadd.s32 80, %v24730_v2 }
 0x263   : > { %v406_v63 = vshrl.u32 %v24794_v41, 4 }
 0x264   : > { %20924 = vmatmul.mubr.msk.f32.gmra.mrb[20].mxu0 %vm28203_vm1, %v4563_v42  ;;  %v24797_v42 = vadd.s32 56, %v24730_v2 }
 0x265   : > { %20926 = vmatprep.mubr.msk.f32.mxu0 %vm28203_vm1, %v4564_v43  ;;  %v396_v43 = vmul.u32 18, %v395_v31  ;;  %v407_v21 = vmul.u32 18, %v406_v63 }
 0x268   : > { %20927 = vmatmul.mubr.msk.f32.gmra.mrb[22].mxu0 %vm28203_vm1, %v4565_v44  ;;  %v24800_v44 = vadd.s32 48, %v24730_v2 }
 0x269   : > { %20929 = vmatprep.mubr.msk.f32.mxu0 %vm28203_vm1, %v4566_v45  ;;  %v24802_v45 = vpop.f32.mrb[14].mxu1 }
 0x26a   : > { %28240 = vst [vmem:[#allocation5_spill] sm:$0xff] %v24802_v45 }
 0x26c   : > { %20930 = vmatmul.mubr.msk.f32.gmra.mrb[24].mxu0 %vm28203_vm1, %v4567_v46  ;;  %v24804_v46 = vpop.f32.mrb[15].mxu1 }
 0x26d   : > { %20932 = vmatprep.mubr.msk.f32.mxu0 %vm28203_vm1, %v4568_v47  ;;  %28241 = vst [vmem:[#allocation6_spill] sm:$0xff] %v24804_v46  ;;  %v24807_v47 = vadd.s32 72, %v24730_v2 }
 0x26f   : > { %v24822_v59 = vmul.u32.u64.low 3817748708, %v24807_v47  ;;  %v24823_v60 = vmul.u32.u64.high 3817748708, %v24807_v47, %v24822_v59 }
 0x270   : > { %20933 = vmatmul.mubr.msk.f32.gmra.mrb[26].mxu0 %vm28203_vm1, %v4569_v48  ;;  %v364_v48 = vsub.s32 %v24730_v2, %v363_v38  ;;  %v450_v59 = vshrl.u32 %v24853_v26, 4  ;;  %v17957_v26 = vld [vmem:[%s28197_s3 + $0x40] sm:$0xff] }
 0x271   : > { %20935 = vmatprep.mubr.msk.f32.mxu0 %vm28203_vm1, %v4570_v49  ;;  %v385_v49 = vmul.u32 18, %v384_v39  ;;  %v461_v37 = vshrl.u32 %v24823_v60, 4  ;;  %v24911_v60 = vmul.u32.u64.low 3817748708, %v24877_v40  ;;  %v24912_v62 = vmul.u32.u64.high 3817748708, %v24877_v40, %v24911_v60 }
 0x272   : > { %vm752_vm6 = vcmp.ne.s32.totalorder %v364_v48, 0  ;;  %vm788_vm7 = vcmp.lt.s32.totalorder %v364_v48, 0  ;;  %v860_v16 = vadd.s32 18, %v364_v48 }
 0x273   : > { %v24835_v8 = vsub.s32 %v322_v15, %v385_v49  ;;  %vm24842_vm10 = vmand %vm788_vm7, %vm752_vm6  ;;  %v472_v49 = vshrl.u32 %v24912_v62, 4 }
 0x274   : > { %20936 = vmatmul.mubr.msk.f32.gmra.mrb[28].mxu0 %vm28203_vm1, %v4571_v50  ;;  %v896_v32 = vsel %vm24842_vm10, %v860_v16, %v364_v48  ;;  %v24883_v48 = vsel %vm933_vm14, 1.0, %v28205_v57 }
 0x275   : > { %20938 = vmatprep.mubr.msk.f32.mxu0 %vm28203_vm1, %v4572_v51  ;;  %v24811_v50 = vmul.u32.u64.low 3817748708, %v24797_v42  ;;  %v24812_v51 = vmul.u32.u64.high 3817748708, %v24797_v42, %v24811_v50  ;;  %vm754_vm12 = vcmp.ne.s32.totalorder %v24835_v8, 0  ;;  %vm790_vm13 = vcmp.lt.s32.totalorder %v24835_v8, 0 }
 0x276   : > { %v862_v34 = vadd.s32 18, %v24835_v8  ;;  %vm24869_vm15 = vmand %vm790_vm13, %vm754_vm12  ;;  %vm24885_vm5 = vcmp.lt.s32.totalorder %v896_v32, 16  ;;  %v24894_v50 = vadd.s32 96, %v24730_v2 }
 0x277   : > { %v439_v15 = vshrl.u32 %v24812_v51, 4 }
 0x278   : > { %20939 = vmatmul.mubr.msk.f32.gmra.mrb[30].mxu0 %vm28203_vm1, %v4573_v52  ;;  %v397_v52 = vsub.s32 %v323_v10, %v396_v43  ;;  %v24838_v10 = vadd.s32 88, %v24730_v2  ;;  %v24880_v43 = vadd.s32 104, %v24730_v2  ;;  %v898_v51 = vsel %vm24869_vm15, %v862_v34, %v24835_v8 }
 0x279   : > { %20941 = vmatprep.mubr.msk.f32.mxu0 %vm28203_vm1, %v4574_v53  ;;  %v417_v53 = vshrl.u32 %v24785_v33, 4  ;;  %v440_v39 = vmul.u32 18, %v439_v15  ;;  %v24925_v13 = vmul.u32.u64.low 3817748708, %v24894_v50  ;;  %v24926_v14 = vmul.u32.u64.high 3817748708, %v24894_v50, %v24925_v13 }
 0x27a   : > { %vm755_vm8 = vcmp.ne.s32.totalorder %v397_v52, 0  ;;  %vm791_vm9 = vcmp.lt.s32.totalorder %v397_v52, 0  ;;  %v863_v17 = vadd.s32 18, %v397_v52  ;;  %v451_v15 = vmul.u32 18, %v450_v59 }
 0x27b   : > { %v418_v9 = vmul.u32 18, %v417_v53  ;;  %vm24846_vm11 = vmand %vm791_vm9, %vm755_vm8  ;;  %v24860_v30 = vmul.u32.u64.low 3817748708, %v24838_v10  ;;  %v24861_v31 = vmul.u32.u64.high 3817748708, %v24838_v10, %v24860_v30  ;;  %v24907_v58 = vsub.s32 %v24797_v42, %v440_v39 }
 0x27c   : > { %20942 = vmatmul.mubr.msk.f32.gmra.mrb[32].mxu0 %vm28203_vm1, %v4575_v54  ;;  %v899_v33 = vsel %vm24846_vm11, %v863_v17, %v397_v52  ;;  %v462_v53 = vmul.u32 18, %v461_v37  ;;  %vm24958_vm14 = vcmp.lt.s32.totalorder %v898_v51, 16  ;;  %v25012_v59 = vadd.s32 128, %v24730_v2 }
 0x27d   : > { %20944 = vmatprep.mubr.msk.f32.mxu0 %vm28203_vm1, %v4576_v55  ;;  %v24816_v54 = vmul.u32.u64.low 3817748708, %v24800_v44  ;;  %v24817_v55 = vmul.u32.u64.high 3817748708, %v24800_v44, %v24816_v54  ;;  %v419_v27 = vsub.s32 %v24766_v23, %v418_v9  ;;  %v24874_v23 = vsub.s32 %v24774_v28, %v407_v21 }
 0x27e   : > { %vm24889_vm6 = vcmp.lt.s32.totalorder %v899_v33, 16  ;;  %v24900_v54 = vadd.s32 120, %v24730_v2  ;;  %v24919_v8 = vmul.u32.u64.low 3817748708, %v24880_v43  ;;  %v24920_v9 = vmul.u32.u64.high 3817748708, %v24880_v43, %v24919_v8 }
 0x27f   : > { %v428_v29 = vshrl.u32 %v24817_v55, 4  ;;  %vm757_vm3 = vcmp.ne.s32.totalorder %v419_v27, 0  ;;  %vm793_vm4 = vcmp.lt.s32.totalorder %v419_v27, 0  ;;  %v865_v52 = vadd.s32 18, %v419_v27 }
 0x280   : > { %20945 = vmatmul.mubr.msk.f32.gmra.mrb[34].mxu0 %vm28203_vm1, %v4577_v56  ;;  %vm24902_vm7 = vmand %vm793_vm4, %vm757_vm3  ;;  %vm756_vm8 = vcmp.ne.s32.totalorder %v24874_v23, 0  ;;  %vm792_vm9 = vcmp.lt.s32.totalorder %v24874_v23, 0  ;;  %v483_v42 = vshrl.u32 %v24861_v31, 4  ;;  %v24931_v17 = vsub.s32 %v24807_v47, %v462_v53 }
 0x281   : > { %v24819_v56 = vpop.f32.mrb[16].mxu1  ;;  %v429_v41 = vmul.u32 18, %v428_v29  ;;  %v901_v16 = vsel %vm24902_vm7, %v865_v52, %v419_v27  ;;  %v24940_v21 = vsel %vm24885_vm5, 1.0, %v28205_v57  ;;  %vm759_vm10 = vcmp.ne.s32.totalorder %v24907_v58, 0  ;;  %v17958_v27 = vld [vmem:[%s28197_s3 + $0x48] sm:$0xff]  ;;  %vm24970_vm3 = vmand %vm792_vm9, %vm756_vm8 }
 0x282   : > { %28242 = vst [vmem:[#allocation7_spill] sm:$0xff] %v24819_v56  ;;  %v24825_v61 = vpop.f32.mrb[17].mxu1  ;;  %vm795_vm11 = vcmp.lt.s32.totalorder %v24907_v58, 0  ;;  %v24947_v22 = vsel %vm24889_vm6, 1.0, %v28205_v57  ;;  %v864_v47 = vadd.s32 18, %v24874_v23  ;;  %vm24962_vm15 = vcmp.lt.s32.totalorder %v901_v16, 16 }
 0x283   : > { %28243 = vst [vmem:[#allocation8_spill] sm:$0xff] %v24825_v61  ;;  %v24916_v63 = vsub.s32 %v24800_v44, %v429_v41  ;;  %v24934_v44 = vmul.u32.u64.low 3817748708, %v24900_v54  ;;  %v24935_v20 = vmul.u32.u64.high 3817748708, %v24900_v54, %v24934_v44  ;;  %v484_v32 = vmul.u32 18, %v483_v42  ;;  %vm24981_vm4 = vmand %vm795_vm11, %vm759_vm10 }
 0x284   : > { %v24975_v33 = vadd.s32 112, %v24730_v2  ;;  %v867_v37 = vadd.s32 18, %v24907_v58  ;;  %vm761_vm5 = vcmp.ne.s32.totalorder %v24931_v17, 0  ;;  %vm797_vm6 = vcmp.lt.s32.totalorder %v24931_v17, 0 }
 0x285   : > { %vm758_vm12 = vcmp.ne.s32.totalorder %v24916_v63, 0  ;;  %vm794_vm13 = vcmp.lt.s32.totalorder %v24916_v63, 0  ;;  %v866_v38 = vadd.s32 18, %v24916_v63  ;;  %v24998_v41 = vsub.s32 %v24833_v5, %v451_v15  ;;  %vm25033_vm8 = vmand %vm797_vm6, %vm761_vm5 }
 0x286   : > { %vm24993_vm7 = vmand %vm794_vm13, %vm758_vm12  ;;  %v25002_v28 = vadd.s32 136, %v24730_v2  ;;  %v25004_v51 = vpack.c.bf16 %v17958_v27, %v17957_v26  ;;  %v900_v52 = vsel %vm24970_vm3, %v864_v47, %v24874_v23  ;;  %v869_v53 = vadd.s32 18, %v24931_v17 }
 0x287   : > { %v505_v55 = vshrl.u32 %v24920_v9, 4  ;;  %v25015_v5 = vsub.s32 %v24838_v10, %v484_v32  ;;  %v494_v60 = vshrl.u32 %v24926_v14, 4  ;;  %v903_v23 = vsel %vm24981_vm4, %v867_v37, %v24907_v58 }
 0x288   : > { %28268 = vst [vmem:[#allocation9_spill] sm:$0xff] %v25004_v51  ;;  %v25019_v62 = vmul.u32.u64.low 3817748708, %v24975_v33  ;;  %v25020_v8 = vmul.u32.u64.high 3817748708, %v24975_v33, %v25019_v62  ;;  %22640 = vmatprep.subr.bf16.mxu1 %v25004_v51  ;;  %v902_v9 = vsel %vm24993_vm7, %v866_v38, %v24916_v63  ;;  %v527_v42 = vshrl.u32 %v24935_v20, 4 }
 0x289   : > { %v25039_v13 = vadd.s32 152, %v24730_v2  ;;  %vm760_vm9 = vcmp.ne.s32.totalorder %v24998_v41, 0  ;;  %v473_v58 = vmul.u32 18, %v472_v49  ;;  %vm796_vm10 = vcmp.lt.s32.totalorder %v24998_v41, 0 }
 0x28a   : > { %v25043_v14 = vmul.u32.u64.low 3817748708, %v25002_v28  ;;  %v25044_v16 = vmul.u32.u64.high 3817748708, %v25002_v28, %v25043_v14  ;;  %v506_v63 = vmul.u32 18, %v505_v55  ;;  %v905_v20 = vsel %vm25033_vm8, %v869_v53, %v24931_v17  ;;  %vm25075_vm13 = vmand %vm796_vm10, %vm760_vm9 }
 0x28b   : > { %v25048_v44 = vmul.u32.u64.low 3817748708, %v25012_v59  ;;  %v25049_v15 = vmul.u32.u64.high 3817748708, %v25012_v59, %v25048_v44  ;;  %vm763_vm11 = vcmp.ne.s32.totalorder %v25015_v5, 0  ;;  %vm799_vm12 = vcmp.lt.s32.totalorder %v25015_v5, 0 }
 0x28c   : > { %v495_v47 = vmul.u32 18, %v494_v60  ;;  %v528_v26 = vmul.u32 18, %v527_v42  ;;  %v25061_v32 = vadd.s32 144, %v24730_v2  ;;  %v25066_v34 = vsel %vm24958_vm14, 1.0, %v28205_v57 }
 0x28d   : > { %v25057_v27 = vmul.u32.u64.low 3817748708, %v25039_v13  ;;  %v25058_v31 = vmul.u32.u64.high 3817748708, %v25039_v13, %v25057_v27  ;;  %28271 = vst [vmem:[#allocation10_spill] sm:$0xff] %v25066_v34  ;;  %v25071_v17 = vsel %vm24962_vm15, 1.0, %v28205_v57  ;;  %v868_v38 = vadd.s32 18, %v24998_v41  ;;  %vm25091_vm15 = vmand %vm799_vm12, %vm763_vm11 }
 0x28e   : > { %28272 = vst [vmem:[#allocation11_spill] sm:$0xff] %v25071_v17  ;;  %v871_v39 = vadd.s32 18, %v25015_v5  ;;  %vm25081_vm3 = vcmp.lt.s32.totalorder %v900_v52, 16  ;;  %vm25085_vm14 = vcmp.lt.s32.totalorder %v903_v23, 16  ;;  %v25096_v53 = vsub.s32 %v24877_v40, %v473_v58 }
 0x28f   : > { %v25099_v55 = vsub.s32 %v24880_v43, %v506_v63  ;;  %vm25101_vm4 = vcmp.lt.s32.totalorder %v902_v9, 16  ;;  %vm25105_vm5 = vcmp.lt.s32.totalorder %v905_v20, 16  ;;  %v25110_v62 = vsub.s32 %v24894_v50, %v495_v47 }
 0x290   : > { %v516_v23 = vshrl.u32 %v25020_v8, 4  ;;  %v25114_v10 = vsub.s32 %v24900_v54, %v528_v26  ;;  %v25117_v40 = vmul.u32.u64.low 3817748708, %v25061_v32  ;;  %v25118_v43 = vmul.u32.u64.high 3817748708, %v25061_v32, %v25117_v40 }
 0x291   : > { %v25121_v9 = vadd.s32 168, %v24730_v2  ;;  %v904_v42 = vsel %vm25075_vm13, %v868_v38, %v24998_v41  ;;  %v907_v50 = vsel %vm25091_vm15, %v871_v39, %v25015_v5  ;;  %v549_v8 = vshrl.u32 %v25044_v16, 4 }
 0x292   : > { %v25131_v54 = vadd.s32 160, %v24730_v2  ;;  %vm762_vm6 = vcmp.ne.s32.totalorder %v25096_v53, 0  ;;  %vm798_vm7 = vcmp.lt.s32.totalorder %v25096_v53, 0  ;;  %vm765_vm8 = vcmp.ne.s32.totalorder %v25099_v55, 0 }
 0x293   : > { %v538_v58 = vshrl.u32 %v25049_v15, 4  ;;  %vm801_vm9 = vcmp.lt.s32.totalorder %v25099_v55, 0  ;;  %vm764_vm10 = vcmp.ne.s32.totalorder %v25110_v62, 0  ;;  %vm800_vm11 = vcmp.lt.s32.totalorder %v25110_v62, 0  ;;  %vm25146_vm13 = vmand %vm798_vm7, %vm762_vm6 }
 0x294   : > { %v517_v41 = vmul.u32 18, %v516_v23  ;;  %vm767_vm12 = vcmp.ne.s32.totalorder %v25114_v10, 0  ;;  %v571_v5 = vshrl.u32 %v25058_v31, 4  ;;  %vm803_vm15 = vcmp.lt.s32.totalorder %v25114_v10, 0  ;;  %vm25162_vm0 = vmand %vm801_vm9, %vm765_vm8 }
 0x295   : > { %v25143_v14 = vmul.u32.u64.low 3817748708, %v25121_v9  ;;  %v25144_v16 = vmul.u32.u64.high 3817748708, %v25121_v9, %v25143_v14  ;;  %v550_v44 = vmul.u32 18, %v549_v8  ;;  %vm25155_vm1 = vcmp.lt.s32.totalorder %v904_v42, 16  ;;  %vm25175_vm7 = vmand %vm800_vm11, %vm764_vm10 }
 0x296   : > { %v25152_v15 = vmul.u32.u64.low 3817748708, %v25131_v54  ;;  %v25153_v20 = vmul.u32.u64.high 3817748708, %v25131_v54, %v25152_v15  ;;  %v870_v26 = vadd.s32 18, %v25096_v53  ;;  %v873_v31 = vadd.s32 18, %v25099_v55  ;;  %vm25198_vm8 = vmand %vm803_vm15, %vm767_vm12 }
 0x297   : > { %v539_v37 = vmul.u32 18, %v538_v58  ;;  %vm25167_vm6 = vcmp.lt.s32.totalorder %v907_v50, 16  ;;  %v872_v30 = vadd.s32 18, %v25110_v62  ;;  %v875_v23 = vadd.s32 18, %v25114_v10 }
 0x298   : > { %v25182_v40 = vsub.s32 %v24975_v33, %v517_v41  ;;  %v25187_v42 = vsel %vm25081_vm3, 1.0, %v28205_v57  ;;  %v25192_v50 = vsel %vm25085_vm14, 1.0, %v28205_v57  ;;  %v572_v33 = vmul.u32 18, %v571_v5 }
 0x299   : > { %28295 = vst [vmem:[#allocation12_spill] sm:$0xff] %v25187_v42  ;;  %28296 = vst [vmem:[#allocation13_spill] sm:$0xff] %v25192_v50  ;;  %v560_v58 = vshrl.u32 %v25118_v43, 4  ;;  %v25206_v49 = vsel %vm25101_vm4, 1.0, %v28205_v57  ;;  %v25211_v29 = vsel %vm25105_vm5, 1.0, %v28205_v57  ;;  %v25216_v41 = vsel %vm25155_vm1, 1.0, %v28205_v57 }
 0x29a   : > { %v551_v14 = vsub.s32 %v25002_v28, %v550_v44  ;;  %v25222_v43 = vsel %vm25167_vm6, 1.0, %v28205_v57  ;;  %v906_v52 = vsel %vm25146_vm13, %v870_v26, %v25096_v53  ;;  %v909_v60 = vsel %vm25162_vm0, %v873_v31, %v25099_v55 }
 0x29b   : > { %v540_v5 = vsub.s32 %v25012_v59, %v539_v37  ;;  %v908_v15 = vsel %vm25175_vm7, %v872_v30, %v25110_v62  ;;  %v911_v28 = vsel %vm25198_vm8, %v875_v23, %v25114_v10  ;;  %vm766_vm1 = vcmp.ne.s32.totalorder %v25182_v40, 0 }
 0x29c   : > { %v25239_v44 = vadd.s32 184, %v24730_v2  ;;  %vm802_vm3 = vcmp.lt.s32.totalorder %v25182_v40, 0  ;;  %v573_v53 = vsub.s32 %v25039_v13, %v572_v33  ;;  %v561_v55 = vmul.u32 18, %v560_v58 }
 0x29d   : > { %v593_v59 = vshrl.u32 %v25144_v16, 4  ;;  %v874_v63 = vadd.s32 18, %v25182_v40  ;;  %vm769_vm0 = vcmp.ne.s32.totalorder %v551_v14, 0  ;;  %v582_v62 = vshrl.u32 %v25153_v20, 4  ;;  %vm25260_vm9 = vmand %vm802_vm3, %vm766_vm1 }
 0x29e   : > { %v25247_v47 = vadd.s32 176, %v24730_v2  ;;  %vm805_vm14 = vcmp.lt.s32.totalorder %v551_v14, 0  ;;  %v877_v10 = vadd.s32 18, %v551_v14  ;;  %vm768_vm4 = vcmp.ne.s32.totalorder %v540_v5, 0 }
 0x29f   : > { %vm804_vm5 = vcmp.lt.s32.totalorder %v540_v5, 0  ;;  %v876_v26 = vadd.s32 18, %v540_v5  ;;  %v25250_v27 = vmul.u32.u64.low 3817748708, %v25239_v44  ;;  %v25251_v31 = vmul.u32.u64.high 3817748708, %v25239_v44, %v25250_v27  ;;  %vm25266_vm12 = vmand %vm805_vm14, %vm769_vm0 }
 0x2a0   : > { %v25254_v13 = vadd.s32 200, %v24730_v2  ;;  %vm771_vm10 = vcmp.ne.s32.totalorder %v573_v53, 0  ;;  %vm807_vm11 = vcmp.lt.s32.totalorder %v573_v53, 0  ;;  %v562_v20 = vsub.s32 %v25061_v32, %v561_v55  ;;  %vm25291_vm7 = vmand %vm804_vm5, %vm768_vm4 }
 0x2a1   : > { %v594_v37 = vmul.u32 18, %v593_v59  ;;  %v583_v39 = vmul.u32 18, %v582_v62  ;;  %v25275_v8 = vadd.s32 192, %v24730_v2  ;;  %vm25277_vm13 = vcmp.lt.s32.totalorder %v906_v52, 16  ;;  %vm25303_vm1 = vmand %vm807_vm11, %vm771_vm10 }
 0x2a2   : > { %v25271_v30 = vmul.u32.u64.low 3817748708, %v25247_v47  ;;  %v25272_v23 = vmul.u32.u64.high 3817748708, %v25247_v47, %v25271_v30  ;;  %vm25281_vm15 = vcmp.lt.s32.totalorder %v909_v60, 16  ;;  %vm25285_vm6 = vcmp.lt.s32.totalorder %v908_v15, 16 }
 0x2a3   : > { %v879_v59 = vadd.s32 18, %v573_v53  ;;  %vm25295_vm8 = vcmp.lt.s32.totalorder %v911_v28, 16  ;;  %v910_v60 = vsel %vm25260_vm9, %v874_v63, %v25182_v40  ;;  %v913_v30 = vsel %vm25266_vm12, %v877_v10, %v551_v14 }
 0x2a4   : > { %v25308_v62 = vmul.u32.u64.low 3817748708, %v25254_v13  ;;  %v25309_v27 = vmul.u32.u64.high 3817748708, %v25254_v13, %v25308_v62  ;;  %vm770_vm3 = vcmp.ne.s32.totalorder %v562_v20, 0  ;;  %vm806_vm0 = vcmp.lt.s32.totalorder %v562_v20, 0 }
 0x2a5   : > { %v25314_v28 = vsub.s32 %v25121_v9, %v594_v37  ;;  %v912_v40 = vsel %vm25291_vm7, %v876_v26, %v540_v5  ;;  %v25319_v63 = vsub.s32 %v25131_v54, %v583_v39  ;;  %v28315_v51 = vmov 0.0   ;;  %vm25347_vm4 = vmand %vm806_vm0, %vm770_vm3  ;;  %v25361_v39 = vld [vmem:[%s28196_s2] ss:$0 sm:$0xff] }
 0x2a6   : > { %v25322_v16 = vmul.u32.u64.low 3817748708, %v25275_v8  ;;  %v25323_v57 = vmul.u32.u64.high 3817748708, %v25275_v8, %v25322_v16  ;;  %v25328_v38 = vsel %vm25277_vm13, 1.0, %v28315_v51  ;;  %v25333_v9 = vsel %vm25281_vm15, 1.0, %v28315_v51 }
 0x2a7   : > { %v915_v14 = vsel %vm25303_vm1, %v879_v59, %v573_v53  ;;  %v878_v5 = vadd.s32 18, %v562_v20  ;;  %v25340_v54 = vsel %vm25285_vm6, 1.0, %v28315_v51  ;;  %v25345_v10 = vsel %vm25295_vm8, 1.0, %v28315_v51 }
 0x2a8   : > { %vm946_vm14 = vcmp.lt.s32.totalorder %v910_v60, 16  ;;  %v615_v37 = vshrl.u32 %v25251_v31, 4  ;;  %vm949_vm5 = vcmp.lt.s32.totalorder %v913_v30, 16  ;;  %vm25352_vm9 = vcmp.lt.s32.totalorder %v912_v40, 16 }
 0x2a9   : > { %vm773_vm10 = vcmp.ne.s32.totalorder %v25314_v28, 0  ;;  %vm809_vm11 = vcmp.lt.s32.totalorder %v25314_v28, 0  ;;  %vm25363_vm12 = vcmp.lt.s32.totalorder %v915_v14, 16  ;;  %vm772_vm13 = vcmp.ne.s32.totalorder %v25319_v63, 0 }
 0x2aa   : > { %vm808_vm15 = vcmp.lt.s32.totalorder %v25319_v63, 0  ;;  %v604_v31 = vshrl.u32 %v25272_v23, 4  ;;  %v25371_v32 = vsel %vm946_vm14, 1.0, %v28315_v51  ;;  %v914_v58 = vsel %vm25347_vm4, %v878_v5, %v562_v20  ;;  %vm25382_vm6 = vmand %vm809_vm11, %vm773_vm10 }
 0x2ab   : > { %28322 = vst [vmem:[#allocation14_spill] sm:$0xff] %v25371_v32  ;;  %v881_v55 = vadd.s32 18, %v25314_v28  ;;  %v25377_v59 = vadd.s32 216, %v24730_v2  ;;  %v25380_v60 = vsel %vm949_vm5, 1.0, %v28315_v51  ;;  %v880_v23 = vadd.s32 18, %v25319_v63  ;;  %vm25403_vm7 = vmand %vm808_vm15, %vm772_vm13 }
 0x2ac   : > { %v616_v62 = vmul.u32 18, %v615_v37  ;;  %v637_v30 = vshrl.u32 %v25309_v27, 4  ;;  %v25392_v16 = vsel %vm25352_vm9, 1.0, %v28315_v51  ;;  %v25397_v14 = vsel %vm25363_vm12, 1.0, %v28315_v51 }
 0x2ad   : > { %v25408_v27 = vadd.s32 208, %v24730_v2  ;;  %vm25411_vm8 = vcmp.lt.s32.totalorder %v914_v58, 16  ;;  %v605_v53 = vmul.u32 18, %v604_v31  ;;  %v626_v33 = vshrl.u32 %v25323_v57, 4 }
 0x2ae   : > { %v917_v61 = vsel %vm25382_vm6, %v881_v55, %v25314_v28  ;;  %v25420_v56 = vmul.u32.u64.low 3817748708, %v25377_v59  ;;  %v25421_v46 = vmul.u32.u64.high 3817748708, %v25377_v59, %v25420_v56  ;;  %v916_v58 = vsel %vm25403_vm7, %v880_v23, %v25319_v63 }
 0x2af   : > { %v638_v31 = vmul.u32 18, %v637_v30  ;;  %v25432_v28 = vmul.u32.u64.low 3817748708, %v25408_v27  ;;  %v25433_v55 = vmul.u32.u64.high 3817748708, %v25408_v27, %v25432_v28  ;;  %v25438_v5 = vsub.s32 %v25247_v47, %v605_v53 }
 0x2b0   : > { %v627_v63 = vmul.u32 18, %v626_v33  ;;  %vm25446_vm1 = vcmp.lt.s32.totalorder %v917_v61, 16  ;;  %vm25454_vm3 = vcmp.lt.s32.totalorder %v916_v58, 16  ;;  %v25463_v61 = vadd.s32 224, %v24730_v2 }
 0x2b1   : > { %v25460_v37 = vsub.s32 %v25254_v13, %v638_v31  ;;  %vm774_vm4 = vcmp.ne.s32.totalorder %v25438_v5, 0  ;;  %vm810_vm5 = vcmp.lt.s32.totalorder %v25438_v5, 0  ;;  %v659_v28 = vshrl.u32 %v25421_v46, 4 }
 0x2b2   : > { %v25473_v13 = vsub.s32 %v25275_v8, %v627_v63  ;;  %vm25509_vm15 = vmand %vm810_vm5, %vm774_vm4  ;;  %v25551_v23 = vadd.s32 248, %v24730_v2 }
 0x2b3   : > { %vm777_vm10 = vcmp.ne.s32.totalorder %v25460_v37, 0  ;;  %vm813_vm11 = vcmp.lt.s32.totalorder %v25460_v37, 0 }
 0x2b4   : > { %vm776_vm12 = vcmp.ne.s32.totalorder %v25473_v13, 0  ;;  %vm812_vm13 = vcmp.lt.s32.totalorder %v25473_v13, 0  ;;  %vm25520_vm6 = vmand %vm813_vm11, %vm777_vm10 }
 0x2b5   : > { %vm25541_vm7 = vmand %vm812_vm13, %vm776_vm12 }
 0x30f   : > { %v20895_v52 = vpop.f32.mrb[0].mxu0 }
 0x310   : > { %v4979_v20 = vadd.f32 %v20895_v52, %v25361_v39  ;;  %v4757_v40 = vpop.f32.mrb[1].mxu0 }
 0x311   : > { %v4978_v26 = vadd.f32 %v25361_v39, %v4757_v40  ;;  %v25427_v40 = vsub.s32 %v25239_v44, %v616_v62 }
 0x312   : > { %v5015_v52 = vmax.f32 %v4979_v20, 0.0 }
 0x313   : > { %v5014_v45 = vmax.f32 %v4978_v26, 0.0  ;;  %v20898_v36 = vpop.f32.mrb[2].mxu0  ;;  %vm775_vm0 = vcmp.ne.s32.totalorder %v25427_v40, 0  ;;  %vm811_vm14 = vcmp.lt.s32.totalorder %v25427_v40, 0  ;;  %v883_v58 = vadd.s32 18, %v25427_v40 }
 0x314   : > { %v5051_v57 = vmul.f32 %v24883_v48, %v5015_v52  ;;  %v4981_v20 = vadd.f32 %v20898_v36, %v25361_v39  ;;  %v4767_v15 = vpop.f32.mrb[3].mxu0  ;;  %v25444_v36 = vsel %vm25411_vm8, 1.0, %v28315_v51  ;;  %vm25484_vm9 = vmand %vm811_vm14, %vm775_vm0 }
 0x315   : > { %v5050_v56 = vmul.f32 %v24940_v21, %v5014_v45  ;;  %v4980_v26 = vadd.f32 %v25361_v39, %v4767_v15  ;;  %v25451_v45 = vadd.s32 232, %v24730_v2  ;;  %v882_v15 = vadd.s32 18, %v25438_v5 }
 0x316   : > { %5087 = vst.msk [vmem:[#allocation3 + $0x1b] sm:$0xff] %vm1040_vm2, %v5051_v57  ;;  %v5017_v44 = vmax.f32 %v4981_v20, 0.0 }
 0x317   : > { %5086 = vst.msk [vmem:[#allocation3 + $0x13] sm:$0xff] %vm1040_vm2, %v5050_v56  ;;  %v5016_v47 = vmax.f32 %v4980_v26, 0.0  ;;  %v20901_v62 = vpop.f32.mrb[4].mxu0 }
 0x318   : > { %v5053_v53 = vmul.f32 %v24947_v22, %v5017_v44  ;;  %v4983_v33 = vadd.f32 %v20901_v62, %v25361_v39  ;;  %v4777_v52 = vpop.f32.mrb[5].mxu0  ;;  %v25490_v63 = vmul.u32.u64.low 3817748708, %v25451_v45  ;;  %v25491_v44 = vmul.u32.u64.high 3817748708, %v25451_v45, %v25490_v63 }
 0x319   : > { %v5052_v57 = vmul.f32 %v25066_v34, %v5016_v47  ;;  %v4982_v20 = vadd.f32 %v25361_v39, %v4777_v52  ;;  %v660_v63 = vmul.u32 18, %v659_v28 }
 0x31a   : > { %5089 = vst.msk [vmem:[#allocation3 + $0x2b] sm:$0xff] %vm1040_vm2, %v5053_v53  ;;  %v5019_v31 = vmax.f32 %v4983_v33, 0.0  ;;  %v648_v53 = vshrl.u32 %v25433_v55, 4 }
 0x31b   : > { %5088 = vst.msk [vmem:[#allocation3 + $0x23] sm:$0xff] %vm1040_vm2, %v5052_v57  ;;  %v5018_v56 = vmax.f32 %v4982_v20, 0.0  ;;  %v20904_v26 = vpop.f32.mrb[6].mxu0 }
 0x31c   : > { %v5055_v46 = vmul.f32 %v25071_v17, %v5019_v31  ;;  %v4985_v47 = vadd.f32 %v20904_v26, %v25361_v39  ;;  %v4787_v62 = vpop.f32.mrb[7].mxu0  ;;  %v919_v26 = vsel %vm25484_vm9, %v883_v58, %v25427_v40  ;;  %v884_v58 = vadd.s32 18, %v25473_v13 }
 0x31d   : > { %v5054_v33 = vmul.f32 %v25187_v42, %v5018_v56  ;;  %v4984_v52 = vadd.f32 %v25361_v39, %v4787_v62  ;;  %v885_v56 = vadd.s32 18, %v25460_v37  ;;  %vm25559_vm8 = vcmp.lt.s32.totalorder %v919_v26, 16 }
 0x31e   : > { %5091 = vst.msk [vmem:[#allocation3 + $0x3b] sm:$0xff] %vm1040_vm2, %v5055_v46  ;;  %v5021_v57 = vmax.f32 %v4985_v47, 0.0  ;;  %v5165_v20 = vld [vmem:[#allocation3 + $0x11] sm:$0xff]  ;;  %v5166_v31 = vld [vmem:[#allocation3 + $0x19] sm:$0xff]  ;;  %v25526_v8 = vmul.u32.u64.low 3817748708, %v25463_v61  ;;  %v25527_v62 = vmul.u32.u64.high 3817748708, %v25463_v61, %v25526_v8  ;;  %v920_v30 = vsel %vm25541_vm7, %v884_v58, %v25473_v13 }
 0x31f   : > { %5090 = vst.msk [vmem:[#allocation3 + $0x33] sm:$0xff] %vm1040_vm2, %v5054_v33  ;;  %v5020_v46 = vmax.f32 %v4984_v52, 0.0  ;;  %v20907_v47 = vpop.f32.mrb[8].mxu0  ;;  %20958 = vmatprep.mubr.msk.f32.mxu1 %vm1040_vm2, %v5165_v20  ;;  %v25535_v20 = vsel %vm25446_vm1, 1.0, %v28315_v51  ;;  %v649_v8 = vmul.u32 18, %v648_v53  ;;  %v25557_v53 = vsel %vm25454_vm3, 1.0, %v28315_v51 }
 0x320   : > { %v5057_v28 = vmul.f32 %v25192_v50, %v5021_v57  ;;  %v4987_v33 = vadd.f32 %v20907_v47, %v25361_v39  ;;  %v4797_v52 = vpop.f32.mrb[9].mxu0  ;;  %20959 = vmatmul.mubr.msk.f32.gmra.mrb[20].mxu1 %vm1040_vm2, %v5166_v31  ;;  %v918_v31 = vsel %vm25509_vm15, %v882_v15, %v25438_v5  ;;  %v921_v5 = vsel %vm25520_vm6, %v885_v56, %v25460_v37 }
 0x321   : > { %v5056_v57 = vmul.f32 %v25206_v49, %v5020_v46  ;;  %v4986_v47 = vadd.f32 %v25361_v39, %v4797_v52  ;;  %v681_v26 = vshrl.u32 %v25491_v44, 4  ;;  %vm25578_vm1 = vcmp.lt.s32.totalorder %v918_v31, 16 }
 0x322   : > { %5093 = vst.msk [vmem:[#allocation3 + $0x4b] sm:$0xff] %vm1040_vm2, %v5057_v28  ;;  %v5023_v50 = vmax.f32 %v4987_v33, 0.0  ;;  %v5167_v17 = vld [vmem:[#allocation3 + $0x21] sm:$0xff]  ;;  %v5168_v34 = vld [vmem:[#allocation3 + $0x29] sm:$0xff]  ;;  %v25572_v28 = vsub.s32 %v25377_v59, %v660_v63  ;;  %v25588_v13 = vmul.u32.u64.low 3817748708, %v25551_v23  ;;  %v25589_v44 = vmul.u32.u64.high 3817748708, %v25551_v23, %v25588_v13 }
 0x323   : > { %5092 = vst.msk [vmem:[#allocation3 + $0x43] sm:$0xff] %vm1040_vm2, %v5056_v57  ;;  %v5022_v15 = vmax.f32 %v4986_v47, 0.0  ;;  %v20910_v55 = vpop.f32.mrb[10].mxu0  ;;  %20961 = vmatprep.mubr.msk.f32.mxu1 %vm1040_vm2, %v5167_v17  ;;  %v25583_v17 = vsub.s32 %v25408_v27, %v649_v8  ;;  %vm25592_vm3 = vcmp.lt.s32.totalorder %v921_v5, 16  ;;  %vm25596_vm0 = vcmp.lt.s32.totalorder %v920_v30, 16 }
 0x324   : > { %v5059_v33 = vmul.f32 %v25211_v29, %v5023_v50  ;;  %v4989_v40 = vadd.f32 %v20910_v55, %v25361_v39  ;;  %v4807_v37 = vpop.f32.mrb[11].mxu0  ;;  %20962 = vmatmul.mubr.msk.f32.gmra.mrb[22].mxu1 %vm1040_vm2, %v5168_v34  ;;  %v25601_v52 = vadd.s32 240, %v24730_v2  ;;  %vm779_vm14 = vcmp.ne.s32.totalorder %v25572_v28, 0 }
 0x325   : > { %v5058_v42 = vmul.f32 %v25216_v41, %v5022_v15  ;;  %v4988_v59 = vadd.f32 %v25361_v39, %v4807_v37  ;;  %vm815_vm4 = vcmp.lt.s32.totalorder %v25572_v28, 0  ;;  %v682_v47 = vmul.u32 18, %v681_v26 }
 0x326   : > { %5095 = vst.msk [vmem:[#allocation3 + $0x5b] sm:$0xff] %vm1040_vm2, %v5059_v33  ;;  %v5025_v50 = vmax.f32 %v4989_v40, 0.0  ;;  %v5169_v63 = vld [vmem:[#allocation3 + $0x31] sm:$0xff]  ;;  %v5170_v34 = vld [vmem:[#allocation3 + $0x39] sm:$0xff]  ;;  %vm778_vm5 = vcmp.ne.s32.totalorder %v25583_v17, 0  ;;  %vm814_vm9 = vcmp.lt.s32.totalorder %v25583_v17, 0  ;;  %vm25621_vm10 = vmand %vm815_vm4, %vm779_vm14 }
 0x327   : > { %5094 = vst.msk [vmem:[#allocation3 + $0x53] sm:$0xff] %vm1040_vm2, %v5058_v42  ;;  %v5024_v8 = vmax.f32 %v4988_v59, 0.0  ;;  %v20913_v57 = vpop.f32.mrb[12].mxu0  ;;  %20964 = vmatprep.mubr.msk.f32.mxu1 %vm1040_vm2, %v5169_v63  ;;  %v887_v33 = vadd.s32 18, %v25572_v28  ;;  %v670_v40 = vshrl.u32 %v25527_v62, 4  ;;  %v25626_v13 = vadd.s32 18, %v25583_v17  ;;  %vm25648_vm11 = vmand %vm814_vm9, %vm778_vm5 }
 0x328   : > { %v5061_v31 = vmul.f32 %v25222_v43, %v5025_v50  ;;  %v4991_v5 = vadd.f32 %v20913_v57, %v25361_v39  ;;  %v4817_v15 = vpop.f32.mrb[13].mxu0  ;;  %20965 = vmatmul.mubr.msk.f32.gmra.mrb[24].mxu1 %vm1040_vm2, %v5170_v34  ;;  %v25629_v50 = vmul.u32.u64.low 3817748708, %v25601_v52  ;;  %v25630_v63 = vmul.u32.u64.high 3817748708, %v25601_v52, %v25629_v50 }
 0x329   : > { %v5060_v55 = vmul.f32 %v25328_v38, %v5024_v8  ;;  %v4990_v30 = vadd.f32 %v25361_v39, %v4817_v15  ;;  %v25637_v8 = vsel %vm25559_vm8, 1.0, %v28315_v51  ;;  %v25642_v57 = vsel %vm25578_vm1, 1.0, %v28315_v51 }
 0x32a   : > { %5097 = vst.msk [vmem:[#allocation3 + $0x6b] sm:$0xff] %vm1040_vm2, %v5061_v31  ;;  %v5027_v26 = vmax.f32 %v4991_v5, 0.0  ;;  %v5171_v37 = vld [vmem:[#allocation3 + $0x41] sm:$0xff]  ;;  %v5172_v42 = vld [vmem:[#allocation3 + $0x49] sm:$0xff]  ;;  %28351 = vst [vmem:[#allocation15_spill] sm:$0xff] %v25642_v57  ;;  %v25653_v5 = vsub.s32 %v25451_v45, %v682_v47  ;;  %v25661_v56 = vsel %vm25592_vm3, 1.0, %v28315_v51 }
 0x32b   : > { %5096 = vst.msk [vmem:[#allocation3 + $0x63] sm:$0xff] %vm1040_vm2, %v5060_v55  ;;  %v5026_v62 = vmax.f32 %v4990_v30, 0.0  ;;  %v20916_v34 = vpop.f32.mrb[14].mxu0  ;;  %20967 = vmatprep.mubr.msk.f32.mxu1 %vm1040_vm2, %v5171_v37  ;;  %28354 = vst [vmem:[#allocation16_spill] sm:$0xff] %v25661_v56  ;;  %v25664_v30 = vadd.s32 264, %v24730_v2  ;;  %v25671_v47 = vsel %vm25596_vm0, 1.0, %v28315_v51 }
 0x32c   : > { %v5063_v46 = vmul.f32 %v25333_v9, %v5027_v26  ;;  %v4993_v15 = vadd.f32 %v20916_v34, %v25361_v39  ;;  %v4827_v55 = vpop.f32.mrb[15].mxu0  ;;  %20968 = vmatmul.mubr.msk.f32.gmra.mrb[26].mxu1 %vm1040_vm2, %v5172_v42  ;;  %28355 = vst [vmem:[#allocation17_spill] sm:$0xff] %v25671_v47  ;;  %v671_v26 = vmul.u32 18, %v670_v40  ;;  %v923_v34 = vsel %vm25621_vm10, %v887_v33, %v25572_v28 }
 0x32d   : > { %v5062_v37 = vmul.f32 %v25340_v54, %v5026_v62  ;;  %v4992_v45 = vadd.f32 %v25361_v39, %v4827_v55  ;;  %v922_v62 = vsel %vm25648_vm11, %v25626_v13, %v25583_v17  ;;  %v703_v55 = vshrl.u32 %v25589_v44, 4 }
 0x32e   : > { %5099 = vst.msk [vmem:[#allocation3 + $0x7b] sm:$0xff] %vm1040_vm2, %v5063_v46  ;;  %v5029_v42 = vmax.f32 %v4993_v15, 0.0  ;;  %v5173_v50 = vld [vmem:[#allocation3 + $0x51] sm:$0xff]  ;;  %v5174_v58 = vld [vmem:[#allocation3 + $0x59] sm:$0xff]  ;;  %vm781_vm12 = vcmp.ne.s32.totalorder %v25653_v5, 0  ;;  %vm817_vm13 = vcmp.lt.s32.totalorder %v25653_v5, 0 }
 0x32f   : > { %5098 = vst.msk [vmem:[#allocation3 + $0x73] sm:$0xff] %vm1040_vm2, %v5062_v37  ;;  %v5028_v27 = vmax.f32 %v4992_v45, 0.0  ;;  %v20919_v40 = vpop.f32.mrb[16].mxu0  ;;  %20970 = vmatprep.mubr.msk.f32.mxu1 %vm1040_vm2, %v5173_v50  ;;  %v25687_v59 = vadd.s32 256, %v24730_v2  ;;  %v25693_v44 = vmul.u32.u64.low 3817748708, %v25664_v30  ;;  %v25694_v13 = vmul.u32.u64.high 3817748708, %v25664_v30, %v25693_v44  ;;  %vm25711_vm6 = vmand %vm817_vm13, %vm781_vm12 }
 0x330   : > { %v5065_v28 = vmul.f32 %v25345_v10, %v5029_v42  ;;  %v4995_v33 = vadd.f32 %v20919_v40, %v25361_v39  ;;  %v4837_v17 = vpop.f32.mrb[17].mxu0  ;;  %20971 = vmatmul.mubr.msk.f32.gmra.mrb[28].mxu1 %vm1040_vm2, %v5174_v58  ;;  %v889_v15 = vadd.s32 18, %v25653_v5  ;;  %v25700_v37 = vsub.s32 %v25463_v61, %v671_v26 }
 0x331   : > { %v5064_v31 = vmul.f32 %v25371_v32, %v5028_v27  ;;  %v4994_v46 = vadd.f32 %v25361_v39, %v4837_v17  ;;  %vm25703_vm15 = vcmp.lt.s32.totalorder %v923_v34, 16  ;;  %v704_v40 = vmul.u32 18, %v703_v55 }
 0x332   : > { %5101 = vst.msk [vmem:[#allocation3 + $0x8b] sm:$0xff] %vm1040_vm2, %v5065_v28  ;;  %v5031_v45 = vmax.f32 %v4995_v33, 0.0  ;;  %v5175_v42 = vld [vmem:[#allocation3 + $0x61] sm:$0xff]  ;;  %v5176_v50 = vld [vmem:[#allocation3 + $0x69] sm:$0xff]  ;;  %v692_v61 = vshrl.u32 %v25630_v63, 4  ;;  %v25723_v17 = vadd.s32 280, %v24730_v2 }
 0x333   : > { %5100 = vst.msk [vmem:[#allocation3 + $0x83] sm:$0xff] %vm1040_vm2, %v5064_v31  ;;  %v5030_v26 = vmax.f32 %v4994_v46, 0.0  ;;  %v20922_v28 = vpop.f32.mrb[18].mxu0  ;;  %20973 = vmatprep.mubr.msk.f32.mxu1 %vm1040_vm2, %v5175_v42  ;;  %v25719_v34 = vmul.u32.u64.low 3817748708, %v25687_v59  ;;  %v25720_v33 = vmul.u32.u64.high 3817748708, %v25687_v59, %v25719_v34  ;;  %vm25728_vm7 = vcmp.lt.s32.totalorder %v922_v62, 16 }
 0x334   : > { %v5067_v44 = vmul.f32 %v25380_v60, %v5031_v45  ;;  %v22769_v32 = vadd.f32 %v20922_v28, %v24726_v0  ;;  %v4847_v55 = vpop.f32.mrb[19].mxu0  ;;  %20974 = vmatmul.mubr.msk.f32.gmra.mrb[30].mxu1 %vm1040_vm2, %v5176_v50  ;;  %v25733_v31 = vadd.s32 272, %v24730_v2  ;;  %v925_v45 = vsel %vm25711_vm6, %v889_v15, %v25653_v5 }
 0x335   : > { %v5066_v46 = vmul.f32 %v25392_v16, %v5030_v26  ;;  %v22770_v42 = vadd.f32 %v4847_v55, %v24728_v1  ;;  %vm780_vm8 = vcmp.ne.s32.totalorder %v25700_v37, 0  ;;  %vm816_vm1 = vcmp.lt.s32.totalorder %v25700_v37, 0 }
 0x336   : > { %5103 = vst.msk [vmem:[#allocation3 + $0x9b] sm:$0xff] %vm1040_vm2, %v5067_v44  ;;  %v4997_v0 = vadd.f32 %v22769_v32, %v25361_v39  ;;  %v5177_v62 = vld [vmem:[#allocation3 + $0x71] sm:$0xff]  ;;  %v5178_v50 = vld [vmem:[#allocation3 + $0x79] sm:$0xff]  ;;  %v888_v2 = vadd.s32 18, %v25700_v37  ;;  %v693_v28 = vmul.u32 18, %v692_v61  ;;  %v25749_v5 = vsub.s32 %v25551_v23, %v704_v40  ;;  %vm25771_vm3 = vmand %vm816_vm1, %vm780_vm8 }
 0x337   : > { %5102 = vst.msk [vmem:[#allocation3 + $0x93] sm:$0xff] %vm1040_vm2, %v5066_v46  ;;  %v4996_v1 = vadd.f32 %v22770_v42, %v25361_v39  ;;  %v20925_v26 = vpop.f32.mrb[20].mxu0  ;;  %20976 = vmatprep.mubr.msk.f32.mxu1 %vm1040_vm2, %v5177_v62  ;;  %v25752_v15 = vmul.u32.u64.low 3817748708, %v25723_v17  ;;  %v25753_v32 = vmul.u32.u64.high 3817748708, %v25723_v17, %v25752_v15  ;;  %v25765_v23 = vsel %vm25703_vm15, 1.0, %v28315_v51 }
 0x338   : > { %v5033_v27 = vmax.f32 %v4997_v0, 0.0  ;;  %v22771_v34 = vadd.f32 %v20925_v26, %v24732_v3  ;;  %v4857_v44 = vpop.f32.mrb[21].mxu0  ;;  %20977 = vmatmul.mubr.msk.f32.gmra.mrb[32].mxu1 %vm1040_vm2, %v5178_v50  ;;  %v25758_v61 = vmul.u32.u64.low 3817748708, %v25733_v31  ;;  %v25759_v55 = vmul.u32.u64.high 3817748708, %v25733_v31, %v25758_v61  ;;  %28362 = vst [vmem:[#allocation18_spill] sm:$0xff] %v25765_v23 }
 0x339   : > { %v5032_v46 = vmax.f32 %v4996_v1, 0.0  ;;  %v22772_v42 = vadd.f32 %v4857_v44, %v24734_v4  ;;  %v725_v40 = vshrl.u32 %v25694_v13, 4  ;;  %v25781_v58 = vsel %vm25728_vm7, 1.0, %v28315_v51 }
 0x33a   : > { %v5069_v0 = vmul.f32 %v25397_v14, %v5033_v27  ;;  %v4999_v62 = vadd.f32 %v22771_v34, %v25361_v39  ;;  %v5179_v4 = vld [vmem:[#allocation3 + $0x81] sm:$0xff]  ;;  %v5180_v50 = vld [vmem:[#allocation3 + $0x89] sm:$0xff]  ;;  %28365 = vst [vmem:[#allocation19_spill] sm:$0xff] %v25781_v58  ;;  %v25784_v1 = vsub.s32 %v25601_v52, %v693_v28  ;;  %vm25789_vm0 = vcmp.lt.s32.totalorder %v925_v45, 16 }
 0x33b   : > { %v5068_v26 = vmul.f32 %v25444_v36, %v5032_v46  ;;  %v4998_v15 = vadd.f32 %v22772_v42, %v25361_v39  ;;  %v20928_v44 = vpop.f32.mrb[22].mxu0  ;;  %20979 = vmatprep.mubr.msk.f32.mxu1 %vm1040_vm2, %v5179_v4  ;;  %v714_v27 = vshrl.u32 %v25720_v33, 4  ;;  %v924_v28 = vsel %vm25771_vm3, %v888_v2, %v25700_v37 }
 0x33c   : > { %5105 = vst.msk [vmem:[#allocation3 + $0xab] sm:$0xff] %vm1040_vm2, %v5069_v0  ;;  %v5035_v63 = vmax.f32 %v4999_v62, 0.0  ;;  %v22773_v34 = vadd.f32 %v20928_v44, %v24737_v6  ;;  %v4867_v52 = vpop.f32.mrb[23].mxu0  ;;  %20980 = vmatmul.mubr.msk.f32.gmra.mrb[34].mxu1 %vm1040_vm2, %v5180_v50  ;;  %vm783_vm14 = vcmp.ne.s32.totalorder %v25749_v5, 0  ;;  %vm819_vm4 = vcmp.lt.s32.totalorder %v25749_v5, 0 }
 0x33d   : > { %5104 = vst.msk [vmem:[#allocation3 + $0xa3] sm:$0xff] %vm1040_vm2, %v5068_v26  ;;  %v5034_v45 = vmax.f32 %v4998_v15, 0.0  ;;  %v22774_v61 = vadd.f32 %v4867_v52, %v24739_v7  ;;  %v726_v33 = vmul.u32 18, %v725_v40  ;;  %vm782_vm5 = vcmp.ne.s32.totalorder %v25784_v1, 0  ;;  %vm25826_vm11 = vmand %vm819_vm4, %vm783_vm14 }
 0x33e   : > { %v5071_v46 = vmul.f32 %v25535_v20, %v5035_v63  ;;  %v5001_v6 = vadd.f32 %v22773_v34, %v25361_v39  ;;  %v5181_v42 = vld [vmem:[#allocation3 + $0x91] sm:$0xff]  ;;  %v5182_v0 = vld [vmem:[#allocation3 + $0x99] sm:$0xff]  ;;  %vm818_vm9 = vcmp.lt.s32.totalorder %v25784_v1, 0  ;;  %v715_v7 = vmul.u32 18, %v714_v27 }
 0x33f   : > { %v5070_v37 = vmul.f32 %v25557_v53, %v5034_v45  ;;  %v5000_v2 = vadd.f32 %v22774_v61, %v25361_v39  ;;  %v20931_v3 = vpop.f32.mrb[24].mxu0  ;;  %20982 = vmatprep.mubr.msk.f32.mxu1 %vm1040_vm2, %v5181_v42  ;;  %v747_v40 = vshrl.u32 %v25753_v32, 4  ;;  %vm25815_vm10 = vcmp.lt.s32.totalorder %v924_v28, 16  ;;  %vm25843_vm12 = vmand %vm818_vm9, %vm782_vm5 }
 0x340   : > { %5107 = vst.msk [vmem:[#allocation3 + $0xbb] sm:$0xff] %vm1040_vm2, %v5071_v46  ;;  %v5037_v62 = vmax.f32 %v5001_v6, 0.0  ;;  %v22775_v4 = vadd.f32 %v20931_v3, %v24745_v11  ;;  %v4877_v50 = vpop.f32.mrb[25].mxu0  ;;  %20983 = vmatmul.mubr.msk.f32.gmra.mrb[36].mxu1 %vm1040_vm2, %v5182_v0  ;;  %v736_v15 = vshrl.u32 %v25759_v55, 4  ;;  %v891_v32 = vadd.s32 18, %v25749_v5 }
 0x341   : > { %5106 = vst.msk [vmem:[#allocation3 + $0xb3] sm:$0xff] %vm1040_vm2, %v5070_v37  ;;  %v5036_v44 = vmax.f32 %v5000_v2, 0.0  ;;  %v22776_v27 = vadd.f32 %v4877_v50, %v24747_v12  ;;  %v890_v63 = vadd.s32 18, %v25784_v1  ;;  %v25837_v12 = vsel %vm25789_vm0, 1.0, %v28315_v51 }
 0x342   : > { %v5073_v34 = vmul.f32 %v25637_v8, %v5037_v62  ;;  %v5003_v55 = vadd.f32 %v22775_v4, %v25361_v39  ;;  %28372 = vst [vmem:[#allocation20_spill] sm:$0xff] %v25837_v12  ;;  %v25848_v28 = vsub.s32 %v25664_v30, %v726_v33  ;;  %v25853_v13 = vsub.s32 %v25687_v59, %v715_v7 }
 0x343   : > { %v5072_v45 = vmul.f32 %v25642_v57, %v5036_v44  ;;  %v5002_v61 = vadd.f32 %v22776_v27, %v25361_v39  ;;  %v20934_v46 = vpop.f32.mrb[26].mxu0  ;;  %v748_v6 = vmul.u32 18, %v747_v40  ;;  %v25860_v30 = vsel %vm25815_vm10, 1.0, %v28315_v51 }
 0x344   : > { %5109 = vst.msk [vmem:[#allocation3 + $0xcb] sm:$0xff] %vm1040_vm2, %v5073_v34  ;;  %v5039_v42 = vmax.f32 %v5003_v55, 0.0  ;;  %v22777_v0 = vadd.f32 %v20934_v46, %v24757_v18  ;;  %v4887_v37 = vpop.f32.mrb[27].mxu0  ;;  %v5183_v2 = vld [vmem:[#allocation3 + $0xa1] sm:$0xff]  ;;  %v5184_v3 = vld [vmem:[#allocation3 + $0xa9] sm:$0xff]  ;;  %28375 = vst [vmem:[#allocation21_spill] sm:$0xff] %v25860_v30  ;;  %v927_v18 = vsel %vm25826_vm11, %v891_v32, %v25749_v5  ;;  %v926_v7 = vsel %vm25843_vm12, %v890_v63, %v25784_v1 }
 0x345   : > { %v737_v33 = vmul.u32 18, %v736_v15  ;;  %5108 = vst.msk [vmem:[#allocation3 + $0xc3] sm:$0xff] %vm1040_vm2, %v5072_v45  ;;  %v5038_v62 = vmax.f32 %v5002_v61, 0.0  ;;  %v22778_v59 = vadd.f32 %v4887_v37, %v24759_v19  ;;  %20985 = vmatprep.mubr.msk.f32.mxu1 %vm1040_vm2, %v5183_v2  ;;  %vm785_vm13 = vcmp.ne.s32.totalorder %v25848_v28, 0 }
 0x346   : > { %v5075_v40 = vmul.f32 %v25661_v56, %v5039_v42  ;;  %v5005_v4 = vadd.f32 %v22777_v0, %v25361_v39  ;;  %20986 = vmatmul.mubr.msk.f32.gmra.mrb[38].mxu1 %vm1040_vm2, %v5184_v3  ;;  %vm821_vm15 = vcmp.lt.s32.totalorder %v25848_v28, 0  ;;  %vm784_vm6 = vcmp.ne.s32.totalorder %v25853_v13, 0 }
 0x347   : > { %v5074_v19 = vmul.f32 %v25671_v47, %v5038_v62  ;;  %v5004_v50 = vadd.f32 %v22778_v59, %v25361_v39  ;;  %v20937_v26 = vpop.f32.mrb[28].mxu0  ;;  %v25880_v5 = vsub.s32 %v25723_v17, %v748_v6  ;;  %vm820_vm7 = vcmp.lt.s32.totalorder %v25853_v13, 0  ;;  %vm25907_vm3 = vmand %vm821_vm15, %vm785_vm13  ;;  %v28384_v59 = vld [vmem:[#allocation4_spill] sm:$0xff] }
 0x348   : > { %5111 = vst.msk [vmem:[#allocation3 + $0xdb] sm:$0xff] %vm1040_vm2, %v5075_v40  ;;  %v5041_v1 = vmax.f32 %v5005_v4, 0.0  ;;  %v22779_v15 = vadd.f32 %v20937_v26, %v24768_v24  ;;  %v4897_v44 = vpop.f32.mrb[29].mxu0  ;;  %v5185_v27 = vld [vmem:[#allocation3 + $0xb1] sm:$0xff]  ;;  %v5186_v11 = vld [vmem:[#allocation3 + $0xb9] sm:$0xff]  ;;  %v25886_v32 = vsub.s32 %v25733_v31, %v737_v33  ;;  %vm25891_vm8 = vcmp.lt.s32.totalorder %v927_v18, 16  ;;  %vm25918_vm0 = vmand %vm820_vm7, %vm784_vm6 }
 0x349   : > { %5110 = vst.msk [vmem:[#allocation3 + $0xd3] sm:$0xff] %vm1040_vm2, %v5074_v19  ;;  %v5040_v63 = vmax.f32 %v5004_v50, 0.0  ;;  %v22780_v34 = vadd.f32 %v4897_v44, %v24770_v25  ;;  %20988 = vmatprep.mubr.msk.f32.mxu1 %vm1040_vm2, %v5185_v27  ;;  %v893_v24 = vadd.s32 18, %v25848_v28  ;;  %vm25899_vm1 = vcmp.lt.s32.totalorder %v926_v7, 16 }
 0x34a   : > { %v5077_v55 = vmul.f32 %v25765_v23, %v5041_v1  ;;  %v5007_v52 = vadd.f32 %v22779_v15, %v25361_v39  ;;  %20989 = vmatmul.mubr.msk.f32.gmra.mrb[40].mxu1 %vm1040_vm2, %v5186_v11  ;;  %v892_v45 = vadd.s32 18, %v25853_v13  ;;  %vm787_vm14 = vcmp.ne.s32.totalorder %v25880_v5, 0 }
 0x34b   : > { %v5076_v61 = vmul.f32 %v25781_v58, %v5040_v63  ;;  %v5006_v46 = vadd.f32 %v22780_v34, %v25361_v39  ;;  %v20940_v6 = vpop.f32.mrb[30].mxu0  ;;  %vm823_vm4 = vcmp.lt.s32.totalorder %v25880_v5, 0  ;;  %vm786_vm5 = vcmp.ne.s32.totalorder %v25886_v32, 0  ;;  %v28393_v34 = vld [vmem:[#allocation5_spill] sm:$0xff] }
 0x34c   : > { %5113 = vst.msk [vmem:[#allocation3 + $0xeb] sm:$0xff] %vm1040_vm2, %v5077_v55  ;;  %v5043_v0 = vmax.f32 %v5007_v52, 0.0  ;;  %v22781_v37 = vadd.f32 %v20940_v6, %v24787_v35  ;;  %v4907_v2 = vpop.f32.mrb[31].mxu0  ;;  %v5187_v3 = vld [vmem:[#allocation3 + $0xc1] sm:$0xff]  ;;  %v5188_v33 = vld [vmem:[#allocation3 + $0xc9] sm:$0xff]  ;;  %vm822_vm9 = vcmp.lt.s32.totalorder %v25886_v32, 0  ;;  %v929_v7 = vsel %vm25907_vm3, %v893_v24, %v25848_v28  ;;  %vm25945_vm10 = vmand %vm823_vm4, %vm787_vm14 }
 0x34d   : > { %5112 = vst.msk [vmem:[#allocation3 + $0xe3] sm:$0xff] %vm1040_vm2, %v5076_v61  ;;  %v5042_v62 = vmax.f32 %v5006_v46, 0.0  ;;  %v22782_v18 = vadd.f32 %v4907_v2, %v28384_v59  ;;  %20991 = vmatprep.mubr.msk.f32.mxu1 %vm1040_vm2, %v5187_v3  ;;  %v895_v35 = vadd.s32 18, %v25880_v5  ;;  %v928_v19 = vsel %vm25918_vm0, %v892_v45, %v25853_v13  ;;  %vm25961_vm11 = vmand %vm822_vm9, %vm786_vm5  ;;  %v28394_v45 = vld [vmem:[#allocation6_spill] sm:$0xff] }
 0x34e   : > { %v5079_v40 = vmul.f32 %v25837_v12, %v5043_v0  ;;  %v5009_v4 = vadd.f32 %v22781_v37, %v25361_v39  ;;  %20992 = vmatmul.mubr.msk.f32.gmra.mrb[42].mxu1 %vm1040_vm2, %v5188_v33  ;;  %v894_v28 = vadd.s32 18, %v25886_v32  ;;  %v25954_v1 = vsel %vm25891_vm8, 1.0, %v28315_v51 }
 0x34f   : > { %v5078_v26 = vmul.f32 %v25860_v30, %v5042_v62  ;;  %28387 = vst [vmem:[#allocation4_spill] sm:$0xff] %v25954_v1  ;;  %v5008_v15 = vadd.f32 %v22782_v18, %v25361_v39  ;;  %v20943_v13 = vpop.f32.mrb[32].mxu0  ;;  %v25969_v11 = vsel %vm25899_vm1, 1.0, %v28315_v51  ;;  %vm25971_vm12 = vcmp.lt.s32.totalorder %v929_v7, 16  ;;  %v28397_v62 = vld [vmem:[#allocation7_spill] sm:$0xff] }
 0x350   : > { %5115 = vst.msk [vmem:[#allocation3 + $0xfb] sm:$0xff] %vm1040_vm2, %v5079_v40  ;;  %v5045_v27 = vmax.f32 %v5009_v4, 0.0  ;;  %28390 = vst [vmem:[#allocation22_spill] sm:$0xff] %v25969_v11  ;;  %v22783_v17 = vadd.f32 %v20943_v13, %v28393_v34  ;;  %v4917_v24 = vpop.f32.mrb[33].mxu0  ;;  %v5189_v55 = vld [vmem:[#allocation3 + $0xd1] sm:$0xff]  ;;  %v5190_v52 = vld [vmem:[#allocation3 + $0xd9] sm:$0xff]  ;;  %v931_v31 = vsel %vm25945_vm10, %v895_v35, %v25880_v5  ;;  %v930_v42 = vsel %vm25961_vm11, %v894_v28, %v25886_v32 }
 0x351   : > { %5114 = vst.msk [vmem:[#allocation3 + $0xf3] sm:$0xff] %vm1040_vm2, %v5078_v26  ;;  %v5044_v25 = vmax.f32 %v5008_v15, 0.0  ;;  %vm964_vm13 = vcmp.lt.s32.totalorder %v928_v19, 16  ;;  %v22784_v61 = vadd.f32 %v4917_v24, %v28394_v45  ;;  %20994 = vmatprep.mubr.msk.f32.mxu1 %vm1040_vm2, %v5189_v55  ;;  %v25992_v37 = vsel %vm25971_vm12, 1.0, %v28315_v51  ;;  %v28398_v40 = vld [vmem:[#allocation8_spill] sm:$0xff]  ;;  %v18078_v30 = vld [vmem:[%s28197_s3 + $0xa8] sm:$0xff] }
 0x352   : > { %v5081_v46 = vmul.f32 %v25954_v1, %v5045_v27  ;;  %v5011_v6 = vadd.f32 %v22783_v17, %v25361_v39  ;;  %20995 = vmatmul.mubr.msk.f32.gmra.mrb[44].mxu1 %vm1040_vm2, %v5190_v52  ;;  %28395 = vst [vmem:[#allocation5_spill] sm:$0xff] %v25992_v37  ;;  %v25997_v33 = vsel %vm964_vm13, 1.0, %v28315_v51  ;;  %vm967_vm15 = vcmp.lt.s32.totalorder %v931_v31, 16  ;;  %v17959_v45 = vld [vmem:[%s28197_s3 + $0x50] sm:$0xff]  ;;  %v5124_v31 = vld [vmem:[#allocation3 + $0x8] sm:$0xff] }
 0x353   : > { %v5080_v0 = vmul.f32 %v25969_v11, %v5044_v25  ;;  %v5010_v2 = vadd.f32 %v22784_v61, %v25361_v39  ;;  %v20946_v5 = vpop.f32.mrb[34].mxu0  ;;  %28396 = vst [vmem:[#allocation6_spill] sm:$0xff] %v25997_v33  ;;  %vm966_vm6 = vcmp.lt.s32.totalorder %v930_v42, 16  ;;  %v26008_v26 = vsel %vm967_vm15, 1.0, %v28315_v51  ;;  %v5123_v25 = vld [vmem:[#allocation3] sm:$0xff]  ;;  %v17998_v42 = vld [vmem:[%s28197_s3 + $0x68] sm:$0xff] }
 0x354   : > { %5117 = vst.msk [vmem:[#allocation3 + $0x10b] sm:$0xff] %vm1040_vm2, %v5081_v46  ;;  %v5047_v3 = vmax.f32 %v5011_v6, 0.0  ;;  %v22785_v59 = vadd.f32 %v20946_v5, %v28397_v62  ;;  %v4927_v32 = vpop.f32.mrb[35].mxu0  ;;  %v5191_v18 = vld [vmem:[#allocation3 + $0xe1] sm:$0xff]  ;;  %v5192_v7 = vld [vmem:[#allocation3 + $0xe9] sm:$0xff]  ;;  %28399 = vst [vmem:[#allocation7_spill] sm:$0xff] %v26008_v26 }
 0x355   : > { %5116 = vst.msk [vmem:[#allocation3 + $0x103] sm:$0xff] %vm1040_vm2, %v5080_v0  ;;  %v5046_v35 = vmax.f32 %v5010_v2, 0.0  ;;  %v22786_v4 = vadd.f32 %v4927_v32, %v28398_v40  ;;  %20997 = vmatprep.mubr.msk.f32.mxu1 %vm1040_vm2, %v5191_v18  ;;  %v26013_v44 = vsel %vm966_vm6, 1.0, %v28315_v51  ;;  %v17960_v61 = vld [vmem:[%s28197_s3 + $0x58] sm:$0xff]  ;;  %v17997_v6 = vld [vmem:[%s28197_s3 + $0x60] sm:$0xff]  ;;  %v5125_v0 = vld [vmem:[#allocation3 + $0x10] sm:$0xff] }
 0x356   : > { %v5083_v19 = vmul.f32 %v25992_v37, %v5047_v3  ;;  %v5013_v50 = vadd.f32 %v22785_v59, %v25361_v39  ;;  %20998 = vmatmul.mubr.msk.f32.gmra.mrb[46].mxu1 %vm1040_vm2, %v5192_v7  ;;  %28400 = vst [vmem:[#allocation8_spill] sm:$0xff] %v26013_v44  ;;  %v22643_v46 = vpack.c.bf16 %v17960_v61, %v17959_v45  ;;  %v28401_v2 = vld [vmem:[#allocation9_spill] sm:$0xff]  ;;  %v5126_v3 = vld [vmem:[#allocation3 + $0x18] sm:$0xff]  ;;  %v5128_v59 = vld [vmem:[#allocation3 + $0x28] sm:$0xff]  ;;  %vm28402_vm7 = vcmask 1043456  }
 0x357   : > { %v5082_v28 = vmul.f32 %v25997_v33, %v5046_v35  ;;  %v5012_v15 = vadd.f32 %v22786_v4, %v25361_v39  ;;  %v26042_v5 = vpack.c.bf16 %v17998_v42, %v17997_v6  ;;  %v5127_v62 = vld [vmem:[#allocation3 + $0x20] sm:$0xff]  ;;  %v5129_v32 = vld [vmem:[#allocation3 + $0x30] sm:$0xff]  ;;  %v5130_v18 = vld [vmem:[#allocation3 + $0x38] sm:$0xff]  ;;  %vm28404_vm1 = vcmask 31744  }
 0x358   : > { %5119 = vst.msk [vmem:[#allocation3 + $0x11b] sm:$0xff] %vm1040_vm2, %v5083_v19  ;;  %v5049_v13 = vmax.f32 %v5013_v50, 0.0  ;;  %v5193_v27 = vld [vmem:[#allocation3 + $0xf1] sm:$0xff]  ;;  %v5194_v63 = vld [vmem:[#allocation3 + $0xf9] sm:$0xff]  ;;  %v5132_v35 = vld [vmem:[#allocation3 + $0x48] sm:$0xff] }
 0x359   : > { %5118 = vst.msk [vmem:[#allocation3 + $0x113] sm:$0xff] %vm1040_vm2, %v5082_v28  ;;  %v5048_v34 = vmax.f32 %v5012_v15, 0.0  ;;  %21000 = vmatprep.mubr.msk.f32.mxu1 %vm1040_vm2, %v5193_v27  ;;  %v5131_v7 = vld [vmem:[#allocation3 + $0x40] sm:$0xff]  ;;  %v5133_v40 = vld [vmem:[#allocation3 + $0x50] sm:$0xff]  ;;  %v5134_v4 = vld [vmem:[#allocation3 + $0x58] sm:$0xff] }
 0x35a   : > { %v5085_v17 = vmul.f32 %v26008_v26, %v5049_v13  ;;  %21001 = vmatmul.mubr.msk.f32.gmra.mrb[48].mxu1 %vm1040_vm2, %v5194_v63  ;;  %v5135_v19 = vld [vmem:[#allocation3 + $0x60] sm:$0xff]  ;;  %v5136_v50 = vld [vmem:[#allocation3 + $0x68] sm:$0xff]  ;;  %v5137_v28 = vld [vmem:[#allocation3 + $0x70] sm:$0xff] }
 0x35b   : > { %v5084_v24 = vmul.f32 %v26013_v44, %v5048_v34  ;;  %v5138_v15 = vld [vmem:[#allocation3 + $0x78] sm:$0xff]  ;;  %v5139_v13 = vld [vmem:[#allocation3 + $0x80] sm:$0xff]  ;;  %v5140_v27 = vld [vmem:[#allocation3 + $0x88] sm:$0xff] }
 0x35c   : > { %5121 = vst.msk [vmem:[#allocation3 + $0x12b] sm:$0xff] %vm1040_vm2, %v5085_v17  ;;  %v5195_v39 = vld [vmem:[#allocation3 + $0x101] sm:$0xff]  ;;  %v5196_v55 = vld [vmem:[#allocation3 + $0x109] sm:$0xff]  ;;  %v5142_v34 = vld [vmem:[#allocation3 + $0x98] sm:$0xff] }
 0x35d   : > { %5120 = vst.msk [vmem:[#allocation3 + $0x123] sm:$0xff] %vm1040_vm2, %v5084_v24  ;;  %21003 = vmatprep.mubr.msk.f32.mxu1 %vm1040_vm2, %v5195_v39  ;;  %v5141_v63 = vld [vmem:[#allocation3 + $0x90] sm:$0xff]  ;;  %v5143_v17 = vld [vmem:[#allocation3 + $0xa0] sm:$0xff]  ;;  %v5144_v24 = vld [vmem:[#allocation3 + $0xa8] sm:$0xff] }
 0x35e   : > { %21004 = vmatmul.mubr.msk.f32.gmra.mrb[50].mxu1 %vm1040_vm2, %v5196_v55  ;;  %v5145_v39 = vld [vmem:[#allocation3 + $0xb0] sm:$0xff]  ;;  %v5146_v55 = vld [vmem:[#allocation3 + $0xb8] sm:$0xff]  ;;  %v5151_v61 = vld [vmem:[#allocation3 + $0xe0] sm:$0xff] }
 0x35f   : > { %v5150_v45 = vld [vmem:[#allocation3 + $0xd8] sm:$0xff]  ;;  %v5155_v42 = vld [vmem:[#allocation3 + $0x100] sm:$0xff]  ;;  %v18077_v1 = vld [vmem:[%s28197_s3 + $0xa0] sm:$0xff] }
 0x360   : > { %v5197_v51 = vld [vmem:[#allocation3 + $0x111] sm:$0xff]  ;;  %v5198_v52 = vld [vmem:[#allocation3 + $0x119] sm:$0xff]  ;;  %v22663_v12 = vpack.c.bf16 %v18078_v30, %v18077_v1  ;;  %vm28403_vm8 = vmmov %vm28402_vm7 }
 0x361   : > { %21006 = vmatprep.mubr.msk.f32.mxu1 %vm1040_vm2, %v5197_v51  ;;  %v5147_v51 = vld [vmem:[#allocation3 + $0xc0] sm:$0xff]  ;;  %v5154_v6 = vld [vmem:[#allocation3 + $0xf8] sm:$0xff]  ;;  %vm28405_vm3 = vmmov %vm28402_vm7 }
 0x362   : > { %21007 = vmatmul.mubr.msk.f32.gmra.mrb[52].mxu1 %vm1040_vm2, %v5198_v52  ;;  %v5148_v52 = vld [vmem:[#allocation3 + $0xc8] sm:$0xff]  ;;  %v5944_v44 = vld [vmem:[#allocation3 + $0x112] sm:$0xff]  ;;  %v5945_v26 = vld [vmem:[#allocation3 + $0x11a] sm:$0xff] }
 0x363   : > { %21017 = vmatprep.mubr.msk.f32.mxu1 %vm1040_vm2, %v5123_v25  ;;  %v5149_v25 = vld [vmem:[#allocation3 + $0xd0] sm:$0xff]  ;;  %v18039_v33 = vld [vmem:[%s28197_s3 + $0x90] sm:$0xff]  ;;  %v18040_v37 = vld [vmem:[%s28197_s3 + $0x98] sm:$0xff] }
 0x364   : > { %v22659_v11 = vpack.c.bf16 %v18040_v37, %v18039_v33  ;;  %v6374_v30 = vld [vmem:[#allocation3 + $0x122] sm:$0xff]  ;;  %v6375_v1 = vld [vmem:[#allocation3 + $0x12a] sm:$0xff]  ;;  %v6770_v33 = vld [vmem:[#allocation3 + $0x13] sm:$0xff] }
 0x365   : > { %v18080_v37 = vld [vmem:[%s28197_s3 + $0xb8] sm:$0xff]  ;;  %vm28406_vm0 = vmmov %vm28404_vm1 }
 0x366   : > { %21018 = vmatmul.mubr.msk.f32.vlgmr.msra.gmra.mrb[18].mxu1 %vm1040_vm2, %v5124_v31  ;;  %v5152_v31 = vld [vmem:[#allocation3 + $0xe8] sm:$0xff]  ;;  %vm28407_vm14 = vmmov %vm28405_vm3 }
 0x367   : > { %22642 = vmatpush3.bf16.msra.mxu1 %v28401_v2  ;;  %21020 = vmatprep.mubr.msk.f32.mxu1 %vm1040_vm2, %v5125_v0  ;;  %v5156_v0 = vld [vmem:[#allocation3 + $0x108] sm:$0xff]  ;;  %v5157_v2 = vld [vmem:[#allocation3 + $0x110] sm:$0xff]  ;;  %vm28408_vm4 = vmmov %vm28405_vm3 }
 0x368   : > { %22644 = vmatprep.subr.bf16.mxu1 %v22643_v46  ;;  %vm28409_vm5 = vmmov %vm28406_vm0 }
 0x369   : > { %vm28410_vm9 = vmmov %vm28406_vm0 }
 0x36a   : > { %21021 = vmatmul.mubr.msk.f32.gmra.mrb[20].mxu1 %vm1040_vm2, %v5126_v3  ;;  %v5910_v3 = vld [vmem:[#allocation3 + $0x2] sm:$0xff]  ;;  %vm28411_vm10 = vmmov %vm28406_vm0 }
 0x36b   : > { %21023 = vmatprep.mubr.msk.f32.mxu1 %vm1040_vm2, %v5127_v62  ;;  %22646 = vmatpush3.bf16.msra.mxu1 %v22643_v46  ;;  %v5153_v46 = vld [vmem:[#allocation3 + $0xf0] sm:$0xff]  ;;  %v5158_v62 = vld [vmem:[#allocation3 + $0x118] sm:$0xff]  ;;  %vm28412_vm11 = vmmov %vm28406_vm0 }
 0x36c   : > { %22648 = vmatprep.subr.bf16.mxu1 %v26042_v5  ;;  %vm28414_vm12 = vmmov %vm28406_vm0 }
 0x36d   : > { %vm28415_vm13 = vmmov %vm28406_vm0 }
 0x36e   : > { %21024 = vmatmul.mubr.msk.f32.gmra.mrb[22].mxu1 %vm1040_vm2, %v5128_v59  ;;  %v17999_v59 = vld [vmem:[%s28197_s3 + $0x70] sm:$0xff]  ;;  %vm28416_vm15 = vmmov %vm28406_vm0 }
 0x36f   : > { %21026 = vmatprep.mubr.msk.f32.mxu1 %vm1040_vm2, %v5129_v32  ;;  %v18000_v32 = vld [vmem:[%s28197_s3 + $0x78] sm:$0xff]  ;;  %vm28417_vm6 = vmmov %vm28406_vm0 }
 0x372   : > { %21027 = vmatmul.mubr.msk.f32.gmra.mrb[24].mxu1 %vm1040_vm2, %v5130_v18  ;;  %v5911_v18 = vld [vmem:[#allocation3 + $0xa] sm:$0xff] }
 0x373   : > { %21029 = vmatprep.mubr.msk.f32.mxu1 %vm1040_vm2, %v5131_v7  ;;  %v22651_v7 = vpack.c.bf16 %v18000_v32, %v17999_v59  ;;  %v5938_v59 = vld [vmem:[#allocation3 + $0xe2] sm:$0xff]  ;;  %v5939_v32 = vld [vmem:[#allocation3 + $0xea] sm:$0xff] }
 0x376   : > { %21030 = vmatmul.mubr.msk.f32.gmra.mrb[26].mxu1 %vm1040_vm2, %v5132_v35  ;;  %v18037_v35 = vld [vmem:[%s28197_s3 + $0x80] sm:$0xff] }
 0x377   : > { %21032 = vmatprep.mubr.msk.f32.mxu1 %vm1040_vm2, %v5133_v40  ;;  %v18038_v40 = vld [vmem:[%s28197_s3 + $0x88] sm:$0xff] }
 0x37a   : > { %21033 = vmatmul.mubr.msk.f32.gmra.mrb[28].mxu1 %vm1040_vm2, %v5134_v4  ;;  %v26092_v4 = vld [vmem:[#allocation3 + $0x12] sm:$0xff] }
 0x37b   : > { %21035 = vmatprep.mubr.msk.f32.mxu1 %vm1040_vm2, %v5135_v19  ;;  %v26097_v19 = vpack.c.bf16 %v18038_v40, %v18037_v35  ;;  %v5942_v35 = vld [vmem:[#allocation3 + $0x102] sm:$0xff]  ;;  %v5943_v40 = vld [vmem:[#allocation3 + $0x10a] sm:$0xff] }
 0x37e   : > { %21036 = vmatmul.mubr.msk.f32.gmra.mrb[30].mxu1 %vm1040_vm2, %v5136_v50  ;;  %v26099_v50 = vld [vmem:[#allocation3 + $0x1a] sm:$0xff] }
 0x37f   : > { %21038 = vmatprep.mubr.msk.f32.mxu1 %vm1040_vm2, %v5137_v28  ;;  %v26103_v28 = vld [vmem:[#allocation3 + $0x22] sm:$0xff] }
 0x382   : > { %21039 = vmatmul.mubr.msk.f32.gmra.mrb[32].mxu1 %vm1040_vm2, %v5138_v15  ;;  %v26112_v15 = vld [vmem:[#allocation3 + $0x32] sm:$0xff] }
 0x383   : > { %21041 = vmatprep.mubr.msk.f32.mxu1 %vm1040_vm2, %v5139_v13  ;;  %v26116_v13 = vld [vmem:[#allocation3 + $0x3a] sm:$0xff] }
 0x386   : > { %21042 = vmatmul.mubr.msk.f32.gmra.mrb[34].mxu1 %vm1040_vm2, %v5140_v27  ;;  %v26120_v27 = vld [vmem:[#allocation3 + $0x42] sm:$0xff] }
 0x387   : > { %21044 = vmatprep.mubr.msk.f32.mxu1 %vm1040_vm2, %v5141_v63  ;;  %v26124_v63 = vld [vmem:[#allocation3 + $0x4a] sm:$0xff] }
 0x38a   : > { %21045 = vmatmul.mubr.msk.f32.gmra.mrb[36].mxu1 %vm1040_vm2, %v5142_v34  ;;  %v26128_v34 = vld [vmem:[#allocation3 + $0x52] sm:$0xff] }
 0x38b   : > { %21047 = vmatprep.mubr.msk.f32.mxu1 %vm1040_vm2, %v5143_v17  ;;  %v26132_v17 = vld [vmem:[#allocation3 + $0x5a] sm:$0xff] }
 0x38e   : > { %21048 = vmatmul.mubr.msk.f32.gmra.mrb[38].mxu1 %vm1040_vm2, %v5144_v24  ;;  %v26136_v24 = vld [vmem:[#allocation3 + $0x62] sm:$0xff] }
 0x38f   : > { %21050 = vmatprep.mubr.msk.f32.mxu1 %vm1040_vm2, %v5145_v39  ;;  %v26140_v39 = vld [vmem:[#allocation3 + $0x6a] sm:$0xff] }
 0x392   : > { %21051 = vmatmul.mubr.msk.f32.gmra.mrb[40].mxu1 %vm1040_vm2, %v5146_v55  ;;  %v26144_v55 = vld [vmem:[#allocation3 + $0x72] sm:$0xff] }
 0x393   : > { %21053 = vmatprep.mubr.msk.f32.mxu1 %vm1040_vm2, %v5147_v51  ;;  %v26148_v51 = vld [vmem:[#allocation3 + $0x7a] sm:$0xff] }
 0x396   : > { %21054 = vmatmul.mubr.msk.f32.gmra.mrb[42].mxu1 %vm1040_vm2, %v5148_v52  ;;  %v26152_v52 = vld [vmem:[#allocation3 + $0x82] sm:$0xff] }
 0x397   : > { %21056 = vmatprep.mubr.msk.f32.mxu1 %vm1040_vm2, %v5149_v25  ;;  %v26156_v25 = vld [vmem:[#allocation3 + $0x8a] sm:$0xff] }
 0x39a   : > { %21057 = vmatmul.mubr.msk.f32.gmra.mrb[44].mxu1 %vm1040_vm2, %v5150_v45  ;;  %v5928_v45 = vld [vmem:[#allocation3 + $0x92] sm:$0xff] }
 0x39b   : > { %21059 = vmatprep.mubr.msk.f32.mxu1 %vm1040_vm2, %v5151_v61  ;;  %v5929_v61 = vld [vmem:[#allocation3 + $0x9a] sm:$0xff] }
 0x39e   : > { %21060 = vmatmul.mubr.msk.f32.gmra.mrb[46].mxu1 %vm1040_vm2, %v5152_v31  ;;  %v5930_v31 = vld [vmem:[#allocation3 + $0xa2] sm:$0xff] }
 0x39f   : > { %21062 = vmatprep.mubr.msk.f32.mxu1 %vm1040_vm2, %v5153_v46  ;;  %v5931_v46 = vld [vmem:[#allocation3 + $0xaa] sm:$0xff] }
 0x3a2   : > { %21063 = vmatmul.mubr.msk.f32.gmra.mrb[48].mxu1 %vm1040_vm2, %v5154_v6  ;;  %v5932_v6 = vld [vmem:[#allocation3 + $0xb2] sm:$0xff] }
 0x3a3   : > { %21065 = vmatprep.mubr.msk.f32.mxu1 %vm1040_vm2, %v5155_v42  ;;  %v5933_v42 = vld [vmem:[#allocation3 + $0xba] sm:$0xff] }
 0x3a6   : > { %21066 = vmatmul.mubr.msk.f32.gmra.mrb[50].mxu1 %vm1040_vm2, %v5156_v0  ;;  %v5934_v0 = vld [vmem:[#allocation3 + $0xc2] sm:$0xff] }
 0x3a7   : > { %21068 = vmatprep.mubr.msk.f32.mxu1 %vm1040_vm2, %v5157_v2  ;;  %v5935_v2 = vld [vmem:[#allocation3 + $0xca] sm:$0xff] }
 0x3aa   : > { %21069 = vmatmul.mubr.msk.f32.gmra.mrb[52].mxu1 %vm1040_vm2, %v5158_v62  ;;  %v5937_v62 = vld [vmem:[#allocation3 + $0xda] sm:$0xff] }
 0x3ab   : > { %21079 = vmatprep.mubr.msk.f32.mxu1 %vm1040_vm2, %v5910_v3  ;;  %v5936_v3 = vld [vmem:[#allocation3 + $0xd2] sm:$0xff] }
 0x3ae   : > { %21080 = vmatmul.mubr.msk.f32.vlgmr.msra.gmra.mrb[18].mxu1 %vm1040_vm2, %v5911_v18  ;;  %v5940_v18 = vld [vmem:[#allocation3 + $0xf2] sm:$0xff] }
 0x3af   : > { %22650 = vmatpush3.bf16.msra.mxu1 %v26042_v5  ;;  %21082 = vmatprep.mubr.msk.f32.mxu1 %vm1040_vm2, %v26092_v4  ;;  %v26108_v5 = vld [vmem:[#allocation3 + $0x2a] sm:$0xff] }
 0x3b0   : > { %22652 = vmatprep.subr.bf16.mxu1 %v22651_v7 }
 0x3b2   : > { %21083 = vmatmul.mubr.msk.f32.gmra.mrb[20].mxu1 %vm1040_vm2, %v26099_v50 }
 0x3b3   : > { %21085 = vmatprep.mubr.msk.f32.mxu1 %vm1040_vm2, %v26103_v28  ;;  %22654 = vmatpush3.bf16.msra.mxu1 %v22651_v7  ;;  %v5941_v7 = vld [vmem:[#allocation3 + $0xfa] sm:$0xff] }
 0x3b4   : > { %22656 = vmatprep.subr.bf16.mxu1 %v26097_v19 }
 0x3b6   : > { %21086 = vmatmul.mubr.msk.f32.gmra.mrb[22].mxu1 %vm1040_vm2, %v26108_v5 }
 0x3b7   : > { %21088 = vmatprep.mubr.msk.f32.mxu1 %vm1040_vm2, %v26112_v15 }
 0x3ba   : > { %21089 = vmatmul.mubr.msk.f32.gmra.mrb[24].mxu1 %vm1040_vm2, %v26116_v13 }
 0x3bb   : > { %21091 = vmatprep.mubr.msk.f32.mxu1 %vm1040_vm2, %v26120_v27 }
 0x3be   : > { %21092 = vmatmul.mubr.msk.f32.gmra.mrb[26].mxu1 %vm1040_vm2, %v26124_v63 }
 0x3bf   : > { %21094 = vmatprep.mubr.msk.f32.mxu1 %vm1040_vm2, %v26128_v34 }
 0x3c2   : > { %21095 = vmatmul.mubr.msk.f32.gmra.mrb[28].mxu1 %vm1040_vm2, %v26132_v17 }
 0x3c3   : > { %21097 = vmatprep.mubr.msk.f32.mxu1 %vm1040_vm2, %v26136_v24 }
 0x3c6   : > { %21098 = vmatmul.mubr.msk.f32.gmra.mrb[30].mxu1 %vm1040_vm2, %v26140_v39 }
 0x3c7   : > { %21100 = vmatprep.mubr.msk.f32.mxu1 %vm1040_vm2, %v26144_v55 }
 0x3ca   : > { %21101 = vmatmul.mubr.msk.f32.gmra.mrb[32].mxu1 %vm1040_vm2, %v26148_v51 }
 0x3cb   : > { %21103 = vmatprep.mubr.msk.f32.mxu1 %vm1040_vm2, %v26152_v52 }
 0x3ce   : > { %21104 = vmatmul.mubr.msk.f32.gmra.mrb[34].mxu1 %vm1040_vm2, %v26156_v25 }
 0x3cf   : > { %21106 = vmatprep.mubr.msk.f32.mxu1 %vm1040_vm2, %v5928_v45 }
 0x3d2   : > { %21107 = vmatmul.mubr.msk.f32.gmra.mrb[36].mxu1 %vm1040_vm2, %v5929_v61 }
 0x3d3   : > { %21109 = vmatprep.mubr.msk.f32.mxu1 %vm1040_vm2, %v5930_v31 }
 0x3d6   : > { %21110 = vmatmul.mubr.msk.f32.gmra.mrb[38].mxu1 %vm1040_vm2, %v5931_v46 }
 0x3d7   : > { %21112 = vmatprep.mubr.msk.f32.mxu1 %vm1040_vm2, %v5932_v6 }
 0x3da   : > { %21113 = vmatmul.mubr.msk.f32.gmra.mrb[40].mxu1 %vm1040_vm2, %v5933_v42 }
 0x3db   : > { %21115 = vmatprep.mubr.msk.f32.mxu1 %vm1040_vm2, %v5934_v0 }
 0x3de   : > { %21116 = vmatmul.mubr.msk.f32.gmra.mrb[42].mxu1 %vm1040_vm2, %v5935_v2 }
 0x3df   : > { %21118 = vmatprep.mubr.msk.f32.mxu1 %vm1040_vm2, %v5936_v3 }
 0x3e2   : > { %21119 = vmatmul.mubr.msk.f32.gmra.mrb[44].mxu1 %vm1040_vm2, %v5937_v62 }
 0x3e3   : > { %21121 = vmatprep.mubr.msk.f32.mxu1 %vm1040_vm2, %v5938_v59 }
 0x3e6   : > { %21122 = vmatmul.mubr.msk.f32.gmra.mrb[46].mxu1 %vm1040_vm2, %v5939_v32 }
 0x3e7   : > { %21124 = vmatprep.mubr.msk.f32.mxu1 %vm1040_vm2, %v5940_v18 }
 0x3ea   : > { %21125 = vmatmul.mubr.msk.f32.gmra.mrb[48].mxu1 %vm1040_vm2, %v5941_v7 }
 0x3eb   : > { %21127 = vmatprep.mubr.msk.f32.mxu1 %vm1040_vm2, %v5942_v35 }
 0x3ee   : > { %21128 = vmatmul.mubr.msk.f32.gmra.mrb[50].mxu1 %vm1040_vm2, %v5943_v40 }
 0x3ef   : > { %21130 = vmatprep.mubr.msk.f32.mxu1 %vm1040_vm2, %v5944_v44 }
 0x3f2   : > { %21131 = vmatmul.mubr.msk.f32.gmra.mrb[52].mxu1 %vm1040_vm2, %v5945_v26 }
 0x3f3   : > { %21141 = vmatprep.mubr.msk.f32.mxu1 %vm1040_vm2, %v26092_v4  ;;  %v6771_v4 = vld [vmem:[#allocation3 + $0x1b] sm:$0xff] }
 0x3f6   : > { %21142 = vmatmul.mubr.msk.f32.vlgmr.msra.gmra.mrb[18].mxu1 %vm1040_vm2, %v26099_v50  ;;  %v6772_v50 = vld [vmem:[#allocation3 + $0x23] sm:$0xff] }
 0x3f7   : > { %22658 = vmatpush3.bf16.msra.mxu1 %v26097_v19  ;;  %21144 = vmatprep.mubr.msk.f32.mxu1 %vm1040_vm2, %v26103_v28  ;;  %v18118_v19 = vld [vmem:[%s28197_s3 + $0xc8] sm:$0xff] }
 0x3f8   : > { %22660 = vmatprep.subr.bf16.mxu1 %v22659_v11 }
 0x3fa   : > { %21145 = vmatmul.mubr.msk.f32.gmra.mrb[20].mxu1 %vm1040_vm2, %v26108_v5  ;;  %v6773_v5 = vld [vmem:[#allocation3 + $0x2b] sm:$0xff] }
 0x3fb   : > { %21147 = vmatprep.mubr.msk.f32.mxu1 %vm1040_vm2, %v26112_v15  ;;  %22662 = vmatpush3.bf16.msra.mxu1 %v22659_v11  ;;  %v18079_v11 = vld [vmem:[%s28197_s3 + $0xb0] sm:$0xff] }
 0x3fc   : > { %22664 = vmatprep.subr.bf16.mxu1 %v22663_v12  ;;  %v6774_v15 = vld [vmem:[#allocation3 + $0x33] sm:$0xff] }
 0x3fe   : > { %21148 = vmatmul.mubr.msk.f32.gmra.mrb[22].mxu1 %vm1040_vm2, %v26116_v13  ;;  %v6775_v13 = vld [vmem:[#allocation3 + $0x3b] sm:$0xff] }
 0x3ff   : > { %21150 = vmatprep.mubr.msk.f32.mxu1 %vm1040_vm2, %v26120_v27  ;;  %v6776_v27 = vld [vmem:[#allocation3 + $0x43] sm:$0xff] }
 0x402   : > { %21151 = vmatmul.mubr.msk.f32.gmra.mrb[24].mxu1 %vm1040_vm2, %v26124_v63  ;;  %v6778_v63 = vld [vmem:[#allocation3 + $0x53] sm:$0xff] }
 0x403   : > { %21153 = vmatprep.mubr.msk.f32.mxu1 %vm1040_vm2, %v26128_v34  ;;  %v6779_v34 = vld [vmem:[#allocation3 + $0x5b] sm:$0xff] }
 0x406   : > { %21154 = vmatmul.mubr.msk.f32.gmra.mrb[26].mxu1 %vm1040_vm2, %v26132_v17  ;;  %v6780_v17 = vld [vmem:[#allocation3 + $0x63] sm:$0xff] }
 0x407   : > { %21156 = vmatprep.mubr.msk.f32.mxu1 %vm1040_vm2, %v26136_v24  ;;  %v6781_v24 = vld [vmem:[#allocation3 + $0x6b] sm:$0xff] }
 0x40a   : > { %21157 = vmatmul.mubr.msk.f32.gmra.mrb[28].mxu1 %vm1040_vm2, %v26140_v39  ;;  %v6782_v39 = vld [vmem:[#allocation3 + $0x73] sm:$0xff] }
 0x40b   : > { %21159 = vmatprep.mubr.msk.f32.mxu1 %vm1040_vm2, %v26144_v55  ;;  %v6783_v55 = vld [vmem:[#allocation3 + $0x7b] sm:$0xff] }
 0x40e   : > { %21160 = vmatmul.mubr.msk.f32.gmra.mrb[30].mxu1 %vm1040_vm2, %v26148_v51  ;;  %v6784_v51 = vld [vmem:[#allocation3 + $0x83] sm:$0xff] }
 0x40f   : > { %21162 = vmatprep.mubr.msk.f32.mxu1 %vm1040_vm2, %v26152_v52  ;;  %v6785_v52 = vld [vmem:[#allocation3 + $0x8b] sm:$0xff] }
 0x412   : > { %21163 = vmatmul.mubr.msk.f32.gmra.mrb[32].mxu1 %vm1040_vm2, %v26156_v25  ;;  %v6786_v25 = vld [vmem:[#allocation3 + $0x93] sm:$0xff] }
 0x413   : > { %21165 = vmatprep.mubr.msk.f32.mxu1 %vm1040_vm2, %v5928_v45  ;;  %v6787_v45 = vld [vmem:[#allocation3 + $0x9b] sm:$0xff] }
 0x416   : > { %21166 = vmatmul.mubr.msk.f32.gmra.mrb[34].mxu1 %vm1040_vm2, %v5929_v61  ;;  %v6788_v61 = vld [vmem:[#allocation3 + $0xa3] sm:$0xff] }
 0x417   : > { %21168 = vmatprep.mubr.msk.f32.mxu1 %vm1040_vm2, %v5930_v31  ;;  %v6789_v31 = vld [vmem:[#allocation3 + $0xab] sm:$0xff] }
 0x41a   : > { %21169 = vmatmul.mubr.msk.f32.gmra.mrb[36].mxu1 %vm1040_vm2, %v5931_v46  ;;  %v6790_v46 = vld [vmem:[#allocation3 + $0xb3] sm:$0xff] }
 0x41b   : > { %21171 = vmatprep.mubr.msk.f32.mxu1 %vm1040_vm2, %v5932_v6  ;;  %v6791_v6 = vld [vmem:[#allocation3 + $0xbb] sm:$0xff] }
 0x41e   : > { %21172 = vmatmul.mubr.msk.f32.gmra.mrb[38].mxu1 %vm1040_vm2, %v5933_v42  ;;  %v6792_v42 = vld [vmem:[#allocation3 + $0xc3] sm:$0xff] }
 0x41f   : > { %21174 = vmatprep.mubr.msk.f32.mxu1 %vm1040_vm2, %v5934_v0  ;;  %v6793_v0 = vld [vmem:[#allocation3 + $0xcb] sm:$0xff] }
 0x422   : > { %21175 = vmatmul.mubr.msk.f32.gmra.mrb[40].mxu1 %vm1040_vm2, %v5935_v2  ;;  %v6794_v2 = vld [vmem:[#allocation3 + $0xd3] sm:$0xff] }
 0x423   : > { %21177 = vmatprep.mubr.msk.f32.mxu1 %vm1040_vm2, %v5936_v3  ;;  %v6795_v3 = vld [vmem:[#allocation3 + $0xdb] sm:$0xff] }
 0x426   : > { %21178 = vmatmul.mubr.msk.f32.gmra.mrb[42].mxu1 %vm1040_vm2, %v5937_v62  ;;  %v6796_v62 = vld [vmem:[#allocation3 + $0xe3] sm:$0xff] }
 0x427   : > { %21180 = vmatprep.mubr.msk.f32.mxu1 %vm1040_vm2, %v5938_v59  ;;  %v6797_v59 = vld [vmem:[#allocation3 + $0xeb] sm:$0xff] }
 0x42a   : > { %21181 = vmatmul.mubr.msk.f32.gmra.mrb[44].mxu1 %vm1040_vm2, %v5939_v32  ;;  %v6798_v32 = vld [vmem:[#allocation3 + $0xf3] sm:$0xff] }
 0x42b   : > { %21183 = vmatprep.mubr.msk.f32.mxu1 %vm1040_vm2, %v5940_v18  ;;  %v6799_v18 = vld [vmem:[#allocation3 + $0xfb] sm:$0xff] }
 0x42e   : > { %21184 = vmatmul.mubr.msk.f32.gmra.mrb[46].mxu1 %vm1040_vm2, %v5941_v7  ;;  %v6800_v7 = vld [vmem:[#allocation3 + $0x103] sm:$0xff] }
 0x42f   : > { %21186 = vmatprep.mubr.msk.f32.mxu1 %vm1040_vm2, %v5942_v35  ;;  %v6801_v35 = vld [vmem:[#allocation3 + $0x10b] sm:$0xff] }
 0x432   : > { %21187 = vmatmul.mubr.msk.f32.gmra.mrb[48].mxu1 %vm1040_vm2, %v5943_v40  ;;  %v6802_v40 = vld [vmem:[#allocation3 + $0x113] sm:$0xff] }
 0x433   : > { %21189 = vmatprep.mubr.msk.f32.mxu1 %vm1040_vm2, %v5944_v44  ;;  %v22667_v44 = vpack.c.bf16 %v18080_v37, %v18079_v11  ;;  %v6805_v11 = vld [vmem:[#allocation3 + $0x12b] sm:$0xff]  ;;  %v18119_v37 = vld [vmem:[%s28197_s3 + $0xd0] sm:$0xff] }
 0x436   : > { %21190 = vmatmul.mubr.msk.f32.gmra.mrb[50].mxu1 %vm1040_vm2, %v5945_v26  ;;  %v18117_v26 = vld [vmem:[%s28197_s3 + $0xc0] sm:$0xff] }
 0x437   : > { %21192 = vmatprep.mubr.msk.f32.mxu1 %vm1040_vm2, %v6374_v30  ;;  %v26258_v28 = vpack.c.bf16 %v18118_v19, %v18117_v26  ;;  %v6803_v30 = vld [vmem:[#allocation3 + $0x11b] sm:$0xff]  ;;  %v18157_v19 = vld [vmem:[%s28197_s3 + $0xe0] sm:$0xff] }
 0x438   : > { %v7201_v26 = vld [vmem:[#allocation3 + $0x1c] sm:$0xff] }
 0x43a   : > { %21193 = vmatmul.mubr.msk.f32.gmra.mrb[52].mxu1 %vm1040_vm2, %v6375_v1  ;;  %v6804_v1 = vld [vmem:[#allocation3 + $0x123] sm:$0xff] }
 0x43b   : > { %21203 = vmatprep.mubr.msk.f32.mxu1 %vm1040_vm2, %v6770_v33  ;;  %v18120_v33 = vld [vmem:[%s28197_s3 + $0xd8] sm:$0xff] }
 0x43e   : > { %21204 = vmatmul.mubr.msk.f32.vlgmr.msra.gmra.mrb[18].mxu1 %vm1040_vm2, %v6771_v4  ;;  %v22675_v4 = vpack.c.bf16 %v18120_v33, %v18119_v37  ;;  %v7235_v37 = vld [vmem:[#allocation3 + $0x12c] sm:$0xff]  ;;  %v18159_v33 = vld [vmem:[%s28197_s3 + $0xf0] sm:$0xff] }
 0x43f   : > { %22666 = vmatpush3.bf16.msra.mxu1 %v22663_v12  ;;  %21206 = vmatprep.mubr.msk.f32.mxu1 %vm1040_vm2, %v6772_v50  ;;  %v6777_v12 = vld [vmem:[#allocation3 + $0x4b] sm:$0xff] }
 0x440   : > { %22668 = vmatprep.subr.bf16.mxu1 %v22667_v44  ;;  %v18158_v50 = vld [vmem:[%s28197_s3 + $0xe8] sm:$0xff] }
 0x442   : > { %21207 = vmatmul.mubr.msk.f32.gmra.mrb[20].mxu1 %vm1040_vm2, %v6773_v5  ;;  %v26308_v5 = vld [vmem:[#allocation3 + $0x24] sm:$0xff] }
 0x443   : > { %21209 = vmatprep.mubr.msk.f32.mxu1 %vm1040_vm2, %v6774_v15  ;;  %22670 = vmatpush3.bf16.msra.mxu1 %v22667_v44  ;;  %v7200_v44 = vld [vmem:[#allocation3 + $0x14] sm:$0xff]  ;;  %v26313_v15 = vpack.c.bf16 %v18158_v50, %v18157_v19 }
 0x444   : > { %22672 = vmatprep.subr.bf16.mxu1 %v26258_v28  ;;  %v18198_v19 = vld [vmem:[%s28197_s3 + $0x108] sm:$0xff] }
 0x446   : > { %21210 = vmatmul.mubr.msk.f32.gmra.mrb[22].mxu1 %vm1040_vm2, %v6775_v13  ;;  %v26315_v13 = vld [vmem:[#allocation3 + $0x2c] sm:$0xff] }
 0x447   : > { %21212 = vmatprep.mubr.msk.f32.mxu1 %vm1040_vm2, %v6776_v27  ;;  %v26319_v27 = vld [vmem:[#allocation3 + $0x34] sm:$0xff] }
 0x44a   : > { %21213 = vmatmul.mubr.msk.f32.gmra.mrb[24].mxu1 %vm1040_vm2, %v6777_v12  ;;  %v26328_v12 = vld [vmem:[#allocation3 + $0x44] sm:$0xff] }
 0x44b   : > { %21215 = vmatprep.mubr.msk.f32.mxu1 %vm1040_vm2, %v6778_v63  ;;  %v26332_v63 = vld [vmem:[#allocation3 + $0x4c] sm:$0xff] }
 0x44e   : > { %21216 = vmatmul.mubr.msk.f32.gmra.mrb[26].mxu1 %vm1040_vm2, %v6779_v34  ;;  %v26336_v34 = vld [vmem:[#allocation3 + $0x54] sm:$0xff] }
 0x44f   : > { %21218 = vmatprep.mubr.msk.f32.mxu1 %vm1040_vm2, %v6780_v17  ;;  %v26340_v17 = vld [vmem:[#allocation3 + $0x5c] sm:$0xff] }
 0x452   : > { %21219 = vmatmul.mubr.msk.f32.gmra.mrb[28].mxu1 %vm1040_vm2, %v6781_v24  ;;  %v26344_v24 = vld [vmem:[#allocation3 + $0x64] sm:$0xff] }
 0x453   : > { %21221 = vmatprep.mubr.msk.f32.mxu1 %vm1040_vm2, %v6782_v39  ;;  %v26348_v39 = vld [vmem:[#allocation3 + $0x6c] sm:$0xff] }
 0x456   : > { %21222 = vmatmul.mubr.msk.f32.gmra.mrb[30].mxu1 %vm1040_vm2, %v6783_v55  ;;  %v26352_v55 = vld [vmem:[#allocation3 + $0x74] sm:$0xff] }
 0x457   : > { %21224 = vmatprep.mubr.msk.f32.mxu1 %vm1040_vm2, %v6784_v51  ;;  %v26356_v51 = vld [vmem:[#allocation3 + $0x7c] sm:$0xff] }
 0x45a   : > { %21225 = vmatmul.mubr.msk.f32.gmra.mrb[32].mxu1 %vm1040_vm2, %v6785_v52  ;;  %v26360_v52 = vld [vmem:[#allocation3 + $0x84] sm:$0xff] }
 0x45b   : > { %21227 = vmatprep.mubr.msk.f32.mxu1 %vm1040_vm2, %v6786_v25  ;;  %v26364_v25 = vld [vmem:[#allocation3 + $0x8c] sm:$0xff] }
 0x45e   : > { %21228 = vmatmul.mubr.msk.f32.gmra.mrb[34].mxu1 %vm1040_vm2, %v6787_v45  ;;  %v26368_v45 = vld [vmem:[#allocation3 + $0x94] sm:$0xff] }
 0x45f   : > { %21230 = vmatprep.mubr.msk.f32.mxu1 %vm1040_vm2, %v6788_v61  ;;  %v26372_v61 = vld [vmem:[#allocation3 + $0x9c] sm:$0xff] }
 0x462   : > { %21231 = vmatmul.mubr.msk.f32.gmra.mrb[36].mxu1 %vm1040_vm2, %v6789_v31  ;;  %v7218_v31 = vld [vmem:[#allocation3 + $0xa4] sm:$0xff] }
 0x463   : > { %21233 = vmatprep.mubr.msk.f32.mxu1 %vm1040_vm2, %v6790_v46  ;;  %v7219_v46 = vld [vmem:[#allocation3 + $0xac] sm:$0xff] }
 0x466   : > { %21234 = vmatmul.mubr.msk.f32.gmra.mrb[38].mxu1 %vm1040_vm2, %v6791_v6  ;;  %v7220_v6 = vld [vmem:[#allocation3 + $0xb4] sm:$0xff] }
 0x467   : > { %21236 = vmatprep.mubr.msk.f32.mxu1 %vm1040_vm2, %v6792_v42  ;;  %v7221_v42 = vld [vmem:[#allocation3 + $0xbc] sm:$0xff] }
 0x46a   : > { %21237 = vmatmul.mubr.msk.f32.gmra.mrb[40].mxu1 %vm1040_vm2, %v6793_v0  ;;  %v7222_v0 = vld [vmem:[#allocation3 + $0xc4] sm:$0xff] }
 0x46b   : > { %21239 = vmatprep.mubr.msk.f32.mxu1 %vm1040_vm2, %v6794_v2  ;;  %v7223_v2 = vld [vmem:[#allocation3 + $0xcc] sm:$0xff] }
 0x46e   : > { %21240 = vmatmul.mubr.msk.f32.gmra.mrb[42].mxu1 %vm1040_vm2, %v6795_v3  ;;  %v7224_v3 = vld [vmem:[#allocation3 + $0xd4] sm:$0xff] }
 0x46f   : > { %21242 = vmatprep.mubr.msk.f32.mxu1 %vm1040_vm2, %v6796_v62  ;;  %v7225_v62 = vld [vmem:[#allocation3 + $0xdc] sm:$0xff] }
 0x472   : > { %21243 = vmatmul.mubr.msk.f32.gmra.mrb[44].mxu1 %vm1040_vm2, %v6797_v59  ;;  %v7226_v59 = vld [vmem:[#allocation3 + $0xe4] sm:$0xff] }
 0x473   : > { %21245 = vmatprep.mubr.msk.f32.mxu1 %vm1040_vm2, %v6798_v32  ;;  %v7227_v32 = vld [vmem:[#allocation3 + $0xec] sm:$0xff] }
 0x476   : > { %21246 = vmatmul.mubr.msk.f32.gmra.mrb[46].mxu1 %vm1040_vm2, %v6799_v18  ;;  %v7228_v18 = vld [vmem:[#allocation3 + $0xf4] sm:$0xff] }
 0x477   : > { %21248 = vmatprep.mubr.msk.f32.mxu1 %vm1040_vm2, %v6800_v7  ;;  %v7229_v7 = vld [vmem:[#allocation3 + $0xfc] sm:$0xff] }
 0x47a   : > { %21249 = vmatmul.mubr.msk.f32.gmra.mrb[48].mxu1 %vm1040_vm2, %v6801_v35  ;;  %v7230_v35 = vld [vmem:[#allocation3 + $0x104] sm:$0xff] }
 0x47b   : > { %21251 = vmatprep.mubr.msk.f32.mxu1 %vm1040_vm2, %v6802_v40  ;;  %v7231_v40 = vld [vmem:[#allocation3 + $0x10c] sm:$0xff] }
 0x47e   : > { %21252 = vmatmul.mubr.msk.f32.gmra.mrb[50].mxu1 %vm1040_vm2, %v6803_v30  ;;  %v7232_v30 = vld [vmem:[#allocation3 + $0x114] sm:$0xff] }
 0x47f   : > { %21254 = vmatprep.mubr.msk.f32.mxu1 %vm1040_vm2, %v6804_v1  ;;  %v7233_v1 = vld [vmem:[#allocation3 + $0x11c] sm:$0xff] }
 0x482   : > { %21255 = vmatmul.mubr.msk.f32.gmra.mrb[52].mxu1 %vm1040_vm2, %v6805_v11  ;;  %v7234_v11 = vld [vmem:[#allocation3 + $0x124] sm:$0xff] }
 0x483   : > { %21265 = vmatprep.mubr.msk.f32.mxu1 %vm1040_vm2, %v7200_v44  ;;  %v18160_v44 = vld [vmem:[%s28197_s3 + $0xf8] sm:$0xff] }
 0x486   : > { %21266 = vmatmul.mubr.msk.f32.vlgmr.msra.gmra.mrb[18].mxu1 %vm1040_vm2, %v7201_v26  ;;  %v18197_v26 = vld [vmem:[%s28197_s3 + $0x100] sm:$0xff] }
 0x487   : > { %22674 = vmatpush3.bf16.msra.mxu1 %v26258_v28  ;;  %21268 = vmatprep.mubr.msk.f32.mxu1 %vm1040_vm2, %v26308_v5  ;;  %v26324_v28 = vld [vmem:[#allocation3 + $0x3c] sm:$0xff]  ;;  %v22687_v50 = vpack.c.bf16 %v18198_v19, %v18197_v26  ;;  %v8092_v26 = vld [vmem:[#allocation3 + $0x125] sm:$0xff] }
 0x488   : > { %22676 = vmatprep.subr.bf16.mxu1 %v22675_v4  ;;  %v8094_v19 = vld [vmem:[#allocation3 + $0x135] sm:$0xff] }
 0x48a   : > { %21269 = vmatmul.mubr.msk.f32.gmra.mrb[20].mxu1 %vm1040_vm2, %v26315_v13 }
 0x48b   : > { %21271 = vmatprep.mubr.msk.f32.mxu1 %vm1040_vm2, %v26319_v27  ;;  %22678 = vmatpush3.bf16.msra.mxu1 %v22675_v4  ;;  %v22683_v4 = vpack.c.bf16 %v18160_v44, %v18159_v33  ;;  %v8089_v33 = vld [vmem:[#allocation3 + $0x10d] sm:$0xff]  ;;  %v8090_v44 = vld [vmem:[#allocation3 + $0x115] sm:$0xff] }
 0x48c   : > { %22680 = vmatprep.subr.bf16.mxu1 %v26313_v15 }
 0x48e   : > { %21272 = vmatmul.mubr.msk.f32.gmra.mrb[22].mxu1 %vm1040_vm2, %v26324_v28 }
 0x48f   : > { %21274 = vmatprep.mubr.msk.f32.mxu1 %vm1040_vm2, %v26328_v12 }
 0x492   : > { %21275 = vmatmul.mubr.msk.f32.gmra.mrb[24].mxu1 %vm1040_vm2, %v26332_v63 }
 0x493   : > { %21277 = vmatprep.mubr.msk.f32.mxu1 %vm1040_vm2, %v26336_v34 }
 0x496   : > { %21278 = vmatmul.mubr.msk.f32.gmra.mrb[26].mxu1 %vm1040_vm2, %v26340_v17 }
 0x497   : > { %21280 = vmatprep.mubr.msk.f32.mxu1 %vm1040_vm2, %v26344_v24 }
 0x49a   : > { %21281 = vmatmul.mubr.msk.f32.gmra.mrb[28].mxu1 %vm1040_vm2, %v26348_v39 }
 0x49b   : > { %21283 = vmatprep.mubr.msk.f32.mxu1 %vm1040_vm2, %v26352_v55 }
 0x49e   : > { %21284 = vmatmul.mubr.msk.f32.gmra.mrb[30].mxu1 %vm1040_vm2, %v26356_v51 }
 0x49f   : > { %21286 = vmatprep.mubr.msk.f32.mxu1 %vm1040_vm2, %v26360_v52 }
 0x4a2   : > { %21287 = vmatmul.mubr.msk.f32.gmra.mrb[32].mxu1 %vm1040_vm2, %v26364_v25 }
 0x4a3   : > { %21289 = vmatprep.mubr.msk.f32.mxu1 %vm1040_vm2, %v26368_v45 }
 0x4a6   : > { %21290 = vmatmul.mubr.msk.f32.gmra.mrb[34].mxu1 %vm1040_vm2, %v26372_v61 }
 0x4a7   : > { %21292 = vmatprep.mubr.msk.f32.mxu1 %vm1040_vm2, %v7218_v31 }
 0x4aa   : > { %21293 = vmatmul.mubr.msk.f32.gmra.mrb[36].mxu1 %vm1040_vm2, %v7219_v46 }
 0x4ab   : > { %21295 = vmatprep.mubr.msk.f32.mxu1 %vm1040_vm2, %v7220_v6 }
 0x4ae   : > { %21296 = vmatmul.mubr.msk.f32.gmra.mrb[38].mxu1 %vm1040_vm2, %v7221_v42 }
 0x4af   : > { %21298 = vmatprep.mubr.msk.f32.mxu1 %vm1040_vm2, %v7222_v0 }
 0x4b2   : > { %21299 = vmatmul.mubr.msk.f32.gmra.mrb[40].mxu1 %vm1040_vm2, %v7223_v2 }
 0x4b3   : > { %21301 = vmatprep.mubr.msk.f32.mxu1 %vm1040_vm2, %v7224_v3 }
 0x4b6   : > { %21302 = vmatmul.mubr.msk.f32.gmra.mrb[42].mxu1 %vm1040_vm2, %v7225_v62 }
 0x4b7   : > { %21304 = vmatprep.mubr.msk.f32.mxu1 %vm1040_vm2, %v7226_v59 }
 0x4ba   : > { %21305 = vmatmul.mubr.msk.f32.gmra.mrb[44].mxu1 %vm1040_vm2, %v7227_v32 }
 0x4bb   : > { %21307 = vmatprep.mubr.msk.f32.mxu1 %vm1040_vm2, %v7228_v18 }
 0x4be   : > { %21308 = vmatmul.mubr.msk.f32.gmra.mrb[46].mxu1 %vm1040_vm2, %v7229_v7 }
 0x4bf   : > { %21310 = vmatprep.mubr.msk.f32.mxu1 %vm1040_vm2, %v7230_v35 }
 0x4c2   : > { %21311 = vmatmul.mubr.msk.f32.gmra.mrb[48].mxu1 %vm1040_vm2, %v7231_v40 }
 0x4c3   : > { %21313 = vmatprep.mubr.msk.f32.mxu1 %vm1040_vm2, %v7232_v30 }
 0x4c6   : > { %21314 = vmatmul.mubr.msk.f32.gmra.mrb[50].mxu1 %vm1040_vm2, %v7233_v1 }
 0x4c7   : > { %21316 = vmatprep.mubr.msk.f32.mxu1 %vm1040_vm2, %v7234_v11 }
 0x4ca   : > { %21317 = vmatmul.mubr.msk.f32.gmra.mrb[52].mxu1 %vm1040_vm2, %v7235_v37 }
 0x4cb   : > { %21327 = vmatprep.mubr.msk.f32.mxu1 %vm1040_vm2, %v26308_v5  ;;  %v7664_v5 = vld [vmem:[#allocation3 + $0x134] sm:$0xff] }
 0x4ce   : > { %21328 = vmatmul.mubr.msk.f32.vlgmr.msra.gmra.mrb[18].mxu1 %vm1040_vm2, %v26315_v13  ;;  %v18199_v13 = vld [vmem:[%s28197_s3 + $0x110] sm:$0xff] }
 0x4cf   : > { %22682 = vmatpush3.bf16.msra.mxu1 %v26313_v15  ;;  %21330 = vmatprep.mubr.msk.f32.mxu1 %vm1040_vm2, %v26319_v27  ;;  %v7665_v15 = vld [vmem:[#allocation3 + $0x13c] sm:$0xff] }
 0x4d0   : > { %22684 = vmatprep.subr.bf16.mxu1 %v22683_v4  ;;  %v18200_v27 = vld [vmem:[%s28197_s3 + $0x118] sm:$0xff] }
 0x4d2   : > { %21331 = vmatmul.mubr.msk.f32.gmra.mrb[20].mxu1 %vm1040_vm2, %v26324_v28  ;;  %v8060_v28 = vld [vmem:[#allocation3 + $0x25] sm:$0xff] }
 0x4d3   : > { %21333 = vmatprep.mubr.msk.f32.mxu1 %vm1040_vm2, %v26328_v12  ;;  %22686 = vmatpush3.bf16.msra.mxu1 %v22683_v4  ;;  %v22691_v12 = vpack.c.bf16 %v18200_v27, %v18199_v13  ;;  %v8091_v4 = vld [vmem:[#allocation3 + $0x11d] sm:$0xff]  ;;  %v8491_v13 = vld [vmem:[#allocation3 + $0x2e] sm:$0xff] }
 0x4d4   : > { %22688 = vmatprep.subr.bf16.mxu1 %v22687_v50  ;;  %v8492_v27 = vld [vmem:[#allocation3 + $0x36] sm:$0xff] }
 0x4d6   : > { %21334 = vmatmul.mubr.msk.f32.gmra.mrb[22].mxu1 %vm1040_vm2, %v26332_v63  ;;  %v8061_v63 = vld [vmem:[#allocation3 + $0x2d] sm:$0xff] }
 0x4d7   : > { %21336 = vmatprep.mubr.msk.f32.mxu1 %vm1040_vm2, %v26336_v34  ;;  %v8062_v34 = vld [vmem:[#allocation3 + $0x35] sm:$0xff] }
 0x4da   : > { %21337 = vmatmul.mubr.msk.f32.gmra.mrb[24].mxu1 %vm1040_vm2, %v26340_v17  ;;  %v8063_v17 = vld [vmem:[#allocation3 + $0x3d] sm:$0xff] }
 0x4db   : > { %21339 = vmatprep.mubr.msk.f32.mxu1 %vm1040_vm2, %v26344_v24  ;;  %v8064_v24 = vld [vmem:[#allocation3 + $0x45] sm:$0xff] }
 0x4de   : > { %21340 = vmatmul.mubr.msk.f32.gmra.mrb[26].mxu1 %vm1040_vm2, %v26348_v39  ;;  %v8065_v39 = vld [vmem:[#allocation3 + $0x4d] sm:$0xff] }
 0x4df   : > { %21342 = vmatprep.mubr.msk.f32.mxu1 %vm1040_vm2, %v26352_v55  ;;  %v8066_v55 = vld [vmem:[#allocation3 + $0x55] sm:$0xff] }
 0x4e2   : > { %21343 = vmatmul.mubr.msk.f32.gmra.mrb[28].mxu1 %vm1040_vm2, %v26356_v51  ;;  %v8067_v51 = vld [vmem:[#allocation3 + $0x5d] sm:$0xff] }
 0x4e3   : > { %21345 = vmatprep.mubr.msk.f32.mxu1 %vm1040_vm2, %v26360_v52  ;;  %v8068_v52 = vld [vmem:[#allocation3 + $0x65] sm:$0xff] }
 0x4e6   : > { %21346 = vmatmul.mubr.msk.f32.gmra.mrb[30].mxu1 %vm1040_vm2, %v26364_v25  ;;  %v18240_v25 = vld [vmem:[%s28195_s1 + $0x28] sm:$0xf] }
 0x4e7   : > { %21348 = vmatprep.mubr.msk.f32.mxu1 %vm1040_vm2, %v26368_v45  ;;  %21505 = vmatprep.subr.msk.mxu0 %vm28402_vm7, %v18240_v25  ;;  %v8069_v45 = vld [vmem:[#allocation3 + $0x6d] sm:$0xff]  ;;  %vm28420_vm7 = vmmov %vm28406_vm0 }
 0x4e8   : > { %21506 = vmatpush3.msk.msra.mxu0 %vm28403_vm8, %v18240_v25  ;;  %v8503_v25 = vld [vmem:[#allocation3 + $0x8e] sm:$0xff]  ;;  %vm28421_vm8 = vmmov %vm28406_vm0 }
 0x4ea   : > { %21349 = vmatmul.mubr.msk.f32.gmra.mrb[32].mxu1 %vm1040_vm2, %v26372_v61  ;;  %v8070_v61 = vld [vmem:[#allocation3 + $0x75] sm:$0xff] }
 0x4eb   : > { %21351 = vmatprep.mubr.msk.f32.mxu1 %vm1040_vm2, %v7218_v31  ;;  %v8071_v31 = vld [vmem:[#allocation3 + $0x7d] sm:$0xff] }
 0x4ee   : > { %21352 = vmatmul.mubr.msk.f32.gmra.mrb[34].mxu1 %vm1040_vm2, %v7219_v46  ;;  %v8072_v46 = vld [vmem:[#allocation3 + $0x85] sm:$0xff] }
 0x4ef   : > { %21354 = vmatprep.mubr.msk.f32.mxu1 %vm1040_vm2, %v7220_v6  ;;  %v8073_v6 = vld [vmem:[#allocation3 + $0x8d] sm:$0xff] }
 0x4f2   : > { %21355 = vmatmul.mubr.msk.f32.gmra.mrb[36].mxu1 %vm1040_vm2, %v7221_v42  ;;  %v8074_v42 = vld [vmem:[#allocation3 + $0x95] sm:$0xff] }
 0x4f3   : > { %21357 = vmatprep.mubr.msk.f32.mxu1 %vm1040_vm2, %v7222_v0  ;;  %v8075_v0 = vld [vmem:[#allocation3 + $0x9d] sm:$0xff] }
 0x4f6   : > { %21358 = vmatmul.mubr.msk.f32.gmra.mrb[38].mxu1 %vm1040_vm2, %v7223_v2  ;;  %v8076_v2 = vld [vmem:[#allocation3 + $0xa5] sm:$0xff] }
 0x4f7   : > { %21360 = vmatprep.mubr.msk.f32.mxu1 %vm1040_vm2, %v7224_v3  ;;  %v8077_v3 = vld [vmem:[#allocation3 + $0xad] sm:$0xff] }
 0x4fa   : > { %21361 = vmatmul.mubr.msk.f32.gmra.mrb[40].mxu1 %vm1040_vm2, %v7225_v62  ;;  %v8078_v62 = vld [vmem:[#allocation3 + $0xb5] sm:$0xff] }
 0x4fb   : > { %21363 = vmatprep.mubr.msk.f32.mxu1 %vm1040_vm2, %v7226_v59  ;;  %v8079_v59 = vld [vmem:[#allocation3 + $0xbd] sm:$0xff] }
 0x4fe   : > { %21364 = vmatmul.mubr.msk.f32.gmra.mrb[42].mxu1 %vm1040_vm2, %v7227_v32  ;;  %v8080_v32 = vld [vmem:[#allocation3 + $0xc5] sm:$0xff] }
 0x4ff   : > { %21366 = vmatprep.mubr.msk.f32.mxu1 %vm1040_vm2, %v7228_v18  ;;  %v8081_v18 = vld [vmem:[#allocation3 + $0xcd] sm:$0xff] }
 0x502   : > { %21367 = vmatmul.mubr.msk.f32.gmra.mrb[44].mxu1 %vm1040_vm2, %v7229_v7  ;;  %v8082_v7 = vld [vmem:[#allocation3 + $0xd5] sm:$0xff] }
 0x503   : > { %21369 = vmatprep.mubr.msk.f32.mxu1 %vm1040_vm2, %v7230_v35  ;;  %v8083_v35 = vld [vmem:[#allocation3 + $0xdd] sm:$0xff] }
 0x506   : > { %21370 = vmatmul.mubr.msk.f32.gmra.mrb[46].mxu1 %vm1040_vm2, %v7231_v40  ;;  %v8084_v40 = vld [vmem:[#allocation3 + $0xe5] sm:$0xff] }
 0x507   : > { %21372 = vmatprep.mubr.msk.f32.mxu1 %vm1040_vm2, %v7232_v30  ;;  %v8085_v30 = vld [vmem:[#allocation3 + $0xed] sm:$0xff] }
 0x50a   : > { %21373 = vmatmul.mubr.msk.f32.gmra.mrb[48].mxu1 %vm1040_vm2, %v7233_v1  ;;  %v8086_v1 = vld [vmem:[#allocation3 + $0xf5] sm:$0xff] }
 0x50b   : > { %21375 = vmatprep.mubr.msk.f32.mxu1 %vm1040_vm2, %v7234_v11  ;;  %v8087_v11 = vld [vmem:[#allocation3 + $0xfd] sm:$0xff] }
 0x50e   : > { %21376 = vmatmul.mubr.msk.f32.gmra.mrb[50].mxu1 %vm1040_vm2, %v7235_v37  ;;  %v8088_v37 = vld [vmem:[#allocation3 + $0x105] sm:$0xff] }
 0x50f   : > { %21378 = vmatprep.mubr.msk.f32.mxu1 %vm1040_vm2, %v7664_v5  ;;  %v8095_v5 = vld [vmem:[#allocation3 + $0x13d] sm:$0xff] }
 0x512   : > { %21379 = vmatmul.mubr.msk.f32.gmra.mrb[52].mxu1 %vm1040_vm2, %v7665_v15  ;;  %v8490_v15 = vld [vmem:[#allocation3 + $0x26] sm:$0xff] }
 0x513   : > { %21389 = vmatprep.mubr.msk.f32.mxu1 %vm1040_vm2, %v8060_v28  ;;  %v8493_v28 = vld [vmem:[#allocation3 + $0x3e] sm:$0xff] }
 0x516   : > { %21390 = vmatmul.mubr.msk.f32.vlgmr.msra.gmra.mrb[18].mxu1 %vm1040_vm2, %v8061_v63  ;;  %v8495_v63 = vld [vmem:[#allocation3 + $0x4e] sm:$0xff] }
 0x517   : > { %22690 = vmatpush3.bf16.msra.mxu1 %v22687_v50  ;;  %21392 = vmatprep.mubr.msk.f32.mxu1 %vm1040_vm2, %v8062_v34  ;;  %v8093_v50 = vld [vmem:[#allocation3 + $0x12d] sm:$0xff]  ;;  %v8496_v34 = vld [vmem:[#allocation3 + $0x56] sm:$0xff] }
 0x518   : > { %22692 = vmatprep.subr.bf16.mxu1 %v22691_v12 }
 0x51a   : > { %21393 = vmatmul.mubr.msk.f32.gmra.mrb[20].mxu1 %vm1040_vm2, %v8063_v17  ;;  %v8497_v17 = vld [vmem:[#allocation3 + $0x5e] sm:$0xff] }
 0x51b   : > { %21395 = vmatprep.mubr.msk.f32.mxu1 %vm1040_vm2, %v8064_v24  ;;  %22694 = vmatpush3.bf16.msra.mxu1 %v22691_v12  ;;  %v8494_v12 = vld [vmem:[#allocation3 + $0x46] sm:$0xff] }
 0x51c   : > { %v8498_v24 = vld [vmem:[#allocation3 + $0x66] sm:$0xff] }
 0x51e   : > { %21396 = vmatmul.mubr.msk.f32.gmra.mrb[22].mxu1 %vm1040_vm2, %v8065_v39  ;;  %v8499_v39 = vld [vmem:[#allocation3 + $0x6e] sm:$0xff] }
 0x51f   : > { %21398 = vmatprep.mubr.msk.f32.mxu1 %vm1040_vm2, %v8066_v55  ;;  %v8500_v55 = vld [vmem:[#allocation3 + $0x76] sm:$0xff] }
 0x522   : > { %21399 = vmatmul.mubr.msk.f32.gmra.mrb[24].mxu1 %vm1040_vm2, %v8067_v51  ;;  %v8501_v51 = vld [vmem:[#allocation3 + $0x7e] sm:$0xff] }
 0x523   : > { %21401 = vmatprep.mubr.msk.f32.mxu1 %vm1040_vm2, %v8068_v52  ;;  %v8502_v52 = vld [vmem:[#allocation3 + $0x86] sm:$0xff] }
 0x526   : > { %21402 = vmatmul.mubr.msk.f32.gmra.mrb[26].mxu1 %vm1040_vm2, %v8069_v45  ;;  %v8504_v45 = vld [vmem:[#allocation3 + $0x96] sm:$0xff] }
 0x527   : > { %21404 = vmatprep.mubr.msk.f32.mxu1 %vm1040_vm2, %v8070_v61  ;;  %v8505_v61 = vld [vmem:[#allocation3 + $0x9e] sm:$0xff] }
 0x52a   : > { %21405 = vmatmul.mubr.msk.f32.gmra.mrb[28].mxu1 %vm1040_vm2, %v8071_v31  ;;  %v8506_v31 = vld [vmem:[#allocation3 + $0xa6] sm:$0xff] }
 0x52b   : > { %21407 = vmatprep.mubr.msk.f32.mxu1 %vm1040_vm2, %v8072_v46  ;;  %v8507_v46 = vld [vmem:[#allocation3 + $0xae] sm:$0xff] }
 0x52e   : > { %21408 = vmatmul.mubr.msk.f32.gmra.mrb[30].mxu1 %vm1040_vm2, %v8073_v6  ;;  %v8508_v6 = vld [vmem:[#allocation3 + $0xb6] sm:$0xff] }
 0x52f   : > { %21410 = vmatprep.mubr.msk.f32.mxu1 %vm1040_vm2, %v8074_v42  ;;  %v8509_v42 = vld [vmem:[#allocation3 + $0xbe] sm:$0xff] }
 0x532   : > { %21411 = vmatmul.mubr.msk.f32.gmra.mrb[32].mxu1 %vm1040_vm2, %v8075_v0  ;;  %v8510_v0 = vld [vmem:[#allocation3 + $0xc6] sm:$0xff] }
 0x533   : > { %21413 = vmatprep.mubr.msk.f32.mxu1 %vm1040_vm2, %v8076_v2  ;;  %v8511_v2 = vld [vmem:[#allocation3 + $0xce] sm:$0xff] }
 0x536   : > { %21414 = vmatmul.mubr.msk.f32.gmra.mrb[34].mxu1 %vm1040_vm2, %v8077_v3  ;;  %v8512_v3 = vld [vmem:[#allocation3 + $0xd6] sm:$0xff] }
 0x537   : > { %21416 = vmatprep.mubr.msk.f32.mxu1 %vm1040_vm2, %v8078_v62  ;;  %v8513_v62 = vld [vmem:[#allocation3 + $0xde] sm:$0xff] }
 0x53a   : > { %21417 = vmatmul.mubr.msk.f32.gmra.mrb[36].mxu1 %vm1040_vm2, %v8079_v59  ;;  %v8514_v59 = vld [vmem:[#allocation3 + $0xe6] sm:$0xff] }
 0x53b   : > { %21419 = vmatprep.mubr.msk.f32.mxu1 %vm1040_vm2, %v8080_v32  ;;  %v8515_v32 = vld [vmem:[#allocation3 + $0xee] sm:$0xff] }
 0x53e   : > { %21420 = vmatmul.mubr.msk.f32.gmra.mrb[38].mxu1 %vm1040_vm2, %v8081_v18  ;;  %v8516_v18 = vld [vmem:[#allocation3 + $0xf6] sm:$0xff] }
 0x53f   : > { %21422 = vmatprep.mubr.msk.f32.mxu1 %vm1040_vm2, %v8082_v7  ;;  %v8517_v7 = vld [vmem:[#allocation3 + $0xfe] sm:$0xff] }
 0x542   : > { %21423 = vmatmul.mubr.msk.f32.gmra.mrb[40].mxu1 %vm1040_vm2, %v8083_v35  ;;  %v8518_v35 = vld [vmem:[#allocation3 + $0x106] sm:$0xff] }
 0x543   : > { %21425 = vmatprep.mubr.msk.f32.mxu1 %vm1040_vm2, %v8084_v40  ;;  %v8519_v40 = vld [vmem:[#allocation3 + $0x10e] sm:$0xff] }
 0x546   : > { %21426 = vmatmul.mubr.msk.f32.gmra.mrb[42].mxu1 %vm1040_vm2, %v8085_v30  ;;  %v8520_v30 = vld [vmem:[#allocation3 + $0x116] sm:$0xff] }
 0x547   : > { %21428 = vmatprep.mubr.msk.f32.mxu1 %vm1040_vm2, %v8086_v1  ;;  %v8521_v1 = vld [vmem:[#allocation3 + $0x11e] sm:$0xff] }
 0x54a   : > { %21429 = vmatmul.mubr.msk.f32.gmra.mrb[44].mxu1 %vm1040_vm2, %v8087_v11  ;;  %v8522_v11 = vld [vmem:[#allocation3 + $0x126] sm:$0xff] }
 0x54b   : > { %21431 = vmatprep.mubr.msk.f32.mxu1 %vm1040_vm2, %v8088_v37  ;;  %v8524_v37 = vld [vmem:[#allocation3 + $0x136] sm:$0xff] }
 0x54e   : > { %21432 = vmatmul.mubr.msk.f32.gmra.mrb[46].mxu1 %vm1040_vm2, %v8089_v33  ;;  %v8523_v33 = vld [vmem:[#allocation3 + $0x12e] sm:$0xff] }
 0x54f   : > { %21434 = vmatprep.mubr.msk.f32.mxu1 %vm1040_vm2, %v8090_v44  ;;  %v8525_v44 = vld [vmem:[#allocation3 + $0x13e] sm:$0xff] }
 0x552   : > { %21435 = vmatmul.mubr.msk.f32.gmra.mrb[48].mxu1 %vm1040_vm2, %v8091_v4  ;;  %v9146_v4 = vld [vmem:[#allocation2 + $0x1] sm:$0xff] }
 0x553   : > { %21437 = vmatprep.mubr.msk.f32.mxu1 %vm1040_vm2, %v8092_v26  ;;  %v18239_v26 = vld [vmem:[%s28195_s1 + $0x24] sm:$0xf]  ;;  %21507 = vmatprep.mubr.msk.f32.mxu0 %vm28404_vm1, %v9146_v4  ;;  %vm28422_vm1 = vmmov %vm28406_vm0  ;;  %v28424_v4 = vld [vmem:[#allocation13_spill] sm:$0xff] }
 0x554   : > { %21561 = vmatprep.subr.msk.mxu0 %vm28405_vm3, %v18239_v26  ;;  %vm28423_vm3 = vmmov %vm28406_vm0 }
 0x556   : > { %21438 = vmatmul.mubr.msk.f32.gmra.mrb[50].mxu1 %vm1040_vm2, %v8093_v50  ;;  %v26552_v50 = vld [vmem:[%s28195_s1 + $0x2c] sm:$0xf] }
 0x557   : > { %21440 = vmatprep.mubr.msk.f32.mxu1 %vm1040_vm2, %v8094_v19  ;;  %v9147_v19 = vld [vmem:[#allocation2 + $0x9] sm:$0xff] }
 0x558   : > { %21508 = vmatmul.mubr.msk.f32.vlgmr.msra.gmra.mrb[36].mxu0 %vm28406_vm0, %v9147_v19 }
 0x559   : > { %21562 = vmatpush3.msk.msra.mxu0 %vm28407_vm14, %v18239_v26  ;;  %vm28425_vm14 = vmmov %vm28406_vm0 }
 0x55a   : > { %21441 = vmatmul.mubr.msk.f32.gmra.mrb[52].mxu1 %vm1040_vm2, %v8095_v5  ;;  %21617 = vmatprep.subr.msk.mxu0 %vm28408_vm4, %v26552_v50  ;;  %v26559_v5 = vld [vmem:[%s28198_s4] ss:$0 sm:$0xff]  ;;  %vm28426_vm4 = vmmov %vm28406_vm0 }
 0x55b   : > { %21451 = vmatprep.mubr.msk.f32.mxu1 %vm1040_vm2, %v8490_v15 }
 0x55e   : > { %21452 = vmatmul.mubr.msk.f32.vlgmr.msra.gmra.mrb[18].mxu1 %vm1040_vm2, %v8491_v13 }
 0x55f   : > { %21454 = vmatprep.mubr.msk.f32.mxu1 %vm1040_vm2, %v8492_v27 }
 0x562   : > { %21455 = vmatmul.mubr.msk.f32.gmra.mrb[20].mxu1 %vm1040_vm2, %v8493_v28 }
 0x563   : > { %21457 = vmatprep.mubr.msk.f32.mxu1 %vm1040_vm2, %v8494_v12 }
 0x566   : > { %21458 = vmatmul.mubr.msk.f32.gmra.mrb[22].mxu1 %vm1040_vm2, %v8495_v63 }
 0x567   : > { %21460 = vmatprep.mubr.msk.f32.mxu1 %vm1040_vm2, %v8496_v34 }
 0x56a   : > { %21461 = vmatmul.mubr.msk.f32.gmra.mrb[24].mxu1 %vm1040_vm2, %v8497_v17 }
 0x56b   : > { %21463 = vmatprep.mubr.msk.f32.mxu1 %vm1040_vm2, %v8498_v24 }
 0x56e   : > { %21464 = vmatmul.mubr.msk.f32.gmra.mrb[26].mxu1 %vm1040_vm2, %v8499_v39 }
 0x56f   : > { %21466 = vmatprep.mubr.msk.f32.mxu1 %vm1040_vm2, %v8500_v55 }
 0x572   : > { %21467 = vmatmul.mubr.msk.f32.gmra.mrb[28].mxu1 %vm1040_vm2, %v8501_v51 }
 0x573   : > { %21469 = vmatprep.mubr.msk.f32.mxu1 %vm1040_vm2, %v8502_v52 }
 0x576   : > { %21470 = vmatmul.mubr.msk.f32.gmra.mrb[30].mxu1 %vm1040_vm2, %v8503_v25 }
 0x577   : > { %21472 = vmatprep.mubr.msk.f32.mxu1 %vm1040_vm2, %v8504_v45 }
 0x57a   : > { %21473 = vmatmul.mubr.msk.f32.gmra.mrb[32].mxu1 %vm1040_vm2, %v8505_v61 }
 0x57b   : > { %21475 = vmatprep.mubr.msk.f32.mxu1 %vm1040_vm2, %v8506_v31 }
 0x57e   : > { %21476 = vmatmul.mubr.msk.f32.gmra.mrb[34].mxu1 %vm1040_vm2, %v8507_v46 }
 0x57f   : > { %21478 = vmatprep.mubr.msk.f32.mxu1 %vm1040_vm2, %v8508_v6  ;;  %v28413_v6 = vld [vmem:[#allocation10_spill] sm:$0xff] }
 0x582   : > { %21479 = vmatmul.mubr.msk.f32.gmra.mrb[36].mxu1 %vm1040_vm2, %v8509_v42 }
 0x583   : > { %21481 = vmatprep.mubr.msk.f32.mxu1 %vm1040_vm2, %v8510_v0 }
 0x586   : > { %21482 = vmatmul.mubr.msk.f32.gmra.mrb[38].mxu1 %vm1040_vm2, %v8511_v2 }
 0x587   : > { %21484 = vmatprep.mubr.msk.f32.mxu1 %vm1040_vm2, %v8512_v3 }
 0x58a   : > { %21485 = vmatmul.mubr.msk.f32.gmra.mrb[40].mxu1 %vm1040_vm2, %v8513_v62 }
 0x58b   : > { %21487 = vmatprep.mubr.msk.f32.mxu1 %vm1040_vm2, %v8514_v59  ;;  %v28418_v59 = vld [vmem:[#allocation11_spill] sm:$0xff] }
 0x58e   : > { %21488 = vmatmul.mubr.msk.f32.gmra.mrb[42].mxu1 %vm1040_vm2, %v8515_v32 }
 0x58f   : > { %21490 = vmatprep.mubr.msk.f32.mxu1 %vm1040_vm2, %v8516_v18 }
 0x592   : > { %21491 = vmatmul.mubr.msk.f32.gmra.mrb[44].mxu1 %vm1040_vm2, %v8517_v7 }
 0x593   : > { %21493 = vmatprep.mubr.msk.f32.mxu1 %vm1040_vm2, %v8518_v35  ;;  %v28419_v35 = vld [vmem:[#allocation12_spill] sm:$0xff] }
 0x596   : > { %21494 = vmatmul.mubr.msk.f32.gmra.mrb[46].mxu1 %vm1040_vm2, %v8519_v40 }
 0x597   : > { %21496 = vmatprep.mubr.msk.f32.mxu1 %vm1040_vm2, %v8520_v30 }
 0x59a   : > { %21497 = vmatmul.mubr.msk.f32.gmra.mrb[48].mxu1 %vm1040_vm2, %v8521_v1 }
 0x59b   : > { %21499 = vmatprep.mubr.msk.f32.mxu1 %vm1040_vm2, %v8522_v11 }
 0x59e   : > { %21500 = vmatmul.mubr.msk.f32.gmra.mrb[50].mxu1 %vm1040_vm2, %v8523_v33 }
 0x59f   : > { %21502 = vmatprep.mubr.msk.f32.mxu1 %vm1040_vm2, %v8524_v37 }
 0x5a2   : > { %21503 = vmatmul.mubr.msk.f32.gmra.mrb[52].mxu1 %vm1040_vm2, %v8525_v44 }
 0x631   : > { %v21453_v15 = vpop.f32.mrb[18].mxu1 }
 0x632   : > { %v8927_v13 = vadd.f32 %v21453_v15, %v26559_v5  ;;  %v8705_v27 = vpop.f32.mrb[19].mxu1 }
 0x633   : > { %v8926_v28 = vadd.f32 %v26559_v5, %v8705_v27 }
 0x634   : > { %v8963_v12 = vmax.f32 %v8927_v13, 0.0 }
 0x635   : > { %v8962_v63 = vmax.f32 %v8926_v28, 0.0  ;;  %v21456_v34 = vpop.f32.mrb[20].mxu1 }
 0x636   : > { %v8999_v17 = vmul.f32 %v24883_v48, %v8963_v12  ;;  %v8929_v24 = vadd.f32 %v21456_v34, %v26559_v5  ;;  %v8715_v39 = vpop.f32.mrb[21].mxu1 }
 0x637   : > { %v8998_v55 = vmul.f32 %v24940_v21, %v8962_v63  ;;  %v8928_v51 = vadd.f32 %v26559_v5, %v8715_v39 }
 0x638   : > { %9035 = vst.msk [vmem:[%s26567_s14 + $0x8] sm:$0xff] %vm28409_vm5, %v8999_v17  ;;  %v8965_v52 = vmax.f32 %v8929_v24, 0.0  ;;  %vm28427_vm5 = vmmov %vm28406_vm0 }
 0x639   : > { %9071 = vst.msk [vmem:[#allocation2 + $0x1b] sm:$0xff] %vm28410_vm9, %v8999_v17  ;;  %v8964_v25 = vmax.f32 %v8928_v51, 0.0  ;;  %v21459_v45 = vpop.f32.mrb[22].mxu1  ;;  %vm28428_vm9 = vmmov %vm28406_vm0 }
 0x63a   : > { %9034 = vst.msk [vmem:[%s26567_s14] sm:$0xff] %vm28411_vm10, %v8998_v55  ;;  %v9001_v61 = vmul.f32 %v24947_v22, %v8965_v52  ;;  %v8931_v31 = vadd.f32 %v21459_v45, %v26559_v5  ;;  %v8725_v46 = vpop.f32.mrb[23].mxu1  ;;  %vm28429_vm10 = vmmov %vm28406_vm0 }
 0x63b   : > { %9070 = vst.msk [vmem:[#allocation2 + $0x13] sm:$0xff] %vm28412_vm11, %v8998_v55  ;;  %v9000_v42 = vmul.f32 %v28413_v6, %v8964_v25  ;;  %v8930_v0 = vadd.f32 %v26559_v5, %v8725_v46  ;;  %vm28430_vm11 = vmmov %vm28406_vm0 }
 0x63c   : > { %9037 = vst.msk [vmem:[%s26567_s14 + $0x18] sm:$0xff] %vm28414_vm12, %v9001_v61  ;;  %v8967_v2 = vmax.f32 %v8931_v31, 0.0  ;;  %vm28431_vm12 = vmmov %vm28406_vm0 }
 0x63d   : > { %9073 = vst.msk [vmem:[#allocation2 + $0x2b] sm:$0xff] %vm28415_vm13, %v9001_v61  ;;  %v8966_v3 = vmax.f32 %v8930_v0, 0.0  ;;  %v21462_v62 = vpop.f32.mrb[24].mxu1  ;;  %vm28432_vm13 = vmmov %vm28406_vm0 }
 0x63e   : > { %9036 = vst.msk [vmem:[%s26567_s14 + $0x10] sm:$0xff] %vm28416_vm15, %v9000_v42  ;;  %v9003_v32 = vmul.f32 %v28418_v59, %v8967_v2  ;;  %v8933_v18 = vadd.f32 %v21462_v62, %v26559_v5  ;;  %v8735_v7 = vpop.f32.mrb[25].mxu1  ;;  %vm28433_vm15 = vmmov %vm28406_vm0 }
 0x63f   : > { %9072 = vst.msk [vmem:[#allocation2 + $0x23] sm:$0xff] %vm28417_vm6, %v9000_v42  ;;  %v9002_v40 = vmul.f32 %v28419_v35, %v8966_v3  ;;  %v8932_v30 = vadd.f32 %v26559_v5, %v8735_v7  ;;  %vm28434_vm6 = vmmov %vm28406_vm0 }
 0x640   : > { %9039 = vst.msk [vmem:[%s26567_s14 + $0x28] sm:$0xff] %vm28420_vm7, %v9003_v32  ;;  %v8969_v1 = vmax.f32 %v8933_v18, 0.0  ;;  %vm28435_vm7 = vmmov %vm28406_vm0 }
 0x641   : > { %9075 = vst.msk [vmem:[#allocation2 + $0x3b] sm:$0xff] %vm28421_vm8, %v9003_v32  ;;  %v8968_v33 = vmax.f32 %v8932_v30, 0.0  ;;  %v21465_v44 = vpop.f32.mrb[26].mxu1  ;;  %vm28436_vm8 = vmmov %vm28406_vm0 }
 0x642   : > { %v9148_v11 = vld [vmem:[#allocation2 + $0x11] sm:$0xff]  ;;  %v9149_v37 = vld [vmem:[#allocation2 + $0x19] sm:$0xff]  ;;  %9038 = vst.msk [vmem:[%s26567_s14 + $0x20] sm:$0xff] %vm28422_vm1, %v9002_v40  ;;  %v9005_v26 = vmul.f32 %v28424_v4, %v8969_v1  ;;  %v8935_v19 = vadd.f32 %v21465_v44, %v26559_v5  ;;  %v8745_v15 = vpop.f32.mrb[27].mxu1  ;;  %vm28437_vm1 = vmmov %vm28406_vm0 }
 0x643   : > { %9074 = vst.msk [vmem:[#allocation2 + $0x33] sm:$0xff] %vm28423_vm3, %v9002_v40  ;;  %21510 = vmatprep.mubr.msk.f32.mxu0 %vm28406_vm0, %v9148_v11  ;;  %v9004_v13 = vmul.f32 %v25206_v49, %v8968_v33  ;;  %v8934_v27 = vadd.f32 %v26559_v5, %v8745_v15  ;;  %vm28438_vm3 = vmmov %vm28406_vm0 }
 0x644   : > { %21511 = vmatmul.mubr.msk.f32.gmra.mrb[38].mxu0 %vm28425_vm14, %v9149_v37  ;;  %9041 = vst.msk [vmem:[%s26567_s14 + $0x38] sm:$0xff] %vm28426_vm4, %v9005_v26  ;;  %v8971_v28 = vmax.f32 %v8935_v19, 0.0  ;;  %vm28439_vm14 = vmmov %vm28406_vm0 }
 0x645   : > { %9077 = vst.msk [vmem:[#allocation2 + $0x4b] sm:$0xff] %vm28427_vm5, %v9005_v26  ;;  %v8970_v34 = vmax.f32 %v8934_v27, 0.0  ;;  %v21468_v17 = vpop.f32.mrb[28].mxu1  ;;  %vm28440_vm4 = vmmov %vm28406_vm0 }
 0x646   : > { %v9150_v12 = vld [vmem:[#allocation2 + $0x21] sm:$0xff]  ;;  %v9151_v63 = vld [vmem:[#allocation2 + $0x29] sm:$0xff]  ;;  %9040 = vst.msk [vmem:[%s26567_s14 + $0x30] sm:$0xff] %vm28428_vm9, %v9004_v13  ;;  %v9007_v24 = vmul.f32 %v25211_v29, %v8971_v28  ;;  %v8937_v39 = vadd.f32 %v21468_v17, %v26559_v5  ;;  %v8755_v55 = vpop.f32.mrb[29].mxu1  ;;  %vm28441_vm5 = vmmov %vm28406_vm0 }
 0x647   : > { %9076 = vst.msk [vmem:[#allocation2 + $0x43] sm:$0xff] %vm28429_vm10, %v9004_v13  ;;  %21513 = vmatprep.mubr.msk.f32.mxu0 %vm28430_vm11, %v9150_v12  ;;  %v9006_v51 = vmul.f32 %v25216_v41, %v8970_v34  ;;  %v8936_v52 = vadd.f32 %v26559_v5, %v8755_v55  ;;  %vm28442_vm9 = vmmov %vm28406_vm0  ;;  %v28449_v34 = vld [vmem:[#allocation14_spill] sm:$0xff] }
 0x648   : > { %21514 = vmatmul.mubr.msk.f32.gmra.mrb[40].mxu0 %vm28431_vm12, %v9151_v63  ;;  %9043 = vst.msk [vmem:[%s26567_s14 + $0x48] sm:$0xff] %vm28432_vm13, %v9007_v24  ;;  %v8973_v25 = vmax.f32 %v8937_v39, 0.0  ;;  %vm28443_vm10 = vmmov %vm28406_vm0 }
 0x649   : > { %9079 = vst.msk [vmem:[#allocation2 + $0x5b] sm:$0xff] %vm28433_vm15, %v9007_v24  ;;  %v8972_v31 = vmax.f32 %v8936_v52, 0.0  ;;  %v21471_v46 = vpop.f32.mrb[30].mxu1  ;;  %vm28444_vm11 = vmmov %vm28406_vm0 }
 0x64a   : > { %v9152_v45 = vld [vmem:[#allocation2 + $0x31] sm:$0xff]  ;;  %v9153_v61 = vld [vmem:[#allocation2 + $0x39] sm:$0xff]  ;;  %9042 = vst.msk [vmem:[%s26567_s14 + $0x40] sm:$0xff] %vm28434_vm6, %v9006_v51  ;;  %v9009_v42 = vmul.f32 %v25222_v43, %v8973_v25  ;;  %v8939_v0 = vadd.f32 %v21471_v46, %v26559_v5  ;;  %v8765_v2 = vpop.f32.mrb[31].mxu1  ;;  %vm28445_vm12 = vmmov %vm28406_vm0 }
 0x64b   : > { %9078 = vst.msk [vmem:[#allocation2 + $0x53] sm:$0xff] %vm28435_vm7, %v9006_v51  ;;  %21516 = vmatprep.mubr.msk.f32.mxu0 %vm28436_vm8, %v9152_v45  ;;  %v9008_v3 = vmul.f32 %v25328_v38, %v8972_v31  ;;  %v8938_v62 = vadd.f32 %v26559_v5, %v8765_v2  ;;  %vm28446_vm13 = vmmov %vm28406_vm0 }
 0x64c   : > { %21517 = vmatmul.mubr.msk.f32.gmra.mrb[42].mxu0 %vm28437_vm1, %v9153_v61  ;;  %9045 = vst.msk [vmem:[%s26567_s14 + $0x58] sm:$0xff] %vm28438_vm3, %v9009_v42  ;;  %v8975_v32 = vmax.f32 %v8939_v0, 0.0  ;;  %vm28447_vm15 = vmmov %vm28406_vm0 }
 0x64d   : > { %9081 = vst.msk [vmem:[#allocation2 + $0x6b] sm:$0xff] %vm28406_vm0, %v9009_v42  ;;  %v8974_v40 = vmax.f32 %v8938_v62, 0.0  ;;  %v21474_v30 = vpop.f32.mrb[32].mxu1  ;;  %vm28448_vm6 = vmmov %vm28406_vm0 }
 0x64e   : > { %v9154_v18 = vld [vmem:[#allocation2 + $0x41] sm:$0xff]  ;;  %v9155_v7 = vld [vmem:[#allocation2 + $0x49] sm:$0xff]  ;;  %9044 = vst.msk [vmem:[%s26567_s14 + $0x50] sm:$0xff] %vm28439_vm14, %v9008_v3  ;;  %v9011_v1 = vmul.f32 %v25333_v9, %v8975_v32  ;;  %v8941_v11 = vadd.f32 %v21474_v30, %v26559_v5  ;;  %v8775_v37 = vpop.f32.mrb[33].mxu1  ;;  %vm28450_vm7 = vmmov %vm28406_vm0 }
 0x64f   : > { %9080 = vst.msk [vmem:[#allocation2 + $0x63] sm:$0xff] %vm28440_vm4, %v9008_v3  ;;  %21519 = vmatprep.mubr.msk.f32.mxu0 %vm28441_vm5, %v9154_v18  ;;  %v9010_v33 = vmul.f32 %v25340_v54, %v8974_v40  ;;  %v8940_v44 = vadd.f32 %v26559_v5, %v8775_v37  ;;  %vm28451_vm8 = vmmov %vm28406_vm0 }
 0x650   : > { %21520 = vmatmul.mubr.msk.f32.gmra.mrb[44].mxu0 %vm28442_vm9, %v9155_v7  ;;  %9047 = vst.msk [vmem:[%s26567_s14 + $0x68] sm:$0xff] %vm28443_vm10, %v9011_v1  ;;  %v8977_v26 = vmax.f32 %v8941_v11, 0.0  ;;  %vm28452_vm1 = vmmov %vm28406_vm0 }
 0x651   : > { %9083 = vst.msk [vmem:[#allocation2 + $0x7b] sm:$0xff] %vm28444_vm11, %v9011_v1  ;;  %v8976_v13 = vmax.f32 %v8940_v44, 0.0  ;;  %v21477_v27 = vpop.f32.mrb[34].mxu1  ;;  %vm28453_vm3 = vmmov %vm28406_vm0 }
 0x652   : > { %v9156_v19 = vld [vmem:[#allocation2 + $0x51] sm:$0xff]  ;;  %v9157_v15 = vld [vmem:[#allocation2 + $0x59] sm:$0xff]  ;;  %9046 = vst.msk [vmem:[%s26567_s14 + $0x60] sm:$0xff] %vm28445_vm12, %v9010_v33  ;;  %v9013_v28 = vmul.f32 %v25345_v10, %v8977_v26  ;;  %v8943_v12 = vadd.f32 %v21477_v27, %v26559_v5  ;;  %v8785_v63 = vpop.f32.mrb[35].mxu1  ;;  %vm28454_vm14 = vmmov %vm28406_vm0 }
 0x653   : > { %9082 = vst.msk [vmem:[#allocation2 + $0x73] sm:$0xff] %vm28446_vm13, %v9010_v33  ;;  %21522 = vmatprep.mubr.msk.f32.mxu0 %vm28447_vm15, %v9156_v19  ;;  %v9012_v17 = vmul.f32 %v28449_v34, %v8976_v13  ;;  %v8942_v24 = vadd.f32 %v26559_v5, %v8785_v63  ;;  %vm28455_vm4 = vmmov %vm28406_vm0 }
 0x654   : > { %21523 = vmatmul.mubr.msk.f32.gmra.mrb[46].mxu0 %vm28448_vm6, %v9157_v15  ;;  %9049 = vst.msk [vmem:[%s26567_s14 + $0x78] sm:$0xff] %vm28450_vm7, %v9013_v28  ;;  %v8979_v39 = vmax.f32 %v8943_v12, 0.0  ;;  %vm28456_vm5 = vmmov %vm28406_vm0 }
 0x655   : > { %9085 = vst.msk [vmem:[#allocation2 + $0x8b] sm:$0xff] %vm28451_vm8, %v9013_v28  ;;  %v8978_v52 = vmax.f32 %v8942_v24, 0.0  ;;  %v21480_v25 = vpop.f32.mrb[36].mxu1  ;;  %vm28457_vm9 = vmmov %vm28406_vm0 }
 0x656   : > { %v9158_v55 = vld [vmem:[#allocation2 + $0x61] sm:$0xff]  ;;  %v9159_v51 = vld [vmem:[#allocation2 + $0x69] sm:$0xff]  ;;  %9048 = vst.msk [vmem:[%s26567_s14 + $0x70] sm:$0xff] %vm28452_vm1, %v9012_v17  ;;  %v9015_v45 = vmul.f32 %v25380_v60, %v8979_v39  ;;  %v8945_v61 = vadd.f32 %v21480_v25, %v26559_v5  ;;  %v8795_v31 = vpop.f32.mrb[37].mxu1  ;;  %vm28458_vm10 = vmmov %vm28406_vm0 }
 0x657   : > { %9084 = vst.msk [vmem:[#allocation2 + $0x83] sm:$0xff] %vm28453_vm3, %v9012_v17  ;;  %21525 = vmatprep.mubr.msk.f32.mxu0 %vm28406_vm0, %v9158_v55  ;;  %v9014_v46 = vmul.f32 %v25392_v16, %v8978_v52  ;;  %v8944_v42 = vadd.f32 %v26559_v5, %v8795_v31  ;;  %vm28459_vm11 = vmmov %vm28406_vm0 }
 0x658   : > { %21526 = vmatmul.mubr.msk.f32.gmra.mrb[48].mxu0 %vm28454_vm14, %v9159_v51  ;;  %9051 = vst.msk [vmem:[%s26567_s14 + $0x88] sm:$0xff] %vm28455_vm4, %v9015_v45  ;;  %v8981_v0 = vmax.f32 %v8945_v61, 0.0  ;;  %vm28460_vm12 = vmmov %vm28406_vm0 }
 0x659   : > { %9087 = vst.msk [vmem:[#allocation2 + $0x9b] sm:$0xff] %vm28456_vm5, %v9015_v45  ;;  %v8980_v62 = vmax.f32 %v8944_v42, 0.0  ;;  %v21483_v32 = vpop.f32.mrb[38].mxu1  ;;  %vm28461_vm13 = vmmov %vm28406_vm0 }
 0x65a   : > { %v9160_v2 = vld [vmem:[#allocation2 + $0x71] sm:$0xff]  ;;  %v9161_v3 = vld [vmem:[#allocation2 + $0x79] sm:$0xff]  ;;  %9050 = vst.msk [vmem:[%s26567_s14 + $0x80] sm:$0xff] %vm28457_vm9, %v9014_v46  ;;  %v9017_v18 = vmul.f32 %v25397_v14, %v8981_v0  ;;  %v8947_v7 = vadd.f32 %v21483_v32, %v26559_v5  ;;  %v8805_v40 = vpop.f32.mrb[39].mxu1  ;;  %vm28462_vm15 = vmmov %vm28406_vm0 }
 0x65b   : > { %9086 = vst.msk [vmem:[#allocation2 + $0x93] sm:$0xff] %vm28458_vm10, %v9014_v46  ;;  %21528 = vmatprep.mubr.msk.f32.mxu0 %vm28459_vm11, %v9160_v2  ;;  %v9016_v30 = vmul.f32 %v25444_v36, %v8980_v62  ;;  %v8946_v1 = vadd.f32 %v26559_v5, %v8805_v40  ;;  %vm28463_vm6 = vmmov %vm28406_vm0 }
 0x65c   : > { %21529 = vmatmul.mubr.msk.f32.gmra.mrb[50].mxu0 %vm28460_vm12, %v9161_v3  ;;  %9053 = vst.msk [vmem:[%s26567_s14 + $0x98] sm:$0xff] %vm28461_vm13, %v9017_v18  ;;  %v8983_v11 = vmax.f32 %v8947_v7, 0.0  ;;  %vm28464_vm7 = vmmov %vm28406_vm0 }
 0x65d   : > { %9089 = vst.msk [vmem:[#allocation2 + $0xab] sm:$0xff] %vm28462_vm15, %v9017_v18  ;;  %v8982_v44 = vmax.f32 %v8946_v1, 0.0  ;;  %v21486_v26 = vpop.f32.mrb[40].mxu1  ;;  %vm28465_vm8 = vmmov %vm28406_vm0 }
 0x65e   : > { %v9162_v37 = vld [vmem:[#allocation2 + $0x81] sm:$0xff]  ;;  %v9163_v33 = vld [vmem:[#allocation2 + $0x89] sm:$0xff]  ;;  %9052 = vst.msk [vmem:[%s26567_s14 + $0x90] sm:$0xff] %vm28463_vm6, %v9016_v30  ;;  %v9019_v19 = vmul.f32 %v25535_v20, %v8983_v11  ;;  %v8949_v15 = vadd.f32 %v21486_v26, %v26559_v5  ;;  %v8815_v13 = vpop.f32.mrb[41].mxu1  ;;  %vm28466_vm1 = vmmov %vm28406_vm0 }
 0x65f   : > { %9088 = vst.msk [vmem:[#allocation2 + $0xa3] sm:$0xff] %vm28464_vm7, %v9016_v30  ;;  %21531 = vmatprep.mubr.msk.f32.mxu0 %vm28465_vm8, %v9162_v37  ;;  %v9018_v27 = vmul.f32 %v25557_v53, %v8982_v44  ;;  %v8948_v28 = vadd.f32 %v26559_v5, %v8815_v13  ;;  %vm28467_vm3 = vmmov %vm28406_vm0 }
 0x660   : > { %21532 = vmatmul.mubr.msk.f32.gmra.mrb[52].mxu0 %vm28466_vm1, %v9163_v33  ;;  %9055 = vst.msk [vmem:[%s26567_s14 + $0xa8] sm:$0xff] %vm28467_vm3, %v9019_v19  ;;  %v8985_v12 = vmax.f32 %v8949_v15, 0.0  ;;  %vm28468_vm14 = vmmov %vm28406_vm0 }
 0x661   : > { %9091 = vst.msk [vmem:[#allocation2 + $0xbb] sm:$0xff] %vm28406_vm0, %v9019_v19  ;;  %vm28469_vm4 = vmmov %vm28406_vm0  ;;  %v8984_v24 = vmax.f32 %v8948_v28, 0.0  ;;  %v21489_v39 = vpop.f32.mrb[42].mxu1 }
 0x662   : > { %v9164_v63 = vld [vmem:[#allocation2 + $0x91] sm:$0xff]  ;;  %v9165_v17 = vld [vmem:[#allocation2 + $0x99] sm:$0xff]  ;;  %9054 = vst.msk [vmem:[%s26567_s14 + $0xa0] sm:$0xff] %vm28468_vm14, %v9018_v27  ;;  %vm28470_vm5 = vmmov %vm28406_vm0  ;;  %v9021_v55 = vmul.f32 %v25637_v8, %v8985_v12  ;;  %v8951_v51 = vadd.f32 %v21489_v39, %v26559_v5  ;;  %v8825_v52 = vpop.f32.mrb[43].mxu1 }
 0x663   : > { %9090 = vst.msk [vmem:[#allocation2 + $0xb3] sm:$0xff] %vm28469_vm4, %v9018_v27  ;;  %21534 = vmatprep.mubr.msk.f32.mxu0 %vm28470_vm5, %v9164_v63  ;;  %vm28471_vm9 = vmmov %vm28406_vm0  ;;  %v9020_v25 = vmul.f32 %v25642_v57, %v8984_v24  ;;  %v8950_v45 = vadd.f32 %v26559_v5, %v8825_v52  ;;  %v28488_v63 = vld [vmem:[#allocation20_spill] sm:$0xff] }
 0x664   : > { %21535 = vmatmul.mubr.msk.f32.gmra.mrb[54].mxu0 %vm28471_vm9, %v9165_v17  ;;  %vm28472_vm10 = vmmov %vm28406_vm0  ;;  %v8987_v61 = vmax.f32 %v8951_v51, 0.0 }
 0x665   : > { %9057 = vst.msk [vmem:[%s26567_s14 + $0xb8] sm:$0xff] %vm28472_vm10, %v9021_v55  ;;  %vm28473_vm11 = vmmov %vm28406_vm0  ;;  %v8986_v42 = vmax.f32 %v8950_v45, 0.0  ;;  %v21492_v0 = vpop.f32.mrb[44].mxu1 }
 0x666   : > { %9093 = vst.msk [vmem:[#allocation2 + $0xcb] sm:$0xff] %vm28473_vm11, %v9021_v55  ;;  %v9166_v31 = vld [vmem:[#allocation2 + $0xa1] sm:$0xff]  ;;  %v9167_v46 = vld [vmem:[#allocation2 + $0xa9] sm:$0xff]  ;;  %vm28474_vm12 = vmmov %vm28406_vm0  ;;  %v9023_v2 = vmul.f32 %v25661_v56, %v8987_v61  ;;  %v8953_v3 = vadd.f32 %v21492_v0, %v26559_v5  ;;  %v8835_v62 = vpop.f32.mrb[45].mxu1 }
 0x667   : > { %9056 = vst.msk [vmem:[%s26567_s14 + $0xb0] sm:$0xff] %vm28474_vm12, %v9020_v25  ;;  %vm28475_vm13 = vmmov %vm28406_vm0  ;;  %v9022_v32 = vmul.f32 %v25671_v47, %v8986_v42  ;;  %v8952_v18 = vadd.f32 %v26559_v5, %v8835_v62  ;;  %v28490_v55 = vld [vmem:[#allocation21_spill] sm:$0xff]  ;;  %v28496_v42 = vld [vmem:[#allocation4_spill] sm:$0xff] }
 0x668   : > { %9092 = vst.msk [vmem:[#allocation2 + $0xc3] sm:$0xff] %vm28475_vm13, %v9020_v25  ;;  %vm28476_vm15 = vmmov %vm28406_vm0  ;;  %v8989_v7 = vmax.f32 %v8953_v3, 0.0  ;;  %v28498_v62 = vld [vmem:[#allocation22_spill] sm:$0xff] }
 0x669   : > { %21537 = vmatprep.mubr.msk.f32.mxu0 %vm28476_vm15, %v9166_v31  ;;  %vm28477_vm6 = vmmov %vm28406_vm0  ;;  %v8988_v1 = vmax.f32 %v8952_v18, 0.0  ;;  %v21495_v11 = vpop.f32.mrb[46].mxu1 }
 0x66a   : > { %21538 = vmatmul.mubr.msk.f32.gmra.mrb[56].mxu0 %vm28477_vm6, %v9167_v46  ;;  %vm28478_vm7 = vmmov %vm28406_vm0  ;;  %v9168_v40 = vld [vmem:[#allocation2 + $0xb1] sm:$0xff]  ;;  %v9169_v30 = vld [vmem:[#allocation2 + $0xb9] sm:$0xff]  ;;  %v9025_v37 = vmul.f32 %v25765_v23, %v8989_v7  ;;  %v8955_v33 = vadd.f32 %v21495_v11, %v26559_v5  ;;  %v8845_v44 = vpop.f32.mrb[47].mxu1 }
 0x66b   : > { %9059 = vst.msk [vmem:[%s26567_s14 + $0xc8] sm:$0xff] %vm28478_vm7, %v9023_v2  ;;  %vm28479_vm8 = vmmov %vm28406_vm0  ;;  %21540 = vmatprep.mubr.msk.f32.mxu0 %vm28406_vm0, %v9168_v40  ;;  %v9024_v26 = vmul.f32 %v25781_v58, %v8988_v1  ;;  %v8954_v19 = vadd.f32 %v26559_v5, %v8845_v44 }
 0x66c   : > { %9095 = vst.msk [vmem:[#allocation2 + $0xdb] sm:$0xff] %vm28479_vm8, %v9023_v2  ;;  %vm28480_vm1 = vmmov %vm28406_vm0  ;;  %v8991_v15 = vmax.f32 %v8955_v33, 0.0 }
 0x66d   : > { %9058 = vst.msk [vmem:[%s26567_s14 + $0xc0] sm:$0xff] %vm28480_vm1, %v9022_v32  ;;  %vm28481_vm3 = vmmov %vm28406_vm0  ;;  %v8990_v28 = vmax.f32 %v8954_v19, 0.0  ;;  %v21498_v12 = vpop.f32.mrb[48].mxu1  ;;  %v28505_v19 = vld [vmem:[#allocation6_spill] sm:$0xff] }
 0x66e   : > { %9094 = vst.msk [vmem:[#allocation2 + $0xd3] sm:$0xff] %vm28481_vm3, %v9022_v32  ;;  %vm28482_vm14 = vmmov %vm28406_vm0  ;;  %v9027_v17 = vmul.f32 %v28488_v63, %v8991_v15  ;;  %v8957_v24 = vadd.f32 %v21498_v12, %v26559_v5  ;;  %v8855_v39 = vpop.f32.mrb[49].mxu1  ;;  %v18429_v63 = vld [vmem:[%s28195_s1 + $0x38] sm:$0xf] }
 0x66f   : > { %21541 = vmatmul.mubr.msk.f32.gmra.mrb[58].mxu0 %vm28482_vm14, %v9169_v30  ;;  %vm28483_vm4 = vmmov %vm28406_vm0  ;;  %v9170_v13 = vld [vmem:[#allocation2 + $0xc1] sm:$0xff]  ;;  %v9171_v27 = vld [vmem:[#allocation2 + $0xc9] sm:$0xff]  ;;  %v9026_v51 = vmul.f32 %v28490_v55, %v8990_v28  ;;  %v8956_v52 = vadd.f32 %v26559_v5, %v8855_v39 }
 0x670   : > { %9061 = vst.msk [vmem:[%s26567_s14 + $0xd8] sm:$0xff] %vm28483_vm4, %v9025_v37  ;;  %vm28484_vm5 = vmmov %vm28406_vm0  ;;  %v8993_v25 = vmax.f32 %v8957_v24, 0.0  ;;  %v28511_v24 = vld [vmem:[#allocation7_spill] sm:$0xff] }
 0x671   : > { %9097 = vst.msk [vmem:[#allocation2 + $0xeb] sm:$0xff] %vm28484_vm5, %v9025_v37  ;;  %vm28485_vm9 = vmmov %vm28406_vm0  ;;  %v8992_v31 = vmax.f32 %v8956_v52, 0.0  ;;  %v21501_v46 = vpop.f32.mrb[50].mxu1  ;;  %v28503_v37 = vld [vmem:[#allocation5_spill] sm:$0xff] }
 0x672   : > { %9060 = vst.msk [vmem:[%s26567_s14 + $0xd0] sm:$0xff] %vm28485_vm9, %v9024_v26  ;;  %vm28486_vm10 = vmmov %vm28406_vm0  ;;  %v9029_v0 = vmul.f32 %v28496_v42, %v8993_v25  ;;  %v8959_v2 = vadd.f32 %v21501_v46, %v26559_v5  ;;  %v8865_v3 = vpop.f32.mrb[51].mxu1  ;;  %v9109_v46 = vld [vmem:[#allocation2 + $0x8] sm:$0xff] }
 0x673   : > { %9096 = vst.msk [vmem:[#allocation2 + $0xe3] sm:$0xff] %vm28486_vm10, %v9024_v26  ;;  %vm28487_vm11 = vmmov %vm28406_vm0  ;;  %v9028_v32 = vmul.f32 %v28498_v62, %v8992_v31  ;;  %v8958_v18 = vadd.f32 %v26559_v5, %v8865_v3  ;;  %v9108_v31 = vld [vmem:[#allocation2] sm:$0xff]  ;;  %v9111_v3 = vld [vmem:[#allocation2 + $0x18] sm:$0xff] }
 0x674   : > { %21543 = vmatprep.mubr.msk.f32.mxu0 %vm28487_vm11, %v9170_v13  ;;  %vm28489_vm12 = vmmov %vm28406_vm0  ;;  %9101 = vst.msk [vmem:[#allocation2 + $0x10b] sm:$0xff] %vm28406_vm0, %v9029_v0  ;;  %v8995_v7 = vmax.f32 %v8959_v2, 0.0  ;;  %v9110_v2 = vld [vmem:[#allocation2 + $0x10] sm:$0xff] }
 0x675   : > { %21544 = vmatmul.mubr.msk.f32.gmra.mrb[60].mxu0 %vm28489_vm12, %v9171_v27  ;;  %vm28491_vm13 = vmmov %vm28406_vm0  ;;  %v9172_v45 = vld [vmem:[#allocation2 + $0xd1] sm:$0xff]  ;;  %v9173_v61 = vld [vmem:[#allocation2 + $0xd9] sm:$0xff]  ;;  %v8994_v1 = vmax.f32 %v8958_v18, 0.0  ;;  %v21504_v11 = vpop.f32.mrb[52].mxu1 }
 0x676   : > { %9063 = vst.msk [vmem:[%s26567_s14 + $0xe8] sm:$0xff] %vm28491_vm13, %v9027_v17  ;;  %vm28492_vm15 = vmmov %vm28406_vm0  ;;  %v9031_v33 = vmul.f32 %v28503_v37, %v8995_v7  ;;  %v8961_v44 = vadd.f32 %v21504_v11, %v26559_v5  ;;  %v8875_v26 = vpop.f32.mrb[53].mxu1  ;;  %v9113_v18 = vld [vmem:[#allocation2 + $0x28] sm:$0xff]  ;;  %v9114_v7 = vld [vmem:[#allocation2 + $0x30] sm:$0xff] }
 0x677   : > { %9099 = vst.msk [vmem:[#allocation2 + $0xfb] sm:$0xff] %vm28492_vm15, %v9027_v17  ;;  %vm28493_vm6 = vmmov %vm28406_vm0  ;;  %v9030_v15 = vmul.f32 %v28505_v19, %v8994_v1  ;;  %v8960_v13 = vadd.f32 %v26559_v5, %v8875_v26  ;;  %v28513_v5 = vld [vmem:[#allocation8_spill] sm:$0xff]  ;;  %v9119_v11 = vld [vmem:[#allocation2 + $0x58] sm:$0xff] }
 0x678   : > { %9062 = vst.msk [vmem:[%s26567_s14 + $0xe0] sm:$0xff] %vm28493_vm6, %v9026_v51  ;;  %vm28494_vm7 = vmmov %vm28406_vm0  ;;  %v8997_v27 = vmax.f32 %v8961_v44, 0.0  ;;  %v9118_v1 = vld [vmem:[#allocation2 + $0x50] sm:$0xff]  ;;  %v9121_v44 = vld [vmem:[#allocation2 + $0x68] sm:$0xff] }
 0x679   : > { %9098 = vst.msk [vmem:[#allocation2 + $0xf3] sm:$0xff] %vm28494_vm7, %v9026_v51  ;;  %vm28495_vm8 = vmmov %vm28406_vm0  ;;  %v8996_v17 = vmax.f32 %v8960_v13, 0.0  ;;  %v9122_v26 = vld [vmem:[#allocation2 + $0x70] sm:$0xff]  ;;  %v9124_v13 = vld [vmem:[#allocation2 + $0x80] sm:$0xff] }
 0x67a   : > { %21546 = vmatprep.mubr.msk.f32.mxu0 %vm28495_vm8, %v9172_v45  ;;  %vm28497_vm1 = vmmov %vm28406_vm0  ;;  %v9174_v40 = vld [vmem:[#allocation2 + $0xe1] sm:$0xff]  ;;  %v9175_v30 = vld [vmem:[#allocation2 + $0xe9] sm:$0xff]  ;;  %v9033_v39 = vmul.f32 %v28511_v24, %v8997_v27 }
 0x67b   : > { %21547 = vmatmul.mubr.msk.f32.gmra.mrb[62].mxu0 %vm28497_vm1, %v9173_v61  ;;  %vm28499_vm3 = vmmov %vm28406_vm0  ;;  %v9032_v51 = vmul.f32 %v28513_v5, %v8996_v17  ;;  %v9125_v27 = vld [vmem:[#allocation2 + $0x88] sm:$0xff]  ;;  %v9128_v17 = vld [vmem:[#allocation2 + $0xa0] sm:$0xff] }
 0x67c   : > { %9065 = vst.msk [vmem:[%s26567_s14 + $0xf8] sm:$0xff] %vm28499_vm3, %v9029_v0  ;;  %vm28500_vm14 = vmmov %vm28406_vm0  ;;  %v26785_v0 = vld [vmem:[%s28195_s1 + $0x30] sm:$0xf] }
 0x67d   : > { %9064 = vst.msk [vmem:[%s26567_s14 + $0xf0] sm:$0xff] %vm28500_vm14, %v9028_v32  ;;  %vm28501_vm4 = vmmov %vm28406_vm0  ;;  %v9925_v5 = vld [vmem:[#allocation2 + $0xea] sm:$0xff] }
 0x67e   : > { %9100 = vst.msk [vmem:[#allocation2 + $0x103] sm:$0xff] %vm28501_vm4, %v9028_v32  ;;  %vm28502_vm5 = vmmov %vm28406_vm0  ;;  %v9112_v32 = vld [vmem:[#allocation2 + $0x20] sm:$0xff] }
 0x67f   : > { %21549 = vmatprep.mubr.msk.f32.mxu0 %vm28502_vm5, %v9174_v40  ;;  %vm28504_vm9 = vmmov %vm28406_vm0  ;;  %v9115_v40 = vld [vmem:[#allocation2 + $0x38] sm:$0xff] }
 0x680   : > { %21550 = vmatmul.mubr.msk.f32.gmra.mrb[64].mxu0 %vm28504_vm9, %v9175_v30  ;;  %vm28506_vm10 = vmmov %vm28406_vm0  ;;  %v9176_v28 = vld [vmem:[#allocation2 + $0xf1] sm:$0xff]  ;;  %v9177_v12 = vld [vmem:[#allocation2 + $0xf9] sm:$0xff] }
 0x681   : > { %9067 = vst.msk [vmem:[%s26567_s14 + $0x108] sm:$0xff] %vm28506_vm10, %v9031_v33  ;;  %vm28507_vm11 = vmmov %vm28406_vm0  ;;  %v9117_v30 = vld [vmem:[#allocation2 + $0x48] sm:$0xff]  ;;  %v9926_v24 = vld [vmem:[#allocation2 + $0xf2] sm:$0xff] }
 0x682   : > { %9103 = vst.msk [vmem:[#allocation2 + $0x11b] sm:$0xff] %vm28507_vm11, %v9031_v33  ;;  %vm28508_vm12 = vmmov %vm28406_vm0  ;;  %vm28523_vm11 = vcmask 1043456   ;;  %v9120_v33 = vld [vmem:[#allocation2 + $0x60] sm:$0xff] }
 0x683   : > { %9066 = vst.msk [vmem:[%s26567_s14 + $0x100] sm:$0xff] %vm28508_vm12, %v9030_v15  ;;  %vm28509_vm13 = vmmov %vm28406_vm0  ;;  %v9927_v19 = vld [vmem:[#allocation2 + $0xfa] sm:$0xff] }
 0x684   : > { %9102 = vst.msk [vmem:[#allocation2 + $0x113] sm:$0xff] %vm28509_vm13, %v9030_v15  ;;  %vm28510_vm15 = vmmov %vm28406_vm0  ;;  %v9123_v15 = vld [vmem:[#allocation2 + $0x78] sm:$0xff] }
 0x685   : > { %21552 = vmatprep.mubr.msk.f32.mxu0 %vm28510_vm15, %v9176_v28  ;;  %vm28512_vm6 = vmmov %vm28406_vm0  ;;  %v9178_v52 = vld [vmem:[#allocation2 + $0x101] sm:$0xff]  ;;  %v9179_v25 = vld [vmem:[#allocation2 + $0x109] sm:$0xff] }
 0x686   : > { %21553 = vmatmul.mubr.msk.f32.gmra.mrb[66].mxu0 %vm28512_vm6, %v9177_v12  ;;  %vm28514_vm7 = vmmov %vm28406_vm0  ;;  %v9126_v28 = vld [vmem:[#allocation2 + $0x90] sm:$0xff]  ;;  %v9127_v12 = vld [vmem:[#allocation2 + $0x98] sm:$0xff] }
 0x687   : > { %9069 = vst.msk [vmem:[%s26567_s14 + $0x118] sm:$0xff] %vm28514_vm7, %v9033_v39  ;;  %vm28515_vm8 = vmmov %vm28406_vm0  ;;  %21555 = vmatprep.mubr.msk.f32.mxu0 %vm28406_vm0, %v9178_v52  ;;  %v9131_v52 = vld [vmem:[#allocation2 + $0xb8] sm:$0xff]  ;;  %v9928_v37 = vld [vmem:[#allocation2 + $0x102] sm:$0xff] }
 0x688   : > { %9105 = vst.msk [vmem:[#allocation2 + $0x12b] sm:$0xff] %vm28515_vm8, %v9033_v39  ;;  %vm28516_vm1 = vmmov %vm28406_vm0  ;;  %v9129_v39 = vld [vmem:[#allocation2 + $0xa8] sm:$0xff] }
 0x689   : > { %9068 = vst.msk [vmem:[%s26567_s14 + $0x110] sm:$0xff] %vm28516_vm1, %v9032_v51  ;;  %vm28517_vm3 = vmmov %vm28406_vm0  ;;  %v9929_v62 = vld [vmem:[#allocation2 + $0x10a] sm:$0xff] }
 0x68a   : > { %9104 = vst.msk [vmem:[#allocation2 + $0x123] sm:$0xff] %vm28517_vm3, %v9032_v51  ;;  %vm28518_vm14 = vmmov %vm28406_vm0  ;;  %v9130_v51 = vld [vmem:[#allocation2 + $0xb0] sm:$0xff] }
 0x68b   : > { %21556 = vmatmul.mubr.msk.f32.gmra.mrb[68].mxu0 %vm28518_vm14, %v9179_v25  ;;  %v9180_v45 = vld [vmem:[#allocation2 + $0x111] sm:$0xff]  ;;  %v9181_v61 = vld [vmem:[#allocation2 + $0x119] sm:$0xff]  ;;  %vm28519_vm4 = vmmov %vm28406_vm0 }
 0x68c   : > { %21558 = vmatprep.mubr.msk.f32.mxu0 %vm28519_vm4, %v9180_v45  ;;  %vm28520_vm5 = vmmov %vm28406_vm0  ;;  %v9132_v25 = vld [vmem:[#allocation2 + $0xc0] sm:$0xff]  ;;  %v9133_v45 = vld [vmem:[#allocation2 + $0xc8] sm:$0xff] }
 0x68d   : > { %vm28521_vm9 = vmmov %vm28406_vm0  ;;  %v9930_v42 = vld [vmem:[#allocation2 + $0x112] sm:$0xff]  ;;  %v9931_v55 = vld [vmem:[#allocation2 + $0x11a] sm:$0xff] }
 0x68e   : > { %vm28522_vm10 = vmmov %vm28406_vm0 }
 0x68f   : > { %21559 = vmatmul.mubr.msk.f32.gmra.mrb[70].mxu0 %vm28520_vm5, %v9181_v61  ;;  %vm28524_vm12 = vmmov %vm28406_vm0  ;;  %v9134_v61 = vld [vmem:[#allocation2 + $0xd0] sm:$0xff] }
 0x690   : > { %21563 = vmatprep.mubr.msk.f32.mxu0 %vm28521_vm9, %v9108_v31  ;;  %vm28525_vm13 = vmmov %vm28523_vm11  ;;  %v9135_v31 = vld [vmem:[#allocation2 + $0xd8] sm:$0xff] }
 0x691   : > { %vm28526_vm15 = vmmov %vm28406_vm0 }
 0x692   : > { %vm28527_vm6 = vmmov %vm28406_vm0 }
 0x693   : > { %21564 = vmatmul.mubr.msk.f32.vlgmr.msra.gmra.mrb[36].mxu0 %vm28522_vm10, %v9109_v46  ;;  %vm28528_vm7 = vmmov %vm28406_vm0  ;;  %v9136_v46 = vld [vmem:[#allocation2 + $0xe0] sm:$0xff] }
 0x694   : > { %21618 = vmatpush3.msk.msra.mxu0 %vm28523_vm11, %v26552_v50  ;;  %21566 = vmatprep.mubr.msk.f32.mxu0 %vm28524_vm12, %v9110_v2  ;;  %vm28529_vm8 = vmmov %vm28406_vm0  ;;  %v9116_v50 = vld [vmem:[#allocation2 + $0x40] sm:$0xff]  ;;  %v9137_v2 = vld [vmem:[#allocation2 + $0xe8] sm:$0xff] }
 0x695   : > { %21673 = vmatprep.subr.msk.mxu0 %vm28525_vm13, %v26785_v0  ;;  %vm28530_vm1 = vmmov %vm28406_vm0 }
 0x696   : > { %vm28531_vm3 = vmmov %vm28406_vm0 }
 0x697   : > { %21567 = vmatmul.mubr.msk.f32.gmra.mrb[38].mxu0 %vm28526_vm15, %v9111_v3  ;;  %vm28532_vm14 = vmmov %vm28406_vm0  ;;  %v9138_v3 = vld [vmem:[#allocation2 + $0xf0] sm:$0xff] }
 0x698   : > { %21569 = vmatprep.mubr.msk.f32.mxu0 %vm28527_vm6, %v9112_v32  ;;  %vm28533_vm4 = vmmov %vm28406_vm0  ;;  %v9139_v32 = vld [vmem:[#allocation2 + $0xf8] sm:$0xff] }
 0x699   : > { %vm28534_vm5 = vmmov %vm28406_vm0 }
 0x69a   : > { %vm28535_vm9 = vmmov %vm28406_vm0 }
 0x69b   : > { %21570 = vmatmul.mubr.msk.f32.gmra.mrb[40].mxu0 %vm28528_vm7, %v9113_v18  ;;  %vm28536_vm10 = vmmov %vm28406_vm0  ;;  %v9140_v18 = vld [vmem:[#allocation2 + $0x100] sm:$0xff] }
 0x69c   : > { %21572 = vmatprep.mubr.msk.f32.mxu0 %vm28529_vm8, %v9114_v7  ;;  %vm28537_vm11 = vmmov %vm28406_vm0  ;;  %v9141_v7 = vld [vmem:[#allocation2 + $0x108] sm:$0xff] }
 0x69d   : > { %vm28538_vm12 = vmmov %vm28406_vm0 }
 0x69e   : > { %vm28539_vm13 = vmmov %vm28406_vm0 }
 0x69f   : > { %21573 = vmatmul.mubr.msk.f32.gmra.mrb[42].mxu0 %vm28530_vm1, %v9115_v40  ;;  %vm28540_vm15 = vmmov %vm28406_vm0  ;;  %v9142_v40 = vld [vmem:[#allocation2 + $0x110] sm:$0xff] }
 0x6a0   : > { %21575 = vmatprep.mubr.msk.f32.mxu0 %vm28531_vm3, %v9116_v50  ;;  %vm28541_vm6 = vmmov %vm28406_vm0  ;;  %v9896_v50 = vld [vmem:[#allocation2 + $0x2] sm:$0xff] }
 0x6a1   : > { %vm28542_vm7 = vmmov %vm28406_vm0 }
 0x6a2   : > { %vm28543_vm8 = vmmov %vm28406_vm0 }
 0x6a3   : > { %21576 = vmatmul.mubr.msk.f32.gmra.mrb[44].mxu0 %vm28406_vm0, %v9117_v30  ;;  %vm28544_vm1 = vmmov %vm28406_vm0  ;;  %v9143_v30 = vld [vmem:[#allocation2 + $0x118] sm:$0xff] }
 0x6a4   : > { %21578 = vmatprep.mubr.msk.f32.mxu0 %vm28532_vm14, %v9118_v1  ;;  %vm28545_vm3 = vmmov %vm28406_vm0  ;;  %v9897_v1 = vld [vmem:[#allocation2 + $0xa] sm:$0xff] }
 0x6a5   : > { %vm28546_vm14 = vmmov %vm28406_vm0 }
 0x6a7   : > { %21579 = vmatmul.mubr.msk.f32.gmra.mrb[46].mxu0 %vm28533_vm4, %v9119_v11  ;;  %vm28547_vm4 = vmmov %vm28406_vm0  ;;  %v26830_v11 = vld [vmem:[%s28195_s1 + $0x34] sm:$0xf] }
 0x6a8   : > { %21581 = vmatprep.mubr.msk.f32.mxu0 %vm28534_vm5, %v9120_v33  ;;  %vm28548_vm5 = vmmov %vm28406_vm0  ;;  %v26833_v33 = vld [vmem:[#allocation2 + $0x12] sm:$0xff] }
 0x6ab   : > { %21582 = vmatmul.mubr.msk.f32.gmra.mrb[48].mxu0 %vm28535_vm9, %v9121_v44  ;;  %vm28549_vm9 = vmmov %vm28406_vm0  ;;  %v26841_v44 = vld [vmem:[#allocation2 + $0x1a] sm:$0xff] }
 0x6ac   : > { %21584 = vmatprep.mubr.msk.f32.mxu0 %vm28536_vm10, %v9122_v26  ;;  %vm28550_vm10 = vmmov %vm28406_vm0  ;;  %v26845_v26 = vld [vmem:[#allocation2 + $0x22] sm:$0xff] }
 0x6af   : > { %21585 = vmatmul.mubr.msk.f32.gmra.mrb[50].mxu0 %vm28537_vm11, %v9123_v15  ;;  %vm28551_vm11 = vmmov %vm28406_vm0  ;;  %v26849_v15 = vld [vmem:[#allocation2 + $0x2a] sm:$0xff] }
 0x6b0   : > { %21587 = vmatprep.mubr.msk.f32.mxu0 %vm28538_vm12, %v9124_v13  ;;  %vm28552_vm12 = vmmov %vm28406_vm0  ;;  %v26857_v13 = vld [vmem:[#allocation2 + $0x3a] sm:$0xff] }
 0x6b3   : > { %21588 = vmatmul.mubr.msk.f32.gmra.mrb[52].mxu0 %vm28539_vm13, %v9125_v27  ;;  %vm28553_vm13 = vmmov %vm28406_vm0  ;;  %v26861_v27 = vld [vmem:[#allocation2 + $0x42] sm:$0xff] }
 0x6b4   : > { %21590 = vmatprep.mubr.msk.f32.mxu0 %vm28540_vm15, %v9126_v28  ;;  %vm28554_vm15 = vmmov %vm28406_vm0  ;;  %v26865_v28 = vld [vmem:[#allocation2 + $0x4a] sm:$0xff] }
 0x6b7   : > { %21591 = vmatmul.mubr.msk.f32.gmra.mrb[54].mxu0 %vm28541_vm6, %v9127_v12  ;;  %vm28555_vm6 = vmmov %vm28406_vm0  ;;  %v26869_v12 = vld [vmem:[#allocation2 + $0x52] sm:$0xff] }
 0x6b8   : > { %21593 = vmatprep.mubr.msk.f32.mxu0 %vm28542_vm7, %v9128_v17  ;;  %vm28556_vm7 = vmmov %vm28406_vm0  ;;  %v9907_v17 = vld [vmem:[#allocation2 + $0x5a] sm:$0xff] }
 0x6bb   : > { %21594 = vmatmul.mubr.msk.f32.gmra.mrb[56].mxu0 %vm28543_vm8, %v9129_v39  ;;  %vm28557_vm8 = vmmov %vm28406_vm0  ;;  %v9908_v39 = vld [vmem:[#allocation2 + $0x62] sm:$0xff] }
 0x6bc   : > { %21596 = vmatprep.mubr.msk.f32.mxu0 %vm28544_vm1, %v9130_v51  ;;  %vm28558_vm1 = vmmov %vm28406_vm0  ;;  %v9909_v51 = vld [vmem:[#allocation2 + $0x6a] sm:$0xff] }
 0x6bf   : > { %21597 = vmatmul.mubr.msk.f32.gmra.mrb[58].mxu0 %vm28545_vm3, %v9131_v52  ;;  %vm28559_vm3 = vcmask 1043456   ;;  %v9910_v52 = vld [vmem:[#allocation2 + $0x72] sm:$0xff] }
 0x6c0   : > { %21599 = vmatprep.mubr.msk.f32.mxu0 %vm28406_vm0, %v9132_v25  ;;  %v9911_v25 = vld [vmem:[#allocation2 + $0x7a] sm:$0xff] }
 0x6c3   : > { %21600 = vmatmul.mubr.msk.f32.gmra.mrb[60].mxu0 %vm28546_vm14, %v9133_v45  ;;  %vm28560_vm14 = vmmov %vm28559_vm3  ;;  %v9912_v45 = vld [vmem:[#allocation2 + $0x82] sm:$0xff] }
 0x6c4   : > { %21602 = vmatprep.mubr.msk.f32.mxu0 %vm28547_vm4, %v9134_v61  ;;  %vm28561_vm4 = vmmov %vm28406_vm0  ;;  %v9913_v61 = vld [vmem:[#allocation2 + $0x8a] sm:$0xff] }
 0x6c7   : > { %21603 = vmatmul.mubr.msk.f32.gmra.mrb[62].mxu0 %vm28548_vm5, %v9135_v31  ;;  %vm28562_vm5 = vmmov %vm28406_vm0  ;;  %v9914_v31 = vld [vmem:[#allocation2 + $0x92] sm:$0xff] }
 0x6c8   : > { %21605 = vmatprep.mubr.msk.f32.mxu0 %vm28549_vm9, %v9136_v46  ;;  %vm28563_vm9 = vmmov %vm28406_vm0  ;;  %v9915_v46 = vld [vmem:[#allocation2 + $0x9a] sm:$0xff] }
 0x6cb   : > { %21606 = vmatmul.mubr.msk.f32.gmra.mrb[64].mxu0 %vm28550_vm10, %v9137_v2  ;;  %vm28564_vm10 = vmmov %vm28406_vm0  ;;  %v9916_v2 = vld [vmem:[#allocation2 + $0xa2] sm:$0xff] }
 0x6cc   : > { %21608 = vmatprep.mubr.msk.f32.mxu0 %vm28551_vm11, %v9138_v3  ;;  %vm28565_vm11 = vmmov %vm28406_vm0  ;;  %v9917_v3 = vld [vmem:[#allocation2 + $0xaa] sm:$0xff] }
 0x6cf   : > { %21609 = vmatmul.mubr.msk.f32.gmra.mrb[66].mxu0 %vm28552_vm12, %v9139_v32  ;;  %vm28566_vm12 = vmmov %vm28406_vm0  ;;  %v9918_v32 = vld [vmem:[#allocation2 + $0xb2] sm:$0xff] }
 0x6d0   : > { %21611 = vmatprep.mubr.msk.f32.mxu0 %vm28553_vm13, %v9140_v18  ;;  %vm28567_vm13 = vmmov %vm28406_vm0  ;;  %v9919_v18 = vld [vmem:[#allocation2 + $0xba] sm:$0xff] }
 0x6d3   : > { %21612 = vmatmul.mubr.msk.f32.gmra.mrb[68].mxu0 %vm28554_vm15, %v9141_v7  ;;  %vm28568_vm15 = vmmov %vm28406_vm0  ;;  %v9920_v7 = vld [vmem:[#allocation2 + $0xc2] sm:$0xff] }
 0x6d4   : > { %21614 = vmatprep.mubr.msk.f32.mxu0 %vm28555_vm6, %v9142_v40  ;;  %vm28569_vm6 = vmmov %vm28406_vm0  ;;  %v9921_v40 = vld [vmem:[#allocation2 + $0xca] sm:$0xff] }
 0x6d7   : > { %21615 = vmatmul.mubr.msk.f32.gmra.mrb[70].mxu0 %vm28556_vm7, %v9143_v30  ;;  %vm28570_vm7 = vmmov %vm28406_vm0  ;;  %v9923_v30 = vld [vmem:[#allocation2 + $0xda] sm:$0xff] }
 0x6d8   : > { %21619 = vmatprep.mubr.msk.f32.mxu0 %vm28557_vm8, %v9896_v50  ;;  %vm28571_vm8 = vmmov %vm28406_vm0  ;;  %v9922_v50 = vld [vmem:[#allocation2 + $0xd2] sm:$0xff] }
 0x6db   : > { %21620 = vmatmul.mubr.msk.f32.vlgmr.msra.gmra.mrb[36].mxu0 %vm28558_vm1, %v9897_v1  ;;  %vm28572_vm1 = vmmov %vm28406_vm0  ;;  %v9924_v1 = vld [vmem:[#allocation2 + $0xe2] sm:$0xff] }
 0x6dc   : > { %21674 = vmatpush3.msk.msra.mxu0 %vm28559_vm3, %v26785_v0  ;;  %21622 = vmatprep.mubr.msk.f32.mxu0 %vm28406_vm0, %v26833_v33  ;;  %v26853_v0 = vld [vmem:[#allocation2 + $0x32] sm:$0xff]  ;;  %vm28573_vm3 = vmmov %vm28406_vm0 }
 0x6dd   : > { %21729 = vmatprep.subr.msk.mxu0 %vm28560_vm14, %v26830_v11  ;;  %vm28574_vm14 = vmmov %vm28406_vm0 }
 0x6df   : > { %21623 = vmatmul.mubr.msk.f32.gmra.mrb[38].mxu0 %vm28561_vm4, %v26841_v44  ;;  %vm28575_vm4 = vmmov %vm28406_vm0 }
 0x6e0   : > { %21625 = vmatprep.mubr.msk.f32.mxu0 %vm28562_vm5, %v26845_v26  ;;  %vm28576_vm5 = vmmov %vm28406_vm0 }
 0x6e3   : > { %21626 = vmatmul.mubr.msk.f32.gmra.mrb[40].mxu0 %vm28563_vm9, %v26849_v15  ;;  %vm28577_vm9 = vmmov %vm28406_vm0 }
 0x6e4   : > { %21628 = vmatprep.mubr.msk.f32.mxu0 %vm28564_vm10, %v26853_v0  ;;  %vm28578_vm10 = vmmov %vm28406_vm0 }
 0x6e7   : > { %21629 = vmatmul.mubr.msk.f32.gmra.mrb[42].mxu0 %vm28565_vm11, %v26857_v13  ;;  %vm28579_vm11 = vmmov %vm28406_vm0 }
 0x6e8   : > { %21631 = vmatprep.mubr.msk.f32.mxu0 %vm28566_vm12, %v26861_v27  ;;  %vm28580_vm12 = vmmov %vm28406_vm0 }
 0x6eb   : > { %21632 = vmatmul.mubr.msk.f32.gmra.mrb[44].mxu0 %vm28567_vm13, %v26865_v28  ;;  %vm28581_vm13 = vmmov %vm28406_vm0 }
 0x6ec   : > { %21634 = vmatprep.mubr.msk.f32.mxu0 %vm28568_vm15, %v26869_v12  ;;  %vm28582_vm15 = vmmov %vm28406_vm0 }
 0x6ef   : > { %21635 = vmatmul.mubr.msk.f32.gmra.mrb[46].mxu0 %vm28569_vm6, %v9907_v17  ;;  %vm28583_vm6 = vmmov %vm28406_vm0 }
 0x6f0   : > { %21637 = vmatprep.mubr.msk.f32.mxu0 %vm28570_vm7, %v9908_v39  ;;  %vm28584_vm7 = vmmov %vm28406_vm0 }
 0x6f3   : > { %21638 = vmatmul.mubr.msk.f32.gmra.mrb[48].mxu0 %vm28571_vm8, %v9909_v51  ;;  %vm28585_vm8 = vmmov %vm28406_vm0 }
 0x6f4   : > { %21640 = vmatprep.mubr.msk.f32.mxu0 %vm28572_vm1, %v9910_v52  ;;  %vm28586_vm1 = vmmov %vm28406_vm0 }
 0x6f7   : > { %21641 = vmatmul.mubr.msk.f32.gmra.mrb[50].mxu0 %vm28573_vm3, %v9911_v25  ;;  %vm28587_vm3 = vmmov %vm28406_vm0 }
 0x6f8   : > { %21643 = vmatprep.mubr.msk.f32.mxu0 %vm28406_vm0, %v9912_v45 }
 0x6fb   : > { %21644 = vmatmul.mubr.msk.f32.gmra.mrb[52].mxu0 %vm28574_vm14, %v9913_v61  ;;  %vm28588_vm14 = vmmov %vm28406_vm0 }
 0x6fc   : > { %21646 = vmatprep.mubr.msk.f32.mxu0 %vm28575_vm4, %v9914_v31  ;;  %vm28589_vm4 = vmmov %vm28406_vm0 }
 0x6ff   : > { %21647 = vmatmul.mubr.msk.f32.gmra.mrb[54].mxu0 %vm28576_vm5, %v9915_v46  ;;  %vm28590_vm5 = vmmov %vm28406_vm0 }
 0x700   : > { %21649 = vmatprep.mubr.msk.f32.mxu0 %vm28577_vm9, %v9916_v2  ;;  %vm28591_vm9 = vmmov %vm28406_vm0 }
 0x703   : > { %21650 = vmatmul.mubr.msk.f32.gmra.mrb[56].mxu0 %vm28578_vm10, %v9917_v3  ;;  %vm28592_vm10 = vmmov %vm28406_vm0 }
 0x704   : > { %21652 = vmatprep.mubr.msk.f32.mxu0 %vm28579_vm11, %v9918_v32  ;;  %vm28593_vm11 = vmmov %vm28406_vm0 }
 0x707   : > { %21653 = vmatmul.mubr.msk.f32.gmra.mrb[58].mxu0 %vm28580_vm12, %v9919_v18  ;;  %vm28594_vm12 = vcmask 1043456  }
 0x708   : > { %21655 = vmatprep.mubr.msk.f32.mxu0 %vm28581_vm13, %v9920_v7  ;;  %vm28595_vm13 = vmmov %vm28406_vm0 }
 0x70b   : > { %21656 = vmatmul.mubr.msk.f32.gmra.mrb[60].mxu0 %vm28582_vm15, %v9921_v40  ;;  %vm28596_vm15 = vmmov %vm28594_vm12 }
 0x70c   : > { %21658 = vmatprep.mubr.msk.f32.mxu0 %vm28583_vm6, %v9922_v50  ;;  %vm28597_vm6 = vmmov %vm28406_vm0 }
 0x70f   : > { %21659 = vmatmul.mubr.msk.f32.gmra.mrb[62].mxu0 %vm28584_vm7, %v9923_v30  ;;  %vm28598_vm7 = vmmov %vm28406_vm0 }
 0x710   : > { %21661 = vmatprep.mubr.msk.f32.mxu0 %vm28585_vm8, %v9924_v1  ;;  %vm28599_vm8 = vmmov %vm28406_vm0 }
 0x713   : > { %21662 = vmatmul.mubr.msk.f32.gmra.mrb[64].mxu0 %vm28586_vm1, %v9925_v5  ;;  %vm28600_vm1 = vmmov %vm28406_vm0 }
 0x714   : > { %21664 = vmatprep.mubr.msk.f32.mxu0 %vm28587_vm3, %v9926_v24  ;;  %vm28601_vm3 = vmmov %vm28406_vm0 }
 0x717   : > { %21665 = vmatmul.mubr.msk.f32.gmra.mrb[66].mxu0 %vm28406_vm0, %v9927_v19 }
 0x718   : > { %21667 = vmatprep.mubr.msk.f32.mxu0 %vm28588_vm14, %v9928_v37  ;;  %vm28602_vm14 = vmmov %vm28406_vm0 }
 0x71b   : > { %21668 = vmatmul.mubr.msk.f32.gmra.mrb[68].mxu0 %vm28589_vm4, %v9929_v62  ;;  %vm28603_vm4 = vmmov %vm28406_vm0 }
 0x71c   : > { %21670 = vmatprep.mubr.msk.f32.mxu0 %vm28590_vm5, %v9930_v42  ;;  %vm28604_vm5 = vmmov %vm28406_vm0 }
 0x71f   : > { %21671 = vmatmul.mubr.msk.f32.gmra.mrb[70].mxu0 %vm28591_vm9, %v9931_v55  ;;  %vm28605_vm9 = vmmov %vm28406_vm0 }
 0x720   : > { %21675 = vmatprep.mubr.msk.f32.mxu0 %vm28592_vm10, %v26833_v33  ;;  %vm28606_vm10 = vmmov %vm28406_vm0  ;;  %v10361_v33 = vld [vmem:[#allocation2 + $0x12a] sm:$0xff] }
 0x723   : > { %21676 = vmatmul.mubr.msk.f32.vlgmr.msra.gmra.mrb[36].mxu0 %vm28593_vm11, %v26841_v44  ;;  %vm28607_vm11 = vmmov %vm28406_vm0  ;;  %v10756_v44 = vld [vmem:[#allocation2 + $0x13] sm:$0xff] }
 0x724   : > { %21730 = vmatpush3.msk.msra.mxu0 %vm28594_vm12, %v26830_v11  ;;  %21678 = vmatprep.mubr.msk.f32.mxu0 %vm28595_vm13, %v26845_v26  ;;  %vm28608_vm12 = vmmov %vm28406_vm0  ;;  %v10360_v11 = vld [vmem:[#allocation2 + $0x122] sm:$0xff]  ;;  %v10763_v26 = vld [vmem:[#allocation2 + $0x4b] sm:$0xff] }
 0x725   : > { %21785 = vmatprep.subr.msk.mxu0 %vm28596_vm15, %v18429_v63  ;;  %vm28609_vm13 = vmmov %vm28406_vm0 }
 0x726   : > { %vm28610_vm15 = vmmov %vm28406_vm0 }
 0x727   : > { %21679 = vmatmul.mubr.msk.f32.gmra.mrb[38].mxu0 %vm28597_vm6, %v26849_v15  ;;  %vm28611_vm6 = vmmov %vm28406_vm0  ;;  %v10765_v15 = vld [vmem:[#allocation2 + $0x5b] sm:$0xff] }
 0x728   : > { %21681 = vmatprep.mubr.msk.f32.mxu0 %vm28598_vm7, %v26853_v0  ;;  %vm28612_vm7 = vmmov %vm28406_vm0  ;;  %v10766_v0 = vld [vmem:[#allocation2 + $0x63] sm:$0xff] }
 0x72b   : > { %21682 = vmatmul.mubr.msk.f32.gmra.mrb[40].mxu0 %vm28599_vm8, %v26857_v13  ;;  %vm28613_vm8 = vmmov %vm28406_vm0  ;;  %v10767_v13 = vld [vmem:[#allocation2 + $0x6b] sm:$0xff] }
 0x72c   : > { %21684 = vmatprep.mubr.msk.f32.mxu0 %vm28600_vm1, %v26861_v27  ;;  %vm28614_vm1 = vmmov %vm28406_vm0  ;;  %v10768_v27 = vld [vmem:[#allocation2 + $0x73] sm:$0xff] }
 0x72f   : > { %21685 = vmatmul.mubr.msk.f32.gmra.mrb[42].mxu0 %vm28601_vm3, %v26865_v28  ;;  %vm28615_vm3 = vmmov %vm28406_vm0  ;;  %v10769_v28 = vld [vmem:[#allocation2 + $0x7b] sm:$0xff] }
 0x730   : > { %21687 = vmatprep.mubr.msk.f32.mxu0 %vm28406_vm0, %v26869_v12  ;;  %v10770_v12 = vld [vmem:[#allocation2 + $0x83] sm:$0xff] }
 0x733   : > { %21688 = vmatmul.mubr.msk.f32.gmra.mrb[44].mxu0 %vm28602_vm14, %v9907_v17  ;;  %vm28616_vm14 = vmmov %vm28406_vm0  ;;  %v10771_v17 = vld [vmem:[#allocation2 + $0x8b] sm:$0xff] }
 0x734   : > { %21690 = vmatprep.mubr.msk.f32.mxu0 %vm28603_vm4, %v9908_v39  ;;  %vm28617_vm4 = vmmov %vm28406_vm0  ;;  %v10772_v39 = vld [vmem:[#allocation2 + $0x93] sm:$0xff] }
 0x737   : > { %21691 = vmatmul.mubr.msk.f32.gmra.mrb[46].mxu0 %vm28604_vm5, %v9909_v51  ;;  %vm28618_vm5 = vmmov %vm28406_vm0  ;;  %v10773_v51 = vld [vmem:[#allocation2 + $0x9b] sm:$0xff] }
 0x738   : > { %21693 = vmatprep.mubr.msk.f32.mxu0 %vm28605_vm9, %v9910_v52  ;;  %vm28619_vm9 = vmmov %vm28406_vm0  ;;  %v10774_v52 = vld [vmem:[#allocation2 + $0xa3] sm:$0xff] }
 0x73b   : > { %21694 = vmatmul.mubr.msk.f32.gmra.mrb[48].mxu0 %vm28606_vm10, %v9911_v25  ;;  %vm28620_vm10 = vmmov %vm28406_vm0  ;;  %v10775_v25 = vld [vmem:[#allocation2 + $0xab] sm:$0xff] }
 0x73c   : > { %21696 = vmatprep.mubr.msk.f32.mxu0 %vm28607_vm11, %v9912_v45  ;;  %vm28621_vm11 = vmmov %vm28406_vm0  ;;  %v10776_v45 = vld [vmem:[#allocation2 + $0xb3] sm:$0xff] }
 0x73f   : > { %21697 = vmatmul.mubr.msk.f32.gmra.mrb[50].mxu0 %vm28608_vm12, %v9913_v61  ;;  %vm28622_vm12 = vmmov %vm28406_vm0  ;;  %v10777_v61 = vld [vmem:[#allocation2 + $0xbb] sm:$0xff] }
 0x740   : > { %21699 = vmatprep.mubr.msk.f32.mxu0 %vm28609_vm13, %v9914_v31  ;;  %vm28623_vm13 = vmmov %vm28406_vm0  ;;  %v10778_v31 = vld [vmem:[#allocation2 + $0xc3] sm:$0xff] }
 0x743   : > { %21700 = vmatmul.mubr.msk.f32.gmra.mrb[52].mxu0 %vm28610_vm15, %v9915_v46  ;;  %vm28624_vm15 = vmmov %vm28406_vm0  ;;  %v10779_v46 = vld [vmem:[#allocation2 + $0xcb] sm:$0xff] }
 0x744   : > { %21702 = vmatprep.mubr.msk.f32.mxu0 %vm28611_vm6, %v9916_v2  ;;  %vm28625_vm6 = vmmov %vm28406_vm0  ;;  %v10780_v2 = vld [vmem:[#allocation2 + $0xd3] sm:$0xff] }
 0x747   : > { %21703 = vmatmul.mubr.msk.f32.gmra.mrb[54].mxu0 %vm28612_vm7, %v9917_v3  ;;  %vm28626_vm7 = vmmov %vm28406_vm0  ;;  %v10781_v3 = vld [vmem:[#allocation2 + $0xdb] sm:$0xff] }
 0x748   : > { %21705 = vmatprep.mubr.msk.f32.mxu0 %vm28613_vm8, %v9918_v32  ;;  %vm28627_vm8 = vmmov %vm28406_vm0  ;;  %v10782_v32 = vld [vmem:[#allocation2 + $0xe3] sm:$0xff] }
 0x74b   : > { %21706 = vmatmul.mubr.msk.f32.gmra.mrb[56].mxu0 %vm28614_vm1, %v9919_v18  ;;  %vm28628_vm1 = vmmov %vm28406_vm0  ;;  %v10783_v18 = vld [vmem:[#allocation2 + $0xeb] sm:$0xff] }
 0x74c   : > { %21708 = vmatprep.mubr.msk.f32.mxu0 %vm28615_vm3, %v9920_v7  ;;  %vm28629_vm3 = vmmov %vm28406_vm0  ;;  %v10784_v7 = vld [vmem:[#allocation2 + $0xf3] sm:$0xff] }
 0x74f   : > { %21709 = vmatmul.mubr.msk.f32.gmra.mrb[58].mxu0 %vm28406_vm0, %v9921_v40  ;;  %vm28630_vm0 = vcmask 1043456   ;;  %v10785_v40 = vld [vmem:[#allocation2 + $0xfb] sm:$0xff] }
 0x750   : > { %21711 = vmatprep.mubr.msk.f32.mxu0 %vm28616_vm14, %v9922_v50  ;;  %vm28631_vm14 = vmmov %vm28628_vm1  ;;  %v10786_v50 = vld [vmem:[#allocation2 + $0x103] sm:$0xff] }
 0x753   : > { %21712 = vmatmul.mubr.msk.f32.gmra.mrb[60].mxu0 %vm28617_vm4, %v9923_v30  ;;  %vm28632_vm4 = vmmov %vm28630_vm0  ;;  %v10787_v30 = vld [vmem:[#allocation2 + $0x10b] sm:$0xff] }
 0x754   : > { %21714 = vmatprep.mubr.msk.f32.mxu0 %vm28618_vm5, %v9924_v1  ;;  %vm28633_vm5 = vmmov %vm28628_vm1  ;;  %v10788_v1 = vld [vmem:[#allocation2 + $0x113] sm:$0xff] }
 0x757   : > { %21715 = vmatmul.mubr.msk.f32.gmra.mrb[62].mxu0 %vm28619_vm9, %v9925_v5  ;;  %vm28634_vm9 = vmmov %vm28628_vm1  ;;  %v10762_v5 = vld [vmem:[#allocation2 + $0x43] sm:$0xff] }
 0x758   : > { %21717 = vmatprep.mubr.msk.f32.mxu0 %vm28620_vm10, %v9926_v24  ;;  %v10757_v24 = vld [vmem:[#allocation2 + $0x1b] sm:$0xff]  ;;  %vm28635_vm10 = vmmov %vm28628_vm1 }
 0x75b   : > { %21718 = vmatmul.mubr.msk.f32.gmra.mrb[64].mxu0 %vm28621_vm11, %v9927_v19  ;;  %v10761_v19 = vld [vmem:[#allocation2 + $0x3b] sm:$0xff]  ;;  %vm28636_vm11 = vmmov %vm28628_vm1 }
 0x75c   : > { %21720 = vmatprep.mubr.msk.f32.mxu0 %vm28622_vm12, %v9928_v37  ;;  %v26953_v37 = vld [vmem:[%s28195_s1 + $0x3c] sm:$0xf]  ;;  %vm28637_vm12 = vmmov %vm28628_vm1 }
 0x75f   : > { %21721 = vmatmul.mubr.msk.f32.gmra.mrb[66].mxu0 %vm28623_vm13, %v9929_v62  ;;  %v10760_v62 = vld [vmem:[#allocation2 + $0x33] sm:$0xff]  ;;  %vm28638_vm13 = vmmov %vm28628_vm1 }
 0x760   : > { %21723 = vmatprep.mubr.msk.f32.mxu0 %vm28624_vm15, %v9930_v42  ;;  %v10758_v42 = vld [vmem:[#allocation2 + $0x23] sm:$0xff]  ;;  %vm28639_vm15 = vmmov %vm28628_vm1 }
 0x763   : > { %21724 = vmatmul.mubr.msk.f32.gmra.mrb[68].mxu0 %vm28625_vm6, %v9931_v55  ;;  %v10759_v55 = vld [vmem:[#allocation2 + $0x2b] sm:$0xff]  ;;  %vm28640_vm6 = vmmov %vm28628_vm1 }
 0x764   : > { %21726 = vmatprep.mubr.msk.f32.mxu0 %vm28626_vm7, %v10360_v11  ;;  %vm28641_vm7 = vmmov %vm28628_vm1  ;;  %v10789_v11 = vld [vmem:[#allocation2 + $0x11b] sm:$0xff] }
 0x767   : > { %21727 = vmatmul.mubr.msk.f32.gmra.mrb[70].mxu0 %vm28627_vm8, %v10361_v33  ;;  %vm28642_vm8 = vmmov %vm28628_vm1  ;;  %v10790_v33 = vld [vmem:[#allocation2 + $0x123] sm:$0xff] }
 0x768   : > { %21731 = vmatprep.mubr.msk.f32.mxu0 %vm28628_vm1, %v10756_v44  ;;  %v10791_v44 = vld [vmem:[#allocation2 + $0x12b] sm:$0xff] }
 0x76b   : > { %21732 = vmatmul.mubr.msk.f32.vlgmr.msra.gmra.mrb[36].mxu0 %vm28629_vm3, %v10757_v24  ;;  %vm28643_vm3 = vmmov %vm28628_vm1  ;;  %v11186_v24 = vld [vmem:[#allocation2 + $0x14] sm:$0xff] }
 0x76c   : > { %21786 = vmatpush3.msk.msra.mxu0 %vm28630_vm0, %v18429_v63  ;;  %21734 = vmatprep.mubr.msk.f32.mxu0 %vm28631_vm14, %v10758_v42  ;;  %v10764_v63 = vld [vmem:[#allocation2 + $0x53] sm:$0xff]  ;;  %vm28644_vm0 = vmmov %vm28628_vm1  ;;  %v11187_v42 = vld [vmem:[#allocation2 + $0x1c] sm:$0xff] }
 0x76d   : > { %21841 = vmatprep.subr.msk.mxu0 %vm28632_vm4, %v26953_v37  ;;  %vm28645_vm14 = vmmov %vm28644_vm0 }
 0x76e   : > { %vm28646_vm4 = vmmov %vm28644_vm0 }
 0x76f   : > { %21735 = vmatmul.mubr.msk.f32.gmra.mrb[38].mxu0 %vm28633_vm5, %v10759_v55  ;;  %vm28647_vm5 = vmmov %vm28644_vm0  ;;  %v26997_v55 = vld [vmem:[%s28195_s1 + $0x40] sm:$0xf] }
 0x770   : > { %21737 = vmatprep.mubr.msk.f32.mxu0 %vm28634_vm9, %v10760_v62  ;;  %vm28648_vm9 = vmmov %vm28644_vm0  ;;  %v27000_v62 = vld [vmem:[#allocation2 + $0x24] sm:$0xff] }
 0x773   : > { %21738 = vmatmul.mubr.msk.f32.gmra.mrb[40].mxu0 %vm28635_vm10, %v10761_v19  ;;  %vm28649_vm10 = vmmov %vm28644_vm0  ;;  %v27008_v19 = vld [vmem:[#allocation2 + $0x2c] sm:$0xff] }
 0x774   : > { %21740 = vmatprep.mubr.msk.f32.mxu0 %vm28636_vm11, %v10762_v5  ;;  %vm28650_vm11 = vmmov %vm28644_vm0  ;;  %v27012_v5 = vld [vmem:[#allocation2 + $0x34] sm:$0xff] }
 0x777   : > { %21741 = vmatmul.mubr.msk.f32.gmra.mrb[42].mxu0 %vm28637_vm12, %v10763_v26  ;;  %vm28651_vm12 = vmmov %vm28644_vm0  ;;  %v27016_v26 = vld [vmem:[#allocation2 + $0x3c] sm:$0xff] }
 0x778   : > { %21743 = vmatprep.mubr.msk.f32.mxu0 %vm28638_vm13, %v10764_v63  ;;  %vm28652_vm13 = vmmov %vm28644_vm0  ;;  %v27024_v63 = vld [vmem:[#allocation2 + $0x4c] sm:$0xff] }
 0x77b   : > { %21744 = vmatmul.mubr.msk.f32.gmra.mrb[44].mxu0 %vm28639_vm15, %v10765_v15  ;;  %vm28653_vm15 = vmmov %vm28644_vm0  ;;  %v27028_v15 = vld [vmem:[#allocation2 + $0x54] sm:$0xff] }
 0x77c   : > { %21746 = vmatprep.mubr.msk.f32.mxu0 %vm28640_vm6, %v10766_v0  ;;  %vm28654_vm6 = vmmov %vm28644_vm0  ;;  %v27032_v0 = vld [vmem:[#allocation2 + $0x5c] sm:$0xff] }
 0x77f   : > { %21747 = vmatmul.mubr.msk.f32.gmra.mrb[46].mxu0 %vm28641_vm7, %v10767_v13  ;;  %vm28655_vm7 = vmmov %vm28644_vm0  ;;  %v27036_v13 = vld [vmem:[#allocation2 + $0x64] sm:$0xff] }
 0x780   : > { %21749 = vmatprep.mubr.msk.f32.mxu0 %vm28642_vm8, %v10768_v27  ;;  %vm28656_vm8 = vmmov %vm28644_vm0  ;;  %v11197_v27 = vld [vmem:[#allocation2 + $0x6c] sm:$0xff] }
 0x783   : > { %21750 = vmatmul.mubr.msk.f32.gmra.mrb[48].mxu0 %vm28628_vm1, %v10769_v28  ;;  %vm28657_vm1 = vmmov %vm28644_vm0  ;;  %v11198_v28 = vld [vmem:[#allocation2 + $0x74] sm:$0xff] }
 0x784   : > { %21752 = vmatprep.mubr.msk.f32.mxu0 %vm28643_vm3, %v10770_v12  ;;  %vm28658_vm3 = vmmov %vm28644_vm0  ;;  %v11199_v12 = vld [vmem:[#allocation2 + $0x7c] sm:$0xff] }
 0x787   : > { %21753 = vmatmul.mubr.msk.f32.gmra.mrb[50].mxu0 %vm28644_vm0, %v10771_v17  ;;  %v11200_v17 = vld [vmem:[#allocation2 + $0x84] sm:$0xff] }
 0x788   : > { %21755 = vmatprep.mubr.msk.f32.mxu0 %vm28645_vm14, %v10772_v39  ;;  %vm28659_vm14 = vmmov %vm28644_vm0  ;;  %v11201_v39 = vld [vmem:[#allocation2 + $0x8c] sm:$0xff] }
 0x78b   : > { %21756 = vmatmul.mubr.msk.f32.gmra.mrb[52].mxu0 %vm28646_vm4, %v10773_v51  ;;  %vm28660_vm4 = vmmov %vm28644_vm0  ;;  %v11202_v51 = vld [vmem:[#allocation2 + $0x94] sm:$0xff] }
 0x78c   : > { %21758 = vmatprep.mubr.msk.f32.mxu0 %vm28647_vm5, %v10774_v52  ;;  %vm28661_vm5 = vmmov %vm28644_vm0  ;;  %v11203_v52 = vld [vmem:[#allocation2 + $0x9c] sm:$0xff] }
 0x78f   : > { %21759 = vmatmul.mubr.msk.f32.gmra.mrb[54].mxu0 %vm28648_vm9, %v10775_v25  ;;  %vm28662_vm9 = vmmov %vm28644_vm0  ;;  %v11204_v25 = vld [vmem:[#allocation2 + $0xa4] sm:$0xff] }
 0x790   : > { %21761 = vmatprep.mubr.msk.f32.mxu0 %vm28649_vm10, %v10776_v45  ;;  %vm28663_vm10 = vmmov %vm28644_vm0  ;;  %v11205_v45 = vld [vmem:[#allocation2 + $0xac] sm:$0xff] }
 0x793   : > { %21762 = vmatmul.mubr.msk.f32.gmra.mrb[56].mxu0 %vm28650_vm11, %v10777_v61  ;;  %vm28664_vm11 = vmmov %vm28644_vm0  ;;  %v11206_v61 = vld [vmem:[#allocation2 + $0xb4] sm:$0xff] }
 0x794   : > { %21764 = vmatprep.mubr.msk.f32.mxu0 %vm28651_vm12, %v10778_v31  ;;  %vm28665_vm12 = vmmov %vm28644_vm0  ;;  %v11207_v31 = vld [vmem:[#allocation2 + $0xbc] sm:$0xff] }
 0x797   : > { %21765 = vmatmul.mubr.msk.f32.gmra.mrb[58].mxu0 %vm28652_vm13, %v10779_v46  ;;  %vm28666_vm13 = vcmask 1043456   ;;  %v11208_v46 = vld [vmem:[#allocation2 + $0xc4] sm:$0xff] }
 0x798   : > { %21767 = vmatprep.mubr.msk.f32.mxu0 %vm28653_vm15, %v10780_v2  ;;  %vm28667_vm15 = vmmov %vm28644_vm0  ;;  %v11209_v2 = vld [vmem:[#allocation2 + $0xcc] sm:$0xff] }
 0x79b   : > { %21768 = vmatmul.mubr.msk.f32.gmra.mrb[60].mxu0 %vm28654_vm6, %v10781_v3  ;;  %vm28668_vm6 = vmmov %vm28666_vm13  ;;  %v11210_v3 = vld [vmem:[#allocation2 + $0xd4] sm:$0xff] }
 0x79c   : > { %21770 = vmatprep.mubr.msk.f32.mxu0 %vm28655_vm7, %v10782_v32  ;;  %vm28669_vm7 = vmmov %vm28644_vm0  ;;  %v11211_v32 = vld [vmem:[#allocation2 + $0xdc] sm:$0xff] }
 0x79f   : > { %21771 = vmatmul.mubr.msk.f32.gmra.mrb[62].mxu0 %vm28656_vm8, %v10783_v18  ;;  %vm28670_vm8 = vmmov %vm28644_vm0  ;;  %v11212_v18 = vld [vmem:[#allocation2 + $0xe4] sm:$0xff] }
 0x7a0   : > { %21773 = vmatprep.mubr.msk.f32.mxu0 %vm28657_vm1, %v10784_v7  ;;  %vm28671_vm1 = vmmov %vm28644_vm0  ;;  %v11213_v7 = vld [vmem:[#allocation2 + $0xec] sm:$0xff] }
 0x7a3   : > { %21774 = vmatmul.mubr.msk.f32.gmra.mrb[64].mxu0 %vm28658_vm3, %v10785_v40  ;;  %vm28672_vm3 = vmmov %vm28644_vm0  ;;  %v11214_v40 = vld [vmem:[#allocation2 + $0xf4] sm:$0xff] }
 0x7a4   : > { %21776 = vmatprep.mubr.msk.f32.mxu0 %vm28644_vm0, %v10786_v50  ;;  %v11215_v50 = vld [vmem:[#allocation2 + $0xfc] sm:$0xff] }
 0x7a7   : > { %21777 = vmatmul.mubr.msk.f32.gmra.mrb[66].mxu0 %vm28659_vm14, %v10787_v30  ;;  %vm28673_vm14 = vmmov %vm28644_vm0  ;;  %v11216_v30 = vld [vmem:[#allocation2 + $0x104] sm:$0xff] }
 0x7a8   : > { %21779 = vmatprep.mubr.msk.f32.mxu0 %vm28660_vm4, %v10788_v1  ;;  %vm28674_vm4 = vmmov %vm28644_vm0  ;;  %v11217_v1 = vld [vmem:[#allocation2 + $0x10c] sm:$0xff] }
 0x7ab   : > { %21780 = vmatmul.mubr.msk.f32.gmra.mrb[68].mxu0 %vm28661_vm5, %v10789_v11  ;;  %vm28675_vm5 = vmmov %vm28644_vm0  ;;  %v11218_v11 = vld [vmem:[#allocation2 + $0x114] sm:$0xff] }
 0x7ac   : > { %21782 = vmatprep.mubr.msk.f32.mxu0 %vm28662_vm9, %v10790_v33  ;;  %vm28676_vm9 = vmmov %vm28644_vm0  ;;  %v11219_v33 = vld [vmem:[#allocation2 + $0x11c] sm:$0xff] }
 0x7af   : > { %21783 = vmatmul.mubr.msk.f32.gmra.mrb[70].mxu0 %vm28663_vm10, %v10791_v44  ;;  %vm28677_vm10 = vmmov %vm28644_vm0  ;;  %v11220_v44 = vld [vmem:[#allocation2 + $0x124] sm:$0xff] }
 0x7b0   : > { %21787 = vmatprep.mubr.msk.f32.mxu0 %vm28664_vm11, %v11186_v24  ;;  %vm28678_vm11 = vmmov %vm28644_vm0  ;;  %v11221_v24 = vld [vmem:[#allocation2 + $0x12c] sm:$0xff] }
 0x7b3   : > { %21788 = vmatmul.mubr.msk.f32.vlgmr.msra.gmra.mrb[36].mxu0 %vm28665_vm12, %v11187_v42  ;;  %vm28679_vm12 = vmmov %vm28644_vm0  ;;  %v18543_v42 = vld [vmem:[%s28195_s1 + $0x44] sm:$0xf] }
 0x7b4   : > { %21842 = vmatpush3.msk.msra.mxu0 %vm28666_vm13, %v26953_v37  ;;  %21790 = vmatprep.mubr.msk.f32.mxu0 %vm28667_vm15, %v27000_v62  ;;  %v27020_v37 = vld [vmem:[#allocation2 + $0x44] sm:$0xff]  ;;  %vm28680_vm13 = vmmov %vm28644_vm0 }
 0x7b5   : > { %21897 = vmatprep.subr.msk.mxu0 %vm28668_vm6, %v26997_v55  ;;  %vm28681_vm15 = vmmov %vm28644_vm0 }
 0x7b6   : > { %vm28682_vm6 = vmmov %vm28644_vm0 }
 0x7b7   : > { %21791 = vmatmul.mubr.msk.f32.gmra.mrb[38].mxu0 %vm28669_vm7, %v27008_v19  ;;  %vm28683_vm7 = vmmov %vm28644_vm0 }
 0x7b8   : > { %21793 = vmatprep.mubr.msk.f32.mxu0 %vm28670_vm8, %v27012_v5  ;;  %vm28684_vm8 = vmmov %vm28644_vm0 }
 0x7bb   : > { %21794 = vmatmul.mubr.msk.f32.gmra.mrb[40].mxu0 %vm28671_vm1, %v27016_v26  ;;  %vm28685_vm1 = vmmov %vm28644_vm0 }
 0x7bc   : > { %21796 = vmatprep.mubr.msk.f32.mxu0 %vm28672_vm3, %v27020_v37  ;;  %vm28686_vm3 = vmmov %vm28644_vm0 }
 0x7bf   : > { %21797 = vmatmul.mubr.msk.f32.gmra.mrb[42].mxu0 %vm28644_vm0, %v27024_v63 }
 0x7c0   : > { %21799 = vmatprep.mubr.msk.f32.mxu0 %vm28673_vm14, %v27028_v15  ;;  %vm28687_vm14 = vmmov %vm28644_vm0 }
 0x7c3   : > { %21800 = vmatmul.mubr.msk.f32.gmra.mrb[44].mxu0 %vm28674_vm4, %v27032_v0  ;;  %vm28688_vm4 = vmmov %vm28644_vm0 }
 0x7c4   : > { %21802 = vmatprep.mubr.msk.f32.mxu0 %vm28675_vm5, %v27036_v13  ;;  %vm28689_vm5 = vmmov %vm28644_vm0 }
 0x7c7   : > { %21803 = vmatmul.mubr.msk.f32.gmra.mrb[46].mxu0 %vm28676_vm9, %v11197_v27  ;;  %vm28690_vm9 = vmmov %vm28644_vm0 }
 0x7c8   : > { %21805 = vmatprep.mubr.msk.f32.mxu0 %vm28677_vm10, %v11198_v28  ;;  %vm28691_vm10 = vmmov %vm28644_vm0 }
 0x7cb   : > { %21806 = vmatmul.mubr.msk.f32.gmra.mrb[48].mxu0 %vm28678_vm11, %v11199_v12  ;;  %vm28692_vm11 = vmmov %vm28644_vm0 }
 0x7cc   : > { %21808 = vmatprep.mubr.msk.f32.mxu0 %vm28679_vm12, %v11200_v17  ;;  %vm28693_vm12 = vmmov %vm28644_vm0 }
 0x7cf   : > { %21809 = vmatmul.mubr.msk.f32.gmra.mrb[50].mxu0 %vm28680_vm13, %v11201_v39  ;;  %vm28694_vm13 = vmmov %vm28644_vm0 }
 0x7d0   : > { %21811 = vmatprep.mubr.msk.f32.mxu0 %vm28681_vm15, %v11202_v51  ;;  %vm28695_vm15 = vmmov %vm28644_vm0 }
 0x7d3   : > { %21812 = vmatmul.mubr.msk.f32.gmra.mrb[52].mxu0 %vm28682_vm6, %v11203_v52  ;;  %vm28696_vm6 = vmmov %vm28644_vm0 }
 0x7d4   : > { %21814 = vmatprep.mubr.msk.f32.mxu0 %vm28683_vm7, %v11204_v25  ;;  %vm28697_vm7 = vmmov %vm28644_vm0 }
 0x7d7   : > { %21815 = vmatmul.mubr.msk.f32.gmra.mrb[54].mxu0 %vm28684_vm8, %v11205_v45  ;;  %vm28698_vm8 = vmmov %vm28644_vm0 }
 0x7d8   : > { %21817 = vmatprep.mubr.msk.f32.mxu0 %vm28685_vm1, %v11206_v61  ;;  %vm28699_vm1 = vmmov %vm28644_vm0 }
 0x7db   : > { %21818 = vmatmul.mubr.msk.f32.gmra.mrb[56].mxu0 %vm28686_vm3, %v11207_v31  ;;  %vm28700_vm3 = vmmov %vm28644_vm0 }
 0x7dc   : > { %21820 = vmatprep.mubr.msk.f32.mxu0 %vm28644_vm0, %v11208_v46 }
 0x7df   : > { %21821 = vmatmul.mubr.msk.f32.gmra.mrb[58].mxu0 %vm28687_vm14, %v11209_v2  ;;  %vm28701_vm14 = vcmask 1043456  }
 0x7e0   : > { %21823 = vmatprep.mubr.msk.f32.mxu0 %vm28688_vm4, %v11210_v3  ;;  %vm28702_vm4 = vmmov %vm28644_vm0 }
 0x7e3   : > { %21824 = vmatmul.mubr.msk.f32.gmra.mrb[60].mxu0 %vm28689_vm5, %v11211_v32  ;;  %vm28703_vm5 = vmmov %vm28701_vm14 }
 0x7e4   : > { %21826 = vmatprep.mubr.msk.f32.mxu0 %vm28690_vm9, %v11212_v18  ;;  %vm28704_vm9 = vmmov %vm28644_vm0 }
 0x7e7   : > { %21827 = vmatmul.mubr.msk.f32.gmra.mrb[62].mxu0 %vm28691_vm10, %v11213_v7  ;;  %vm28705_vm10 = vmmov %vm28644_vm0 }
 0x7e8   : > { %21829 = vmatprep.mubr.msk.f32.mxu0 %vm28692_vm11, %v11214_v40  ;;  %vm28706_vm11 = vmmov %vm28644_vm0 }
 0x7eb   : > { %21830 = vmatmul.mubr.msk.f32.gmra.mrb[64].mxu0 %vm28693_vm12, %v11215_v50  ;;  %vm28707_vm12 = vmmov %vm28644_vm0 }
 0x7ec   : > { %21832 = vmatprep.mubr.msk.f32.mxu0 %vm28694_vm13, %v11216_v30  ;;  %vm28708_vm13 = vmmov %vm28644_vm0 }
 0x7ef   : > { %21833 = vmatmul.mubr.msk.f32.gmra.mrb[66].mxu0 %vm28695_vm15, %v11217_v1  ;;  %vm28709_vm15 = vmmov %vm28644_vm0 }
 0x7f0   : > { %21835 = vmatprep.mubr.msk.f32.mxu0 %vm28696_vm6, %v11218_v11  ;;  %vm28710_vm6 = vmmov %vm28644_vm0 }
 0x7f3   : > { %21836 = vmatmul.mubr.msk.f32.gmra.mrb[68].mxu0 %vm28697_vm7, %v11219_v33  ;;  %vm28711_vm7 = vmmov %vm28644_vm0 }
 0x7f4   : > { %21838 = vmatprep.mubr.msk.f32.mxu0 %vm28698_vm8, %v11220_v44  ;;  %vm28712_vm8 = vmmov %vm28644_vm0 }
 0x7f7   : > { %21839 = vmatmul.mubr.msk.f32.gmra.mrb[70].mxu0 %vm28699_vm1, %v11221_v24  ;;  %vm28713_vm1 = vmmov %vm28644_vm0 }
 0x7f8   : > { %21843 = vmatprep.mubr.msk.f32.mxu0 %vm28700_vm3, %v27000_v62  ;;  %vm28714_vm3 = vmmov %vm28644_vm0  ;;  %v11651_v62 = vld [vmem:[#allocation2 + $0x13c] sm:$0xff] }
 0x7fb   : > { %21844 = vmatmul.mubr.msk.f32.vlgmr.msra.gmra.mrb[36].mxu0 %vm28644_vm0, %v27008_v19  ;;  %v12046_v19 = vld [vmem:[#allocation2 + $0x25] sm:$0xff] }
 0x7fc   : > { %21898 = vmatpush3.msk.msra.mxu0 %vm28701_vm14, %v26997_v55  ;;  %21846 = vmatprep.mubr.msk.f32.mxu0 %vm28702_vm4, %v27012_v5  ;;  %vm28715_vm14 = vmmov %vm28644_vm0  ;;  %v11650_v55 = vld [vmem:[#allocation2 + $0x134] sm:$0xff] }
 0x7fd   : > { %21953 = vmatprep.subr.msk.mxu0 %vm28703_vm5, %v18543_v42  ;;  %vm28716_vm4 = vmmov %vm28644_vm0  ;;  %v12047_v5 = vld [vmem:[#allocation2 + $0x2d] sm:$0xff] }
 0x7fe   : > { %vm28717_vm5 = vmmov %vm28644_vm0 }
 0x7ff   : > { %21847 = vmatmul.mubr.msk.f32.gmra.mrb[38].mxu0 %vm28704_vm9, %v27016_v26  ;;  %vm28718_vm9 = vmmov %vm28644_vm0  ;;  %v12048_v26 = vld [vmem:[#allocation2 + $0x35] sm:$0xff] }
 0x800   : > { %21849 = vmatprep.mubr.msk.f32.mxu0 %vm28705_vm10, %v27020_v37  ;;  %vm28719_vm10 = vmmov %vm28644_vm0  ;;  %v12049_v37 = vld [vmem:[#allocation2 + $0x3d] sm:$0xff] }
 0x803   : > { %21850 = vmatmul.mubr.msk.f32.gmra.mrb[40].mxu0 %vm28706_vm11, %v27024_v63  ;;  %vm28720_vm11 = vmmov %vm28644_vm0  ;;  %v12050_v63 = vld [vmem:[#allocation2 + $0x45] sm:$0xff] }
 0x804   : > { %21852 = vmatprep.mubr.msk.f32.mxu0 %vm28707_vm12, %v27028_v15  ;;  %vm28721_vm12 = vmmov %vm28644_vm0  ;;  %v12051_v15 = vld [vmem:[#allocation2 + $0x4d] sm:$0xff] }
 0x807   : > { %21853 = vmatmul.mubr.msk.f32.gmra.mrb[42].mxu0 %vm28708_vm13, %v27032_v0  ;;  %vm28722_vm13 = vmmov %vm28644_vm0  ;;  %v12052_v0 = vld [vmem:[#allocation2 + $0x55] sm:$0xff] }
 0x808   : > { %21855 = vmatprep.mubr.msk.f32.mxu0 %vm28709_vm15, %v27036_v13  ;;  %vm28723_vm15 = vmmov %vm28644_vm0  ;;  %v12053_v13 = vld [vmem:[#allocation2 + $0x5d] sm:$0xff] }
 0x80b   : > { %21856 = vmatmul.mubr.msk.f32.gmra.mrb[44].mxu0 %vm28710_vm6, %v11197_v27  ;;  %vm28724_vm6 = vmmov %vm28644_vm0  ;;  %v12054_v27 = vld [vmem:[#allocation2 + $0x65] sm:$0xff] }
 0x80c   : > { %21858 = vmatprep.mubr.msk.f32.mxu0 %vm28711_vm7, %v11198_v28  ;;  %vm28725_vm7 = vmmov %vm28644_vm0  ;;  %v18587_v28 = vld [vmem:[%s28197_s3 + $0x140] sm:$0xff] }
 0x80f   : > { %21859 = vmatmul.mubr.msk.f32.gmra.mrb[46].mxu0 %vm28712_vm8, %v11199_v12  ;;  %vm28726_vm8 = vmmov %vm28644_vm0  ;;  %v18588_v12 = vld [vmem:[%s28197_s3 + $0x148] sm:$0xff] }
 0x810   : > { %21861 = vmatprep.mubr.msk.f32.mxu0 %vm28713_vm1, %v11200_v17  ;;  %vm28727_vm1 = vmmov %vm28644_vm0  ;;  %v18589_v17 = vld [vmem:[%s28197_s3 + $0x150] sm:$0xff] }
 0x813   : > { %21862 = vmatmul.mubr.msk.f32.gmra.mrb[48].mxu0 %vm28714_vm3, %v11201_v39  ;;  %vm28728_vm3 = vmmov %vm28644_vm0  ;;  %v22695_v39 = vpack.c.bf16 %v18588_v12, %v18587_v28  ;;  %v12479_v28 = vld [vmem:[#allocation2 + $0x3e] sm:$0xff]  ;;  %v12480_v12 = vld [vmem:[#allocation2 + $0x46] sm:$0xff] }
 0x814   : > { %21864 = vmatprep.mubr.msk.f32.mxu0 %vm28644_vm0, %v11202_v51  ;;  %v18590_v51 = vld [vmem:[%s28197_s3 + $0x158] sm:$0xff] }
 0x815   : > { %22696 = vmatprep.subr.bf16.mxu1 %v22695_v39 }
 0x816   : > { %22698 = vmatpush3.bf16.msra.mxu1 %v22695_v39  ;;  %v12482_v39 = vld [vmem:[#allocation2 + $0x56] sm:$0xff] }
 0x817   : > { %21865 = vmatmul.mubr.msk.f32.gmra.mrb[50].mxu0 %vm28715_vm14, %v11203_v52  ;;  %vm28729_vm14 = vmmov %vm28644_vm0  ;;  %v22699_v52 = vpack.c.bf16 %v18590_v51, %v18589_v17  ;;  %v12481_v17 = vld [vmem:[#allocation2 + $0x4e] sm:$0xff]  ;;  %v12483_v51 = vld [vmem:[#allocation2 + $0x5e] sm:$0xff] }
 0x818   : > { %21867 = vmatprep.mubr.msk.f32.mxu0 %vm28716_vm4, %v11204_v25  ;;  %vm28730_vm4 = vmmov %vm28644_vm0  ;;  %v12055_v25 = vld [vmem:[#allocation2 + $0x6d] sm:$0xff] }
 0x819   : > { %22700 = vmatprep.subr.bf16.mxu1 %v22699_v52 }
 0x81a   : > { %22702 = vmatpush3.bf16.msra.mxu1 %v22699_v52  ;;  %v12484_v52 = vld [vmem:[#allocation2 + $0x66] sm:$0xff] }
 0x81b   : > { %21868 = vmatmul.mubr.msk.f32.gmra.mrb[52].mxu0 %vm28717_vm5, %v11205_v45  ;;  %vm28731_vm5 = vmmov %vm28644_vm0  ;;  %v12056_v45 = vld [vmem:[#allocation2 + $0x75] sm:$0xff] }
 0x81c   : > { %21870 = vmatprep.mubr.msk.f32.mxu0 %vm28718_vm9, %v11206_v61  ;;  %vm28732_vm9 = vmmov %vm28644_vm0  ;;  %v12057_v61 = vld [vmem:[#allocation2 + $0x7d] sm:$0xff] }
 0x81f   : > { %21871 = vmatmul.mubr.msk.f32.gmra.mrb[54].mxu0 %vm28719_vm10, %v11207_v31  ;;  %vm28733_vm10 = vmmov %vm28644_vm0  ;;  %v12058_v31 = vld [vmem:[#allocation2 + $0x85] sm:$0xff] }
 0x820   : > { %21873 = vmatprep.mubr.msk.f32.mxu0 %vm28720_vm11, %v11208_v46  ;;  %vm28734_vm11 = vmmov %vm28644_vm0  ;;  %v12059_v46 = vld [vmem:[#allocation2 + $0x8d] sm:$0xff] }
 0x823   : > { %21874 = vmatmul.mubr.msk.f32.gmra.mrb[56].mxu0 %vm28721_vm12, %v11209_v2  ;;  %vm28735_vm12 = vmmov %vm28644_vm0  ;;  %v12060_v2 = vld [vmem:[#allocation2 + $0x95] sm:$0xff] }
 0x824   : > { %21876 = vmatprep.mubr.msk.f32.mxu0 %vm28722_vm13, %v11210_v3  ;;  %vm28736_vm13 = vmmov %vm28644_vm0  ;;  %v12061_v3 = vld [vmem:[#allocation2 + $0x9d] sm:$0xff] }
 0x827   : > { %21877 = vmatmul.mubr.msk.f32.gmra.mrb[58].mxu0 %vm28723_vm15, %v11211_v32  ;;  %vm28737_vm15 = vcmask 1043456   ;;  %v12062_v32 = vld [vmem:[#allocation2 + $0xa5] sm:$0xff] }
 0x828   : > { %21879 = vmatprep.mubr.msk.f32.mxu0 %vm28724_vm6, %v11212_v18  ;;  %vm28738_vm6 = vmmov %vm28644_vm0  ;;  %v12063_v18 = vld [vmem:[#allocation2 + $0xad] sm:$0xff] }
 0x82b   : > { %21880 = vmatmul.mubr.msk.f32.gmra.mrb[60].mxu0 %vm28725_vm7, %v11213_v7  ;;  %vm28739_vm7 = vmmov %vm28644_vm0  ;;  %v12064_v7 = vld [vmem:[#allocation2 + $0xb5] sm:$0xff] }
 0x82c   : > { %21882 = vmatprep.mubr.msk.f32.mxu0 %vm28726_vm8, %v11214_v40  ;;  %vm28740_vm8 = vmmov %vm28644_vm0  ;;  %v12065_v40 = vld [vmem:[#allocation2 + $0xbd] sm:$0xff] }
 0x82f   : > { %21883 = vmatmul.mubr.msk.f32.gmra.mrb[62].mxu0 %vm28727_vm1, %v11215_v50  ;;  %vm28741_vm1 = vmmov %vm28644_vm0  ;;  %v12066_v50 = vld [vmem:[#allocation2 + $0xc5] sm:$0xff] }
 0x830   : > { %21885 = vmatprep.mubr.msk.f32.mxu0 %vm28728_vm3, %v11216_v30  ;;  %vm28742_vm3 = vmmov %vm28644_vm0  ;;  %v12067_v30 = vld [vmem:[#allocation2 + $0xcd] sm:$0xff] }
 0x833   : > { %21886 = vmatmul.mubr.msk.f32.gmra.mrb[64].mxu0 %vm28644_vm0, %v11217_v1  ;;  %v12068_v1 = vld [vmem:[#allocation2 + $0xd5] sm:$0xff] }
 0x834   : > { %21888 = vmatprep.mubr.msk.f32.mxu0 %vm28729_vm14, %v11218_v11  ;;  %vm28743_vm14 = vmmov %vm28644_vm0  ;;  %v12069_v11 = vld [vmem:[#allocation2 + $0xdd] sm:$0xff] }
 0x837   : > { %21889 = vmatmul.mubr.msk.f32.gmra.mrb[66].mxu0 %vm28730_vm4, %v11219_v33  ;;  %vm28744_vm4 = vmmov %vm28644_vm0  ;;  %v12070_v33 = vld [vmem:[#allocation2 + $0xe5] sm:$0xff] }
 0x838   : > { %21891 = vmatprep.mubr.msk.f32.mxu0 %vm28731_vm5, %v11220_v44  ;;  %vm28745_vm5 = vmmov %vm28644_vm0  ;;  %v12071_v44 = vld [vmem:[#allocation2 + $0xed] sm:$0xff] }
 0x83b   : > { %21892 = vmatmul.mubr.msk.f32.gmra.mrb[68].mxu0 %vm28732_vm9, %v11221_v24  ;;  %vm28746_vm9 = vmmov %vm28644_vm0  ;;  %v12072_v24 = vld [vmem:[#allocation2 + $0xf5] sm:$0xff] }
 0x83c   : > { %21894 = vmatprep.mubr.msk.f32.mxu0 %vm28733_vm10, %v11650_v55  ;;  %vm28747_vm10 = vmmov %vm28644_vm0  ;;  %v12074_v55 = vld [vmem:[#allocation2 + $0x105] sm:$0xff] }
 0x83f   : > { %21895 = vmatmul.mubr.msk.f32.gmra.mrb[70].mxu0 %vm28734_vm11, %v11651_v62  ;;  %vm28748_vm11 = vmmov %vm28644_vm0  ;;  %v12075_v62 = vld [vmem:[#allocation2 + $0x10d] sm:$0xff] }
 0x840   : > { %21899 = vmatprep.mubr.msk.f32.mxu0 %vm28735_vm12, %v12046_v19  ;;  %vm28749_vm12 = vmmov %vm28644_vm0  ;;  %v12076_v19 = vld [vmem:[#allocation2 + $0x115] sm:$0xff] }
 0x843   : > { %21900 = vmatmul.mubr.msk.f32.vlgmr.msra.gmra.mrb[36].mxu0 %vm28736_vm13, %v12047_v5  ;;  %vm28750_vm13 = vmmov %vm28644_vm0  ;;  %v12077_v5 = vld [vmem:[#allocation2 + $0x11d] sm:$0xff] }
 0x844   : > { %21954 = vmatpush3.msk.msra.mxu0 %vm28737_vm15, %v18543_v42  ;;  %21902 = vmatprep.mubr.msk.f32.mxu0 %vm28738_vm6, %v12048_v26  ;;  %vm28751_vm15 = vmmov %vm28644_vm0  ;;  %v12073_v42 = vld [vmem:[#allocation2 + $0xfd] sm:$0xff]  ;;  %v12078_v26 = vld [vmem:[#allocation2 + $0x125] sm:$0xff] }
 0x845   : > { %vm28752_vm6 = vmmov %vm28644_vm0 }
 0x847   : > { %21903 = vmatmul.mubr.msk.f32.gmra.mrb[38].mxu0 %vm28739_vm7, %v12049_v37  ;;  %vm28753_vm7 = vmmov %vm28644_vm0  ;;  %v12080_v37 = vld [vmem:[#allocation2 + $0x135] sm:$0xff] }
 0x848   : > { %21905 = vmatprep.mubr.msk.f32.mxu0 %vm28740_vm8, %v12050_v63  ;;  %vm28754_vm8 = vmmov %vm28644_vm0  ;;  %v12079_v63 = vld [vmem:[#allocation2 + $0x12d] sm:$0xff] }
 0x84b   : > { %21906 = vmatmul.mubr.msk.f32.gmra.mrb[40].mxu0 %vm28741_vm1, %v12051_v15  ;;  %vm28755_vm1 = vmmov %vm28644_vm0  ;;  %v12081_v15 = vld [vmem:[#allocation2 + $0x13d] sm:$0xff] }
 0x84c   : > { %21908 = vmatprep.mubr.msk.f32.mxu0 %vm28742_vm3, %v12052_v0  ;;  %vm28756_vm3 = vmmov %vm28644_vm0  ;;  %v12476_v0 = vld [vmem:[#allocation2 + $0x26] sm:$0xff] }
 0x84f   : > { %21909 = vmatmul.mubr.msk.f32.gmra.mrb[42].mxu0 %vm28644_vm0, %v12053_v13  ;;  %v12477_v13 = vld [vmem:[#allocation2 + $0x2e] sm:$0xff] }
 0x850   : > { %21911 = vmatprep.mubr.msk.f32.mxu0 %vm28743_vm14, %v12054_v27  ;;  %vm28757_vm14 = vmmov %vm28644_vm0  ;;  %v12478_v27 = vld [vmem:[#allocation2 + $0x36] sm:$0xff] }
 0x853   : > { %21912 = vmatmul.mubr.msk.f32.gmra.mrb[44].mxu0 %vm28744_vm4, %v12055_v25  ;;  %vm28758_vm4 = vmmov %vm28644_vm0  ;;  %v12485_v25 = vld [vmem:[#allocation2 + $0x6e] sm:$0xff] }
 0x854   : > { %21914 = vmatprep.mubr.msk.f32.mxu0 %vm28745_vm5, %v12056_v45  ;;  %vm28759_vm5 = vmmov %vm28644_vm0  ;;  %v12486_v45 = vld [vmem:[#allocation2 + $0x76] sm:$0xff] }
 0x857   : > { %21915 = vmatmul.mubr.msk.f32.gmra.mrb[46].mxu0 %vm28746_vm9, %v12057_v61  ;;  %vm28760_vm9 = vmmov %vm28644_vm0  ;;  %v12487_v61 = vld [vmem:[#allocation2 + $0x7e] sm:$0xff] }
 0x858   : > { %21917 = vmatprep.mubr.msk.f32.mxu0 %vm28747_vm10, %v12058_v31  ;;  %vm28761_vm10 = vmmov %vm28644_vm0  ;;  %v12488_v31 = vld [vmem:[#allocation2 + $0x86] sm:$0xff] }
 0x85b   : > { %21918 = vmatmul.mubr.msk.f32.gmra.mrb[48].mxu0 %vm28748_vm11, %v12059_v46  ;;  %vm28762_vm11 = vmmov %vm28644_vm0  ;;  %v12489_v46 = vld [vmem:[#allocation2 + $0x8e] sm:$0xff] }
 0x85c   : > { %21920 = vmatprep.mubr.msk.f32.mxu0 %vm28749_vm12, %v12060_v2  ;;  %vm28763_vm12 = vmmov %vm28644_vm0  ;;  %v12490_v2 = vld [vmem:[#allocation2 + $0x96] sm:$0xff] }
 0x85f   : > { %21921 = vmatmul.mubr.msk.f32.gmra.mrb[50].mxu0 %vm28750_vm13, %v12061_v3  ;;  %vm28764_vm13 = vmmov %vm28644_vm0  ;;  %v12491_v3 = vld [vmem:[#allocation2 + $0x9e] sm:$0xff] }
 0x860   : > { %21923 = vmatprep.mubr.msk.f32.mxu0 %vm28751_vm15, %v12062_v32  ;;  %vm28765_vm15 = vmmov %vm28644_vm0  ;;  %v12492_v32 = vld [vmem:[#allocation2 + $0xa6] sm:$0xff] }
 0x863   : > { %21924 = vmatmul.mubr.msk.f32.gmra.mrb[52].mxu0 %vm28752_vm6, %v12063_v18  ;;  %vm28766_vm6 = vmmov %vm28644_vm0  ;;  %v12493_v18 = vld [vmem:[#allocation2 + $0xae] sm:$0xff] }
 0x864   : > { %21926 = vmatprep.mubr.msk.f32.mxu0 %vm28753_vm7, %v12064_v7  ;;  %vm28767_vm7 = vmmov %vm28644_vm0  ;;  %v12494_v7 = vld [vmem:[#allocation2 + $0xb6] sm:$0xff] }
 0x867   : > { %21927 = vmatmul.mubr.msk.f32.gmra.mrb[54].mxu0 %vm28754_vm8, %v12065_v40  ;;  %vm28768_vm8 = vmmov %vm28644_vm0  ;;  %v12495_v40 = vld [vmem:[#allocation2 + $0xbe] sm:$0xff] }
 0x868   : > { %21929 = vmatprep.mubr.msk.f32.mxu0 %vm28755_vm1, %v12066_v50  ;;  %vm28769_vm1 = vmmov %vm28644_vm0  ;;  %v12496_v50 = vld [vmem:[#allocation2 + $0xc6] sm:$0xff] }
 0x86b   : > { %21930 = vmatmul.mubr.msk.f32.gmra.mrb[56].mxu0 %vm28756_vm3, %v12067_v30  ;;  %vm28770_vm3 = vmmov %vm28644_vm0  ;;  %v12497_v30 = vld [vmem:[#allocation2 + $0xce] sm:$0xff] }
 0x86c   : > { %21932 = vmatprep.mubr.msk.f32.mxu0 %vm28644_vm0, %v12068_v1  ;;  %v12498_v1 = vld [vmem:[#allocation2 + $0xd6] sm:$0xff] }
 0x86f   : > { %21933 = vmatmul.mubr.msk.f32.gmra.mrb[58].mxu0 %vm28757_vm14, %v12069_v11  ;;  %vm28771_vm14 = vmmov %vm28644_vm0  ;;  %v12499_v11 = vld [vmem:[#allocation2 + $0xde] sm:$0xff] }
 0x870   : > { %21935 = vmatprep.mubr.msk.f32.mxu0 %vm28758_vm4, %v12070_v33  ;;  %vm28772_vm4 = vmmov %vm28644_vm0  ;;  %v12500_v33 = vld [vmem:[#allocation2 + $0xe6] sm:$0xff] }
 0x873   : > { %21936 = vmatmul.mubr.msk.f32.gmra.mrb[60].mxu0 %vm28759_vm5, %v12071_v44  ;;  %vm28773_vm5 = vmmov %vm28644_vm0  ;;  %v12501_v44 = vld [vmem:[#allocation2 + $0xee] sm:$0xff] }
 0x874   : > { %21938 = vmatprep.mubr.msk.f32.mxu0 %vm28760_vm9, %v12072_v24  ;;  %vm28774_vm9 = vmmov %vm28644_vm0  ;;  %v12502_v24 = vld [vmem:[#allocation2 + $0xf6] sm:$0xff] }
 0x877   : > { %21939 = vmatmul.mubr.msk.f32.gmra.mrb[62].mxu0 %vm28761_vm10, %v12073_v42  ;;  %vm28775_vm10 = vmmov %vm28644_vm0  ;;  %v12503_v42 = vld [vmem:[#allocation2 + $0xfe] sm:$0xff] }
 0x878   : > { %21941 = vmatprep.mubr.msk.f32.mxu0 %vm28762_vm11, %v12074_v55  ;;  %vm28776_vm11 = vmmov %vm28644_vm0  ;;  %v12504_v55 = vld [vmem:[#allocation2 + $0x106] sm:$0xff] }
 0x87b   : > { %21942 = vmatmul.mubr.msk.f32.gmra.mrb[64].mxu0 %vm28763_vm12, %v12075_v62  ;;  %vm28777_vm12 = vmmov %vm28644_vm0  ;;  %v12505_v62 = vld [vmem:[#allocation2 + $0x10e] sm:$0xff] }
 0x87c   : > { %21944 = vmatprep.mubr.msk.f32.mxu0 %vm28764_vm13, %v12076_v19  ;;  %vm28778_vm13 = vmmov %vm28644_vm0  ;;  %v12506_v19 = vld [vmem:[#allocation2 + $0x116] sm:$0xff] }
 0x87f   : > { %21945 = vmatmul.mubr.msk.f32.gmra.mrb[66].mxu0 %vm28765_vm15, %v12077_v5  ;;  %vm28779_vm15 = vmmov %vm28644_vm0  ;;  %v12507_v5 = vld [vmem:[#allocation2 + $0x11e] sm:$0xff] }
 0x880   : > { %21947 = vmatprep.mubr.msk.f32.mxu0 %vm28766_vm6, %v12078_v26  ;;  %vm28780_vm6 = vmmov %vm28644_vm0  ;;  %v12508_v26 = vld [vmem:[#allocation2 + $0x126] sm:$0xff] }
 0x883   : > { %21948 = vmatmul.mubr.msk.f32.gmra.mrb[68].mxu0 %vm28767_vm7, %v12079_v63  ;;  %vm28781_vm7 = vmmov %vm28644_vm0  ;;  %v12509_v63 = vld [vmem:[#allocation2 + $0x12e] sm:$0xff] }
 0x884   : > { %21950 = vmatprep.mubr.msk.f32.mxu0 %vm28768_vm8, %v12080_v37  ;;  %vm28782_vm8 = vmmov %vm28644_vm0  ;;  %v12510_v37 = vld [vmem:[#allocation2 + $0x136] sm:$0xff] }
 0x887   : > { %21951 = vmatmul.mubr.msk.f32.gmra.mrb[70].mxu0 %vm28769_vm1, %v12081_v15  ;;  %vm28783_vm1 = vmmov %vm28644_vm0  ;;  %v12511_v15 = vld [vmem:[#allocation2 + $0x13e] sm:$0xff] }
 0x888   : > { %21955 = vmatprep.mubr.msk.f32.mxu0 %vm28770_vm3, %v12476_v0  ;;  %vm28784_vm3 = vmmov %vm28644_vm0  ;;  %v13099_v0 = vld [vmem:[#allocation3 + $0x1] sm:$0xff] }
 0x889   : > { %22017 = vmatprep.mubr.msk.f32.mxu1 %vm1040_vm2, %v13099_v0 }
 0x88b   : > { %21956 = vmatmul.mubr.msk.f32.vlgmr.msra.gmra.mrb[36].mxu0 %vm28644_vm0, %v12477_v13  ;;  %v18583_v13 = vld [vmem:[%s28197_s3 + $0x120] sm:$0xff] }
 0x88c   : > { %21958 = vmatprep.mubr.msk.f32.mxu0 %vm28771_vm14, %v12478_v27  ;;  %vm28785_vm14 = vmmov %vm28644_vm0  ;;  %v18584_v27 = vld [vmem:[%s28197_s3 + $0x128] sm:$0xff] }
 0x88f   : > { %21959 = vmatmul.mubr.msk.f32.gmra.mrb[38].mxu0 %vm28772_vm4, %v12479_v28  ;;  %vm28786_vm4 = vmmov %vm28644_vm0  ;;  %v22703_v28 = vpack.c.bf16 %v18584_v27, %v18583_v13 }
 0x890   : > { %21961 = vmatprep.mubr.msk.f32.mxu0 %vm28773_vm5, %v12480_v12  ;;  %vm28787_vm5 = vmmov %vm28644_vm0  ;;  %v13100_v12 = vld [vmem:[#allocation3 + $0x9] sm:$0xff] }
 0x891   : > { %22018 = vmatmul.mubr.msk.f32.vlgmr.msra.gmra.mrb[54].mxu1 %vm1040_vm2, %v13100_v12  ;;  %22704 = vmatprep.subr.bf16.mxu1 %v22703_v28 }
 0x892   : > { %22706 = vmatpush3.bf16.msra.mxu1 %v22703_v28 }
 0x893   : > { %21962 = vmatmul.mubr.msk.f32.gmra.mrb[40].mxu0 %vm28774_vm9, %v12481_v17  ;;  %vm28788_vm9 = vmmov %vm28644_vm0  ;;  %v18585_v17 = vld [vmem:[%s28197_s3 + $0x130] sm:$0xff] }
 0x894   : > { %21964 = vmatprep.mubr.msk.f32.mxu0 %vm28775_vm10, %v12482_v39  ;;  %vm28789_vm10 = vmmov %vm28644_vm0  ;;  %v18586_v39 = vld [vmem:[%s28197_s3 + $0x138] sm:$0xff] }
 0x897   : > { %21965 = vmatmul.mubr.msk.f32.gmra.mrb[42].mxu0 %vm28776_vm11, %v12483_v51  ;;  %vm28790_vm11 = vmmov %vm28644_vm0  ;;  %v22707_v51 = vpack.c.bf16 %v18586_v39, %v18585_v17 }
 0x898   : > { %21967 = vmatprep.mubr.msk.f32.mxu0 %vm28777_vm12, %v12484_v52  ;;  %vm28791_vm12 = vmmov %vm28644_vm0  ;;  %v18663_v52 = vld [vmem:[%s28197_s3 + $0x160] sm:$0xff] }
 0x899   : > { %22708 = vmatprep.subr.bf16.mxu1 %v22707_v51 }
 0x89a   : > { %22710 = vmatpush3.bf16.msra.mxu1 %v22707_v51 }
 0x89b   : > { %21968 = vmatmul.mubr.msk.f32.gmra.mrb[44].mxu0 %vm28778_vm13, %v12485_v25  ;;  %vm28792_vm13 = vmmov %vm28644_vm0  ;;  %v18664_v25 = vld [vmem:[%s28197_s3 + $0x168] sm:$0xff] }
 0x89c   : > { %21970 = vmatprep.mubr.msk.f32.mxu0 %vm28779_vm15, %v12486_v45  ;;  %vm28793_vm15 = vmmov %vm28644_vm0  ;;  %v27221_v45 = vpack.c.bf16 %v18664_v25, %v18663_v52 }
 0x89e   : > { %22712 = vmatprep.subr.bf16.mxu1 %v27221_v45 }
 0x89f   : > { %21971 = vmatmul.mubr.msk.f32.gmra.mrb[46].mxu0 %vm28780_vm6, %v12487_v61  ;;  %vm28794_vm6 = vmmov %vm28644_vm0  ;;  %v27227_v61 = vld [vmem:[%s28196_s2 + $0x1] ss:$0 sm:$0xff] }
 0x8a0   : > { %21973 = vmatprep.mubr.msk.f32.mxu0 %vm28781_vm7, %v12488_v31  ;;  %vm28795_vm7 = vmmov %vm28644_vm0 }
 0x8a3   : > { %21974 = vmatmul.mubr.msk.f32.gmra.mrb[48].mxu0 %vm28782_vm8, %v12489_v46  ;;  %vm28796_vm8 = vmmov %vm28644_vm0 }
 0x8a4   : > { %21976 = vmatprep.mubr.msk.f32.mxu0 %vm28783_vm1, %v12490_v2  ;;  %vm28797_vm1 = vmmov %vm28644_vm0 }
 0x8a7   : > { %21977 = vmatmul.mubr.msk.f32.gmra.mrb[50].mxu0 %vm28784_vm3, %v12491_v3  ;;  %vm28798_vm3 = vmmov %vm28644_vm0 }
 0x8a8   : > { %21979 = vmatprep.mubr.msk.f32.mxu0 %vm28644_vm0, %v12492_v32 }
 0x8ab   : > { %21980 = vmatmul.mubr.msk.f32.gmra.mrb[52].mxu0 %vm28785_vm14, %v12493_v18  ;;  %vm28799_vm14 = vmmov %vm28644_vm0 }
 0x8ac   : > { %21982 = vmatprep.mubr.msk.f32.mxu0 %vm28786_vm4, %v12494_v7  ;;  %vm28800_vm4 = vmmov %vm28644_vm0 }
 0x8af   : > { %21983 = vmatmul.mubr.msk.f32.gmra.mrb[54].mxu0 %vm28787_vm5, %v12495_v40  ;;  %vm28801_vm5 = vmmov %vm28644_vm0 }
 0x8b0   : > { %21985 = vmatprep.mubr.msk.f32.mxu0 %vm28788_vm9, %v12496_v50  ;;  %vm28802_vm9 = vmmov %vm28644_vm0 }
 0x8b3   : > { %21986 = vmatmul.mubr.msk.f32.gmra.mrb[56].mxu0 %vm28789_vm10, %v12497_v30  ;;  %vm28811_vm10 = vcmask 1043456  }
 0x8b4   : > { %21988 = vmatprep.mubr.msk.f32.mxu0 %vm28790_vm11, %v12498_v1  ;;  %vm28812_vm11 = vmmov %vm28811_vm10 }
 0x8b7   : > { %21989 = vmatmul.mubr.msk.f32.gmra.mrb[58].mxu0 %vm28791_vm12, %v12499_v11  ;;  %vm28814_vm12 = vmmov %vm28644_vm0 }
 0x8b8   : > { %21991 = vmatprep.mubr.msk.f32.mxu0 %vm28792_vm13, %v12500_v33  ;;  %vm28815_vm13 = vmmov %vm28644_vm0 }
 0x8bb   : > { %21992 = vmatmul.mubr.msk.f32.gmra.mrb[60].mxu0 %vm28793_vm15, %v12501_v44  ;;  %vm28816_vm15 = vmmov %vm28644_vm0 }
 0x8bc   : > { %21994 = vmatprep.mubr.msk.f32.mxu0 %vm28794_vm6, %v12502_v24  ;;  %vm28817_vm6 = vmmov %vm28644_vm0 }
 0x8bf   : > { %21995 = vmatmul.mubr.msk.f32.gmra.mrb[62].mxu0 %vm28795_vm7, %v12503_v42  ;;  %vm28818_vm7 = vmmov %vm28644_vm0 }
 0x8c0   : > { %21997 = vmatprep.mubr.msk.f32.mxu0 %vm28796_vm8, %v12504_v55  ;;  %vm28819_vm8 = vmmov %vm28644_vm0 }
 0x8c3   : > { %21998 = vmatmul.mubr.msk.f32.gmra.mrb[64].mxu0 %vm28797_vm1, %v12505_v62  ;;  %vm28820_vm1 = vmmov %vm28644_vm0 }
 0x8c4   : > { %22000 = vmatprep.mubr.msk.f32.mxu0 %vm28798_vm3, %v12506_v19  ;;  %vm28821_vm3 = vmmov %vm28644_vm0 }
 0x8c7   : > { %22001 = vmatmul.mubr.msk.f32.gmra.mrb[66].mxu0 %vm28644_vm0, %v12507_v5 }
 0x8c8   : > { %22003 = vmatprep.mubr.msk.f32.mxu0 %vm28799_vm14, %v12508_v26  ;;  %vm28822_vm14 = vmmov %vm28644_vm0 }
 0x8cb   : > { %22004 = vmatmul.mubr.msk.f32.gmra.mrb[68].mxu0 %vm28800_vm4, %v12509_v63  ;;  %vm28823_vm4 = vmmov %vm28644_vm0 }
 0x8cc   : > { %22006 = vmatprep.mubr.msk.f32.mxu0 %vm28801_vm5, %v12510_v37  ;;  %vm28824_vm5 = vmmov %vm28644_vm0 }
 0x8cf   : > { %22007 = vmatmul.mubr.msk.f32.gmra.mrb[70].mxu0 %vm28802_vm9, %v12511_v15  ;;  %vm28825_vm9 = vmmov %vm28644_vm0 }
 0x95e   : > { %v21957_v31 = vpop.f32.mrb[36].mxu0 }
 0x95f   : > { %v12913_v46 = vadd.f32 %v21957_v31, %v27227_v61  ;;  %v12691_v2 = vpop.f32.mrb[37].mxu0 }
 0x960   : > { %v12912_v3 = vadd.f32 %v27227_v61, %v12691_v2 }
 0x961   : > { %v12949_v32 = vmax.f32 %v12913_v46, 0.0 }
 0x962   : > { %v12948_v18 = vmax.f32 %v12912_v3, 0.0  ;;  %v21960_v7 = vpop.f32.mrb[38].mxu0 }
 0x963   : > { %v12985_v40 = vmul.f32 %v24883_v48, %v12949_v32  ;;  %v12915_v50 = vadd.f32 %v21960_v7, %v27227_v61  ;;  %v12701_v30 = vpop.f32.mrb[39].mxu0 }
 0x964   : > { %v12984_v1 = vmul.f32 %v24940_v21, %v12948_v18  ;;  %v12914_v11 = vadd.f32 %v27227_v61, %v12701_v30 }
 0x965   : > { %13021 = vst.msk [vmem:[#allocation3 + $0x1b] sm:$0xff] %vm1040_vm2, %v12985_v40  ;;  %v12951_v33 = vmax.f32 %v12915_v50, 0.0 }
 0x966   : > { %13020 = vst.msk [vmem:[#allocation3 + $0x13] sm:$0xff] %vm1040_vm2, %v12984_v1  ;;  %v12950_v44 = vmax.f32 %v12914_v11, 0.0  ;;  %v21963_v24 = vpop.f32.mrb[40].mxu0 }
 0x967   : > { %v12987_v42 = vmul.f32 %v24947_v22, %v12951_v33  ;;  %v12917_v55 = vadd.f32 %v21963_v24, %v27227_v61  ;;  %v12711_v62 = vpop.f32.mrb[41].mxu0 }
 0x968   : > { %v12986_v19 = vmul.f32 %v28413_v6, %v12950_v44  ;;  %v12916_v5 = vadd.f32 %v27227_v61, %v12711_v62 }
 0x969   : > { %13023 = vst.msk [vmem:[#allocation3 + $0x2b] sm:$0xff] %vm1040_vm2, %v12987_v42  ;;  %v12953_v26 = vmax.f32 %v12917_v55, 0.0 }
 0x96a   : > { %13022 = vst.msk [vmem:[#allocation3 + $0x23] sm:$0xff] %vm1040_vm2, %v12986_v19  ;;  %v12952_v37 = vmax.f32 %v12916_v5, 0.0  ;;  %v21966_v63 = vpop.f32.mrb[42].mxu0 }
 0x96b   : > { %v12989_v15 = vmul.f32 %v28418_v59, %v12953_v26  ;;  %v12919_v0 = vadd.f32 %v21966_v63, %v27227_v61  ;;  %v12721_v13 = vpop.f32.mrb[43].mxu0 }
 0x96c   : > { %v12988_v27 = vmul.f32 %v28419_v35, %v12952_v37  ;;  %v12918_v28 = vadd.f32 %v27227_v61, %v12721_v13 }
 0x96d   : > { %13025 = vst.msk [vmem:[#allocation3 + $0x3b] sm:$0xff] %vm1040_vm2, %v12989_v15  ;;  %v12955_v12 = vmax.f32 %v12919_v0, 0.0  ;;  %v13101_v17 = vld [vmem:[#allocation3 + $0x11] sm:$0xff]  ;;  %v13102_v39 = vld [vmem:[#allocation3 + $0x19] sm:$0xff] }
 0x96e   : > { %13024 = vst.msk [vmem:[#allocation3 + $0x33] sm:$0xff] %vm1040_vm2, %v12988_v27  ;;  %v12954_v51 = vmax.f32 %v12918_v28, 0.0  ;;  %v21969_v52 = vpop.f32.mrb[44].mxu0  ;;  %22020 = vmatprep.mubr.msk.f32.mxu1 %vm1040_vm2, %v13101_v17 }
 0x96f   : > { %v12991_v25 = vmul.f32 %v28424_v4, %v12955_v12  ;;  %v12921_v31 = vadd.f32 %v21969_v52, %v27227_v61  ;;  %v12731_v46 = vpop.f32.mrb[45].mxu0  ;;  %22021 = vmatmul.mubr.msk.f32.gmra.mrb[56].mxu1 %vm1040_vm2, %v13102_v39 }
 0x970   : > { %v12990_v2 = vmul.f32 %v25206_v49, %v12954_v51  ;;  %v12920_v3 = vadd.f32 %v27227_v61, %v12731_v46 }
 0x971   : > { %13027 = vst.msk [vmem:[#allocation3 + $0x4b] sm:$0xff] %vm1040_vm2, %v12991_v25  ;;  %v12957_v32 = vmax.f32 %v12921_v31, 0.0  ;;  %v13103_v18 = vld [vmem:[#allocation3 + $0x21] sm:$0xff]  ;;  %v13104_v7 = vld [vmem:[#allocation3 + $0x29] sm:$0xff] }
 0x972   : > { %13026 = vst.msk [vmem:[#allocation3 + $0x43] sm:$0xff] %vm1040_vm2, %v12990_v2  ;;  %v12956_v40 = vmax.f32 %v12920_v3, 0.0  ;;  %v21972_v50 = vpop.f32.mrb[46].mxu0  ;;  %22023 = vmatprep.mubr.msk.f32.mxu1 %vm1040_vm2, %v13103_v18 }
 0x973   : > { %v12993_v30 = vmul.f32 %v25211_v29, %v12957_v32  ;;  %v12923_v1 = vadd.f32 %v21972_v50, %v27227_v61  ;;  %v12741_v11 = vpop.f32.mrb[47].mxu0  ;;  %22024 = vmatmul.mubr.msk.f32.gmra.mrb[58].mxu1 %vm1040_vm2, %v13104_v7 }
 0x974   : > { %v12992_v33 = vmul.f32 %v25216_v41, %v12956_v40  ;;  %v12922_v44 = vadd.f32 %v27227_v61, %v12741_v11 }
 0x975   : > { %13029 = vst.msk [vmem:[#allocation3 + $0x5b] sm:$0xff] %vm1040_vm2, %v12993_v30  ;;  %v12959_v24 = vmax.f32 %v12923_v1, 0.0  ;;  %v13105_v42 = vld [vmem:[#allocation3 + $0x31] sm:$0xff]  ;;  %v13106_v55 = vld [vmem:[#allocation3 + $0x39] sm:$0xff] }
 0x976   : > { %13028 = vst.msk [vmem:[#allocation3 + $0x53] sm:$0xff] %vm1040_vm2, %v12992_v33  ;;  %v12958_v62 = vmax.f32 %v12922_v44, 0.0  ;;  %v21975_v19 = vpop.f32.mrb[48].mxu0  ;;  %22026 = vmatprep.mubr.msk.f32.mxu1 %vm1040_vm2, %v13105_v42 }
 0x977   : > { %v12995_v5 = vmul.f32 %v25222_v43, %v12959_v24  ;;  %v12925_v26 = vadd.f32 %v21975_v19, %v27227_v61  ;;  %v12751_v37 = vpop.f32.mrb[49].mxu0  ;;  %22027 = vmatmul.mubr.msk.f32.gmra.mrb[60].mxu1 %vm1040_vm2, %v13106_v55 }
 0x978   : > { %v12994_v63 = vmul.f32 %v25328_v38, %v12958_v62  ;;  %v12924_v15 = vadd.f32 %v27227_v61, %v12751_v37 }
 0x979   : > { %13031 = vst.msk [vmem:[#allocation3 + $0x6b] sm:$0xff] %vm1040_vm2, %v12995_v5  ;;  %v12961_v0 = vmax.f32 %v12925_v26, 0.0  ;;  %v13107_v13 = vld [vmem:[#allocation3 + $0x41] sm:$0xff]  ;;  %v13108_v27 = vld [vmem:[#allocation3 + $0x49] sm:$0xff] }
 0x97a   : > { %13030 = vst.msk [vmem:[#allocation3 + $0x63] sm:$0xff] %vm1040_vm2, %v12994_v63  ;;  %v12960_v28 = vmax.f32 %v12924_v15, 0.0  ;;  %v21978_v12 = vpop.f32.mrb[50].mxu0  ;;  %22029 = vmatprep.mubr.msk.f32.mxu1 %vm1040_vm2, %v13107_v13 }
 0x97b   : > { %v12997_v17 = vmul.f32 %v25333_v9, %v12961_v0  ;;  %v12927_v39 = vadd.f32 %v21978_v12, %v27227_v61  ;;  %v12761_v51 = vpop.f32.mrb[51].mxu0  ;;  %22030 = vmatmul.mubr.msk.f32.gmra.mrb[62].mxu1 %vm1040_vm2, %v13108_v27 }
 0x97c   : > { %v12996_v52 = vmul.f32 %v25340_v54, %v12960_v28  ;;  %v12926_v25 = vadd.f32 %v27227_v61, %v12761_v51 }
 0x97d   : > { %13033 = vst.msk [vmem:[#allocation3 + $0x7b] sm:$0xff] %vm1040_vm2, %v12997_v17  ;;  %v12963_v31 = vmax.f32 %v12927_v39, 0.0  ;;  %v13109_v46 = vld [vmem:[#allocation3 + $0x51] sm:$0xff]  ;;  %v13110_v2 = vld [vmem:[#allocation3 + $0x59] sm:$0xff] }
 0x97e   : > { %13032 = vst.msk [vmem:[#allocation3 + $0x73] sm:$0xff] %vm1040_vm2, %v12996_v52  ;;  %v12962_v3 = vmax.f32 %v12926_v25, 0.0  ;;  %v21981_v32 = vpop.f32.mrb[52].mxu0  ;;  %22032 = vmatprep.mubr.msk.f32.mxu1 %vm1040_vm2, %v13109_v46 }
 0x97f   : > { %v12999_v18 = vmul.f32 %v25345_v10, %v12963_v31  ;;  %v12929_v7 = vadd.f32 %v21981_v32, %v27227_v61  ;;  %v12771_v40 = vpop.f32.mrb[53].mxu0  ;;  %22033 = vmatmul.mubr.msk.f32.gmra.mrb[64].mxu1 %vm1040_vm2, %v13110_v2 }
 0x980   : > { %v12998_v50 = vmul.f32 %v28449_v34, %v12962_v3  ;;  %v12928_v30 = vadd.f32 %v27227_v61, %v12771_v40 }
 0x981   : > { %13035 = vst.msk [vmem:[#allocation3 + $0x8b] sm:$0xff] %vm1040_vm2, %v12999_v18  ;;  %v12965_v1 = vmax.f32 %v12929_v7, 0.0  ;;  %v13111_v11 = vld [vmem:[#allocation3 + $0x61] sm:$0xff]  ;;  %v13112_v33 = vld [vmem:[#allocation3 + $0x69] sm:$0xff] }
 0x982   : > { %13034 = vst.msk [vmem:[#allocation3 + $0x83] sm:$0xff] %vm1040_vm2, %v12998_v50  ;;  %v12964_v44 = vmax.f32 %v12928_v30, 0.0  ;;  %v21984_v24 = vpop.f32.mrb[54].mxu0  ;;  %22035 = vmatprep.mubr.msk.f32.mxu1 %vm1040_vm2, %v13111_v11 }
 0x983   : > { %v13001_v42 = vmul.f32 %v25380_v60, %v12965_v1  ;;  %v12931_v55 = vadd.f32 %v21984_v24, %v27227_v61  ;;  %v12781_v62 = vpop.f32.mrb[55].mxu0  ;;  %22036 = vmatmul.mubr.msk.f32.gmra.mrb[66].mxu1 %vm1040_vm2, %v13112_v33 }
 0x984   : > { %v13000_v19 = vmul.f32 %v25392_v16, %v12964_v44  ;;  %v12930_v5 = vadd.f32 %v27227_v61, %v12781_v62 }
 0x985   : > { %13037 = vst.msk [vmem:[#allocation3 + $0x9b] sm:$0xff] %vm1040_vm2, %v13001_v42  ;;  %v12967_v26 = vmax.f32 %v12931_v55, 0.0  ;;  %v13113_v37 = vld [vmem:[#allocation3 + $0x71] sm:$0xff]  ;;  %v13114_v63 = vld [vmem:[#allocation3 + $0x79] sm:$0xff] }
 0x986   : > { %13036 = vst.msk [vmem:[#allocation3 + $0x93] sm:$0xff] %vm1040_vm2, %v13000_v19  ;;  %v12966_v15 = vmax.f32 %v12930_v5, 0.0  ;;  %v21987_v0 = vpop.f32.mrb[56].mxu0  ;;  %22038 = vmatprep.mubr.msk.f32.mxu1 %vm1040_vm2, %v13113_v37 }
 0x987   : > { %v13003_v13 = vmul.f32 %v25397_v14, %v12967_v26  ;;  %v12933_v27 = vadd.f32 %v21987_v0, %v27227_v61  ;;  %v12791_v28 = vpop.f32.mrb[57].mxu0  ;;  %22039 = vmatmul.mubr.msk.f32.gmra.mrb[68].mxu1 %vm1040_vm2, %v13114_v63 }
 0x988   : > { %v13002_v12 = vmul.f32 %v25444_v36, %v12966_v15  ;;  %v12932_v17 = vadd.f32 %v27227_v61, %v12791_v28 }
 0x989   : > { %13039 = vst.msk [vmem:[#allocation3 + $0xab] sm:$0xff] %vm1040_vm2, %v13003_v13  ;;  %v12969_v39 = vmax.f32 %v12933_v27, 0.0  ;;  %v13115_v51 = vld [vmem:[#allocation3 + $0x81] sm:$0xff]  ;;  %v13116_v52 = vld [vmem:[#allocation3 + $0x89] sm:$0xff] }
 0x98a   : > { %13038 = vst.msk [vmem:[#allocation3 + $0xa3] sm:$0xff] %vm1040_vm2, %v13002_v12  ;;  %v12968_v25 = vmax.f32 %v12932_v17, 0.0  ;;  %v21990_v31 = vpop.f32.mrb[58].mxu0  ;;  %22041 = vmatprep.mubr.msk.f32.mxu1 %vm1040_vm2, %v13115_v51 }
 0x98b   : > { %v13005_v46 = vmul.f32 %v25535_v20, %v12969_v39  ;;  %v12935_v2 = vadd.f32 %v21990_v31, %v27227_v61  ;;  %v12801_v3 = vpop.f32.mrb[59].mxu0  ;;  %22042 = vmatmul.mubr.msk.f32.gmra.mrb[70].mxu1 %vm1040_vm2, %v13116_v52 }
 0x98c   : > { %v13004_v32 = vmul.f32 %v25557_v53, %v12968_v25  ;;  %v12934_v18 = vadd.f32 %v27227_v61, %v12801_v3 }
 0x98d   : > { %13041 = vst.msk [vmem:[#allocation3 + $0xbb] sm:$0xff] %vm1040_vm2, %v13005_v46  ;;  %v12971_v7 = vmax.f32 %v12935_v2, 0.0  ;;  %v13117_v40 = vld [vmem:[#allocation3 + $0x91] sm:$0xff]  ;;  %v13118_v50 = vld [vmem:[#allocation3 + $0x99] sm:$0xff] }
 0x98e   : > { %13040 = vst.msk [vmem:[#allocation3 + $0xb3] sm:$0xff] %vm1040_vm2, %v13004_v32  ;;  %v12970_v30 = vmax.f32 %v12934_v18, 0.0  ;;  %v21993_v1 = vpop.f32.mrb[60].mxu0  ;;  %22044 = vmatprep.mubr.msk.f32.mxu1 %vm1040_vm2, %v13117_v40  ;;  %v28803_v40 = vld [vmem:[#allocation20_spill] sm:$0xff] }
 0x98f   : > { %v13007_v11 = vmul.f32 %v25637_v8, %v12971_v7  ;;  %v12937_v33 = vadd.f32 %v21993_v1, %v27227_v61  ;;  %v12811_v44 = vpop.f32.mrb[61].mxu0  ;;  %22045 = vmatmul.mubr.msk.f32.gmra.mrb[72].mxu1 %vm1040_vm2, %v13118_v50 }
 0x990   : > { %v13006_v24 = vmul.f32 %v25642_v57, %v12970_v30  ;;  %v12936_v42 = vadd.f32 %v27227_v61, %v12811_v44 }
 0x991   : > { %13043 = vst.msk [vmem:[#allocation3 + $0xcb] sm:$0xff] %vm1040_vm2, %v13007_v11  ;;  %v12973_v55 = vmax.f32 %v12937_v33, 0.0  ;;  %v13119_v62 = vld [vmem:[#allocation3 + $0xa1] sm:$0xff]  ;;  %v13120_v19 = vld [vmem:[#allocation3 + $0xa9] sm:$0xff] }
 0x992   : > { %13042 = vst.msk [vmem:[#allocation3 + $0xc3] sm:$0xff] %vm1040_vm2, %v13006_v24  ;;  %v12972_v5 = vmax.f32 %v12936_v42, 0.0  ;;  %v21996_v26 = vpop.f32.mrb[62].mxu0  ;;  %22047 = vmatprep.mubr.msk.f32.mxu1 %vm1040_vm2, %v13119_v62  ;;  %v28804_v11 = vld [vmem:[#allocation21_spill] sm:$0xff] }
 0x993   : > { %v13009_v37 = vmul.f32 %v25661_v56, %v12973_v55  ;;  %v12939_v63 = vadd.f32 %v21996_v26, %v27227_v61  ;;  %v12821_v15 = vpop.f32.mrb[63].mxu0  ;;  %22048 = vmatmul.mubr.msk.f32.gmra.mrb[74].mxu1 %vm1040_vm2, %v13120_v19  ;;  %v18784_v56 = vld [vmem:[%s28197_s3 + $0x1c8] sm:$0xff] }
 0x994   : > { %v13008_v0 = vmul.f32 %v25671_v47, %v12972_v5  ;;  %v12938_v13 = vadd.f32 %v27227_v61, %v12821_v15  ;;  %v28805_v5 = vld [vmem:[#allocation4_spill] sm:$0xff]  ;;  %v28806_v15 = vld [vmem:[#allocation22_spill] sm:$0xff] }
 0x995   : > { %13045 = vst.msk [vmem:[#allocation3 + $0xdb] sm:$0xff] %vm1040_vm2, %v13009_v37  ;;  %v12975_v27 = vmax.f32 %v12939_v63, 0.0  ;;  %v13121_v28 = vld [vmem:[#allocation3 + $0xb1] sm:$0xff]  ;;  %v13122_v12 = vld [vmem:[#allocation3 + $0xb9] sm:$0xff]  ;;  %v18783_v47 = vld [vmem:[%s28197_s3 + $0x1c0] sm:$0xff] }
 0x996   : > { %13044 = vst.msk [vmem:[#allocation3 + $0xd3] sm:$0xff] %vm1040_vm2, %v13008_v0  ;;  %v12974_v17 = vmax.f32 %v12938_v13, 0.0  ;;  %v21999_v39 = vpop.f32.mrb[64].mxu0  ;;  %22050 = vmatprep.mubr.msk.f32.mxu1 %vm1040_vm2, %v13121_v28  ;;  %v22735_v57 = vpack.c.bf16 %v18784_v56, %v18783_v47 }
 0x997   : > { %v13011_v51 = vmul.f32 %v25765_v23, %v12975_v27  ;;  %v12941_v52 = vadd.f32 %v21999_v39, %v27227_v61  ;;  %v12831_v25 = vpop.f32.mrb[65].mxu0  ;;  %22051 = vmatmul.mubr.msk.f32.gmra.mrb[76].mxu1 %vm1040_vm2, %v13122_v12 }
 0x998   : > { %v13010_v31 = vmul.f32 %v25781_v58, %v12974_v17  ;;  %v12940_v46 = vadd.f32 %v27227_v61, %v12831_v25  ;;  %v18746_v58 = vld [vmem:[%s28197_s3 + $0x1b8] sm:$0xff] }
 0x999   : > { %13047 = vst.msk [vmem:[#allocation3 + $0xeb] sm:$0xff] %vm1040_vm2, %v13011_v51  ;;  %v12977_v2 = vmax.f32 %v12941_v52, 0.0  ;;  %v13123_v3 = vld [vmem:[#allocation3 + $0xc1] sm:$0xff]  ;;  %v13124_v32 = vld [vmem:[#allocation3 + $0xc9] sm:$0xff] }
 0x99a   : > { %13046 = vst.msk [vmem:[#allocation3 + $0xe3] sm:$0xff] %vm1040_vm2, %v13010_v31  ;;  %v12976_v18 = vmax.f32 %v12940_v46, 0.0  ;;  %v22002_v7 = vpop.f32.mrb[66].mxu0  ;;  %22053 = vmatprep.mubr.msk.f32.mxu1 %vm1040_vm2, %v13123_v3  ;;  %v28807_v51 = vld [vmem:[#allocation5_spill] sm:$0xff]  ;;  %v28808_v46 = vld [vmem:[#allocation6_spill] sm:$0xff] }
 0x99b   : > { %v13013_v50 = vmul.f32 %v28803_v40, %v12977_v2  ;;  %v12943_v30 = vadd.f32 %v22002_v7, %v27227_v61  ;;  %v12841_v1 = vpop.f32.mrb[67].mxu0  ;;  %22054 = vmatmul.mubr.msk.f32.gmra.mrb[78].mxu1 %vm1040_vm2, %v13124_v32  ;;  %v18745_v40 = vld [vmem:[%s28197_s3 + $0x1b0] sm:$0xff] }
 0x99c   : > { %v13012_v33 = vmul.f32 %v28804_v11, %v12976_v18  ;;  %v12942_v44 = vadd.f32 %v27227_v61, %v12841_v1  ;;  %v22731_v23 = vpack.c.bf16 %v18746_v58, %v18745_v40  ;;  %v18786_v58 = vld [vmem:[%s28197_s3 + $0x1d8] sm:$0xff]  ;;  %v14706_v40 = vld [vmem:[#allocation3 + $0x13] sm:$0xff] }
 0x99d   : > { %13049 = vst.msk [vmem:[#allocation3 + $0xfb] sm:$0xff] %vm1040_vm2, %v13013_v50  ;;  %v12979_v24 = vmax.f32 %v12943_v30, 0.0  ;;  %v13125_v42 = vld [vmem:[#allocation3 + $0xd1] sm:$0xff]  ;;  %v13126_v55 = vld [vmem:[#allocation3 + $0xd9] sm:$0xff] }
 0x99e   : > { %13048 = vst.msk [vmem:[#allocation3 + $0xf3] sm:$0xff] %vm1040_vm2, %v13012_v33  ;;  %v12978_v62 = vmax.f32 %v12942_v44, 0.0  ;;  %v22005_v19 = vpop.f32.mrb[68].mxu0  ;;  %22056 = vmatprep.mubr.msk.f32.mxu1 %vm1040_vm2, %v13125_v42  ;;  %v28809_v30 = vld [vmem:[#allocation7_spill] sm:$0xff]  ;;  %v28810_v33 = vld [vmem:[#allocation8_spill] sm:$0xff] }
 0x99f   : > { %v13015_v26 = vmul.f32 %v28805_v5, %v12979_v24  ;;  %v12945_v37 = vadd.f32 %v22005_v19, %v27227_v61  ;;  %v12851_v63 = vpop.f32.mrb[69].mxu0  ;;  %22057 = vmatmul.mubr.msk.f32.gmra.mrb[80].mxu1 %vm1040_vm2, %v13126_v55  ;;  %v18665_v19 = vld [vmem:[%s28197_s3 + $0x170] sm:$0xff] }
 0x9a0   : > { %v13014_v0 = vmul.f32 %v28806_v15, %v12978_v62  ;;  %v12944_v13 = vadd.f32 %v27227_v61, %v12851_v63  ;;  %v13058_v62 = vld [vmem:[#allocation3] sm:$0xff] }
 0x9a1   : > { %13051 = vst.msk [vmem:[#allocation3 + $0x10b] sm:$0xff] %vm1040_vm2, %v13015_v26  ;;  %v12981_v27 = vmax.f32 %v12945_v37, 0.0  ;;  %v13127_v28 = vld [vmem:[#allocation3 + $0xe1] sm:$0xff]  ;;  %v13128_v12 = vld [vmem:[#allocation3 + $0xe9] sm:$0xff] }
 0x9a2   : > { %13050 = vst.msk [vmem:[#allocation3 + $0x103] sm:$0xff] %vm1040_vm2, %v13014_v0  ;;  %v12980_v17 = vmax.f32 %v12944_v13, 0.0  ;;  %v22008_v39 = vpop.f32.mrb[70].mxu0  ;;  %22059 = vmatprep.mubr.msk.f32.mxu1 %vm1040_vm2, %v13127_v28  ;;  %v18666_v26 = vld [vmem:[%s28197_s3 + $0x178] sm:$0xff]  ;;  %v13059_v37 = vld [vmem:[#allocation3 + $0x8] sm:$0xff]  ;;  %v18704_v13 = vld [vmem:[%s28197_s3 + $0x188] sm:$0xff] }
 0x9a3   : > { %v13017_v52 = vmul.f32 %v28807_v51, %v12981_v27  ;;  %v12947_v25 = vadd.f32 %v22008_v39, %v27227_v61  ;;  %v12861_v31 = vpop.f32.mrb[71].mxu0  ;;  %22060 = vmatmul.mubr.msk.f32.gmra.mrb[82].mxu1 %vm1040_vm2, %v13128_v12  ;;  %v22715_v63 = vpack.c.bf16 %v18666_v26, %v18665_v19  ;;  %v18703_v0 = vld [vmem:[%s28197_s3 + $0x180] sm:$0xff]  ;;  %v13060_v27 = vld [vmem:[#allocation3 + $0x10] sm:$0xff]  ;;  %v13061_v12 = vld [vmem:[#allocation3 + $0x18] sm:$0xff] }
 0x9a4   : > { %v13016_v2 = vmul.f32 %v28808_v46, %v12980_v17  ;;  %v12946_v3 = vadd.f32 %v27227_v61, %v12861_v31  ;;  %v27387_v28 = vpack.c.bf16 %v18704_v13, %v18703_v0  ;;  %v13062_v17 = vld [vmem:[#allocation3 + $0x20] sm:$0xff]  ;;  %v13063_v39 = vld [vmem:[#allocation3 + $0x28] sm:$0xff]  ;;  %v13081_v19 = vld [vmem:[#allocation3 + $0xb8] sm:$0xff] }
 0x9a5   : > { %13053 = vst.msk [vmem:[#allocation3 + $0x11b] sm:$0xff] %vm1040_vm2, %v13017_v52  ;;  %v12983_v32 = vmax.f32 %v12947_v25, 0.0  ;;  %v13129_v18 = vld [vmem:[#allocation3 + $0xf1] sm:$0xff]  ;;  %v13130_v7 = vld [vmem:[#allocation3 + $0xf9] sm:$0xff]  ;;  %v13067_v31 = vld [vmem:[#allocation3 + $0x48] sm:$0xff] }
 0x9a6   : > { %13052 = vst.msk [vmem:[#allocation3 + $0x113] sm:$0xff] %vm1040_vm2, %v13016_v2  ;;  %v12982_v50 = vmax.f32 %v12946_v3, 0.0  ;;  %22062 = vmatprep.mubr.msk.f32.mxu1 %vm1040_vm2, %v13129_v18  ;;  %v13064_v52 = vld [vmem:[#allocation3 + $0x30] sm:$0xff]  ;;  %v13066_v25 = vld [vmem:[#allocation3 + $0x40] sm:$0xff]  ;;  %v13069_v3 = vld [vmem:[#allocation3 + $0x58] sm:$0xff] }
 0x9a7   : > { %v13019_v1 = vmul.f32 %v28809_v30, %v12983_v32  ;;  %22063 = vmatmul.mubr.msk.f32.gmra.mrb[84].mxu1 %vm1040_vm2, %v13130_v7  ;;  %v13068_v2 = vld [vmem:[#allocation3 + $0x50] sm:$0xff]  ;;  %v13070_v32 = vld [vmem:[#allocation3 + $0x60] sm:$0xff]  ;;  %v13071_v18 = vld [vmem:[#allocation3 + $0x68] sm:$0xff] }
 0x9a8   : > { %v13018_v44 = vmul.f32 %v28810_v33, %v12982_v50  ;;  %v13072_v7 = vld [vmem:[#allocation3 + $0x70] sm:$0xff]  ;;  %v13073_v50 = vld [vmem:[#allocation3 + $0x78] sm:$0xff]  ;;  %v13082_v26 = vld [vmem:[#allocation3 + $0xc0] sm:$0xff] }
 0x9a9   : > { %13055 = vst.msk [vmem:[#allocation3 + $0x12b] sm:$0xff] %vm1040_vm2, %v13019_v1  ;;  %v13131_v24 = vld [vmem:[#allocation3 + $0x101] sm:$0xff]  ;;  %v13132_v61 = vld [vmem:[#allocation3 + $0x109] sm:$0xff]  ;;  %v13085_v0 = vld [vmem:[#allocation3 + $0xd8] sm:$0xff] }
 0x9aa   : > { %13054 = vst.msk [vmem:[#allocation3 + $0x123] sm:$0xff] %vm1040_vm2, %v13018_v44  ;;  %22065 = vmatprep.mubr.msk.f32.mxu1 %vm1040_vm2, %v13131_v24  ;;  %v13074_v1 = vld [vmem:[#allocation3 + $0x80] sm:$0xff]  ;;  %v13075_v44 = vld [vmem:[#allocation3 + $0x88] sm:$0xff]  ;;  %v13076_v24 = vld [vmem:[#allocation3 + $0x90] sm:$0xff] }
 0x9ab   : > { %22066 = vmatmul.mubr.msk.f32.gmra.mrb[86].mxu1 %vm1040_vm2, %v13132_v61  ;;  %v13077_v61 = vld [vmem:[#allocation3 + $0x98] sm:$0xff]  ;;  %v13086_v13 = vld [vmem:[#allocation3 + $0xe0] sm:$0xff]  ;;  %v13875_v33 = vld [vmem:[#allocation3 + $0xea] sm:$0xff] }
 0x9ac   : > { %v13876_v30 = vld [vmem:[#allocation3 + $0xf2] sm:$0xff]  ;;  %v13877_v46 = vld [vmem:[#allocation3 + $0xfa] sm:$0xff]  ;;  %v13878_v51 = vld [vmem:[#allocation3 + $0x102] sm:$0xff] }
 0x9ad   : > { %v13133_v42 = vld [vmem:[#allocation3 + $0x111] sm:$0xff]  ;;  %v13134_v55 = vld [vmem:[#allocation3 + $0x119] sm:$0xff] }
 0x9ae   : > { %22068 = vmatprep.mubr.msk.f32.mxu1 %vm1040_vm2, %v13133_v42  ;;  %v13078_v42 = vld [vmem:[#allocation3 + $0xa0] sm:$0xff]  ;;  %v13879_v15 = vld [vmem:[#allocation3 + $0x10a] sm:$0xff]  ;;  %v13880_v5 = vld [vmem:[#allocation3 + $0x112] sm:$0xff] }
 0x9af   : > { %22069 = vmatmul.mubr.msk.f32.gmra.mrb[88].mxu1 %vm1040_vm2, %v13134_v55  ;;  %v13079_v55 = vld [vmem:[#allocation3 + $0xa8] sm:$0xff]  ;;  %v13881_v11 = vld [vmem:[#allocation3 + $0x11a] sm:$0xff] }
 0x9b0   : > { %22079 = vmatprep.mubr.msk.f32.mxu1 %vm1040_vm2, %v13058_v62  ;;  %v13080_v62 = vld [vmem:[#allocation3 + $0xb0] sm:$0xff] }
 0x9b1   : > { %v14310_v56 = vld [vmem:[#allocation3 + $0x122] sm:$0xff]  ;;  %v14311_v47 = vld [vmem:[#allocation3 + $0x12a] sm:$0xff] }
 0x9b3   : > { %22080 = vmatmul.mubr.msk.f32.vlgmr.msra.gmra.mrb[54].mxu1 %vm1040_vm2, %v13059_v37  ;;  %v13083_v37 = vld [vmem:[#allocation3 + $0xc8] sm:$0xff] }
 0x9b4   : > { %22714 = vmatpush3.bf16.msra.mxu1 %v27221_v45  ;;  %22082 = vmatprep.mubr.msk.f32.mxu1 %vm1040_vm2, %v13060_v27  ;;  %v13065_v45 = vld [vmem:[#allocation3 + $0x38] sm:$0xff]  ;;  %v13087_v27 = vld [vmem:[#allocation3 + $0xe8] sm:$0xff] }
 0x9b5   : > { %22716 = vmatprep.subr.bf16.mxu1 %v22715_v63 }
 0x9b7   : > { %22083 = vmatmul.mubr.msk.f32.gmra.mrb[56].mxu1 %vm1040_vm2, %v13061_v12  ;;  %v13088_v12 = vld [vmem:[#allocation3 + $0xf0] sm:$0xff] }
 0x9b8   : > { %22085 = vmatprep.mubr.msk.f32.mxu1 %vm1040_vm2, %v13062_v17  ;;  %22718 = vmatpush3.bf16.msra.mxu1 %v22715_v63  ;;  %v13084_v63 = vld [vmem:[#allocation3 + $0xd0] sm:$0xff]  ;;  %v13089_v17 = vld [vmem:[#allocation3 + $0xf8] sm:$0xff] }
 0x9b9   : > { %22720 = vmatprep.subr.bf16.mxu1 %v27387_v28 }
 0x9bb   : > { %22086 = vmatmul.mubr.msk.f32.gmra.mrb[58].mxu1 %vm1040_vm2, %v13063_v39  ;;  %v13090_v39 = vld [vmem:[#allocation3 + $0x100] sm:$0xff] }
 0x9bc   : > { %22088 = vmatprep.mubr.msk.f32.mxu1 %vm1040_vm2, %v13064_v52  ;;  %v13091_v52 = vld [vmem:[#allocation3 + $0x108] sm:$0xff] }
 0x9bf   : > { %22089 = vmatmul.mubr.msk.f32.gmra.mrb[60].mxu1 %vm1040_vm2, %v13065_v45  ;;  %v13092_v45 = vld [vmem:[#allocation3 + $0x110] sm:$0xff] }
 0x9c0   : > { %22091 = vmatprep.mubr.msk.f32.mxu1 %vm1040_vm2, %v13066_v25  ;;  %v13846_v25 = vld [vmem:[#allocation3 + $0x2] sm:$0xff] }
 0x9c3   : > { %22092 = vmatmul.mubr.msk.f32.gmra.mrb[62].mxu1 %vm1040_vm2, %v13067_v31  ;;  %v13093_v31 = vld [vmem:[#allocation3 + $0x118] sm:$0xff] }
 0x9c4   : > { %22094 = vmatprep.mubr.msk.f32.mxu1 %vm1040_vm2, %v13068_v2  ;;  %v18705_v2 = vld [vmem:[%s28197_s3 + $0x190] sm:$0xff] }
 0x9c7   : > { %22095 = vmatmul.mubr.msk.f32.gmra.mrb[64].mxu1 %vm1040_vm2, %v13069_v3  ;;  %v18706_v3 = vld [vmem:[%s28197_s3 + $0x198] sm:$0xff] }
 0x9c8   : > { %22097 = vmatprep.mubr.msk.f32.mxu1 %vm1040_vm2, %v13070_v32  ;;  %v13847_v32 = vld [vmem:[#allocation3 + $0xa] sm:$0xff] }
 0x9cb   : > { %22098 = vmatmul.mubr.msk.f32.gmra.mrb[66].mxu1 %vm1040_vm2, %v13071_v18  ;;  %v22723_v18 = vpack.c.bf16 %v18706_v3, %v18705_v2  ;;  %v13869_v2 = vld [vmem:[#allocation3 + $0xba] sm:$0xff]  ;;  %v13870_v3 = vld [vmem:[#allocation3 + $0xc2] sm:$0xff] }
 0x9cc   : > { %22100 = vmatprep.mubr.msk.f32.mxu1 %vm1040_vm2, %v13072_v7  ;;  %v18743_v7 = vld [vmem:[%s28197_s3 + $0x1a0] sm:$0xff] }
 0x9cf   : > { %22101 = vmatmul.mubr.msk.f32.gmra.mrb[68].mxu1 %vm1040_vm2, %v13073_v50  ;;  %v18744_v50 = vld [vmem:[%s28197_s3 + $0x1a8] sm:$0xff] }
 0x9d0   : > { %22103 = vmatprep.mubr.msk.f32.mxu1 %vm1040_vm2, %v13074_v1  ;;  %v27437_v1 = vld [vmem:[#allocation3 + $0x12] sm:$0xff] }
 0x9d3   : > { %22104 = vmatmul.mubr.msk.f32.gmra.mrb[70].mxu1 %vm1040_vm2, %v13075_v44  ;;  %v27442_v44 = vpack.c.bf16 %v18744_v50, %v18743_v7  ;;  %v13873_v7 = vld [vmem:[#allocation3 + $0xda] sm:$0xff]  ;;  %v13874_v50 = vld [vmem:[#allocation3 + $0xe2] sm:$0xff] }
 0x9d4   : > { %22106 = vmatprep.mubr.msk.f32.mxu1 %vm1040_vm2, %v13076_v24  ;;  %v27444_v24 = vld [vmem:[#allocation3 + $0x1a] sm:$0xff] }
 0x9d7   : > { %22107 = vmatmul.mubr.msk.f32.gmra.mrb[72].mxu1 %vm1040_vm2, %v13077_v61  ;;  %v27448_v61 = vld [vmem:[#allocation3 + $0x22] sm:$0xff] }
 0x9d8   : > { %22109 = vmatprep.mubr.msk.f32.mxu1 %vm1040_vm2, %v13078_v42  ;;  %v27457_v42 = vld [vmem:[#allocation3 + $0x32] sm:$0xff] }
 0x9db   : > { %22110 = vmatmul.mubr.msk.f32.gmra.mrb[74].mxu1 %vm1040_vm2, %v13079_v55  ;;  %v27461_v55 = vld [vmem:[#allocation3 + $0x3a] sm:$0xff] }
 0x9dc   : > { %22112 = vmatprep.mubr.msk.f32.mxu1 %vm1040_vm2, %v13080_v62  ;;  %v27465_v62 = vld [vmem:[#allocation3 + $0x42] sm:$0xff] }
 0x9df   : > { %22113 = vmatmul.mubr.msk.f32.gmra.mrb[76].mxu1 %vm1040_vm2, %v13081_v19  ;;  %v27469_v19 = vld [vmem:[#allocation3 + $0x4a] sm:$0xff] }
 0x9e0   : > { %22115 = vmatprep.mubr.msk.f32.mxu1 %vm1040_vm2, %v13082_v26  ;;  %v27473_v26 = vld [vmem:[#allocation3 + $0x52] sm:$0xff] }
 0x9e3   : > { %22116 = vmatmul.mubr.msk.f32.gmra.mrb[78].mxu1 %vm1040_vm2, %v13083_v37  ;;  %v27477_v37 = vld [vmem:[#allocation3 + $0x5a] sm:$0xff] }
 0x9e4   : > { %22118 = vmatprep.mubr.msk.f32.mxu1 %vm1040_vm2, %v13084_v63  ;;  %v27481_v63 = vld [vmem:[#allocation3 + $0x62] sm:$0xff] }
 0x9e7   : > { %22119 = vmatmul.mubr.msk.f32.gmra.mrb[80].mxu1 %vm1040_vm2, %v13085_v0  ;;  %v27485_v0 = vld [vmem:[#allocation3 + $0x6a] sm:$0xff] }
 0x9e8   : > { %22121 = vmatprep.mubr.msk.f32.mxu1 %vm1040_vm2, %v13086_v13  ;;  %v27489_v13 = vld [vmem:[#allocation3 + $0x72] sm:$0xff] }
 0x9eb   : > { %22122 = vmatmul.mubr.msk.f32.gmra.mrb[82].mxu1 %vm1040_vm2, %v13087_v27  ;;  %v27493_v27 = vld [vmem:[#allocation3 + $0x7a] sm:$0xff] }
 0x9ec   : > { %22124 = vmatprep.mubr.msk.f32.mxu1 %vm1040_vm2, %v13088_v12  ;;  %v27497_v12 = vld [vmem:[#allocation3 + $0x82] sm:$0xff] }
 0x9ef   : > { %22125 = vmatmul.mubr.msk.f32.gmra.mrb[84].mxu1 %vm1040_vm2, %v13089_v17  ;;  %v27501_v17 = vld [vmem:[#allocation3 + $0x8a] sm:$0xff] }
 0x9f0   : > { %22127 = vmatprep.mubr.msk.f32.mxu1 %vm1040_vm2, %v13090_v39  ;;  %v13864_v39 = vld [vmem:[#allocation3 + $0x92] sm:$0xff] }
 0x9f3   : > { %22128 = vmatmul.mubr.msk.f32.gmra.mrb[86].mxu1 %vm1040_vm2, %v13091_v52  ;;  %v13865_v52 = vld [vmem:[#allocation3 + $0x9a] sm:$0xff] }
 0x9f4   : > { %22130 = vmatprep.mubr.msk.f32.mxu1 %vm1040_vm2, %v13092_v45  ;;  %v13866_v45 = vld [vmem:[#allocation3 + $0xa2] sm:$0xff] }
 0x9f7   : > { %22131 = vmatmul.mubr.msk.f32.gmra.mrb[88].mxu1 %vm1040_vm2, %v13093_v31  ;;  %v13868_v31 = vld [vmem:[#allocation3 + $0xb2] sm:$0xff] }
 0x9f8   : > { %22141 = vmatprep.mubr.msk.f32.mxu1 %vm1040_vm2, %v13846_v25  ;;  %v13867_v25 = vld [vmem:[#allocation3 + $0xaa] sm:$0xff] }
 0x9fb   : > { %22142 = vmatmul.mubr.msk.f32.vlgmr.msra.gmra.mrb[54].mxu1 %vm1040_vm2, %v13847_v32  ;;  %v13871_v32 = vld [vmem:[#allocation3 + $0xca] sm:$0xff] }
 0x9fc   : > { %22722 = vmatpush3.bf16.msra.mxu1 %v27387_v28  ;;  %22144 = vmatprep.mubr.msk.f32.mxu1 %vm1040_vm2, %v27437_v1  ;;  %v27453_v28 = vld [vmem:[#allocation3 + $0x2a] sm:$0xff] }
 0x9fd   : > { %22724 = vmatprep.subr.bf16.mxu1 %v22723_v18 }
 0x9ff   : > { %22145 = vmatmul.mubr.msk.f32.gmra.mrb[56].mxu1 %vm1040_vm2, %v27444_v24 }
 0xa00   : > { %22147 = vmatprep.mubr.msk.f32.mxu1 %vm1040_vm2, %v27448_v61  ;;  %22726 = vmatpush3.bf16.msra.mxu1 %v22723_v18  ;;  %v13872_v18 = vld [vmem:[#allocation3 + $0xd2] sm:$0xff] }
 0xa01   : > { %22728 = vmatprep.subr.bf16.mxu1 %v27442_v44 }
 0xa03   : > { %22148 = vmatmul.mubr.msk.f32.gmra.mrb[58].mxu1 %vm1040_vm2, %v27453_v28 }
 0xa04   : > { %22150 = vmatprep.mubr.msk.f32.mxu1 %vm1040_vm2, %v27457_v42 }
 0xa07   : > { %22151 = vmatmul.mubr.msk.f32.gmra.mrb[60].mxu1 %vm1040_vm2, %v27461_v55 }
 0xa08   : > { %22153 = vmatprep.mubr.msk.f32.mxu1 %vm1040_vm2, %v27465_v62 }
 0xa0b   : > { %22154 = vmatmul.mubr.msk.f32.gmra.mrb[62].mxu1 %vm1040_vm2, %v27469_v19 }
 0xa0c   : > { %22156 = vmatprep.mubr.msk.f32.mxu1 %vm1040_vm2, %v27473_v26 }
 0xa0f   : > { %22157 = vmatmul.mubr.msk.f32.gmra.mrb[64].mxu1 %vm1040_vm2, %v27477_v37 }
 0xa10   : > { %22159 = vmatprep.mubr.msk.f32.mxu1 %vm1040_vm2, %v27481_v63 }
 0xa13   : > { %22160 = vmatmul.mubr.msk.f32.gmra.mrb[66].mxu1 %vm1040_vm2, %v27485_v0 }
 0xa14   : > { %22162 = vmatprep.mubr.msk.f32.mxu1 %vm1040_vm2, %v27489_v13 }
 0xa17   : > { %22163 = vmatmul.mubr.msk.f32.gmra.mrb[68].mxu1 %vm1040_vm2, %v27493_v27 }
 0xa18   : > { %22165 = vmatprep.mubr.msk.f32.mxu1 %vm1040_vm2, %v27497_v12 }
 0xa1b   : > { %22166 = vmatmul.mubr.msk.f32.gmra.mrb[70].mxu1 %vm1040_vm2, %v27501_v17 }
 0xa1c   : > { %22168 = vmatprep.mubr.msk.f32.mxu1 %vm1040_vm2, %v13864_v39 }
 0xa1f   : > { %22169 = vmatmul.mubr.msk.f32.gmra.mrb[72].mxu1 %vm1040_vm2, %v13865_v52 }
 0xa20   : > { %22171 = vmatprep.mubr.msk.f32.mxu1 %vm1040_vm2, %v13866_v45 }
 0xa23   : > { %22172 = vmatmul.mubr.msk.f32.gmra.mrb[74].mxu1 %vm1040_vm2, %v13867_v25 }
 0xa24   : > { %22174 = vmatprep.mubr.msk.f32.mxu1 %vm1040_vm2, %v13868_v31 }
 0xa27   : > { %22175 = vmatmul.mubr.msk.f32.gmra.mrb[76].mxu1 %vm1040_vm2, %v13869_v2 }
 0xa28   : > { %22177 = vmatprep.mubr.msk.f32.mxu1 %vm1040_vm2, %v13870_v3 }
 0xa2b   : > { %22178 = vmatmul.mubr.msk.f32.gmra.mrb[78].mxu1 %vm1040_vm2, %v13871_v32 }
 0xa2c   : > { %22180 = vmatprep.mubr.msk.f32.mxu1 %vm1040_vm2, %v13872_v18 }
 0xa2f   : > { %22181 = vmatmul.mubr.msk.f32.gmra.mrb[80].mxu1 %vm1040_vm2, %v13873_v7 }
 0xa30   : > { %22183 = vmatprep.mubr.msk.f32.mxu1 %vm1040_vm2, %v13874_v50 }
 0xa33   : > { %22184 = vmatmul.mubr.msk.f32.gmra.mrb[82].mxu1 %vm1040_vm2, %v13875_v33 }
 0xa34   : > { %22186 = vmatprep.mubr.msk.f32.mxu1 %vm1040_vm2, %v13876_v30 }
 0xa37   : > { %22187 = vmatmul.mubr.msk.f32.gmra.mrb[84].mxu1 %vm1040_vm2, %v13877_v46 }
 0xa38   : > { %22189 = vmatprep.mubr.msk.f32.mxu1 %vm1040_vm2, %v13878_v51 }
 0xa3b   : > { %22190 = vmatmul.mubr.msk.f32.gmra.mrb[86].mxu1 %vm1040_vm2, %v13879_v15 }
 0xa3c   : > { %22192 = vmatprep.mubr.msk.f32.mxu1 %vm1040_vm2, %v13880_v5 }
 0xa3f   : > { %22193 = vmatmul.mubr.msk.f32.gmra.mrb[88].mxu1 %vm1040_vm2, %v13881_v11 }
 0xa40   : > { %22203 = vmatprep.mubr.msk.f32.mxu1 %vm1040_vm2, %v27437_v1  ;;  %v14710_v1 = vld [vmem:[#allocation3 + $0x33] sm:$0xff] }
 0xa43   : > { %22204 = vmatmul.mubr.msk.f32.vlgmr.msra.gmra.mrb[54].mxu1 %vm1040_vm2, %v27444_v24  ;;  %v14712_v24 = vld [vmem:[#allocation3 + $0x43] sm:$0xff] }
 0xa44   : > { %22730 = vmatpush3.bf16.msra.mxu1 %v27442_v44  ;;  %22206 = vmatprep.mubr.msk.f32.mxu1 %vm1040_vm2, %v27448_v61  ;;  %v14711_v44 = vld [vmem:[#allocation3 + $0x3b] sm:$0xff]  ;;  %v14714_v61 = vld [vmem:[#allocation3 + $0x53] sm:$0xff] }
 0xa45   : > { %22732 = vmatprep.subr.bf16.mxu1 %v22731_v23 }
 0xa47   : > { %22207 = vmatmul.mubr.msk.f32.gmra.mrb[56].mxu1 %vm1040_vm2, %v27453_v28  ;;  %v14715_v28 = vld [vmem:[#allocation3 + $0x5b] sm:$0xff] }
 0xa48   : > { %22209 = vmatprep.mubr.msk.f32.mxu1 %vm1040_vm2, %v27457_v42  ;;  %22734 = vmatpush3.bf16.msra.mxu1 %v22731_v23  ;;  %v18785_v23 = vld [vmem:[%s28197_s3 + $0x1d0] sm:$0xff]  ;;  %v14716_v42 = vld [vmem:[#allocation3 + $0x63] sm:$0xff] }
 0xa49   : > { %22736 = vmatprep.subr.bf16.mxu1 %v22735_v57 }
 0xa4b   : > { %22210 = vmatmul.mubr.msk.f32.gmra.mrb[58].mxu1 %vm1040_vm2, %v27461_v55  ;;  %v14717_v55 = vld [vmem:[#allocation3 + $0x6b] sm:$0xff] }
 0xa4c   : > { %22212 = vmatprep.mubr.msk.f32.mxu1 %vm1040_vm2, %v27465_v62  ;;  %v14718_v62 = vld [vmem:[#allocation3 + $0x73] sm:$0xff] }
 0xa4f   : > { %22213 = vmatmul.mubr.msk.f32.gmra.mrb[60].mxu1 %vm1040_vm2, %v27469_v19  ;;  %v14719_v19 = vld [vmem:[#allocation3 + $0x7b] sm:$0xff] }
 0xa50   : > { %22215 = vmatprep.mubr.msk.f32.mxu1 %vm1040_vm2, %v27473_v26  ;;  %v14720_v26 = vld [vmem:[#allocation3 + $0x83] sm:$0xff] }
 0xa53   : > { %22216 = vmatmul.mubr.msk.f32.gmra.mrb[62].mxu1 %vm1040_vm2, %v27477_v37  ;;  %v14721_v37 = vld [vmem:[#allocation3 + $0x8b] sm:$0xff] }
 0xa54   : > { %22218 = vmatprep.mubr.msk.f32.mxu1 %vm1040_vm2, %v27481_v63  ;;  %v14722_v63 = vld [vmem:[#allocation3 + $0x93] sm:$0xff] }
 0xa57   : > { %22219 = vmatmul.mubr.msk.f32.gmra.mrb[64].mxu1 %vm1040_vm2, %v27485_v0  ;;  %v14723_v0 = vld [vmem:[#allocation3 + $0x9b] sm:$0xff] }
 0xa58   : > { %22221 = vmatprep.mubr.msk.f32.mxu1 %vm1040_vm2, %v27489_v13  ;;  %v14724_v13 = vld [vmem:[#allocation3 + $0xa3] sm:$0xff] }
 0xa5b   : > { %22222 = vmatmul.mubr.msk.f32.gmra.mrb[66].mxu1 %vm1040_vm2, %v27493_v27  ;;  %v14725_v27 = vld [vmem:[#allocation3 + $0xab] sm:$0xff] }
 0xa5c   : > { %22224 = vmatprep.mubr.msk.f32.mxu1 %vm1040_vm2, %v27497_v12  ;;  %v14726_v12 = vld [vmem:[#allocation3 + $0xb3] sm:$0xff] }
 0xa5f   : > { %22225 = vmatmul.mubr.msk.f32.gmra.mrb[68].mxu1 %vm1040_vm2, %v27501_v17  ;;  %v14727_v17 = vld [vmem:[#allocation3 + $0xbb] sm:$0xff] }
 0xa60   : > { %22227 = vmatprep.mubr.msk.f32.mxu1 %vm1040_vm2, %v13864_v39  ;;  %v14728_v39 = vld [vmem:[#allocation3 + $0xc3] sm:$0xff] }
 0xa63   : > { %22228 = vmatmul.mubr.msk.f32.gmra.mrb[70].mxu1 %vm1040_vm2, %v13865_v52  ;;  %v14729_v52 = vld [vmem:[#allocation3 + $0xcb] sm:$0xff] }
 0xa64   : > { %22230 = vmatprep.mubr.msk.f32.mxu1 %vm1040_vm2, %v13866_v45  ;;  %v14730_v45 = vld [vmem:[#allocation3 + $0xd3] sm:$0xff] }
 0xa67   : > { %22231 = vmatmul.mubr.msk.f32.gmra.mrb[72].mxu1 %vm1040_vm2, %v13867_v25  ;;  %v14731_v25 = vld [vmem:[#allocation3 + $0xdb] sm:$0xff] }
 0xa68   : > { %22233 = vmatprep.mubr.msk.f32.mxu1 %vm1040_vm2, %v13868_v31  ;;  %v14732_v31 = vld [vmem:[#allocation3 + $0xe3] sm:$0xff] }
 0xa6b   : > { %22234 = vmatmul.mubr.msk.f32.gmra.mrb[74].mxu1 %vm1040_vm2, %v13869_v2  ;;  %v14733_v2 = vld [vmem:[#allocation3 + $0xeb] sm:$0xff] }
 0xa6c   : > { %22236 = vmatprep.mubr.msk.f32.mxu1 %vm1040_vm2, %v13870_v3  ;;  %v14734_v3 = vld [vmem:[#allocation3 + $0xf3] sm:$0xff] }
 0xa6f   : > { %22237 = vmatmul.mubr.msk.f32.gmra.mrb[76].mxu1 %vm1040_vm2, %v13871_v32  ;;  %v14735_v32 = vld [vmem:[#allocation3 + $0xfb] sm:$0xff] }
 0xa70   : > { %22239 = vmatprep.mubr.msk.f32.mxu1 %vm1040_vm2, %v13872_v18  ;;  %v14736_v18 = vld [vmem:[#allocation3 + $0x103] sm:$0xff] }
 0xa73   : > { %22240 = vmatmul.mubr.msk.f32.gmra.mrb[78].mxu1 %vm1040_vm2, %v13873_v7  ;;  %v14737_v7 = vld [vmem:[#allocation3 + $0x10b] sm:$0xff] }
 0xa74   : > { %22242 = vmatprep.mubr.msk.f32.mxu1 %vm1040_vm2, %v13874_v50  ;;  %v14738_v50 = vld [vmem:[#allocation3 + $0x113] sm:$0xff] }
 0xa77   : > { %22243 = vmatmul.mubr.msk.f32.gmra.mrb[80].mxu1 %vm1040_vm2, %v13875_v33  ;;  %v14709_v33 = vld [vmem:[#allocation3 + $0x2b] sm:$0xff] }
 0xa78   : > { %22245 = vmatprep.mubr.msk.f32.mxu1 %vm1040_vm2, %v13876_v30 }
 0xa7b   : > { %22246 = vmatmul.mubr.msk.f32.gmra.mrb[82].mxu1 %vm1040_vm2, %v13877_v46  ;;  %v14708_v46 = vld [vmem:[#allocation3 + $0x23] sm:$0xff] }
 0xa7c   : > { %22248 = vmatprep.mubr.msk.f32.mxu1 %vm1040_vm2, %v13878_v51  ;;  %v18824_v51 = vld [vmem:[%s28197_s3 + $0x1e8] sm:$0xff] }
 0xa7f   : > { %22249 = vmatmul.mubr.msk.f32.gmra.mrb[84].mxu1 %vm1040_vm2, %v13879_v15  ;;  %v14707_v15 = vld [vmem:[#allocation3 + $0x1b] sm:$0xff] }
 0xa80   : > { %22251 = vmatprep.mubr.msk.f32.mxu1 %vm1040_vm2, %v13880_v5  ;;  %v22739_v5 = vpack.c.bf16 %v18786_v58, %v18785_v23  ;;  %v14741_v23 = vld [vmem:[#allocation3 + $0x12b] sm:$0xff]  ;;  %v18825_v58 = vld [vmem:[%s28197_s3 + $0x1f0] sm:$0xff] }
 0xa83   : > { %22252 = vmatmul.mubr.msk.f32.gmra.mrb[86].mxu1 %vm1040_vm2, %v13881_v11  ;;  %v18823_v11 = vld [vmem:[%s28197_s3 + $0x1e0] sm:$0xff] }
 0xa84   : > { %22254 = vmatprep.mubr.msk.f32.mxu1 %vm1040_vm2, %v14310_v56  ;;  %v27603_v30 = vpack.c.bf16 %v18824_v51, %v18823_v11  ;;  %v14739_v56 = vld [vmem:[#allocation3 + $0x11b] sm:$0xff]  ;;  %v18863_v51 = vld [vmem:[%s28197_s3 + $0x200] sm:$0xff] }
 0xa85   : > { %v15137_v11 = vld [vmem:[#allocation3 + $0x1c] sm:$0xff] }
 0xa87   : > { %22255 = vmatmul.mubr.msk.f32.gmra.mrb[88].mxu1 %vm1040_vm2, %v14311_v47  ;;  %v14740_v47 = vld [vmem:[#allocation3 + $0x123] sm:$0xff] }
 0xa88   : > { %22265 = vmatprep.mubr.msk.f32.mxu1 %vm1040_vm2, %v14706_v40  ;;  %v18826_v40 = vld [vmem:[%s28197_s3 + $0x1f8] sm:$0xff] }
 0xa8b   : > { %22266 = vmatmul.mubr.msk.f32.vlgmr.msra.gmra.mrb[54].mxu1 %vm1040_vm2, %v14707_v15  ;;  %v22747_v15 = vpack.c.bf16 %v18826_v40, %v18825_v58  ;;  %v15171_v58 = vld [vmem:[#allocation3 + $0x12c] sm:$0xff]  ;;  %v18865_v40 = vld [vmem:[%s28197_s3 + $0x210] sm:$0xff] }
 0xa8c   : > { %22738 = vmatpush3.bf16.msra.mxu1 %v22735_v57  ;;  %22268 = vmatprep.mubr.msk.f32.mxu1 %vm1040_vm2, %v14708_v46  ;;  %v14713_v57 = vld [vmem:[#allocation3 + $0x4b] sm:$0xff] }
 0xa8d   : > { %22740 = vmatprep.subr.bf16.mxu1 %v22739_v5  ;;  %v18864_v46 = vld [vmem:[%s28197_s3 + $0x208] sm:$0xff] }
 0xa8f   : > { %22269 = vmatmul.mubr.msk.f32.gmra.mrb[56].mxu1 %vm1040_vm2, %v14709_v33  ;;  %v27653_v33 = vld [vmem:[#allocation3 + $0x24] sm:$0xff] }
 0xa90   : > { %22271 = vmatprep.mubr.msk.f32.mxu1 %vm1040_vm2, %v14710_v1  ;;  %22742 = vmatpush3.bf16.msra.mxu1 %v22739_v5  ;;  %v15136_v5 = vld [vmem:[#allocation3 + $0x14] sm:$0xff]  ;;  %v27658_v1 = vpack.c.bf16 %v18864_v46, %v18863_v51 }
 0xa91   : > { %22744 = vmatprep.subr.bf16.mxu1 %v27603_v30  ;;  %v18904_v51 = vld [vmem:[%s28197_s3 + $0x228] sm:$0xff] }
 0xa93   : > { %22272 = vmatmul.mubr.msk.f32.gmra.mrb[58].mxu1 %vm1040_vm2, %v14711_v44  ;;  %v27660_v44 = vld [vmem:[#allocation3 + $0x2c] sm:$0xff] }
 0xa94   : > { %22274 = vmatprep.mubr.msk.f32.mxu1 %vm1040_vm2, %v14712_v24  ;;  %v27664_v24 = vld [vmem:[#allocation3 + $0x34] sm:$0xff] }
 0xa97   : > { %22275 = vmatmul.mubr.msk.f32.gmra.mrb[60].mxu1 %vm1040_vm2, %v14713_v57  ;;  %v27673_v57 = vld [vmem:[#allocation3 + $0x44] sm:$0xff] }
 0xa98   : > { %22277 = vmatprep.mubr.msk.f32.mxu1 %vm1040_vm2, %v14714_v61  ;;  %v27677_v61 = vld [vmem:[#allocation3 + $0x4c] sm:$0xff] }
 0xa9b   : > { %22278 = vmatmul.mubr.msk.f32.gmra.mrb[62].mxu1 %vm1040_vm2, %v14715_v28  ;;  %v27681_v28 = vld [vmem:[#allocation3 + $0x54] sm:$0xff] }
 0xa9c   : > { %22280 = vmatprep.mubr.msk.f32.mxu1 %vm1040_vm2, %v14716_v42  ;;  %v27685_v42 = vld [vmem:[#allocation3 + $0x5c] sm:$0xff] }
 0xa9f   : > { %22281 = vmatmul.mubr.msk.f32.gmra.mrb[64].mxu1 %vm1040_vm2, %v14717_v55  ;;  %v27689_v55 = vld [vmem:[#allocation3 + $0x64] sm:$0xff] }
 0xaa0   : > { %22283 = vmatprep.mubr.msk.f32.mxu1 %vm1040_vm2, %v14718_v62  ;;  %v27693_v62 = vld [vmem:[#allocation3 + $0x6c] sm:$0xff] }
 0xaa3   : > { %22284 = vmatmul.mubr.msk.f32.gmra.mrb[66].mxu1 %vm1040_vm2, %v14719_v19  ;;  %v27697_v19 = vld [vmem:[#allocation3 + $0x74] sm:$0xff] }
 0xaa4   : > { %22286 = vmatprep.mubr.msk.f32.mxu1 %vm1040_vm2, %v14720_v26  ;;  %v27701_v26 = vld [vmem:[#allocation3 + $0x7c] sm:$0xff] }
 0xaa7   : > { %22287 = vmatmul.mubr.msk.f32.gmra.mrb[68].mxu1 %vm1040_vm2, %v14721_v37  ;;  %v27705_v37 = vld [vmem:[#allocation3 + $0x84] sm:$0xff] }
 0xaa8   : > { %22289 = vmatprep.mubr.msk.f32.mxu1 %vm1040_vm2, %v14722_v63  ;;  %v27709_v63 = vld [vmem:[#allocation3 + $0x8c] sm:$0xff] }
 0xaab   : > { %22290 = vmatmul.mubr.msk.f32.gmra.mrb[70].mxu1 %vm1040_vm2, %v14723_v0  ;;  %v27713_v0 = vld [vmem:[#allocation3 + $0x94] sm:$0xff] }
 0xaac   : > { %22292 = vmatprep.mubr.msk.f32.mxu1 %vm1040_vm2, %v14724_v13  ;;  %v27717_v13 = vld [vmem:[#allocation3 + $0x9c] sm:$0xff] }
 0xaaf   : > { %22293 = vmatmul.mubr.msk.f32.gmra.mrb[72].mxu1 %vm1040_vm2, %v14725_v27  ;;  %v15154_v27 = vld [vmem:[#allocation3 + $0xa4] sm:$0xff] }
 0xab0   : > { %22295 = vmatprep.mubr.msk.f32.mxu1 %vm1040_vm2, %v14726_v12  ;;  %v15155_v12 = vld [vmem:[#allocation3 + $0xac] sm:$0xff] }
 0xab3   : > { %22296 = vmatmul.mubr.msk.f32.gmra.mrb[74].mxu1 %vm1040_vm2, %v14727_v17  ;;  %v15156_v17 = vld [vmem:[#allocation3 + $0xb4] sm:$0xff] }
 0xab4   : > { %22298 = vmatprep.mubr.msk.f32.mxu1 %vm1040_vm2, %v14728_v39  ;;  %v15157_v39 = vld [vmem:[#allocation3 + $0xbc] sm:$0xff] }
 0xab7   : > { %22299 = vmatmul.mubr.msk.f32.gmra.mrb[76].mxu1 %vm1040_vm2, %v14729_v52  ;;  %v15158_v52 = vld [vmem:[#allocation3 + $0xc4] sm:$0xff] }
 0xab8   : > { %22301 = vmatprep.mubr.msk.f32.mxu1 %vm1040_vm2, %v14730_v45  ;;  %v15159_v45 = vld [vmem:[#allocation3 + $0xcc] sm:$0xff] }
 0xabb   : > { %22302 = vmatmul.mubr.msk.f32.gmra.mrb[78].mxu1 %vm1040_vm2, %v14731_v25  ;;  %v15160_v25 = vld [vmem:[#allocation3 + $0xd4] sm:$0xff] }
 0xabc   : > { %22304 = vmatprep.mubr.msk.f32.mxu1 %vm1040_vm2, %v14732_v31  ;;  %v15161_v31 = vld [vmem:[#allocation3 + $0xdc] sm:$0xff] }
 0xabf   : > { %22305 = vmatmul.mubr.msk.f32.gmra.mrb[80].mxu1 %vm1040_vm2, %v14733_v2  ;;  %v15162_v2 = vld [vmem:[#allocation3 + $0xe4] sm:$0xff] }
 0xac0   : > { %22307 = vmatprep.mubr.msk.f32.mxu1 %vm1040_vm2, %v14734_v3  ;;  %v15163_v3 = vld [vmem:[#allocation3 + $0xec] sm:$0xff] }
 0xac3   : > { %22308 = vmatmul.mubr.msk.f32.gmra.mrb[82].mxu1 %vm1040_vm2, %v14735_v32  ;;  %v15164_v32 = vld [vmem:[#allocation3 + $0xf4] sm:$0xff] }
 0xac4   : > { %22310 = vmatprep.mubr.msk.f32.mxu1 %vm1040_vm2, %v14736_v18  ;;  %v15165_v18 = vld [vmem:[#allocation3 + $0xfc] sm:$0xff] }
 0xac7   : > { %22311 = vmatmul.mubr.msk.f32.gmra.mrb[84].mxu1 %vm1040_vm2, %v14737_v7  ;;  %v15166_v7 = vld [vmem:[#allocation3 + $0x104] sm:$0xff] }
 0xac8   : > { %22313 = vmatprep.mubr.msk.f32.mxu1 %vm1040_vm2, %v14738_v50  ;;  %v15167_v50 = vld [vmem:[#allocation3 + $0x10c] sm:$0xff] }
 0xacb   : > { %22314 = vmatmul.mubr.msk.f32.gmra.mrb[86].mxu1 %vm1040_vm2, %v14739_v56  ;;  %v15168_v56 = vld [vmem:[#allocation3 + $0x114] sm:$0xff] }
 0xacc   : > { %22316 = vmatprep.mubr.msk.f32.mxu1 %vm1040_vm2, %v14740_v47  ;;  %v15169_v47 = vld [vmem:[#allocation3 + $0x11c] sm:$0xff] }
 0xacf   : > { %22317 = vmatmul.mubr.msk.f32.gmra.mrb[88].mxu1 %vm1040_vm2, %v14741_v23  ;;  %v15170_v23 = vld [vmem:[#allocation3 + $0x124] sm:$0xff] }
 0xad0   : > { %22327 = vmatprep.mubr.msk.f32.mxu1 %vm1040_vm2, %v15136_v5  ;;  %v18866_v5 = vld [vmem:[%s28197_s3 + $0x218] sm:$0xff] }
 0xad3   : > { %22328 = vmatmul.mubr.msk.f32.vlgmr.msra.gmra.mrb[54].mxu1 %vm1040_vm2, %v15137_v11  ;;  %v18903_v11 = vld [vmem:[%s28197_s3 + $0x220] sm:$0xff] }
 0xad4   : > { %22746 = vmatpush3.bf16.msra.mxu1 %v27603_v30  ;;  %22330 = vmatprep.mubr.msk.f32.mxu1 %vm1040_vm2, %v27653_v33  ;;  %v27669_v30 = vld [vmem:[#allocation3 + $0x3c] sm:$0xff]  ;;  %v22759_v46 = vpack.c.bf16 %v18904_v51, %v18903_v11  ;;  %v16028_v11 = vld [vmem:[#allocation3 + $0x125] sm:$0xff] }
 0xad5   : > { %22748 = vmatprep.subr.bf16.mxu1 %v22747_v15  ;;  %v16030_v51 = vld [vmem:[#allocation3 + $0x135] sm:$0xff] }
 0xad7   : > { %22331 = vmatmul.mubr.msk.f32.gmra.mrb[56].mxu1 %vm1040_vm2, %v27660_v44 }
 0xad8   : > { %22333 = vmatprep.mubr.msk.f32.mxu1 %vm1040_vm2, %v27664_v24  ;;  %22750 = vmatpush3.bf16.msra.mxu1 %v22747_v15  ;;  %v22755_v15 = vpack.c.bf16 %v18866_v5, %v18865_v40  ;;  %v16025_v40 = vld [vmem:[#allocation3 + $0x10d] sm:$0xff]  ;;  %v16026_v5 = vld [vmem:[#allocation3 + $0x115] sm:$0xff] }
 0xad9   : > { %22752 = vmatprep.subr.bf16.mxu1 %v27658_v1 }
 0xadb   : > { %22334 = vmatmul.mubr.msk.f32.gmra.mrb[58].mxu1 %vm1040_vm2, %v27669_v30 }
 0xadc   : > { %22336 = vmatprep.mubr.msk.f32.mxu1 %vm1040_vm2, %v27673_v57 }
 0xadf   : > { %22337 = vmatmul.mubr.msk.f32.gmra.mrb[60].mxu1 %vm1040_vm2, %v27677_v61 }
 0xae0   : > { %22339 = vmatprep.mubr.msk.f32.mxu1 %vm1040_vm2, %v27681_v28 }
 0xae3   : > { %22340 = vmatmul.mubr.msk.f32.gmra.mrb[62].mxu1 %vm1040_vm2, %v27685_v42 }
 0xae4   : > { %22342 = vmatprep.mubr.msk.f32.mxu1 %vm1040_vm2, %v27689_v55 }
 0xae7   : > { %22343 = vmatmul.mubr.msk.f32.gmra.mrb[64].mxu1 %vm1040_vm2, %v27693_v62 }
 0xae8   : > { %22345 = vmatprep.mubr.msk.f32.mxu1 %vm1040_vm2, %v27697_v19 }
 0xaeb   : > { %22346 = vmatmul.mubr.msk.f32.gmra.mrb[66].mxu1 %vm1040_vm2, %v27701_v26 }
 0xaec   : > { %22348 = vmatprep.mubr.msk.f32.mxu1 %vm1040_vm2, %v27705_v37 }
 0xaef   : > { %22349 = vmatmul.mubr.msk.f32.gmra.mrb[68].mxu1 %vm1040_vm2, %v27709_v63 }
 0xaf0   : > { %22351 = vmatprep.mubr.msk.f32.mxu1 %vm1040_vm2, %v27713_v0 }
 0xaf3   : > { %22352 = vmatmul.mubr.msk.f32.gmra.mrb[70].mxu1 %vm1040_vm2, %v27717_v13 }
 0xaf4   : > { %22354 = vmatprep.mubr.msk.f32.mxu1 %vm1040_vm2, %v15154_v27 }
 0xaf7   : > { %22355 = vmatmul.mubr.msk.f32.gmra.mrb[72].mxu1 %vm1040_vm2, %v15155_v12 }
 0xaf8   : > { %22357 = vmatprep.mubr.msk.f32.mxu1 %vm1040_vm2, %v15156_v17 }
 0xafb   : > { %22358 = vmatmul.mubr.msk.f32.gmra.mrb[74].mxu1 %vm1040_vm2, %v15157_v39 }
 0xafc   : > { %22360 = vmatprep.mubr.msk.f32.mxu1 %vm1040_vm2, %v15158_v52 }
 0xaff   : > { %22361 = vmatmul.mubr.msk.f32.gmra.mrb[76].mxu1 %vm1040_vm2, %v15159_v45 }
 0xb00   : > { %22363 = vmatprep.mubr.msk.f32.mxu1 %vm1040_vm2, %v15160_v25 }
 0xb03   : > { %22364 = vmatmul.mubr.msk.f32.gmra.mrb[78].mxu1 %vm1040_vm2, %v15161_v31 }
 0xb04   : > { %22366 = vmatprep.mubr.msk.f32.mxu1 %vm1040_vm2, %v15162_v2 }
 0xb07   : > { %22367 = vmatmul.mubr.msk.f32.gmra.mrb[80].mxu1 %vm1040_vm2, %v15163_v3 }
 0xb08   : > { %22369 = vmatprep.mubr.msk.f32.mxu1 %vm1040_vm2, %v15164_v32 }
 0xb0b   : > { %22370 = vmatmul.mubr.msk.f32.gmra.mrb[82].mxu1 %vm1040_vm2, %v15165_v18 }
 0xb0c   : > { %22372 = vmatprep.mubr.msk.f32.mxu1 %vm1040_vm2, %v15166_v7 }
 0xb0f   : > { %22373 = vmatmul.mubr.msk.f32.gmra.mrb[84].mxu1 %vm1040_vm2, %v15167_v50 }
 0xb10   : > { %22375 = vmatprep.mubr.msk.f32.mxu1 %vm1040_vm2, %v15168_v56 }
 0xb13   : > { %22376 = vmatmul.mubr.msk.f32.gmra.mrb[86].mxu1 %vm1040_vm2, %v15169_v47 }
 0xb14   : > { %22378 = vmatprep.mubr.msk.f32.mxu1 %vm1040_vm2, %v15170_v23 }
 0xb17   : > { %22379 = vmatmul.mubr.msk.f32.gmra.mrb[88].mxu1 %vm1040_vm2, %v15171_v58 }
 0xb18   : > { %22389 = vmatprep.mubr.msk.f32.mxu1 %vm1040_vm2, %v27653_v33  ;;  %v15600_v33 = vld [vmem:[#allocation3 + $0x134] sm:$0xff] }
 0xb1b   : > { %22390 = vmatmul.mubr.msk.f32.vlgmr.msra.gmra.mrb[54].mxu1 %vm1040_vm2, %v27660_v44  ;;  %v18905_v44 = vld [vmem:[%s28197_s3 + $0x230] sm:$0xff] }
 0xb1c   : > { %22754 = vmatpush3.bf16.msra.mxu1 %v27658_v1  ;;  %22392 = vmatprep.mubr.msk.f32.mxu1 %vm1040_vm2, %v27664_v24  ;;  %v15601_v1 = vld [vmem:[#allocation3 + $0x13c] sm:$0xff] }
 0xb1d   : > { %22756 = vmatprep.subr.bf16.mxu1 %v22755_v15  ;;  %v18906_v24 = vld [vmem:[%s28197_s3 + $0x238] sm:$0xff] }
 0xb1f   : > { %22393 = vmatmul.mubr.msk.f32.gmra.mrb[56].mxu1 %vm1040_vm2, %v27669_v30  ;;  %v15996_v30 = vld [vmem:[#allocation3 + $0x25] sm:$0xff] }
 0xb20   : > { %22395 = vmatprep.mubr.msk.f32.mxu1 %vm1040_vm2, %v27673_v57  ;;  %22758 = vmatpush3.bf16.msra.mxu1 %v22755_v15  ;;  %v22763_v57 = vpack.c.bf16 %v18906_v24, %v18905_v44  ;;  %v16027_v15 = vld [vmem:[#allocation3 + $0x11d] sm:$0xff]  ;;  %v16427_v44 = vld [vmem:[#allocation3 + $0x2e] sm:$0xff] }
 0xb21   : > { %22760 = vmatprep.subr.bf16.mxu1 %v22759_v46  ;;  %v16428_v24 = vld [vmem:[#allocation3 + $0x36] sm:$0xff] }
 0xb23   : > { %22396 = vmatmul.mubr.msk.f32.gmra.mrb[58].mxu1 %vm1040_vm2, %v27677_v61  ;;  %v15997_v61 = vld [vmem:[#allocation3 + $0x2d] sm:$0xff] }
 0xb24   : > { %22398 = vmatprep.mubr.msk.f32.mxu1 %vm1040_vm2, %v27681_v28  ;;  %v15998_v28 = vld [vmem:[#allocation3 + $0x35] sm:$0xff] }
 0xb27   : > { %22399 = vmatmul.mubr.msk.f32.gmra.mrb[60].mxu1 %vm1040_vm2, %v27685_v42  ;;  %v15999_v42 = vld [vmem:[#allocation3 + $0x3d] sm:$0xff] }
 0xb28   : > { %22401 = vmatprep.mubr.msk.f32.mxu1 %vm1040_vm2, %v27689_v55  ;;  %v16000_v55 = vld [vmem:[#allocation3 + $0x45] sm:$0xff] }
 0xb2b   : > { %22402 = vmatmul.mubr.msk.f32.gmra.mrb[62].mxu1 %vm1040_vm2, %v27693_v62  ;;  %v16001_v62 = vld [vmem:[#allocation3 + $0x4d] sm:$0xff] }
 0xb2c   : > { %22404 = vmatprep.mubr.msk.f32.mxu1 %vm1040_vm2, %v27697_v19  ;;  %v16002_v19 = vld [vmem:[#allocation3 + $0x55] sm:$0xff] }
 0xb2f   : > { %22405 = vmatmul.mubr.msk.f32.gmra.mrb[64].mxu1 %vm1040_vm2, %v27701_v26  ;;  %v16003_v26 = vld [vmem:[#allocation3 + $0x5d] sm:$0xff] }
 0xb30   : > { %22407 = vmatprep.mubr.msk.f32.mxu1 %vm1040_vm2, %v27705_v37  ;;  %v16004_v37 = vld [vmem:[#allocation3 + $0x65] sm:$0xff] }
 0xb33   : > { %22408 = vmatmul.mubr.msk.f32.gmra.mrb[66].mxu1 %vm1040_vm2, %v27709_v63  ;;  %v17007_v63 = vld [vmem:[%s28199_s5] sm:$0xf] }
 0xb34   : > { %22410 = vmatprep.mubr.msk.f32.mxu1 %vm1040_vm2, %v27713_v0  ;;  %22567 = vmatprep.subr.msk.mxu0 %vm28811_vm10, %v17007_v63  ;;  %v16005_v0 = vld [vmem:[#allocation3 + $0x6d] sm:$0xff]  ;;  %vm28826_vm10 = vmmov %vm28644_vm0 }
 0xb35   : > { %22568 = vmatpush3.msk.msra.mxu0 %vm28812_vm11, %v17007_v63  ;;  %v16439_v63 = vld [vmem:[#allocation3 + $0x8e] sm:$0xff]  ;;  %vm28827_vm11 = vmmov %vm28644_vm0 }
 0xb37   : > { %22411 = vmatmul.mubr.msk.f32.gmra.mrb[68].mxu1 %vm1040_vm2, %v27717_v13  ;;  %v16006_v13 = vld [vmem:[#allocation3 + $0x75] sm:$0xff] }
 0xb38   : > { %22413 = vmatprep.mubr.msk.f32.mxu1 %vm1040_vm2, %v15154_v27  ;;  %v16007_v27 = vld [vmem:[#allocation3 + $0x7d] sm:$0xff] }
 0xb3b   : > { %22414 = vmatmul.mubr.msk.f32.gmra.mrb[70].mxu1 %vm1040_vm2, %v15155_v12  ;;  %v16008_v12 = vld [vmem:[#allocation3 + $0x85] sm:$0xff] }
 0xb3c   : > { %22416 = vmatprep.mubr.msk.f32.mxu1 %vm1040_vm2, %v15156_v17  ;;  %v16009_v17 = vld [vmem:[#allocation3 + $0x8d] sm:$0xff] }
 0xb3f   : > { %22417 = vmatmul.mubr.msk.f32.gmra.mrb[72].mxu1 %vm1040_vm2, %v15157_v39  ;;  %v16010_v39 = vld [vmem:[#allocation3 + $0x95] sm:$0xff] }
 0xb40   : > { %22419 = vmatprep.mubr.msk.f32.mxu1 %vm1040_vm2, %v15158_v52  ;;  %v16011_v52 = vld [vmem:[#allocation3 + $0x9d] sm:$0xff] }
 0xb43   : > { %22420 = vmatmul.mubr.msk.f32.gmra.mrb[74].mxu1 %vm1040_vm2, %v15159_v45  ;;  %v16012_v45 = vld [vmem:[#allocation3 + $0xa5] sm:$0xff] }
 0xb44   : > { %22422 = vmatprep.mubr.msk.f32.mxu1 %vm1040_vm2, %v15160_v25  ;;  %v16013_v25 = vld [vmem:[#allocation3 + $0xad] sm:$0xff] }
 0xb47   : > { %22423 = vmatmul.mubr.msk.f32.gmra.mrb[76].mxu1 %vm1040_vm2, %v15161_v31  ;;  %v16014_v31 = vld [vmem:[#allocation3 + $0xb5] sm:$0xff] }
 0xb48   : > { %22425 = vmatprep.mubr.msk.f32.mxu1 %vm1040_vm2, %v15162_v2  ;;  %v16015_v2 = vld [vmem:[#allocation3 + $0xbd] sm:$0xff] }
 0xb4b   : > { %22426 = vmatmul.mubr.msk.f32.gmra.mrb[78].mxu1 %vm1040_vm2, %v15163_v3  ;;  %v16016_v3 = vld [vmem:[#allocation3 + $0xc5] sm:$0xff] }
 0xb4c   : > { %22428 = vmatprep.mubr.msk.f32.mxu1 %vm1040_vm2, %v15164_v32  ;;  %v16017_v32 = vld [vmem:[#allocation3 + $0xcd] sm:$0xff] }
 0xb4f   : > { %22429 = vmatmul.mubr.msk.f32.gmra.mrb[80].mxu1 %vm1040_vm2, %v15165_v18  ;;  %v16018_v18 = vld [vmem:[#allocation3 + $0xd5] sm:$0xff] }
 0xb50   : > { %22431 = vmatprep.mubr.msk.f32.mxu1 %vm1040_vm2, %v15166_v7  ;;  %v16019_v7 = vld [vmem:[#allocation3 + $0xdd] sm:$0xff] }
 0xb53   : > { %22432 = vmatmul.mubr.msk.f32.gmra.mrb[82].mxu1 %vm1040_vm2, %v15167_v50  ;;  %v16020_v50 = vld [vmem:[#allocation3 + $0xe5] sm:$0xff] }
 0xb54   : > { %22434 = vmatprep.mubr.msk.f32.mxu1 %vm1040_vm2, %v15168_v56  ;;  %v16021_v56 = vld [vmem:[#allocation3 + $0xed] sm:$0xff] }
 0xb57   : > { %22435 = vmatmul.mubr.msk.f32.gmra.mrb[84].mxu1 %vm1040_vm2, %v15169_v47  ;;  %v16022_v47 = vld [vmem:[#allocation3 + $0xf5] sm:$0xff] }
 0xb58   : > { %22437 = vmatprep.mubr.msk.f32.mxu1 %vm1040_vm2, %v15170_v23  ;;  %v16023_v23 = vld [vmem:[#allocation3 + $0xfd] sm:$0xff] }
 0xb5b   : > { %22438 = vmatmul.mubr.msk.f32.gmra.mrb[86].mxu1 %vm1040_vm2, %v15171_v58  ;;  %v16024_v58 = vld [vmem:[#allocation3 + $0x105] sm:$0xff] }
 0xb5c   : > { %22440 = vmatprep.mubr.msk.f32.mxu1 %vm1040_vm2, %v15600_v33  ;;  %v16031_v33 = vld [vmem:[#allocation3 + $0x13d] sm:$0xff] }
 0xb5f   : > { %22441 = vmatmul.mubr.msk.f32.gmra.mrb[88].mxu1 %vm1040_vm2, %v15601_v1  ;;  %v16426_v1 = vld [vmem:[#allocation3 + $0x26] sm:$0xff] }
 0xb60   : > { %22451 = vmatprep.mubr.msk.f32.mxu1 %vm1040_vm2, %v15996_v30  ;;  %v16429_v30 = vld [vmem:[#allocation3 + $0x3e] sm:$0xff] }
 0xb63   : > { %22452 = vmatmul.mubr.msk.f32.vlgmr.msra.gmra.mrb[54].mxu1 %vm1040_vm2, %v15997_v61  ;;  %v16431_v61 = vld [vmem:[#allocation3 + $0x4e] sm:$0xff] }
 0xb64   : > { %22762 = vmatpush3.bf16.msra.mxu1 %v22759_v46  ;;  %22454 = vmatprep.mubr.msk.f32.mxu1 %vm1040_vm2, %v15998_v28  ;;  %v16029_v46 = vld [vmem:[#allocation3 + $0x12d] sm:$0xff]  ;;  %v16432_v28 = vld [vmem:[#allocation3 + $0x56] sm:$0xff] }
 0xb65   : > { %22764 = vmatprep.subr.bf16.mxu1 %v22763_v57 }
 0xb67   : > { %22455 = vmatmul.mubr.msk.f32.gmra.mrb[56].mxu1 %vm1040_vm2, %v15999_v42  ;;  %v16433_v42 = vld [vmem:[#allocation3 + $0x5e] sm:$0xff] }
 0xb68   : > { %22457 = vmatprep.mubr.msk.f32.mxu1 %vm1040_vm2, %v16000_v55  ;;  %22766 = vmatpush3.bf16.msra.mxu1 %v22763_v57  ;;  %v16430_v57 = vld [vmem:[#allocation3 + $0x46] sm:$0xff] }
 0xb69   : > { %v16434_v55 = vld [vmem:[#allocation3 + $0x66] sm:$0xff] }
 0xb6b   : > { %22458 = vmatmul.mubr.msk.f32.gmra.mrb[58].mxu1 %vm1040_vm2, %v16001_v62  ;;  %v16435_v62 = vld [vmem:[#allocation3 + $0x6e] sm:$0xff] }
 0xb6c   : > { %22460 = vmatprep.mubr.msk.f32.mxu1 %vm1040_vm2, %v16002_v19  ;;  %v16436_v19 = vld [vmem:[#allocation3 + $0x76] sm:$0xff] }
 0xb6f   : > { %22461 = vmatmul.mubr.msk.f32.gmra.mrb[60].mxu1 %vm1040_vm2, %v16003_v26  ;;  %v16437_v26 = vld [vmem:[#allocation3 + $0x7e] sm:$0xff] }
 0xb70   : > { %22463 = vmatprep.mubr.msk.f32.mxu1 %vm1040_vm2, %v16004_v37  ;;  %v16438_v37 = vld [vmem:[#allocation3 + $0x86] sm:$0xff] }
 0xb73   : > { %22464 = vmatmul.mubr.msk.f32.gmra.mrb[62].mxu1 %vm1040_vm2, %v16005_v0  ;;  %v16440_v0 = vld [vmem:[#allocation3 + $0x96] sm:$0xff] }
 0xb74   : > { %22466 = vmatprep.mubr.msk.f32.mxu1 %vm1040_vm2, %v16006_v13  ;;  %v16441_v13 = vld [vmem:[#allocation3 + $0x9e] sm:$0xff] }
 0xb77   : > { %22467 = vmatmul.mubr.msk.f32.gmra.mrb[64].mxu1 %vm1040_vm2, %v16007_v27  ;;  %v16442_v27 = vld [vmem:[#allocation3 + $0xa6] sm:$0xff] }
 0xb78   : > { %22469 = vmatprep.mubr.msk.f32.mxu1 %vm1040_vm2, %v16008_v12  ;;  %v16443_v12 = vld [vmem:[#allocation3 + $0xae] sm:$0xff] }
 0xb7b   : > { %22470 = vmatmul.mubr.msk.f32.gmra.mrb[66].mxu1 %vm1040_vm2, %v16009_v17  ;;  %v16444_v17 = vld [vmem:[#allocation3 + $0xb6] sm:$0xff] }
 0xb7c   : > { %22472 = vmatprep.mubr.msk.f32.mxu1 %vm1040_vm2, %v16010_v39  ;;  %v16445_v39 = vld [vmem:[#allocation3 + $0xbe] sm:$0xff] }
 0xb7f   : > { %22473 = vmatmul.mubr.msk.f32.gmra.mrb[68].mxu1 %vm1040_vm2, %v16011_v52  ;;  %v16446_v52 = vld [vmem:[#allocation3 + $0xc6] sm:$0xff] }
 0xb80   : > { %22475 = vmatprep.mubr.msk.f32.mxu1 %vm1040_vm2, %v16012_v45  ;;  %v16447_v45 = vld [vmem:[#allocation3 + $0xce] sm:$0xff] }
 0xb83   : > { %22476 = vmatmul.mubr.msk.f32.gmra.mrb[70].mxu1 %vm1040_vm2, %v16013_v25  ;;  %v16448_v25 = vld [vmem:[#allocation3 + $0xd6] sm:$0xff] }
 0xb84   : > { %22478 = vmatprep.mubr.msk.f32.mxu1 %vm1040_vm2, %v16014_v31  ;;  %v16449_v31 = vld [vmem:[#allocation3 + $0xde] sm:$0xff] }
 0xb87   : > { %22479 = vmatmul.mubr.msk.f32.gmra.mrb[72].mxu1 %vm1040_vm2, %v16015_v2  ;;  %v16450_v2 = vld [vmem:[#allocation3 + $0xe6] sm:$0xff] }
 0xb88   : > { %22481 = vmatprep.mubr.msk.f32.mxu1 %vm1040_vm2, %v16016_v3  ;;  %v16451_v3 = vld [vmem:[#allocation3 + $0xee] sm:$0xff] }
 0xb8b   : > { %22482 = vmatmul.mubr.msk.f32.gmra.mrb[74].mxu1 %vm1040_vm2, %v16017_v32  ;;  %v16452_v32 = vld [vmem:[#allocation3 + $0xf6] sm:$0xff] }
 0xb8c   : > { %22484 = vmatprep.mubr.msk.f32.mxu1 %vm1040_vm2, %v16018_v18  ;;  %v16453_v18 = vld [vmem:[#allocation3 + $0xfe] sm:$0xff] }
 0xb8f   : > { %22485 = vmatmul.mubr.msk.f32.gmra.mrb[76].mxu1 %vm1040_vm2, %v16019_v7  ;;  %v16454_v7 = vld [vmem:[#allocation3 + $0x106] sm:$0xff] }
 0xb90   : > { %22487 = vmatprep.mubr.msk.f32.mxu1 %vm1040_vm2, %v16020_v50  ;;  %v16455_v50 = vld [vmem:[#allocation3 + $0x10e] sm:$0xff] }
 0xb93   : > { %22488 = vmatmul.mubr.msk.f32.gmra.mrb[78].mxu1 %vm1040_vm2, %v16021_v56  ;;  %v16456_v56 = vld [vmem:[#allocation3 + $0x116] sm:$0xff] }
 0xb94   : > { %22490 = vmatprep.mubr.msk.f32.mxu1 %vm1040_vm2, %v16022_v47  ;;  %v16457_v47 = vld [vmem:[#allocation3 + $0x11e] sm:$0xff] }
 0xb97   : > { %22491 = vmatmul.mubr.msk.f32.gmra.mrb[80].mxu1 %vm1040_vm2, %v16023_v23  ;;  %v16458_v23 = vld [vmem:[#allocation3 + $0x126] sm:$0xff] }
 0xb98   : > { %22493 = vmatprep.mubr.msk.f32.mxu1 %vm1040_vm2, %v16024_v58  ;;  %v16460_v58 = vld [vmem:[#allocation3 + $0x136] sm:$0xff] }
 0xb9b   : > { %22494 = vmatmul.mubr.msk.f32.gmra.mrb[82].mxu1 %vm1040_vm2, %v16025_v40  ;;  %v16459_v40 = vld [vmem:[#allocation3 + $0x12e] sm:$0xff] }
 0xb9c   : > { %22496 = vmatprep.mubr.msk.f32.mxu1 %vm1040_vm2, %v16026_v5  ;;  %v16461_v5 = vld [vmem:[#allocation3 + $0x13e] sm:$0xff] }
 0xb9f   : > { %22497 = vmatmul.mubr.msk.f32.gmra.mrb[84].mxu1 %vm1040_vm2, %v16027_v15  ;;  %v27890_v15 = vld [vmem:[%s28198_s4 + $0x1] ss:$0 sm:$0xff] }
 0xba0   : > { %22499 = vmatprep.mubr.msk.f32.mxu1 %vm1040_vm2, %v16028_v11 }
 0xba3   : > { %22500 = vmatmul.mubr.msk.f32.gmra.mrb[86].mxu1 %vm1040_vm2, %v16029_v46 }
 0xba4   : > { %22502 = vmatprep.mubr.msk.f32.mxu1 %vm1040_vm2, %v16030_v51 }
 0xba7   : > { %22503 = vmatmul.mubr.msk.f32.gmra.mrb[88].mxu1 %vm1040_vm2, %v16031_v33 }
 0xba8   : > { %22513 = vmatprep.mubr.msk.f32.mxu1 %vm1040_vm2, %v16426_v1 }
 0xbab   : > { %22514 = vmatmul.mubr.msk.f32.vlgmr.msra.gmra.mrb[54].mxu1 %vm1040_vm2, %v16427_v44 }
 0xbac   : > { %22516 = vmatprep.mubr.msk.f32.mxu1 %vm1040_vm2, %v16428_v24 }
 0xbaf   : > { %22517 = vmatmul.mubr.msk.f32.gmra.mrb[56].mxu1 %vm1040_vm2, %v16429_v30 }
 0xbb0   : > { %22519 = vmatprep.mubr.msk.f32.mxu1 %vm1040_vm2, %v16430_v57 }
 0xbb3   : > { %22520 = vmatmul.mubr.msk.f32.gmra.mrb[58].mxu1 %vm1040_vm2, %v16431_v61 }
 0xbb4   : > { %22522 = vmatprep.mubr.msk.f32.mxu1 %vm1040_vm2, %v16432_v28 }
 0xbb7   : > { %22523 = vmatmul.mubr.msk.f32.gmra.mrb[60].mxu1 %vm1040_vm2, %v16433_v42 }
 0xbb8   : > { %22525 = vmatprep.mubr.msk.f32.mxu1 %vm1040_vm2, %v16434_v55 }
 0xbbb   : > { %22526 = vmatmul.mubr.msk.f32.gmra.mrb[62].mxu1 %vm1040_vm2, %v16435_v62 }
 0xbbc   : > { %22528 = vmatprep.mubr.msk.f32.mxu1 %vm1040_vm2, %v16436_v19 }
 0xbbf   : > { %22529 = vmatmul.mubr.msk.f32.gmra.mrb[64].mxu1 %vm1040_vm2, %v16437_v26 }
 0xbc0   : > { %22531 = vmatprep.mubr.msk.f32.mxu1 %vm1040_vm2, %v16438_v37 }
 0xbc3   : > { %22532 = vmatmul.mubr.msk.f32.gmra.mrb[66].mxu1 %vm1040_vm2, %v16439_v63 }
 0xbc4   : > { %22534 = vmatprep.mubr.msk.f32.mxu1 %vm1040_vm2, %v16440_v0 }
 0xbc7   : > { %22535 = vmatmul.mubr.msk.f32.gmra.mrb[68].mxu1 %vm1040_vm2, %v16441_v13 }
 0xbc8   : > { %22537 = vmatprep.mubr.msk.f32.mxu1 %vm1040_vm2, %v16442_v27 }
 0xbcb   : > { %22538 = vmatmul.mubr.msk.f32.gmra.mrb[70].mxu1 %vm1040_vm2, %v16443_v12 }
 0xbcc   : > { %22540 = vmatprep.mubr.msk.f32.mxu1 %vm1040_vm2, %v16444_v17 }
 0xbcf   : > { %22541 = vmatmul.mubr.msk.f32.gmra.mrb[72].mxu1 %vm1040_vm2, %v16445_v39 }
 0xbd0   : > { %22543 = vmatprep.mubr.msk.f32.mxu1 %vm1040_vm2, %v16446_v52 }
 0xbd3   : > { %22544 = vmatmul.mubr.msk.f32.gmra.mrb[74].mxu1 %vm1040_vm2, %v16447_v45 }
 0xbd4   : > { %22546 = vmatprep.mubr.msk.f32.mxu1 %vm1040_vm2, %v16448_v25 }
 0xbd7   : > { %22547 = vmatmul.mubr.msk.f32.gmra.mrb[76].mxu1 %vm1040_vm2, %v16449_v31 }
 0xbd8   : > { %22549 = vmatprep.mubr.msk.f32.mxu1 %vm1040_vm2, %v16450_v2 }
 0xbdb   : > { %22550 = vmatmul.mubr.msk.f32.gmra.mrb[78].mxu1 %vm1040_vm2, %v16451_v3 }
 0xbdc   : > { %22552 = vmatprep.mubr.msk.f32.mxu1 %vm1040_vm2, %v16452_v32 }
 0xbdf   : > { %22553 = vmatmul.mubr.msk.f32.gmra.mrb[80].mxu1 %vm1040_vm2, %v16453_v18 }
 0xbe0   : > { %22555 = vmatprep.mubr.msk.f32.mxu1 %vm1040_vm2, %v16454_v7 }
 0xbe3   : > { %22556 = vmatmul.mubr.msk.f32.gmra.mrb[82].mxu1 %vm1040_vm2, %v16455_v50 }
 0xbe4   : > { %22558 = vmatprep.mubr.msk.f32.mxu1 %vm1040_vm2, %v16456_v56 }
 0xbe7   : > { %22559 = vmatmul.mubr.msk.f32.gmra.mrb[84].mxu1 %vm1040_vm2, %v16457_v47 }
 0xbe8   : > { %22561 = vmatprep.mubr.msk.f32.mxu1 %vm1040_vm2, %v16458_v23 }
 0xbeb   : > { %22562 = vmatmul.mubr.msk.f32.gmra.mrb[86].mxu1 %vm1040_vm2, %v16459_v40 }
 0xbec   : > { %22564 = vmatprep.mubr.msk.f32.mxu1 %vm1040_vm2, %v16460_v58 }
 0xbef   : > { %22565 = vmatmul.mubr.msk.f32.gmra.mrb[88].mxu1 %vm1040_vm2, %v16461_v5  ;;  %vm28813_vm2 = vmmov %vm28644_vm0 }
 0xc7e   : > { %v22515_v11 = vpop.f32.mrb[54].mxu1 }
 0xc7f   : > { %v16863_v51 = vadd.f32 %v22515_v11, %v27890_v15  ;;  %v16641_v46 = vpop.f32.mrb[55].mxu1 }
 0xc80   : > { %v16862_v33 = vadd.f32 %v27890_v15, %v16641_v46 }
 0xc81   : > { %v16899_v1 = vmax.f32 %v16863_v51, 0.0 }
 0xc82   : > { %v16898_v44 = vmax.f32 %v16862_v33, 0.0  ;;  %v22518_v24 = vpop.f32.mrb[56].mxu1 }
 0xc83   : > { %v16935_v30 = vmul.f32 %v24883_v48, %v16899_v1  ;;  %v16865_v57 = vadd.f32 %v22518_v24, %v27890_v15  ;;  %v16651_v61 = vpop.f32.mrb[57].mxu1 }
 0xc84   : > { %v16934_v28 = vmul.f32 %v24940_v21, %v16898_v44  ;;  %v16864_v42 = vadd.f32 %v27890_v15, %v16651_v61 }
 0xc85   : > { %18945 = vst.msk [vmem:[%s26567_s14 + $0x128] sm:$0xff] %vm28813_vm2, %v16935_v30  ;;  %v16901_v55 = vmax.f32 %v16865_v57, 0.0  ;;  %vm28828_vm2 = vmmov %vm28644_vm0 }
 0xc86   : > { %18944 = vst.msk [vmem:[%s26567_s14 + $0x120] sm:$0xff] %vm28814_vm12, %v16934_v28  ;;  %v16900_v62 = vmax.f32 %v16864_v42, 0.0  ;;  %v22521_v19 = vpop.f32.mrb[58].mxu1  ;;  %22569 = vmatprep.mubr.msk.f32.mxu0 %vm28815_vm13, %v16934_v28  ;;  %vm28829_vm12 = vmmov %vm28644_vm0 }
 0xc87   : > { %v16937_v48 = vmul.f32 %v24947_v22, %v16901_v55  ;;  %v16867_v26 = vadd.f32 %v22521_v19, %v27890_v15  ;;  %v16661_v37 = vpop.f32.mrb[59].mxu1  ;;  %22570 = vmatmul.mubr.msk.f32.vlgmr.msra.gmra.mrb[72].mxu0 %vm28816_vm15, %v16935_v30  ;;  %vm28830_vm13 = vmmov %vm28644_vm0 }
 0xc88   : > { %v16936_v21 = vmul.f32 %v28413_v6, %v16900_v62  ;;  %v16866_v63 = vadd.f32 %v27890_v15, %v16661_v37  ;;  %vm28831_vm15 = vmmov %vm28644_vm0 }
 0xc89   : > { %18947 = vst.msk [vmem:[%s26567_s14 + $0x138] sm:$0xff] %vm28817_vm6, %v16937_v48  ;;  %v16903_v0 = vmax.f32 %v16867_v26, 0.0  ;;  %vm28832_vm6 = vmmov %vm28644_vm0 }
 0xc8a   : > { %18946 = vst.msk [vmem:[%s26567_s14 + $0x130] sm:$0xff] %vm28818_vm7, %v16936_v21  ;;  %v16902_v13 = vmax.f32 %v16866_v63, 0.0  ;;  %v22524_v27 = vpop.f32.mrb[60].mxu1  ;;  %22572 = vmatprep.mubr.msk.f32.mxu0 %vm28819_vm8, %v16936_v21  ;;  %vm28833_vm7 = vmmov %vm28644_vm0 }
 0xc8b   : > { %v16939_v22 = vmul.f32 %v28418_v59, %v16903_v0  ;;  %v16869_v12 = vadd.f32 %v22524_v27, %v27890_v15  ;;  %v16671_v17 = vpop.f32.mrb[61].mxu1  ;;  %22573 = vmatmul.mubr.msk.f32.gmra.mrb[74].mxu0 %vm28820_vm1, %v16937_v48  ;;  %vm28834_vm8 = vmmov %vm28644_vm0 }
 0xc8c   : > { %v16938_v6 = vmul.f32 %v28419_v35, %v16902_v13  ;;  %v16868_v39 = vadd.f32 %v27890_v15, %v16671_v17  ;;  %vm28835_vm1 = vmmov %vm28644_vm0 }
 0xc8d   : > { %18949 = vst.msk [vmem:[%s26567_s14 + $0x148] sm:$0xff] %vm28821_vm3, %v16939_v22  ;;  %v16905_v52 = vmax.f32 %v16869_v12, 0.0  ;;  %vm28836_vm3 = vmmov %vm28644_vm0 }
 0xc8e   : > { %18948 = vst.msk [vmem:[%s26567_s14 + $0x140] sm:$0xff] %vm28644_vm0, %v16938_v6  ;;  %v16904_v45 = vmax.f32 %v16868_v39, 0.0  ;;  %v22527_v25 = vpop.f32.mrb[62].mxu1  ;;  %22575 = vmatprep.mubr.msk.f32.mxu0 %vm28822_vm14, %v16938_v6  ;;  %vm28837_vm14 = vmmov %vm28644_vm0 }
 0xc8f   : > { %v16941_v59 = vmul.f32 %v28424_v4, %v16905_v52  ;;  %v16871_v31 = vadd.f32 %v22527_v25, %v27890_v15  ;;  %v16681_v2 = vpop.f32.mrb[63].mxu1  ;;  %22576 = vmatmul.mubr.msk.f32.gmra.mrb[76].mxu0 %vm28823_vm4, %v16939_v22  ;;  %vm28838_vm4 = vmmov %vm28644_vm0 }
 0xc90   : > { %v16940_v35 = vmul.f32 %v25206_v49, %v16904_v45  ;;  %v16870_v3 = vadd.f32 %v27890_v15, %v16681_v2 }
 0xc91   : > { %18951 = vst.msk [vmem:[%s26567_s14 + $0x158] sm:$0xff] %vm28824_vm5, %v16941_v59  ;;  %v16907_v32 = vmax.f32 %v16871_v31, 0.0  ;;  %vm28839_vm5 = vmmov %vm28644_vm0 }
 0xc92   : > { %18950 = vst.msk [vmem:[%s26567_s14 + $0x150] sm:$0xff] %vm28825_vm9, %v16940_v35  ;;  %v16906_v18 = vmax.f32 %v16870_v3, 0.0  ;;  %v22530_v7 = vpop.f32.mrb[64].mxu1  ;;  %22578 = vmatprep.mubr.msk.f32.mxu0 %vm28826_vm10, %v16940_v35  ;;  %vm28840_vm9 = vmmov %vm28644_vm0 }
 0xc93   : > { %v16943_v4 = vmul.f32 %v25211_v29, %v16907_v32  ;;  %v16873_v50 = vadd.f32 %v22530_v7, %v27890_v15  ;;  %v16691_v56 = vpop.f32.mrb[65].mxu1  ;;  %22579 = vmatmul.mubr.msk.f32.gmra.mrb[78].mxu0 %vm28827_vm11, %v16941_v59  ;;  %vm28841_vm10 = vmmov %vm28644_vm0 }
 0xc94   : > { %v16942_v49 = vmul.f32 %v25216_v41, %v16906_v18  ;;  %v16872_v47 = vadd.f32 %v27890_v15, %v16691_v56  ;;  %vm28842_vm11 = vmmov %vm28644_vm0 }
 0xc95   : > { %18953 = vst.msk [vmem:[%s26567_s14 + $0x168] sm:$0xff] %vm28828_vm2, %v16943_v4  ;;  %v16909_v23 = vmax.f32 %v16873_v50, 0.0  ;;  %vm28843_vm2 = vmmov %vm28644_vm0 }
 0xc96   : > { %18952 = vst.msk [vmem:[%s26567_s14 + $0x160] sm:$0xff] %vm28829_vm12, %v16942_v49  ;;  %v16908_v58 = vmax.f32 %v16872_v47, 0.0  ;;  %v22533_v40 = vpop.f32.mrb[66].mxu1  ;;  %22581 = vmatprep.mubr.msk.f32.mxu0 %vm28830_vm13, %v16942_v49  ;;  %vm28844_vm12 = vmmov %vm28644_vm0 }
 0xc97   : > { %v16945_v29 = vmul.f32 %v25222_v43, %v16909_v23  ;;  %v16875_v5 = vadd.f32 %v22533_v40, %v27890_v15  ;;  %v16701_v11 = vpop.f32.mrb[67].mxu1  ;;  %22582 = vmatmul.mubr.msk.f32.gmra.mrb[80].mxu0 %vm28831_vm15, %v16943_v4  ;;  %vm28845_vm13 = vmmov %vm28644_vm0 }
 0xc98   : > { %v16944_v41 = vmul.f32 %v25328_v38, %v16908_v58  ;;  %v16874_v51 = vadd.f32 %v27890_v15, %v16701_v11  ;;  %vm28846_vm15 = vmmov %vm28644_vm0  ;;  %v28860_v58 = vld [vmem:[#allocation17_spill] sm:$0xff] }
 0xc99   : > { %18955 = vst.msk [vmem:[%s26567_s14 + $0x178] sm:$0xff] %vm28832_vm6, %v16945_v29  ;;  %v16911_v46 = vmax.f32 %v16875_v5, 0.0  ;;  %vm28847_vm6 = vmmov %vm28644_vm0 }
 0xc9a   : > { %18954 = vst.msk [vmem:[%s26567_s14 + $0x170] sm:$0xff] %vm28833_vm7, %v16944_v41  ;;  %v16910_v33 = vmax.f32 %v16874_v51, 0.0  ;;  %v22536_v1 = vpop.f32.mrb[68].mxu1  ;;  %22584 = vmatprep.mubr.msk.f32.mxu0 %vm28834_vm8, %v16944_v41  ;;  %vm28848_vm7 = vmmov %vm28644_vm0  ;;  %v28864_v51 = vld [vmem:[#allocation18_spill] sm:$0xff] }
 0xc9b   : > { %v16947_v43 = vmul.f32 %v25333_v9, %v16911_v46  ;;  %v16877_v44 = vadd.f32 %v22536_v1, %v27890_v15  ;;  %v16711_v24 = vpop.f32.mrb[69].mxu1  ;;  %22585 = vmatmul.mubr.msk.f32.gmra.mrb[82].mxu0 %vm28835_vm1, %v16945_v29  ;;  %vm28849_vm8 = vmmov %vm28644_vm0 }
 0xc9c   : > { %v16946_v38 = vmul.f32 %v25340_v54, %v16910_v33  ;;  %v16876_v30 = vadd.f32 %v27890_v15, %v16711_v24  ;;  %vm28850_vm1 = vmmov %vm28644_vm0 }
 0xc9d   : > { %18957 = vst.msk [vmem:[%s26567_s14 + $0x188] sm:$0xff] %vm28836_vm3, %v16947_v43  ;;  %v16913_v57 = vmax.f32 %v16877_v44, 0.0  ;;  %vm28851_vm3 = vmmov %vm28644_vm0 }
 0xc9e   : > { %18956 = vst.msk [vmem:[%s26567_s14 + $0x180] sm:$0xff] %vm28644_vm0, %v16946_v38  ;;  %v16912_v61 = vmax.f32 %v16876_v30, 0.0  ;;  %v22539_v28 = vpop.f32.mrb[70].mxu1  ;;  %22587 = vmatprep.mubr.msk.f32.mxu0 %vm28837_vm14, %v16946_v38  ;;  %vm28852_vm14 = vmmov %vm28644_vm0 }
 0xc9f   : > { %v16949_v9 = vmul.f32 %v25345_v10, %v16913_v57  ;;  %v16879_v42 = vadd.f32 %v22539_v28, %v27890_v15  ;;  %v16721_v55 = vpop.f32.mrb[71].mxu1  ;;  %22588 = vmatmul.mubr.msk.f32.gmra.mrb[84].mxu0 %vm28838_vm4, %v16947_v43  ;;  %vm28853_vm4 = vmmov %vm28644_vm0  ;;  %v28866_v43 = vld [vmem:[#allocation19_spill] sm:$0xff] }
 0xca0   : > { %v16948_v54 = vmul.f32 %v28449_v34, %v16912_v61  ;;  %v16878_v62 = vadd.f32 %v27890_v15, %v16721_v55  ;;  %v28870_v61 = vld [vmem:[#allocation20_spill] sm:$0xff]  ;;  %v28872_v55 = vld [vmem:[#allocation21_spill] sm:$0xff] }
 0xca1   : > { %18959 = vst.msk [vmem:[%s26567_s14 + $0x198] sm:$0xff] %vm28839_vm5, %v16949_v9  ;;  %v16915_v19 = vmax.f32 %v16879_v42, 0.0  ;;  %vm28855_vm5 = vmmov %vm28644_vm0 }
 0xca2   : > { %18958 = vst.msk [vmem:[%s26567_s14 + $0x190] sm:$0xff] %vm28840_vm9, %v16948_v54  ;;  %v16914_v48 = vmax.f32 %v16878_v62, 0.0  ;;  %v22542_v26 = vpop.f32.mrb[72].mxu1  ;;  %22590 = vmatprep.mubr.msk.f32.mxu0 %vm28841_vm10, %v16948_v54  ;;  %vm28856_vm9 = vmmov %vm28644_vm0 }
 0xca3   : > { %v16951_v10 = vmul.f32 %v25380_v60, %v16915_v19  ;;  %v16881_v37 = vadd.f32 %v22542_v26, %v27890_v15  ;;  %v16731_v21 = vpop.f32.mrb[73].mxu1  ;;  %22591 = vmatmul.mubr.msk.f32.gmra.mrb[86].mxu0 %vm28842_vm11, %v16949_v9  ;;  %vm28857_vm10 = vmmov %vm28644_vm0 }
 0xca4   : > { %v16950_v34 = vmul.f32 %v25392_v16, %v16914_v48  ;;  %v16880_v63 = vadd.f32 %v27890_v15, %v16731_v21  ;;  %vm28859_vm11 = vmmov %vm28644_vm0 }
 0xca5   : > { %18961 = vst.msk [vmem:[%s26567_s14 + $0x1a8] sm:$0xff] %vm28843_vm2, %v16951_v10  ;;  %v16917_v0 = vmax.f32 %v16881_v37, 0.0  ;;  %vm28861_vm2 = vmmov %vm28644_vm0 }
 0xca6   : > { %18960 = vst.msk [vmem:[%s26567_s14 + $0x1a0] sm:$0xff] %vm28844_vm12, %v16950_v34  ;;  %v16916_v13 = vmax.f32 %v16880_v63, 0.0  ;;  %v22545_v27 = vpop.f32.mrb[74].mxu1  ;;  %22593 = vmatprep.mubr.msk.f32.mxu0 %vm28845_vm13, %v16950_v34  ;;  %vm28862_vm12 = vmmov %vm28644_vm0  ;;  %v28877_v63 = vld [vmem:[#allocation22_spill] sm:$0xff] }
 0xca7   : > { %v16953_v60 = vmul.f32 %v25397_v14, %v16917_v0  ;;  %v16883_v22 = vadd.f32 %v22545_v27, %v27890_v15  ;;  %v16741_v12 = vpop.f32.mrb[75].mxu1  ;;  %22594 = vmatmul.mubr.msk.f32.gmra.mrb[88].mxu0 %vm28846_vm15, %v16951_v10  ;;  %vm28863_vm13 = vmmov %vm28644_vm0  ;;  %v28875_v10 = vld [vmem:[#allocation4_spill] sm:$0xff] }
 0xca8   : > { %v16952_v16 = vmul.f32 %v25444_v36, %v16916_v13  ;;  %v16882_v17 = vadd.f32 %v27890_v15, %v16741_v12  ;;  %vm28865_vm15 = vmmov %vm28644_vm0  ;;  %v28881_v12 = vld [vmem:[#allocation5_spill] sm:$0xff] }
 0xca9   : > { %18963 = vst.msk [vmem:[%s26567_s14 + $0x1b8] sm:$0xff] %vm28847_vm6, %v16953_v60  ;;  %v16919_v6 = vmax.f32 %v16883_v22, 0.0  ;;  %vm28867_vm6 = vmmov %vm28644_vm0 }
 0xcaa   : > { %18962 = vst.msk [vmem:[%s26567_s14 + $0x1b0] sm:$0xff] %vm28848_vm7, %v16952_v16  ;;  %v16918_v39 = vmax.f32 %v16882_v17, 0.0  ;;  %v22548_v52 = vpop.f32.mrb[76].mxu1  ;;  %22596 = vmatprep.mubr.msk.f32.mxu0 %vm28849_vm8, %v16952_v16  ;;  %vm28868_vm7 = vmmov %vm28644_vm0 }
 0xcab   : > { %v16955_v14 = vmul.f32 %v25535_v20, %v16919_v6  ;;  %v16885_v45 = vadd.f32 %v22548_v52, %v27890_v15  ;;  %v16751_v25 = vpop.f32.mrb[77].mxu1  ;;  %22597 = vmatmul.mubr.msk.f32.gmra.mrb[90].mxu0 %vm28850_vm1, %v16953_v60  ;;  %vm28869_vm8 = vmmov %vm28644_vm0 }
 0xcac   : > { %v16954_v36 = vmul.f32 %v25557_v53, %v16918_v39  ;;  %v16884_v59 = vadd.f32 %v27890_v15, %v16751_v25  ;;  %v28854_v53 = vld [vmem:[#allocation15_spill] sm:$0xff]  ;;  %vm28871_vm1 = vmmov %vm28644_vm0  ;;  %v28883_v39 = vld [vmem:[#allocation6_spill] sm:$0xff] }
 0xcad   : > { %18965 = vst.msk [vmem:[%s26567_s14 + $0x1c8] sm:$0xff] %vm28851_vm3, %v16955_v14  ;;  %v16921_v31 = vmax.f32 %v16885_v45, 0.0  ;;  %vm28873_vm3 = vmmov %vm28644_vm0 }
 0xcae   : > { %18964 = vst.msk [vmem:[%s26567_s14 + $0x1c0] sm:$0xff] %vm28644_vm0, %v16954_v36  ;;  %v16920_v2 = vmax.f32 %v16884_v59, 0.0  ;;  %v22551_v35 = vpop.f32.mrb[78].mxu1  ;;  %22599 = vmatprep.mubr.msk.f32.mxu0 %vm28852_vm14, %v16954_v36  ;;  %vm28874_vm14 = vmmov %vm28644_vm0  ;;  %v28887_v36 = vld [vmem:[#allocation7_spill] sm:$0xff] }
 0xcaf   : > { %v16957_v20 = vmul.f32 %v25637_v8, %v16921_v31  ;;  %v16887_v3 = vadd.f32 %v22551_v35, %v27890_v15  ;;  %v16761_v32 = vpop.f32.mrb[79].mxu1  ;;  %22600 = vmatmul.mubr.msk.f32.gmra.mrb[92].mxu0 %vm28853_vm4, %v16955_v14  ;;  %v28858_v8 = vld [vmem:[#allocation16_spill] sm:$0xff]  ;;  %vm28876_vm4 = vmmov %vm28644_vm0 }
 0xcb0   : > { %v16956_v18 = vmul.f32 %v28854_v53, %v16920_v2  ;;  %v16886_v7 = vadd.f32 %v27890_v15, %v16761_v32  ;;  %v28889_v31 = vld [vmem:[#allocation8_spill] sm:$0xff] }
 0xcb1   : > { %18967 = vst.msk [vmem:[%s26567_s14 + $0x1d8] sm:$0xff] %vm28855_vm5, %v16957_v20  ;;  %v16923_v4 = vmax.f32 %v16887_v3, 0.0  ;;  %vm28878_vm5 = vmmov %vm28644_vm0 }
 0xcb2   : > { %18966 = vst.msk [vmem:[%s26567_s14 + $0x1d0] sm:$0xff] %vm28856_vm9, %v16956_v18  ;;  %v16922_v50 = vmax.f32 %v16886_v7, 0.0  ;;  %v22554_v56 = vpop.f32.mrb[80].mxu1  ;;  %22602 = vmatprep.mubr.msk.f32.mxu0 %vm28857_vm10, %v16956_v18  ;;  %vm28879_vm9 = vmmov %vm28644_vm0 }
 0xcb3   : > { %v16959_v49 = vmul.f32 %v28858_v8, %v16923_v4  ;;  %v16889_v47 = vadd.f32 %v22554_v56, %v27890_v15  ;;  %v16771_v23 = vpop.f32.mrb[81].mxu1  ;;  %22603 = vmatmul.mubr.msk.f32.gmra.mrb[94].mxu0 %vm28859_vm11, %v16957_v20  ;;  %vm28880_vm10 = vmmov %vm28644_vm0 }
 0xcb4   : > { %v16958_v40 = vmul.f32 %v28860_v58, %v16922_v50  ;;  %v16888_v29 = vadd.f32 %v27890_v15, %v16771_v23  ;;  %vm28882_vm11 = vmmov %vm28644_vm0 }
 0xcb5   : > { %18969 = vst.msk [vmem:[%s26567_s14 + $0x1e8] sm:$0xff] %vm28861_vm2, %v16959_v49  ;;  %v16925_v5 = vmax.f32 %v16889_v47, 0.0  ;;  %vm28884_vm2 = vmmov %vm28644_vm0 }
 0xcb6   : > { %18968 = vst.msk [vmem:[%s26567_s14 + $0x1e0] sm:$0xff] %vm28862_vm12, %v16958_v40  ;;  %v16924_v11 = vmax.f32 %v16888_v29, 0.0  ;;  %v22557_v41 = vpop.f32.mrb[82].mxu1  ;;  %22605 = vmatprep.mubr.msk.f32.mxu0 %vm28863_vm13, %v16958_v40  ;;  %vm28885_vm12 = vmmov %vm28644_vm0 }
 0xcb7   : > { %v16961_v46 = vmul.f32 %v28864_v51, %v16925_v5  ;;  %v16891_v33 = vadd.f32 %v22557_v41, %v27890_v15  ;;  %v16781_v1 = vpop.f32.mrb[83].mxu1  ;;  %22606 = vmatmul.mubr.msk.f32.gmra.mrb[96].mxu0 %vm28865_vm15, %v16959_v49  ;;  %vm28886_vm13 = vmmov %vm28644_vm0 }
 0xcb8   : > { %v16960_v44 = vmul.f32 %v28866_v43, %v16924_v11  ;;  %v16890_v24 = vadd.f32 %v27890_v15, %v16781_v1  ;;  %vm28888_vm15 = vmmov %vm28644_vm0 }
 0xcb9   : > { %18971 = vst.msk [vmem:[%s26567_s14 + $0x1f8] sm:$0xff] %vm28867_vm6, %v16961_v46  ;;  %v16927_v38 = vmax.f32 %v16891_v33, 0.0  ;;  %vm28890_vm6 = vmmov %vm28644_vm0 }
 0xcba   : > { %18970 = vst.msk [vmem:[%s26567_s14 + $0x1f0] sm:$0xff] %vm28868_vm7, %v16960_v44  ;;  %v16926_v30 = vmax.f32 %v16890_v24, 0.0  ;;  %v22560_v57 = vpop.f32.mrb[84].mxu1  ;;  %22608 = vmatprep.mubr.msk.f32.mxu0 %vm28869_vm8, %v16960_v44  ;;  %vm28891_vm7 = vmmov %vm28644_vm0 }
 0xcbb   : > { %v16963_v28 = vmul.f32 %v28870_v61, %v16927_v38  ;;  %v16893_v9 = vadd.f32 %v22560_v57, %v27890_v15  ;;  %v16791_v42 = vpop.f32.mrb[85].mxu1  ;;  %22609 = vmatmul.mubr.msk.f32.gmra.mrb[98].mxu0 %vm28871_vm1, %v16961_v46  ;;  %vm28892_vm8 = vmmov %vm28644_vm0 }
 0xcbc   : > { %v16962_v54 = vmul.f32 %v28872_v55, %v16926_v30  ;;  %v16892_v62 = vadd.f32 %v27890_v15, %v16791_v42  ;;  %vm28893_vm1 = vmmov %vm28644_vm0 }
 0xcbd   : > { %18973 = vst.msk [vmem:[%s26567_s14 + $0x208] sm:$0xff] %vm28873_vm3, %v16963_v28  ;;  %v16929_v19 = vmax.f32 %v16893_v9, 0.0  ;;  %vm28894_vm3 = vmmov %vm28644_vm0 }
 0xcbe   : > { %18972 = vst.msk [vmem:[%s26567_s14 + $0x200] sm:$0xff] %vm28644_vm0, %v16962_v54  ;;  %v16928_v48 = vmax.f32 %v16892_v62, 0.0  ;;  %v22563_v26 = vpop.f32.mrb[86].mxu1  ;;  %22611 = vmatprep.mubr.msk.f32.mxu0 %vm28874_vm14, %v16962_v54  ;;  %vm28895_vm14 = vmmov %vm28644_vm0 }
 0xcbf   : > { %v16965_v37 = vmul.f32 %v28875_v10, %v16929_v19  ;;  %v16895_v21 = vadd.f32 %v22563_v26, %v27890_v15  ;;  %v16801_v34 = vpop.f32.mrb[87].mxu1  ;;  %22612 = vmatmul.mubr.msk.f32.gmra.mrb[100].mxu0 %vm28876_vm4, %v16963_v28  ;;  %vm28896_vm4 = vmmov %vm28644_vm0 }
 0xcc0   : > { %v16964_v0 = vmul.f32 %v28877_v63, %v16928_v48  ;;  %v16894_v13 = vadd.f32 %v27890_v15, %v16801_v34 }
 0xcc1   : > { %18975 = vst.msk [vmem:[%s26567_s14 + $0x218] sm:$0xff] %vm28878_vm5, %v16965_v37  ;;  %v16931_v27 = vmax.f32 %v16895_v21, 0.0  ;;  %vm28897_vm5 = vmmov %vm28644_vm0 }
 0xcc2   : > { %18974 = vst.msk [vmem:[%s26567_s14 + $0x210] sm:$0xff] %vm28879_vm9, %v16964_v0  ;;  %v16930_v60 = vmax.f32 %v16894_v13, 0.0  ;;  %v22566_v22 = vpop.f32.mrb[88].mxu1  ;;  %22614 = vmatprep.mubr.msk.f32.mxu0 %vm28880_vm10, %v16964_v0  ;;  %vm28898_vm9 = vmmov %vm28644_vm0 }
 0xcc3   : > { %v16967_v16 = vmul.f32 %v28881_v12, %v16931_v27  ;;  %v16897_v17 = vadd.f32 %v22566_v22, %v27890_v15  ;;  %v16811_v6 = vpop.f32.mrb[89].mxu1  ;;  %22615 = vmatmul.mubr.msk.f32.gmra.mrb[102].mxu0 %vm28882_vm11, %v16965_v37  ;;  %vm28899_vm10 = vmmov %vm28644_vm0 }
 0xcc4   : > { %v16966_v52 = vmul.f32 %v28883_v39, %v16930_v60  ;;  %v16896_v14 = vadd.f32 %v27890_v15, %v16811_v6  ;;  %v28076_v15 = vld [vmem:[%s28200_s6] ss:$0 sm:$0xff]  ;;  %vm28900_vm11 = vmmov %vm28644_vm0 }
 0xcc5   : > { %18977 = vst.msk [vmem:[%s26567_s14 + $0x228] sm:$0xff] %vm28884_vm2, %v16967_v16  ;;  %v16933_v45 = vmax.f32 %v16897_v17, 0.0  ;;  %vm28901_vm2 = vmmov %vm28644_vm0 }
 0xcc6   : > { %18976 = vst.msk [vmem:[%s26567_s14 + $0x220] sm:$0xff] %vm28885_vm12, %v16966_v52  ;;  %v16932_v25 = vmax.f32 %v16896_v14, 0.0  ;;  %22617 = vmatprep.mubr.msk.f32.mxu0 %vm28886_vm13, %v16966_v52  ;;  %vm28902_vm12 = vmmov %vm28644_vm0 }
 0xcc7   : > { %v16969_v59 = vmul.f32 %v28887_v36, %v16933_v45  ;;  %22618 = vmatmul.mubr.msk.f32.gmra.mrb[104].mxu0 %vm28888_vm15, %v16967_v16  ;;  %vm28903_vm13 = vmmov %vm28644_vm0 }
 0xcc8   : > { %v16968_v2 = vmul.f32 %v28889_v31, %v16932_v25  ;;  %vm28904_vm15 = vmmov %vm28644_vm0 }
 0xcc9   : > { %18979 = vst.msk [vmem:[%s26567_s14 + $0x238] sm:$0xff] %vm28890_vm6, %v16969_v59  ;;  %vm28905_vm6 = vmmov %vm28644_vm0 }
 0xcca   : > { %18978 = vst.msk [vmem:[%s26567_s14 + $0x230] sm:$0xff] %vm28891_vm7, %v16968_v2  ;;  %22620 = vmatprep.mubr.msk.f32.mxu0 %vm28892_vm8, %v16968_v2  ;;  %vm28906_vm7 = vmmov %vm28644_vm0 }
 0xccb   : > { %22621 = vmatmul.mubr.msk.f32.gmra.mrb[106].mxu0 %vm28893_vm1, %v16969_v59  ;;  %vm28907_vm8 = vmmov %vm28644_vm0 }
 0xccc   : > { %vm28908_vm1 = vmmov %vm28644_vm0 }
 0xd5a   : > { %v22571_v35 = vpop.f32.mrb[72].mxu0 }
 0xd5b   : > { %v17198_v20 = vadd.f32 %v22571_v35, %v28076_v15  ;;  %v17192_v3 = vpop.f32.mrb[73].mxu0 }
 0xd5c   : > { %v17193_v32 = vadd.f32 %v28076_v15, %v17192_v3 }
 0xd5d   : > { %17372 = vst.msk [vmem:[%s28081_s15 + $0x8] sm:$0xff] %vm28894_vm3, %v17198_v20  ;;  %vm28909_vm3 = vmmov %vm28644_vm0 }
 0xd5e   : > { %17371 = vst.msk [vmem:[%s28081_s15] sm:$0xff] %vm28644_vm0, %v17193_v32  ;;  %v22574_v53 = vpop.f32.mrb[74].mxu0 }
 0xd5f   : > { %v17208_v18 = vadd.f32 %v22574_v53, %v28076_v15  ;;  %v17202_v7 = vpop.f32.mrb[75].mxu0 }
 0xd60   : > { %v17203_v4 = vadd.f32 %v28076_v15, %v17202_v7 }
 0xd61   : > { %17374 = vst.msk [vmem:[%s28081_s15 + $0x18] sm:$0xff] %vm28895_vm14, %v17208_v18  ;;  %vm28910_vm14 = vmmov %vm28644_vm0 }
 0xd62   : > { %17373 = vst.msk [vmem:[%s28081_s15 + $0x10] sm:$0xff] %vm28896_vm4, %v17203_v4  ;;  %v22577_v50 = vpop.f32.mrb[76].mxu0  ;;  %vm28911_vm4 = vmmov %vm28644_vm0 }
 0xd63   : > { %v17218_v56 = vadd.f32 %v22577_v50, %v28076_v15  ;;  %v17212_v8 = vpop.f32.mrb[77].mxu0 }
 0xd64   : > { %v17213_v49 = vadd.f32 %v28076_v15, %v17212_v8 }
 0xd65   : > { %17376 = vst.msk [vmem:[%s28081_s15 + $0x28] sm:$0xff] %vm28897_vm5, %v17218_v56  ;;  %vm28912_vm5 = vmmov %vm28644_vm0 }
 0xd66   : > { %17375 = vst.msk [vmem:[%s28081_s15 + $0x20] sm:$0xff] %vm28898_vm9, %v17213_v49  ;;  %v22580_v47 = vpop.f32.mrb[78].mxu0  ;;  %vm28913_vm9 = vmmov %vm28644_vm0 }
 0xd67   : > { %v17228_v23 = vadd.f32 %v22580_v47, %v28076_v15  ;;  %v17222_v58 = vpop.f32.mrb[79].mxu0 }
 0xd68   : > { %v17223_v40 = vadd.f32 %v28076_v15, %v17222_v58 }
 0xd69   : > { %17378 = vst.msk [vmem:[%s28081_s15 + $0x38] sm:$0xff] %vm28899_vm10, %v17228_v23  ;;  %vm28914_vm10 = vmmov %vm28644_vm0 }
 0xd6a   : > { %17377 = vst.msk [vmem:[%s28081_s15 + $0x30] sm:$0xff] %vm28900_vm11, %v17223_v40  ;;  %v22583_v29 = vpop.f32.mrb[80].mxu0  ;;  %vm28915_vm11 = vmmov %vm28644_vm0 }
 0xd6b   : > { %v17238_v5 = vadd.f32 %v22583_v29, %v28076_v15  ;;  %v17232_v11 = vpop.f32.mrb[81].mxu0 }
 0xd6c   : > { %v17233_v41 = vadd.f32 %v28076_v15, %v17232_v11 }
 0xd6d   : > { %17380 = vst.msk [vmem:[%s28081_s15 + $0x48] sm:$0xff] %vm28901_vm2, %v17238_v5  ;;  %vm28916_vm2 = vmmov %vm28644_vm0 }
 0xd6e   : > { %17379 = vst.msk [vmem:[%s28081_s15 + $0x40] sm:$0xff] %vm28902_vm12, %v17233_v41  ;;  %v22586_v51 = vpop.f32.mrb[82].mxu0  ;;  %vm28917_vm12 = vmmov %vm28644_vm0 }
 0xd6f   : > { %v17248_v46 = vadd.f32 %v22586_v51, %v28076_v15  ;;  %v17242_v33 = vpop.f32.mrb[83].mxu0 }
 0xd70   : > { %v17243_v1 = vadd.f32 %v28076_v15, %v17242_v33 }
 0xd71   : > { %17382 = vst.msk [vmem:[%s28081_s15 + $0x58] sm:$0xff] %vm28903_vm13, %v17248_v46  ;;  %vm28918_vm13 = vmmov %vm28644_vm0 }
 0xd72   : > { %17381 = vst.msk [vmem:[%s28081_s15 + $0x50] sm:$0xff] %vm28904_vm15, %v17243_v1  ;;  %v22589_v43 = vpop.f32.mrb[84].mxu0  ;;  %vm28919_vm15 = vmmov %vm28644_vm0 }
 0xd73   : > { %v17258_v44 = vadd.f32 %v22589_v43, %v28076_v15  ;;  %v17252_v24 = vpop.f32.mrb[85].mxu0 }
 0xd74   : > { %v17253_v38 = vadd.f32 %v28076_v15, %v17252_v24 }
 0xd75   : > { %17384 = vst.msk [vmem:[%s28081_s15 + $0x68] sm:$0xff] %vm28905_vm6, %v17258_v44  ;;  %vm28920_vm6 = vmmov %vm28644_vm0 }
 0xd76   : > { %17383 = vst.msk [vmem:[%s28081_s15 + $0x60] sm:$0xff] %vm28906_vm7, %v17253_v38  ;;  %v22592_v30 = vpop.f32.mrb[86].mxu0  ;;  %vm28921_vm7 = vmmov %vm28644_vm0 }
 0xd77   : > { %v17268_v57 = vadd.f32 %v22592_v30, %v28076_v15  ;;  %v17262_v61 = vpop.f32.mrb[87].mxu0 }
 0xd78   : > { %v17263_v28 = vadd.f32 %v28076_v15, %v17262_v61 }
 0xd79   : > { %17386 = vst.msk [vmem:[%s28081_s15 + $0x78] sm:$0xff] %vm28907_vm8, %v17268_v57  ;;  %vm28922_vm8 = vmmov %vm28644_vm0 }
 0xd7a   : > { %17385 = vst.msk [vmem:[%s28081_s15 + $0x70] sm:$0xff] %vm28908_vm1, %v17263_v28  ;;  %v22595_v9 = vpop.f32.mrb[88].mxu0  ;;  %vm28923_vm1 = vmmov %vm28644_vm0 }
 0xd7b   : > { %v17278_v42 = vadd.f32 %v22595_v9, %v28076_v15  ;;  %v17272_v55 = vpop.f32.mrb[89].mxu0 }
 0xd7c   : > { %v17273_v54 = vadd.f32 %v28076_v15, %v17272_v55 }
 0xd7d   : > { %17388 = vst.msk [vmem:[%s28081_s15 + $0x88] sm:$0xff] %vm28909_vm3, %v17278_v42  ;;  %vm28924_vm3 = vmmov %vm28644_vm0 }
 0xd7e   : > { %17387 = vst.msk [vmem:[%s28081_s15 + $0x80] sm:$0xff] %vm28644_vm0, %v17273_v54  ;;  %v22598_v62 = vpop.f32.mrb[90].mxu0 }
 0xd7f   : > { %v17288_v19 = vadd.f32 %v22598_v62, %v28076_v15  ;;  %v17282_v48 = vpop.f32.mrb[91].mxu0 }
 0xd80   : > { %v17283_v26 = vadd.f32 %v28076_v15, %v17282_v48 }
 0xd81   : > { %17390 = vst.msk [vmem:[%s28081_s15 + $0x98] sm:$0xff] %vm28910_vm14, %v17288_v19  ;;  %vm28925_vm14 = vmmov %vm28644_vm0 }
 0xd82   : > { %17389 = vst.msk [vmem:[%s28081_s15 + $0x90] sm:$0xff] %vm28911_vm4, %v17283_v26  ;;  %v22601_v10 = vpop.f32.mrb[92].mxu0  ;;  %vm28926_vm4 = vmmov %vm28644_vm0 }
 0xd83   : > { %v17298_v37 = vadd.f32 %v22601_v10, %v28076_v15  ;;  %v17292_v21 = vpop.f32.mrb[93].mxu0 }
 0xd84   : > { %v17293_v34 = vadd.f32 %v28076_v15, %v17292_v21 }
 0xd85   : > { %17392 = vst.msk [vmem:[%s28081_s15 + $0xa8] sm:$0xff] %vm28912_vm5, %v17298_v37 }
 0xd86   : > { %17391 = vst.msk [vmem:[%s28081_s15 + $0xa0] sm:$0xff] %vm28913_vm9, %v17293_v34  ;;  %v22604_v63 = vpop.f32.mrb[94].mxu0 }
 0xd87   : > { %v17308_v0 = vadd.f32 %v22604_v63, %v28076_v15  ;;  %v17302_v13 = vpop.f32.mrb[95].mxu0 }
 0xd88   : > { %v17303_v27 = vadd.f32 %v28076_v15, %v17302_v13 }
 0xd89   : > { %17394 = vst.msk [vmem:[%s28081_s15 + $0xb8] sm:$0xff] %vm28914_vm10, %v17308_v0 }
 0xd8a   : > { %17393 = vst.msk [vmem:[%s28081_s15 + $0xb0] sm:$0xff] %vm28915_vm11, %v17303_v27  ;;  %v22607_v60 = vpop.f32.mrb[96].mxu0 }
 0xd8b   : > { %v17318_v22 = vadd.f32 %v22607_v60, %v28076_v15  ;;  %v17312_v12 = vpop.f32.mrb[97].mxu0 }
 0xd8c   : > { %v17313_v16 = vadd.f32 %v28076_v15, %v17312_v12 }
 0xd8d   : > { %17396 = vst.msk [vmem:[%s28081_s15 + $0xc8] sm:$0xff] %vm28916_vm2, %v17318_v22 }
 0xd8e   : > { %17395 = vst.msk [vmem:[%s28081_s15 + $0xc0] sm:$0xff] %vm28917_vm12, %v17313_v16  ;;  %v22610_v17 = vpop.f32.mrb[98].mxu0 }
 0xd8f   : > { %v17328_v6 = vadd.f32 %v22610_v17, %v28076_v15  ;;  %v17322_v39 = vpop.f32.mrb[99].mxu0 }
 0xd90   : > { %v17323_v52 = vadd.f32 %v28076_v15, %v17322_v39 }
 0xd91   : > { %17398 = vst.msk [vmem:[%s28081_s15 + $0xd8] sm:$0xff] %vm28918_vm13, %v17328_v6 }
 0xd92   : > { %17397 = vst.msk [vmem:[%s28081_s15 + $0xd0] sm:$0xff] %vm28919_vm15, %v17323_v52  ;;  %v22613_v14 = vpop.f32.mrb[100].mxu0 }
 0xd93   : > { %v17338_v45 = vadd.f32 %v22613_v14, %v28076_v15  ;;  %v17332_v25 = vpop.f32.mrb[101].mxu0 }
 0xd94   : > { %v17333_v36 = vadd.f32 %v28076_v15, %v17332_v25 }
 0xd95   : > { %17400 = vst.msk [vmem:[%s28081_s15 + $0xe8] sm:$0xff] %vm28920_vm6, %v17338_v45 }
 0xd96   : > { %17399 = vst.msk [vmem:[%s28081_s15 + $0xe0] sm:$0xff] %vm28921_vm7, %v17333_v36  ;;  %v22616_v59 = vpop.f32.mrb[102].mxu0 }
 0xd97   : > { %v17348_v31 = vadd.f32 %v22616_v59, %v28076_v15  ;;  %v17342_v2 = vpop.f32.mrb[103].mxu0 }
 0xd98   : > { %v17343_v35 = vadd.f32 %v28076_v15, %v17342_v2 }
 0xd99   : > { %17402 = vst.msk [vmem:[%s28081_s15 + $0xf8] sm:$0xff] %vm28922_vm8, %v17348_v31 }
 0xd9a   : > { %17401 = vst.msk [vmem:[%s28081_s15 + $0xf0] sm:$0xff] %vm28923_vm1, %v17343_v35  ;;  %v22619_v20 = vpop.f32.mrb[104].mxu0 }
 0xd9b   : > { %v17358_v3 = vadd.f32 %v22619_v20, %v28076_v15  ;;  %v17352_v32 = vpop.f32.mrb[105].mxu0 }
 0xd9c   : > { %v17353_v53 = vadd.f32 %v28076_v15, %v17352_v32 }
 0xd9d   : > { %17404 = vst.msk [vmem:[%s28081_s15 + $0x108] sm:$0xff] %vm28924_vm3, %v17358_v3 }
 0xd9e   : > { %17403 = vst.msk [vmem:[%s28081_s15 + $0x100] sm:$0xff] %vm28644_vm0, %v17353_v53  ;;  %v22622_v18 = vpop.f32.mrb[106].mxu0 }
 0xd9f   : > { %v17368_v7 = vadd.f32 %v22622_v18, %v28076_v15  ;;  %v17362_v4 = vpop.f32.mrb[107].mxu0 }
 0xda0   : > { %v17363_v50 = vadd.f32 %v28076_v15, %v17362_v4 }
 0xda1   : > { %17406 = vst.msk [vmem:[%s28081_s15 + $0x118] sm:$0xff] %vm28925_vm14, %v17368_v7 }
 0xda2   : > { %17405 = vst.msk [vmem:[%s28081_s15 + $0x110] sm:$0xff] %vm28926_vm4, %v17363_v50 }
 0xda3 PF: > { %s19_s27 = sadd.s32 1, %s24011_s27  }
 0xda4   : > { %p16_p4 = scmp.ge.s32.totalorder %s19_s27, 4  }
 0xda6   :  { %18 = sbr.rel (!%p16_p4) target bundleno = 1 (0x1), region = 127 }

</bundles_post_ra>
